<compile_context>
chip_gen: v5e
topology: v5e:2x2
jax: 0.10.0
libtpu: 0.0.40
codegen_flags: <defaults>
</compile_context>

<pallas_src>
from functools import partial

import jax
import jax.numpy as jnp
from jax.experimental import pallas as pl
from jax.experimental.pallas import tpu as pltpu


def _round_up(x, m):
    return ((x + m - 1) // m) * m


# ----------------------------- Pallas kernels ------------------------------ #

def _conv_block_kernel(x_ref, w_ref, s_ref, b_ref, o_ref, *, wp):
    """Fused 3x3 conv (as 9 shifted matmuls) + folded BN/bias + ReLU.

    x_ref: (1, Min, Cin)  bf16   flattened zero-padded image (rows = Hp*Wp + pad)
    w_ref: (9*Cin, Cout)  bf16   rows ordered (kh, kw, cin)
    s_ref: (1, Cout)      f32    folded BN scale
    b_ref: (1, Cout)      f32    folded conv-bias + BN bias
    o_ref: (1, L, Cout)   bf16   L = H*Wp flat conv output (pad columns = junk)
    """
    L = o_ref.shape[1]
    cin = x_ref.shape[-1]
    acc = None
    for dy in range(3):
        for dx in range(3):
            off = dy * wp + dx                      # static flat row offset
            t = dy * 3 + dx
            xs = x_ref[0, off:off + L, :]           # (L, Cin) bf16 shifted view
            wk = w_ref[t * cin:(t + 1) * cin, :]    # (Cin, Cout) bf16
            d = jnp.dot(xs, wk, preferred_element_type=jnp.float32)  # MXU, f32 acc
            acc = d if acc is None else acc + d
    y = jnp.maximum(acc * s_ref[...] + b_ref[...], 0.0)   # BN + bias + ReLU (f32)
    o_ref[0, :, :] = y.astype(o_ref.dtype)


def conv_block(x_nhwc, w, scale, bias):
    """One conv block: Conv2d(3x3, pad=1) + BN(folded) + ReLU, grid over batch."""
    N, H, W, Cin = x_nhwc.shape
    Cout = w.shape[1]
    Hp, Wp = H + 2, W + 2
    L = H * Wp                                  # flat conv-output rows per image
    Min = _round_up(Hp * Wp + 2, 8)             # +2 so the largest tap stays in-bounds

    xp = jnp.pad(x_nhwc, ((0, 0), (1, 1), (1, 1), (0, 0)))          # zero conv pad
    xp = xp.reshape(N, Hp * Wp, Cin)
    xp = jnp.pad(xp, ((0, 0), (0, Min - Hp * Wp), (0, 0)))
    xp = xp.astype(jnp.bfloat16)
    wb = w.astype(jnp.bfloat16)

    flops = 2 * N * H * W * 9 * Cin * Cout
    bytes_accessed = (xp.size * 2 + wb.size * 2 + N * L * Cout * 2
                      + (scale.size + bias.size) * 4)

    out = pl.pallas_call(
        partial(_conv_block_kernel, wp=Wp),
        out_shape=jax.ShapeDtypeStruct((N, L, Cout), jnp.bfloat16),
        grid=(N,),
        in_specs=[
            pl.BlockSpec((1, Min, Cin), lambda n: (n, 0, 0)),   # one image / step
            pl.BlockSpec((9 * Cin, Cout), lambda n: (0, 0)),    # weights resident
            pl.BlockSpec((1, Cout), lambda n: (0, 0)),
            pl.BlockSpec((1, Cout), lambda n: (0, 0)),
        ],
        # NOTE: block-1 Cout=64 (<128 lanes) gives masked partial stores; later
        # blocks (128/256/512) are lane-dense.
        out_specs=pl.BlockSpec((1, L, Cout), lambda n: (n, 0, 0)),
        compiler_params=pltpu.CompilerParams(
            dimension_semantics=("parallel",),          # batch images independent
            vmem_limit_bytes=48 * 1024 * 1024,
        ),
        cost_estimate=pl.CostEstimate(flops=flops, transcendentals=0,
                                      bytes_accessed=bytes_accessed),
    )(xp, wb, scale, bias)

    # Drop the 2 junk pad-columns per row (flat layout keeps row stride Wp).
    return out.reshape(N, H, Wp, Cout)[:, :, :W, :]


def _head_kernel(x_ref, w_ref, b_ref, o_ref):
    """Fused Linear + Softmax (bf16 matmul, f32 softmax)."""
    logits = jnp.dot(x_ref[...], w_ref[...], preferred_element_type=jnp.float32)
    logits = logits + b_ref[...]
    m = jnp.max(logits, axis=-1, keepdims=True)
    e = jnp.exp(logits - m)
    o_ref[...] = (e / jnp.sum(e, axis=-1, keepdims=True)).astype(o_ref.dtype)


def linear_softmax(feat, w, b):
    N, D = feat.shape
    C = w.shape[1]
    bn = N if N <= 256 else 256                     # batch-row tiles
    fb = feat.astype(jnp.bfloat16)
    wb = w.astype(jnp.bfloat16)
    return pl.pallas_call(
        _head_kernel,
        out_shape=jax.ShapeDtypeStruct((N, C), jnp.float32),
        grid=(pl.cdiv(N, bn),),
        in_specs=[
            pl.BlockSpec((bn, D), lambda i: (i, 0)),
            pl.BlockSpec((D, C), lambda i: (0, 0)),
            pl.BlockSpec((1, C), lambda i: (0, 0)),
        ],
        out_specs=pl.BlockSpec((bn, C), lambda i: (i, 0)),
        compiler_params=pltpu.CompilerParams(
            dimension_semantics=("parallel",),
            vmem_limit_bytes=48 * 1024 * 1024,
        ),
        cost_estimate=pl.CostEstimate(flops=2 * N * D * C, transcendentals=N * C,
                                      bytes_accessed=N * D * 2 + D * C * 2 + N * C * 4),
    )(fb, wb, b)


# ------------------------------- JAX glue ---------------------------------- #

def maxpool_2x2_s2_p1(x):
    """PyTorch MaxPool2d(kernel_size=2, stride=2, padding=1); -inf implicit pad."""
    N, H, W, C = x.shape
    Ho = (H + 2 - 2) // 2 + 1
    Wo = (W + 2 - 2) // 2 + 1
    xp = jnp.pad(x, ((0, 0), (1, 1), (1, 1), (0, 0)), constant_values=-jnp.inf)
    xp = xp[:, :2 * Ho, :2 * Wo, :]
    return xp.reshape(N, Ho, 2, Wo, 2, C).max(axis=(2, 4))


def supervised_net_forward(x_nchw, params):
    """Forward pass matching SupervisedNet.forward. Input is NCHW like PyTorch."""
    x = jnp.transpose(x_nchw, (0, 2, 3, 1)).astype(jnp.float32)   # -> NHWC
    for (w, scale, bias) in params["conv_blocks"]:
        y = conv_block(x, w, scale, bias)     # Pallas: conv + BN + ReLU
        x = maxpool_2x2_s2_p1(y)
    N, Hf, Wf, C = x.shape
    feat = x.reshape(N, Hf * Wf * C)          # NHWC flatten (no activation transpose)
    # Fold PyTorch's torch.flatten(x, 1) (C,H,W order) into the tiny static weight.
    nclass = params["linear_w"].shape[1]
    lw = (params["linear_w"].reshape(C, Hf, Wf, nclass)
          .transpose(1, 2, 0, 3).reshape(Hf * Wf * C, nclass))
    return linear_softmax(feat, lw, params["linear_b"])           # Pallas


# --------------------------- parameter generation --------------------------- #

def init_params(key, n_channels, n_inputs):
    chans = [n_channels, 64, 128, 256, 512]
    eps = 1e-5
    blocks = []
    for i in range(4):
        cin, cout = chans[i], chans[i + 1]
        key, k1, k2, k3, k4, k5, k6 = jax.random.split(key, 7)
        # Conv weight stored pre-reshaped as (kh*kw*cin, cout), row order (kh, kw, cin).
        w = jax.random.normal(k1, (9 * cin, cout), jnp.float32) * (1.0 / (9 * cin)) ** 0.5
        conv_b = 0.1 * jax.random.normal(k2, (cout,), jnp.float32)
        gamma = 1.0 + 0.1 * jax.random.normal(k3, (cout,), jnp.float32)
        beta = 0.1 * jax.random.normal(k4, (cout,), jnp.float32)
        rmean = 0.1 * jax.random.normal(k5, (cout,), jnp.float32)
        rvar = jnp.abs(1.0 + 0.1 * jax.random.normal(k6, (cout,), jnp.float32))
        s = gamma / jnp.sqrt(rvar + eps)            # folded BN scale
        t = (conv_b - rmean) * s + beta             # folded conv-bias + BN bias
        blocks.append((w, s.reshape(1, cout), t.reshape(1, cout)))
    key, kw, kb = jax.random.split(key, 3)
    # Linear weight kept in PyTorch NCHW-flatten row order (n_inputs, 10).
    lw = jax.random.normal(kw, (n_inputs, 10), jnp.float32) * (1.0 / n_inputs) ** 0.5
    lb = 0.1 * jax.random.normal(kb, (1, 10), jnp.float32)
    return {"conv_blocks": blocks, "linear_w": lw, "linear_b": lb}


def _final_spatial(h):
    for _ in range(4):
        h = (h + 2 - 2) // 2 + 1  # MaxPool2d(k=2, s=2, p=1)
    return h


if __name__ == "__main__":
    key = jax.random.PRNGKey(0)
    n_channels, batch, spatial = 3, 2, 16
    hf = _final_spatial(spatial)                    # 16 -> 9 -> 5 -> 3 -> 2
    n_inputs = 512 * hf * hf                        # 2048

    key, kx, kp = jax.random.split(key, 3)
    x = jax.random.normal(kx, (batch, n_channels, spatial, spatial), jnp.float32)
    params = init_params(kp, n_channels, n_inputs)

    preds = jax.jit(supervised_net_forward)(x, params)
    preds = jax.block_until_ready(preds)

    assert preds.shape == (batch, 10)
    assert bool(jnp.all(jnp.isfinite(preds)))
    assert bool(jnp.allclose(jnp.sum(preds, axis=1), 1.0, atol=1e-5))
    print("KERNEL_OK")
</pallas_src>

<mosaic_0001>
module attributes {stable_mosaic.version = 11 : i64} {
  func.func @_conv_block_kernel(%arg0: i32, %arg1: memref<1x328x3xbf16, #tpu.memory_space<vmem>>, %arg2: memref<27x64xbf16, #tpu.memory_space<vmem>>, %arg3: memref<1x64xf32, #tpu.memory_space<vmem>>, %arg4: memref<1x64xf32, #tpu.memory_space<vmem>>, %arg5: memref<1x288x64xbf16, #tpu.memory_space<vmem>>) attributes {dimension_semantics = [#tpu.dimension_semantics<parallel>], iteration_bounds = array<i64: 2>, scalar_prefetch = 0 : i64, scratch_operands = 0 : i64, tpu.core_type = #tpu.core_type<tc>, window_params = [{transform_indices = @transform_0, window_bounds = array<i64: 1, 328, 3>}, {pipeline_mode = #tpu.pipeline_mode<synchronous>, transform_indices = @transform_1, window_bounds = array<i64: 27, 64>}, {pipeline_mode = #tpu.pipeline_mode<synchronous>, transform_indices = @transform_2, window_bounds = array<i64: 1, 64>}, {pipeline_mode = #tpu.pipeline_mode<synchronous>, transform_indices = @transform_3, window_bounds = array<i64: 1, 64>}, {transform_indices = @transform_4, window_bounds = array<i64: 1, 288, 64>}]} {
    %c0 = arith.constant 0 : index
    %c0_0 = arith.constant 0 : index
    %c0_1 = arith.constant 0 : index
    %0 = vector.load %arg1[%c0, %c0_0, %c0_1] : memref<1x328x3xbf16, #tpu.memory_space<vmem>>, vector<1x288x3xbf16>
    %1 = vector.shape_cast %0 : vector<1x288x3xbf16> to vector<288x3xbf16>
    %c0_2 = arith.constant 0 : index
    %c0_3 = arith.constant 0 : index
    %2 = vector.load %arg2[%c0_2, %c0_3] : memref<27x64xbf16, #tpu.memory_space<vmem>>, vector<3x64xbf16>
    %cst = arith.constant dense<0.000000e+00> : vector<288x64xf32>
    %3 = tpu.matmul %1, %2, %cst {dimension_numbers = #tpu.dot_dimension_numbers<[1], [0], [0], [1], [0, 0, 1, 1], [], []>} : vector<288x3xbf16>, vector<3x64xbf16>, vector<288x64xf32> -> vector<288x64xf32>
    %c0_4 = arith.constant 0 : index
    %c1 = arith.constant 1 : index
    %c0_5 = arith.constant 0 : index
    %4 = vector.load %arg1[%c0_4, %c1, %c0_5] : memref<1x328x3xbf16, #tpu.memory_space<vmem>>, vector<1x288x3xbf16>
    %5 = vector.shape_cast %4 : vector<1x288x3xbf16> to vector<288x3xbf16>
    %c3 = arith.constant 3 : index
    %c0_6 = arith.constant 0 : index
    %6 = vector.load %arg2[%c3, %c0_6] : memref<27x64xbf16, #tpu.memory_space<vmem>>, vector<3x64xbf16>
    %cst_7 = arith.constant dense<0.000000e+00> : vector<288x64xf32>
    %7 = tpu.matmul %5, %6, %cst_7 {dimension_numbers = #tpu.dot_dimension_numbers<[1], [0], [0], [1], [0, 0, 1, 1], [], []>} : vector<288x3xbf16>, vector<3x64xbf16>, vector<288x64xf32> -> vector<288x64xf32>
    %8 = arith.addf %3, %7 : vector<288x64xf32>
    %c0_8 = arith.constant 0 : index
    %c2 = arith.constant 2 : index
    %c0_9 = arith.constant 0 : index
    %9 = vector.load %arg1[%c0_8, %c2, %c0_9] : memref<1x328x3xbf16, #tpu.memory_space<vmem>>, vector<1x288x3xbf16>
    %10 = vector.shape_cast %9 : vector<1x288x3xbf16> to vector<288x3xbf16>
    %c6 = arith.constant 6 : index
    %c0_10 = arith.constant 0 : index
    %11 = vector.load %arg2[%c6, %c0_10] : memref<27x64xbf16, #tpu.memory_space<vmem>>, vector<3x64xbf16>
    %cst_11 = arith.constant dense<0.000000e+00> : vector<288x64xf32>
    %12 = tpu.matmul %10, %11, %cst_11 {dimension_numbers = #tpu.dot_dimension_numbers<[1], [0], [0], [1], [0, 0, 1, 1], [], []>} : vector<288x3xbf16>, vector<3x64xbf16>, vector<288x64xf32> -> vector<288x64xf32>
    %13 = arith.addf %8, %12 : vector<288x64xf32>
    %c0_12 = arith.constant 0 : index
    %c18 = arith.constant 18 : index
    %c0_13 = arith.constant 0 : index
    %14 = vector.load %arg1[%c0_12, %c18, %c0_13] : memref<1x328x3xbf16, #tpu.memory_space<vmem>>, vector<1x288x3xbf16>
    %15 = vector.shape_cast %14 : vector<1x288x3xbf16> to vector<288x3xbf16>
    %c9 = arith.constant 9 : index
    %c0_14 = arith.constant 0 : index
    %16 = vector.load %arg2[%c9, %c0_14] : memref<27x64xbf16, #tpu.memory_space<vmem>>, vector<3x64xbf16>
    %cst_15 = arith.constant dense<0.000000e+00> : vector<288x64xf32>
    %17 = tpu.matmul %15, %16, %cst_15 {dimension_numbers = #tpu.dot_dimension_numbers<[1], [0], [0], [1], [0, 0, 1, 1], [], []>} : vector<288x3xbf16>, vector<3x64xbf16>, vector<288x64xf32> -> vector<288x64xf32>
    %18 = arith.addf %13, %17 : vector<288x64xf32>
    %c0_16 = arith.constant 0 : index
    %c19 = arith.constant 19 : index
    %c0_17 = arith.constant 0 : index
    %19 = vector.load %arg1[%c0_16, %c19, %c0_17] : memref<1x328x3xbf16, #tpu.memory_space<vmem>>, vector<1x288x3xbf16>
    %20 = vector.shape_cast %19 : vector<1x288x3xbf16> to vector<288x3xbf16>
    %c12 = arith.constant 12 : index
    %c0_18 = arith.constant 0 : index
    %21 = vector.load %arg2[%c12, %c0_18] : memref<27x64xbf16, #tpu.memory_space<vmem>>, vector<3x64xbf16>
    %cst_19 = arith.constant dense<0.000000e+00> : vector<288x64xf32>
    %22 = tpu.matmul %20, %21, %cst_19 {dimension_numbers = #tpu.dot_dimension_numbers<[1], [0], [0], [1], [0, 0, 1, 1], [], []>} : vector<288x3xbf16>, vector<3x64xbf16>, vector<288x64xf32> -> vector<288x64xf32>
    %23 = arith.addf %18, %22 : vector<288x64xf32>
    %c0_20 = arith.constant 0 : index
    %c20 = arith.constant 20 : index
    %c0_21 = arith.constant 0 : index
    %24 = vector.load %arg1[%c0_20, %c20, %c0_21] : memref<1x328x3xbf16, #tpu.memory_space<vmem>>, vector<1x288x3xbf16>
    %25 = vector.shape_cast %24 : vector<1x288x3xbf16> to vector<288x3xbf16>
    %c15 = arith.constant 15 : index
    %c0_22 = arith.constant 0 : index
    %26 = vector.load %arg2[%c15, %c0_22] : memref<27x64xbf16, #tpu.memory_space<vmem>>, vector<3x64xbf16>
    %cst_23 = arith.constant dense<0.000000e+00> : vector<288x64xf32>
    %27 = tpu.matmul %25, %26, %cst_23 {dimension_numbers = #tpu.dot_dimension_numbers<[1], [0], [0], [1], [0, 0, 1, 1], [], []>} : vector<288x3xbf16>, vector<3x64xbf16>, vector<288x64xf32> -> vector<288x64xf32>
    %28 = arith.addf %23, %27 : vector<288x64xf32>
    %c0_24 = arith.constant 0 : index
    %c36 = arith.constant 36 : index
    %c0_25 = arith.constant 0 : index
    %29 = vector.load %arg1[%c0_24, %c36, %c0_25] : memref<1x328x3xbf16, #tpu.memory_space<vmem>>, vector<1x288x3xbf16>
    %30 = vector.shape_cast %29 : vector<1x288x3xbf16> to vector<288x3xbf16>
    %c18_26 = arith.constant 18 : index
    %c0_27 = arith.constant 0 : index
    %31 = vector.load %arg2[%c18_26, %c0_27] : memref<27x64xbf16, #tpu.memory_space<vmem>>, vector<3x64xbf16>
    %cst_28 = arith.constant dense<0.000000e+00> : vector<288x64xf32>
    %32 = tpu.matmul %30, %31, %cst_28 {dimension_numbers = #tpu.dot_dimension_numbers<[1], [0], [0], [1], [0, 0, 1, 1], [], []>} : vector<288x3xbf16>, vector<3x64xbf16>, vector<288x64xf32> -> vector<288x64xf32>
    %33 = arith.addf %28, %32 : vector<288x64xf32>
    %c0_29 = arith.constant 0 : index
    %c37 = arith.constant 37 : index
    %c0_30 = arith.constant 0 : index
    %34 = vector.load %arg1[%c0_29, %c37, %c0_30] : memref<1x328x3xbf16, #tpu.memory_space<vmem>>, vector<1x288x3xbf16>
    %35 = vector.shape_cast %34 : vector<1x288x3xbf16> to vector<288x3xbf16>
    %c21 = arith.constant 21 : index
    %c0_31 = arith.constant 0 : index
    %36 = vector.load %arg2[%c21, %c0_31] : memref<27x64xbf16, #tpu.memory_space<vmem>>, vector<3x64xbf16>
    %cst_32 = arith.constant dense<0.000000e+00> : vector<288x64xf32>
    %37 = tpu.matmul %35, %36, %cst_32 {dimension_numbers = #tpu.dot_dimension_numbers<[1], [0], [0], [1], [0, 0, 1, 1], [], []>} : vector<288x3xbf16>, vector<3x64xbf16>, vector<288x64xf32> -> vector<288x64xf32>
    %38 = arith.addf %33, %37 : vector<288x64xf32>
    %c0_33 = arith.constant 0 : index
    %c38 = arith.constant 38 : index
    %c0_34 = arith.constant 0 : index
    %39 = vector.load %arg1[%c0_33, %c38, %c0_34] : memref<1x328x3xbf16, #tpu.memory_space<vmem>>, vector<1x288x3xbf16>
    %40 = vector.shape_cast %39 : vector<1x288x3xbf16> to vector<288x3xbf16>
    %c24 = arith.constant 24 : index
    %c0_35 = arith.constant 0 : index
    %41 = vector.load %arg2[%c24, %c0_35] : memref<27x64xbf16, #tpu.memory_space<vmem>>, vector<3x64xbf16>
    %cst_36 = arith.constant dense<0.000000e+00> : vector<288x64xf32>
    %42 = tpu.matmul %40, %41, %cst_36 {dimension_numbers = #tpu.dot_dimension_numbers<[1], [0], [0], [1], [0, 0, 1, 1], [], []>} : vector<288x3xbf16>, vector<3x64xbf16>, vector<288x64xf32> -> vector<288x64xf32>
    %43 = arith.addf %38, %42 : vector<288x64xf32>
    %c0_37 = arith.constant 0 : index
    %c0_38 = arith.constant 0 : index
    %44 = vector.load %arg3[%c0_37, %c0_38] : memref<1x64xf32, #tpu.memory_space<vmem>>, vector<1x64xf32>
    %45 = vector.broadcast %44 : vector<1x64xf32> to vector<288x64xf32>
    %46 = arith.mulf %43, %45 : vector<288x64xf32>
    %c0_39 = arith.constant 0 : index
    %c0_40 = arith.constant 0 : index
    %47 = vector.load %arg4[%c0_39, %c0_40] : memref<1x64xf32, #tpu.memory_space<vmem>>, vector<1x64xf32>
    %48 = vector.broadcast %47 : vector<1x64xf32> to vector<288x64xf32>
    %49 = arith.addf %46, %48 : vector<288x64xf32>
    %cst_41 = arith.constant 0.000000e+00 : f32
    %50 = vector.broadcast %cst_41 : f32 to vector<288x64xf32>
    %51 = arith.maximumf %49, %50 : vector<288x64xf32>
    %52 = arith.truncf %51 : vector<288x64xf32> to vector<288x64xbf16>
    %c0_42 = arith.constant 0 : index
    %c0_43 = arith.constant 0 : index
    %c0_44 = arith.constant 0 : index
    %53 = vector.load %arg5[%c0_42, %c0_43, %c0_44] : memref<1x288x64xbf16, #tpu.memory_space<vmem>>, vector<1x288x64xbf16>
    %54 = vector.shape_cast %53 : vector<1x288x64xbf16> to vector<288x64xbf16>
    %55 = vector.shape_cast %52 : vector<288x64xbf16> to vector<1x288x64xbf16>
    tpu.vector_store %arg5[%c0_42, %c0_43, %c0_44], %55 {strides = array<i32>} : memref<1x288x64xbf16, #tpu.memory_space<vmem>>, vector<1x288x64xbf16>,
    return
  }
  func.func @transform_0(%arg0: i32) -> (i32, i32, i32) {
    %c0_i32 = arith.constant 0 : i32
    %c0_i32_0 = arith.constant 0 : i32
    %c0_i32_1 = arith.constant 0 : i32
    return %arg0, %c0_i32, %c0_i32_0 : i32, i32, i32
  }
  func.func @transform_1(%arg0: i32) -> (i32, i32) {
    %c0_i32 = arith.constant 0 : i32
    %c0_i32_0 = arith.constant 0 : i32
    %c0_i32_1 = arith.constant 0 : i32
    return %c0_i32, %c0_i32_0 : i32, i32
  }
  func.func @transform_2(%arg0: i32) -> (i32, i32) {
    %c0_i32 = arith.constant 0 : i32
    %c0_i32_0 = arith.constant 0 : i32
    %c0_i32_1 = arith.constant 0 : i32
    return %c0_i32, %c0_i32_0 : i32, i32
  }
  func.func @transform_3(%arg0: i32) -> (i32, i32) {
    %c0_i32 = arith.constant 0 : i32
    %c0_i32_0 = arith.constant 0 : i32
    %c0_i32_1 = arith.constant 0 : i32
    return %c0_i32, %c0_i32_0 : i32, i32
  }
  func.func @transform_4(%arg0: i32) -> (i32, i32, i32) {
    %c0_i32 = arith.constant 0 : i32
    %c0_i32_0 = arith.constant 0 : i32
    %c0_i32_1 = arith.constant 0 : i32
    return %arg0, %c0_i32, %c0_i32_0 : i32, i32, i32
  }
}

module attributes {stable_mosaic.version = 11 : i64} {
  func.func @_conv_block_kernel(%arg0: i32, %arg1: memref<1x128x64xbf16, #tpu.memory_space<vmem>>, %arg2: memref<576x128xbf16, #tpu.memory_space<vmem>>, %arg3: memref<1x128xf32, #tpu.memory_space<vmem>>, %arg4: memref<1x128xf32, #tpu.memory_space<vmem>>, %arg5: memref<1x99x128xbf16, #tpu.memory_space<vmem>>) attributes {dimension_semantics = [#tpu.dimension_semantics<parallel>], iteration_bounds = array<i64: 2>, scalar_prefetch = 0 : i64, scratch_operands = 0 : i64, tpu.core_type = #tpu.core_type<tc>, window_params = [{transform_indices = @transform_0, window_bounds = array<i64: 1, 128, 64>}, {pipeline_mode = #tpu.pipeline_mode<synchronous>, transform_indices = @transform_1, window_bounds = array<i64: 576, 128>}, {pipeline_mode = #tpu.pipeline_mode<synchronous>, transform_indices = @transform_2, window_bounds = array<i64: 1, 128>}, {pipeline_mode = #tpu.pipeline_mode<synchronous>, transform_indices = @transform_3, window_bounds = array<i64: 1, 128>}, {transform_indices = @transform_4, window_bounds = array<i64: 1, 99, 128>}]} {
    %c0 = arith.constant 0 : index
    %c0_0 = arith.constant 0 : index
    %c0_1 = arith.constant 0 : index
    %0 = vector.load %arg1[%c0, %c0_0, %c0_1] : memref<1x128x64xbf16, #tpu.memory_space<vmem>>, vector<1x99x64xbf16>
    %1 = vector.shape_cast %0 : vector<1x99x64xbf16> to vector<99x64xbf16>
    %c0_2 = arith.constant 0 : index
    %c0_3 = arith.constant 0 : index
    %2 = vector.load %arg2[%c0_2, %c0_3] : memref<576x128xbf16, #tpu.memory_space<vmem>>, vector<64x128xbf16>
    %cst = arith.constant dense<0.000000e+00> : vector<99x128xf32>
    %3 = tpu.matmul %1, %2, %cst {dimension_numbers = #tpu.dot_dimension_numbers<[1], [0], [0], [1], [0, 0, 1, 1], [], []>} : vector<99x64xbf16>, vector<64x128xbf16>, vector<99x128xf32> -> vector<99x128xf32>
    %c0_4 = arith.constant 0 : index
    %c1 = arith.constant 1 : index
    %c0_5 = arith.constant 0 : index
    %4 = vector.load %arg1[%c0_4, %c1, %c0_5] : memref<1x128x64xbf16, #tpu.memory_space<vmem>>, vector<1x99x64xbf16>
    %5 = vector.shape_cast %4 : vector<1x99x64xbf16> to vector<99x64xbf16>
    %c64 = arith.constant 64 : index
    %c0_6 = arith.constant 0 : index
    %6 = vector.load %arg2[%c64, %c0_6] : memref<576x128xbf16, #tpu.memory_space<vmem>>, vector<64x128xbf16>
    %cst_7 = arith.constant dense<0.000000e+00> : vector<99x128xf32>
    %7 = tpu.matmul %5, %6, %cst_7 {dimension_numbers = #tpu.dot_dimension_numbers<[1], [0], [0], [1], [0, 0, 1, 1], [], []>} : vector<99x64xbf16>, vector<64x128xbf16>, vector<99x128xf32> -> vector<99x128xf32>
    %8 = arith.addf %3, %7 : vector<99x128xf32>
    %c0_8 = arith.constant 0 : index
    %c2 = arith.constant 2 : index
    %c0_9 = arith.constant 0 : index
    %9 = vector.load %arg1[%c0_8, %c2, %c0_9] : memref<1x128x64xbf16, #tpu.memory_space<vmem>>, vector<1x99x64xbf16>
    %10 = vector.shape_cast %9 : vector<1x99x64xbf16> to vector<99x64xbf16>
    %c128 = arith.constant 128 : index
    %c0_10 = arith.constant 0 : index
    %11 = vector.load %arg2[%c128, %c0_10] : memref<576x128xbf16, #tpu.memory_space<vmem>>, vector<64x128xbf16>
    %cst_11 = arith.constant dense<0.000000e+00> : vector<99x128xf32>
    %12 = tpu.matmul %10, %11, %cst_11 {dimension_numbers = #tpu.dot_dimension_numbers<[1], [0], [0], [1], [0, 0, 1, 1], [], []>} : vector<99x64xbf16>, vector<64x128xbf16>, vector<99x128xf32> -> vector<99x128xf32>
    %13 = arith.addf %8, %12 : vector<99x128xf32>
    %c0_12 = arith.constant 0 : index
    %c11 = arith.constant 11 : index
    %c0_13 = arith.constant 0 : index
    %14 = vector.load %arg1[%c0_12, %c11, %c0_13] : memref<1x128x64xbf16, #tpu.memory_space<vmem>>, vector<1x99x64xbf16>
    %15 = vector.shape_cast %14 : vector<1x99x64xbf16> to vector<99x64xbf16>
    %c192 = arith.constant 192 : index
    %c0_14 = arith.constant 0 : index
    %16 = vector.load %arg2[%c192, %c0_14] : memref<576x128xbf16, #tpu.memory_space<vmem>>, vector<64x128xbf16>
    %cst_15 = arith.constant dense<0.000000e+00> : vector<99x128xf32>
    %17 = tpu.matmul %15, %16, %cst_15 {dimension_numbers = #tpu.dot_dimension_numbers<[1], [0], [0], [1], [0, 0, 1, 1], [], []>} : vector<99x64xbf16>, vector<64x128xbf16>, vector<99x128xf32> -> vector<99x128xf32>
    %18 = arith.addf %13, %17 : vector<99x128xf32>
    %c0_16 = arith.constant 0 : index
    %c12 = arith.constant 12 : index
    %c0_17 = arith.constant 0 : index
    %19 = vector.load %arg1[%c0_16, %c12, %c0_17] : memref<1x128x64xbf16, #tpu.memory_space<vmem>>, vector<1x99x64xbf16>
    %20 = vector.shape_cast %19 : vector<1x99x64xbf16> to vector<99x64xbf16>
    %c256 = arith.constant 256 : index
    %c0_18 = arith.constant 0 : index
    %21 = vector.load %arg2[%c256, %c0_18] : memref<576x128xbf16, #tpu.memory_space<vmem>>, vector<64x128xbf16>
    %cst_19 = arith.constant dense<0.000000e+00> : vector<99x128xf32>
    %22 = tpu.matmul %20, %21, %cst_19 {dimension_numbers = #tpu.dot_dimension_numbers<[1], [0], [0], [1], [0, 0, 1, 1], [], []>} : vector<99x64xbf16>, vector<64x128xbf16>, vector<99x128xf32> -> vector<99x128xf32>
    %23 = arith.addf %18, %22 : vector<99x128xf32>
    %c0_20 = arith.constant 0 : index
    %c13 = arith.constant 13 : index
    %c0_21 = arith.constant 0 : index
    %24 = vector.load %arg1[%c0_20, %c13, %c0_21] : memref<1x128x64xbf16, #tpu.memory_space<vmem>>, vector<1x99x64xbf16>
    %25 = vector.shape_cast %24 : vector<1x99x64xbf16> to vector<99x64xbf16>
    %c320 = arith.constant 320 : index
    %c0_22 = arith.constant 0 : index
    %26 = vector.load %arg2[%c320, %c0_22] : memref<576x128xbf16, #tpu.memory_space<vmem>>, vector<64x128xbf16>
    %cst_23 = arith.constant dense<0.000000e+00> : vector<99x128xf32>
    %27 = tpu.matmul %25, %26, %cst_23 {dimension_numbers = #tpu.dot_dimension_numbers<[1], [0], [0], [1], [0, 0, 1, 1], [], []>} : vector<99x64xbf16>, vector<64x128xbf16>, vector<99x128xf32> -> vector<99x128xf32>
    %28 = arith.addf %23, %27 : vector<99x128xf32>
    %c0_24 = arith.constant 0 : index
    %c22 = arith.constant 22 : index
    %c0_25 = arith.constant 0 : index
    %29 = vector.load %arg1[%c0_24, %c22, %c0_25] : memref<1x128x64xbf16, #tpu.memory_space<vmem>>, vector<1x99x64xbf16>
    %30 = vector.shape_cast %29 : vector<1x99x64xbf16> to vector<99x64xbf16>
    %c384 = arith.constant 384 : index
    %c0_26 = arith.constant 0 : index
    %31 = vector.load %arg2[%c384, %c0_26] : memref<576x128xbf16, #tpu.memory_space<vmem>>, vector<64x128xbf16>
    %cst_27 = arith.constant dense<0.000000e+00> : vector<99x128xf32>
    %32 = tpu.matmul %30, %31, %cst_27 {dimension_numbers = #tpu.dot_dimension_numbers<[1], [0], [0], [1], [0, 0, 1, 1], [], []>} : vector<99x64xbf16>, vector<64x128xbf16>, vector<99x128xf32> -> vector<99x128xf32>
    %33 = arith.addf %28, %32 : vector<99x128xf32>
    %c0_28 = arith.constant 0 : index
    %c23 = arith.constant 23 : index
    %c0_29 = arith.constant 0 : index
    %34 = vector.load %arg1[%c0_28, %c23, %c0_29] : memref<1x128x64xbf16, #tpu.memory_space<vmem>>, vector<1x99x64xbf16>
    %35 = vector.shape_cast %34 : vector<1x99x64xbf16> to vector<99x64xbf16>
    %c448 = arith.constant 448 : index
    %c0_30 = arith.constant 0 : index
    %36 = vector.load %arg2[%c448, %c0_30] : memref<576x128xbf16, #tpu.memory_space<vmem>>, vector<64x128xbf16>
    %cst_31 = arith.constant dense<0.000000e+00> : vector<99x128xf32>
    %37 = tpu.matmul %35, %36, %cst_31 {dimension_numbers = #tpu.dot_dimension_numbers<[1], [0], [0], [1], [0, 0, 1, 1], [], []>} : vector<99x64xbf16>, vector<64x128xbf16>, vector<99x128xf32> -> vector<99x128xf32>
    %38 = arith.addf %33, %37 : vector<99x128xf32>
    %c0_32 = arith.constant 0 : index
    %c24 = arith.constant 24 : index
    %c0_33 = arith.constant 0 : index
    %39 = vector.load %arg1[%c0_32, %c24, %c0_33] : memref<1x128x64xbf16, #tpu.memory_space<vmem>>, vector<1x99x64xbf16>
    %40 = vector.shape_cast %39 : vector<1x99x64xbf16> to vector<99x64xbf16>
    %c512 = arith.constant 512 : index
    %c0_34 = arith.constant 0 : index
    %41 = vector.load %arg2[%c512, %c0_34] : memref<576x128xbf16, #tpu.memory_space<vmem>>, vector<64x128xbf16>
    %cst_35 = arith.constant dense<0.000000e+00> : vector<99x128xf32>
    %42 = tpu.matmul %40, %41, %cst_35 {dimension_numbers = #tpu.dot_dimension_numbers<[1], [0], [0], [1], [0, 0, 1, 1], [], []>} : vector<99x64xbf16>, vector<64x128xbf16>, vector<99x128xf32> -> vector<99x128xf32>
    %43 = arith.addf %38, %42 : vector<99x128xf32>
    %c0_36 = arith.constant 0 : index
    %c0_37 = arith.constant 0 : index
    %44 = vector.load %arg3[%c0_36, %c0_37] : memref<1x128xf32, #tpu.memory_space<vmem>>, vector<1x128xf32>
    %45 = vector.broadcast %44 : vector<1x128xf32> to vector<99x128xf32>
    %46 = arith.mulf %43, %45 : vector<99x128xf32>
    %c0_38 = arith.constant 0 : index
    %c0_39 = arith.constant 0 : index
    %47 = vector.load %arg4[%c0_38, %c0_39] : memref<1x128xf32, #tpu.memory_space<vmem>>, vector<1x128xf32>
    %48 = vector.broadcast %47 : vector<1x128xf32> to vector<99x128xf32>
    %49 = arith.addf %46, %48 : vector<99x128xf32>
    %cst_40 = arith.constant 0.000000e+00 : f32
    %50 = vector.broadcast %cst_40 : f32 to vector<99x128xf32>
    %51 = arith.maximumf %49, %50 : vector<99x128xf32>
    %52 = arith.truncf %51 : vector<99x128xf32> to vector<99x128xbf16>
    %c0_41 = arith.constant 0 : index
    %c0_42 = arith.constant 0 : index
    %c0_43 = arith.constant 0 : index
    %53 = vector.load %arg5[%c0_41, %c0_42, %c0_43] : memref<1x99x128xbf16, #tpu.memory_space<vmem>>, vector<1x99x128xbf16>
    %54 = vector.shape_cast %53 : vector<1x99x128xbf16> to vector<99x128xbf16>
    %55 = vector.shape_cast %52 : vector<99x128xbf16> to vector<1x99x128xbf16>
    tpu.vector_store %arg5[%c0_41, %c0_42, %c0_43], %55 {strides = array<i32>} : memref<1x99x128xbf16, #tpu.memory_space<vmem>>, vector<1x99x128xbf16>,
    return
  }
  func.func @transform_0(%arg0: i32) -> (i32, i32, i32) {
    %c0_i32 = arith.constant 0 : i32
    %c0_i32_0 = arith.constant 0 : i32
    %c0_i32_1 = arith.constant 0 : i32
    return %arg0, %c0_i32, %c0_i32_0 : i32, i32, i32
  }
  func.func @transform_1(%arg0: i32) -> (i32, i32) {
    %c0_i32 = arith.constant 0 : i32
    %c0_i32_0 = arith.constant 0 : i32
    %c0_i32_1 = arith.constant 0 : i32
    return %c0_i32, %c0_i32_0 : i32, i32
  }
  func.func @transform_2(%arg0: i32) -> (i32, i32) {
    %c0_i32 = arith.constant 0 : i32
    %c0_i32_0 = arith.constant 0 : i32
    %c0_i32_1 = arith.constant 0 : i32
    return %c0_i32, %c0_i32_0 : i32, i32
  }
  func.func @transform_3(%arg0: i32) -> (i32, i32) {
    %c0_i32 = arith.constant 0 : i32
    %c0_i32_0 = arith.constant 0 : i32
    %c0_i32_1 = arith.constant 0 : i32
    return %c0_i32, %c0_i32_0 : i32, i32
  }
  func.func @transform_4(%arg0: i32) -> (i32, i32, i32) {
    %c0_i32 = arith.constant 0 : i32
    %c0_i32_0 = arith.constant 0 : i32
    %c0_i32_1 = arith.constant 0 : i32
    return %arg0, %c0_i32, %c0_i32_0 : i32, i32, i32
  }
}

module attributes {stable_mosaic.version = 11 : i64} {
  func.func @_conv_block_kernel(%arg0: i32, %arg1: memref<1x56x128xbf16, #tpu.memory_space<vmem>>, %arg2: memref<1152x256xbf16, #tpu.memory_space<vmem>>, %arg3: memref<1x256xf32, #tpu.memory_space<vmem>>, %arg4: memref<1x256xf32, #tpu.memory_space<vmem>>, %arg5: memref<1x35x256xbf16, #tpu.memory_space<vmem>>) attributes {dimension_semantics = [#tpu.dimension_semantics<parallel>], iteration_bounds = array<i64: 2>, scalar_prefetch = 0 : i64, scratch_operands = 0 : i64, tpu.core_type = #tpu.core_type<tc>, window_params = [{transform_indices = @transform_0, window_bounds = array<i64: 1, 56, 128>}, {pipeline_mode = #tpu.pipeline_mode<synchronous>, transform_indices = @transform_1, window_bounds = array<i64: 1152, 256>}, {pipeline_mode = #tpu.pipeline_mode<synchronous>, transform_indices = @transform_2, window_bounds = array<i64: 1, 256>}, {pipeline_mode = #tpu.pipeline_mode<synchronous>, transform_indices = @transform_3, window_bounds = array<i64: 1, 256>}, {transform_indices = @transform_4, window_bounds = array<i64: 1, 35, 256>}]} {
    %c0 = arith.constant 0 : index
    %c0_0 = arith.constant 0 : index
    %c0_1 = arith.constant 0 : index
    %0 = vector.load %arg1[%c0, %c0_0, %c0_1] : memref<1x56x128xbf16, #tpu.memory_space<vmem>>, vector<1x35x128xbf16>
    %1 = vector.shape_cast %0 : vector<1x35x128xbf16> to vector<35x128xbf16>
    %c0_2 = arith.constant 0 : index
    %c0_3 = arith.constant 0 : index
    %2 = vector.load %arg2[%c0_2, %c0_3] : memref<1152x256xbf16, #tpu.memory_space<vmem>>, vector<128x256xbf16>
    %cst = arith.constant dense<0.000000e+00> : vector<35x256xf32>
    %3 = tpu.matmul %1, %2, %cst {dimension_numbers = #tpu.dot_dimension_numbers<[1], [0], [0], [1], [0, 0, 1, 1], [], []>} : vector<35x128xbf16>, vector<128x256xbf16>, vector<35x256xf32> -> vector<35x256xf32>
    %c0_4 = arith.constant 0 : index
    %c1 = arith.constant 1 : index
    %c0_5 = arith.constant 0 : index
    %4 = vector.load %arg1[%c0_4, %c1, %c0_5] : memref<1x56x128xbf16, #tpu.memory_space<vmem>>, vector<1x35x128xbf16>
    %5 = vector.shape_cast %4 : vector<1x35x128xbf16> to vector<35x128xbf16>
    %c128 = arith.constant 128 : index
    %c0_6 = arith.constant 0 : index
    %6 = vector.load %arg2[%c128, %c0_6] : memref<1152x256xbf16, #tpu.memory_space<vmem>>, vector<128x256xbf16>
    %cst_7 = arith.constant dense<0.000000e+00> : vector<35x256xf32>
    %7 = tpu.matmul %5, %6, %cst_7 {dimension_numbers = #tpu.dot_dimension_numbers<[1], [0], [0], [1], [0, 0, 1, 1], [], []>} : vector<35x128xbf16>, vector<128x256xbf16>, vector<35x256xf32> -> vector<35x256xf32>
    %8 = arith.addf %3, %7 : vector<35x256xf32>
    %c0_8 = arith.constant 0 : index
    %c2 = arith.constant 2 : index
    %c0_9 = arith.constant 0 : index
    %9 = vector.load %arg1[%c0_8, %c2, %c0_9] : memref<1x56x128xbf16, #tpu.memory_space<vmem>>, vector<1x35x128xbf16>
    %10 = vector.shape_cast %9 : vector<1x35x128xbf16> to vector<35x128xbf16>
    %c256 = arith.constant 256 : index
    %c0_10 = arith.constant 0 : index
    %11 = vector.load %arg2[%c256, %c0_10] : memref<1152x256xbf16, #tpu.memory_space<vmem>>, vector<128x256xbf16>
    %cst_11 = arith.constant dense<0.000000e+00> : vector<35x256xf32>
    %12 = tpu.matmul %10, %11, %cst_11 {dimension_numbers = #tpu.dot_dimension_numbers<[1], [0], [0], [1], [0, 0, 1, 1], [], []>} : vector<35x128xbf16>, vector<128x256xbf16>, vector<35x256xf32> -> vector<35x256xf32>
    %13 = arith.addf %8, %12 : vector<35x256xf32>
    %c0_12 = arith.constant 0 : index
    %c7 = arith.constant 7 : index
    %c0_13 = arith.constant 0 : index
    %14 = vector.load %arg1[%c0_12, %c7, %c0_13] : memref<1x56x128xbf16, #tpu.memory_space<vmem>>, vector<1x35x128xbf16>
    %15 = vector.shape_cast %14 : vector<1x35x128xbf16> to vector<35x128xbf16>
    %c384 = arith.constant 384 : index
    %c0_14 = arith.constant 0 : index
    %16 = vector.load %arg2[%c384, %c0_14] : memref<1152x256xbf16, #tpu.memory_space<vmem>>, vector<128x256xbf16>
    %cst_15 = arith.constant dense<0.000000e+00> : vector<35x256xf32>
    %17 = tpu.matmul %15, %16, %cst_15 {dimension_numbers = #tpu.dot_dimension_numbers<[1], [0], [0], [1], [0, 0, 1, 1], [], []>} : vector<35x128xbf16>, vector<128x256xbf16>, vector<35x256xf32> -> vector<35x256xf32>
    %18 = arith.addf %13, %17 : vector<35x256xf32>
    %c0_16 = arith.constant 0 : index
    %c8 = arith.constant 8 : index
    %c0_17 = arith.constant 0 : index
    %19 = vector.load %arg1[%c0_16, %c8, %c0_17] : memref<1x56x128xbf16, #tpu.memory_space<vmem>>, vector<1x35x128xbf16>
    %20 = vector.shape_cast %19 : vector<1x35x128xbf16> to vector<35x128xbf16>
    %c512 = arith.constant 512 : index
    %c0_18 = arith.constant 0 : index
    %21 = vector.load %arg2[%c512, %c0_18] : memref<1152x256xbf16, #tpu.memory_space<vmem>>, vector<128x256xbf16>
    %cst_19 = arith.constant dense<0.000000e+00> : vector<35x256xf32>
    %22 = tpu.matmul %20, %21, %cst_19 {dimension_numbers = #tpu.dot_dimension_numbers<[1], [0], [0], [1], [0, 0, 1, 1], [], []>} : vector<35x128xbf16>, vector<128x256xbf16>, vector<35x256xf32> -> vector<35x256xf32>
    %23 = arith.addf %18, %22 : vector<35x256xf32>
    %c0_20 = arith.constant 0 : index
    %c9 = arith.constant 9 : index
    %c0_21 = arith.constant 0 : index
    %24 = vector.load %arg1[%c0_20, %c9, %c0_21] : memref<1x56x128xbf16, #tpu.memory_space<vmem>>, vector<1x35x128xbf16>
    %25 = vector.shape_cast %24 : vector<1x35x128xbf16> to vector<35x128xbf16>
    %c640 = arith.constant 640 : index
    %c0_22 = arith.constant 0 : index
    %26 = vector.load %arg2[%c640, %c0_22] : memref<1152x256xbf16, #tpu.memory_space<vmem>>, vector<128x256xbf16>
    %cst_23 = arith.constant dense<0.000000e+00> : vector<35x256xf32>
    %27 = tpu.matmul %25, %26, %cst_23 {dimension_numbers = #tpu.dot_dimension_numbers<[1], [0], [0], [1], [0, 0, 1, 1], [], []>} : vector<35x128xbf16>, vector<128x256xbf16>, vector<35x256xf32> -> vector<35x256xf32>
    %28 = arith.addf %23, %27 : vector<35x256xf32>
    %c0_24 = arith.constant 0 : index
    %c14 = arith.constant 14 : index
    %c0_25 = arith.constant 0 : index
    %29 = vector.load %arg1[%c0_24, %c14, %c0_25] : memref<1x56x128xbf16, #tpu.memory_space<vmem>>, vector<1x35x128xbf16>
    %30 = vector.shape_cast %29 : vector<1x35x128xbf16> to vector<35x128xbf16>
    %c768 = arith.constant 768 : index
    %c0_26 = arith.constant 0 : index
    %31 = vector.load %arg2[%c768, %c0_26] : memref<1152x256xbf16, #tpu.memory_space<vmem>>, vector<128x256xbf16>
    %cst_27 = arith.constant dense<0.000000e+00> : vector<35x256xf32>
    %32 = tpu.matmul %30, %31, %cst_27 {dimension_numbers = #tpu.dot_dimension_numbers<[1], [0], [0], [1], [0, 0, 1, 1], [], []>} : vector<35x128xbf16>, vector<128x256xbf16>, vector<35x256xf32> -> vector<35x256xf32>
    %33 = arith.addf %28, %32 : vector<35x256xf32>
    %c0_28 = arith.constant 0 : index
    %c15 = arith.constant 15 : index
    %c0_29 = arith.constant 0 : index
    %34 = vector.load %arg1[%c0_28, %c15, %c0_29] : memref<1x56x128xbf16, #tpu.memory_space<vmem>>, vector<1x35x128xbf16>
    %35 = vector.shape_cast %34 : vector<1x35x128xbf16> to vector<35x128xbf16>
    %c896 = arith.constant 896 : index
    %c0_30 = arith.constant 0 : index
    %36 = vector.load %arg2[%c896, %c0_30] : memref<1152x256xbf16, #tpu.memory_space<vmem>>, vector<128x256xbf16>
    %cst_31 = arith.constant dense<0.000000e+00> : vector<35x256xf32>
    %37 = tpu.matmul %35, %36, %cst_31 {dimension_numbers = #tpu.dot_dimension_numbers<[1], [0], [0], [1], [0, 0, 1, 1], [], []>} : vector<35x128xbf16>, vector<128x256xbf16>, vector<35x256xf32> -> vector<35x256xf32>
    %38 = arith.addf %33, %37 : vector<35x256xf32>
    %c0_32 = arith.constant 0 : index
    %c16 = arith.constant 16 : index
    %c0_33 = arith.constant 0 : index
    %39 = vector.load %arg1[%c0_32, %c16, %c0_33] : memref<1x56x128xbf16, #tpu.memory_space<vmem>>, vector<1x35x128xbf16>
    %40 = vector.shape_cast %39 : vector<1x35x128xbf16> to vector<35x128xbf16>
    %c1024 = arith.constant 1024 : index
    %c0_34 = arith.constant 0 : index
    %41 = vector.load %arg2[%c1024, %c0_34] : memref<1152x256xbf16, #tpu.memory_space<vmem>>, vector<128x256xbf16>
    %cst_35 = arith.constant dense<0.000000e+00> : vector<35x256xf32>
    %42 = tpu.matmul %40, %41, %cst_35 {dimension_numbers = #tpu.dot_dimension_numbers<[1], [0], [0], [1], [0, 0, 1, 1], [], []>} : vector<35x128xbf16>, vector<128x256xbf16>, vector<35x256xf32> -> vector<35x256xf32>
    %43 = arith.addf %38, %42 : vector<35x256xf32>
    %c0_36 = arith.constant 0 : index
    %c0_37 = arith.constant 0 : index
    %44 = vector.load %arg3[%c0_36, %c0_37] : memref<1x256xf32, #tpu.memory_space<vmem>>, vector<1x256xf32>
    %45 = vector.broadcast %44 : vector<1x256xf32> to vector<35x256xf32>
    %46 = arith.mulf %43, %45 : vector<35x256xf32>
    %c0_38 = arith.constant 0 : index
    %c0_39 = arith.constant 0 : index
    %47 = vector.load %arg4[%c0_38, %c0_39] : memref<1x256xf32, #tpu.memory_space<vmem>>, vector<1x256xf32>
    %48 = vector.broadcast %47 : vector<1x256xf32> to vector<35x256xf32>
    %49 = arith.addf %46, %48 : vector<35x256xf32>
    %cst_40 = arith.constant 0.000000e+00 : f32
    %50 = vector.broadcast %cst_40 : f32 to vector<35x256xf32>
    %51 = arith.maximumf %49, %50 : vector<35x256xf32>
    %52 = arith.truncf %51 : vector<35x256xf32> to vector<35x256xbf16>
    %c0_41 = arith.constant 0 : index
    %c0_42 = arith.constant 0 : index
    %c0_43 = arith.constant 0 : index
    %53 = vector.load %arg5[%c0_41, %c0_42, %c0_43] : memref<1x35x256xbf16, #tpu.memory_space<vmem>>, vector<1x35x256xbf16>
    %54 = vector.shape_cast %53 : vector<1x35x256xbf16> to vector<35x256xbf16>
    %55 = vector.shape_cast %52 : vector<35x256xbf16> to vector<1x35x256xbf16>
    tpu.vector_store %arg5[%c0_41, %c0_42, %c0_43], %55 {strides = array<i32>} : memref<1x35x256xbf16, #tpu.memory_space<vmem>>, vector<1x35x256xbf16>,
    return
  }
  func.func @transform_0(%arg0: i32) -> (i32, i32, i32) {
    %c0_i32 = arith.constant 0 : i32
    %c0_i32_0 = arith.constant 0 : i32
    %c0_i32_1 = arith.constant 0 : i32
    return %arg0, %c0_i32, %c0_i32_0 : i32, i32, i32
  }
  func.func @transform_1(%arg0: i32) -> (i32, i32) {
    %c0_i32 = arith.constant 0 : i32
    %c0_i32_0 = arith.constant 0 : i32
    %c0_i32_1 = arith.constant 0 : i32
    return %c0_i32, %c0_i32_0 : i32, i32
  }
  func.func @transform_2(%arg0: i32) -> (i32, i32) {
    %c0_i32 = arith.constant 0 : i32
    %c0_i32_0 = arith.constant 0 : i32
    %c0_i32_1 = arith.constant 0 : i32
    return %c0_i32, %c0_i32_0 : i32, i32
  }
  func.func @transform_3(%arg0: i32) -> (i32, i32) {
    %c0_i32 = arith.constant 0 : i32
    %c0_i32_0 = arith.constant 0 : i32
    %c0_i32_1 = arith.constant 0 : i32
    return %c0_i32, %c0_i32_0 : i32, i32
  }
  func.func @transform_4(%arg0: i32) -> (i32, i32, i32) {
    %c0_i32 = arith.constant 0 : i32
    %c0_i32_0 = arith.constant 0 : i32
    %c0_i32_1 = arith.constant 0 : i32
    return %arg0, %c0_i32, %c0_i32_0 : i32, i32, i32
  }
}

module attributes {stable_mosaic.version = 11 : i64} {
  func.func @_conv_block_kernel(%arg0: i32, %arg1: memref<1x32x256xbf16, #tpu.memory_space<vmem>>, %arg2: memref<2304x512xbf16, #tpu.memory_space<vmem>>, %arg3: memref<1x512xf32, #tpu.memory_space<vmem>>, %arg4: memref<1x512xf32, #tpu.memory_space<vmem>>, %arg5: memref<1x15x512xbf16, #tpu.memory_space<vmem>>) attributes {dimension_semantics = [#tpu.dimension_semantics<parallel>], iteration_bounds = array<i64: 2>, scalar_prefetch = 0 : i64, scratch_operands = 0 : i64, tpu.core_type = #tpu.core_type<tc>, window_params = [{transform_indices = @transform_0, window_bounds = array<i64: 1, 32, 256>}, {pipeline_mode = #tpu.pipeline_mode<synchronous>, transform_indices = @transform_1, window_bounds = array<i64: 2304, 512>}, {pipeline_mode = #tpu.pipeline_mode<synchronous>, transform_indices = @transform_2, window_bounds = array<i64: 1, 512>}, {pipeline_mode = #tpu.pipeline_mode<synchronous>, transform_indices = @transform_3, window_bounds = array<i64: 1, 512>}, {transform_indices = @transform_4, window_bounds = array<i64: 1, 15, 512>}]} {
    %c0 = arith.constant 0 : index
    %c0_0 = arith.constant 0 : index
    %c0_1 = arith.constant 0 : index
    %0 = vector.load %arg1[%c0, %c0_0, %c0_1] : memref<1x32x256xbf16, #tpu.memory_space<vmem>>, vector<1x15x256xbf16>
    %1 = vector.shape_cast %0 : vector<1x15x256xbf16> to vector<15x256xbf16>
    %c0_2 = arith.constant 0 : index
    %c0_3 = arith.constant 0 : index
    %2 = vector.load %arg2[%c0_2, %c0_3] : memref<2304x512xbf16, #tpu.memory_space<vmem>>, vector<256x512xbf16>
    %cst = arith.constant dense<0.000000e+00> : vector<15x512xf32>
    %3 = tpu.matmul %1, %2, %cst {dimension_numbers = #tpu.dot_dimension_numbers<[1], [0], [0], [1], [0, 0, 1, 1], [], []>} : vector<15x256xbf16>, vector<256x512xbf16>, vector<15x512xf32> -> vector<15x512xf32>
    %c0_4 = arith.constant 0 : index
    %c1 = arith.constant 1 : index
    %c0_5 = arith.constant 0 : index
    %4 = vector.load %arg1[%c0_4, %c1, %c0_5] : memref<1x32x256xbf16, #tpu.memory_space<vmem>>, vector<1x15x256xbf16>
    %5 = vector.shape_cast %4 : vector<1x15x256xbf16> to vector<15x256xbf16>
    %c256 = arith.constant 256 : index
    %c0_6 = arith.constant 0 : index
    %6 = vector.load %arg2[%c256, %c0_6] : memref<2304x512xbf16, #tpu.memory_space<vmem>>, vector<256x512xbf16>
    %cst_7 = arith.constant dense<0.000000e+00> : vector<15x512xf32>
    %7 = tpu.matmul %5, %6, %cst_7 {dimension_numbers = #tpu.dot_dimension_numbers<[1], [0], [0], [1], [0, 0, 1, 1], [], []>} : vector<15x256xbf16>, vector<256x512xbf16>, vector<15x512xf32> -> vector<15x512xf32>
    %8 = arith.addf %3, %7 : vector<15x512xf32>
    %c0_8 = arith.constant 0 : index
    %c2 = arith.constant 2 : index
    %c0_9 = arith.constant 0 : index
    %9 = vector.load %arg1[%c0_8, %c2, %c0_9] : memref<1x32x256xbf16, #tpu.memory_space<vmem>>, vector<1x15x256xbf16>
    %10 = vector.shape_cast %9 : vector<1x15x256xbf16> to vector<15x256xbf16>
    %c512 = arith.constant 512 : index
    %c0_10 = arith.constant 0 : index
    %11 = vector.load %arg2[%c512, %c0_10] : memref<2304x512xbf16, #tpu.memory_space<vmem>>, vector<256x512xbf16>
    %cst_11 = arith.constant dense<0.000000e+00> : vector<15x512xf32>
    %12 = tpu.matmul %10, %11, %cst_11 {dimension_numbers = #tpu.dot_dimension_numbers<[1], [0], [0], [1], [0, 0, 1, 1], [], []>} : vector<15x256xbf16>, vector<256x512xbf16>, vector<15x512xf32> -> vector<15x512xf32>
    %13 = arith.addf %8, %12 : vector<15x512xf32>
    %c0_12 = arith.constant 0 : index
    %c5 = arith.constant 5 : index
    %c0_13 = arith.constant 0 : index
    %14 = vector.load %arg1[%c0_12, %c5, %c0_13] : memref<1x32x256xbf16, #tpu.memory_space<vmem>>, vector<1x15x256xbf16>
    %15 = vector.shape_cast %14 : vector<1x15x256xbf16> to vector<15x256xbf16>
    %c768 = arith.constant 768 : index
    %c0_14 = arith.constant 0 : index
    %16 = vector.load %arg2[%c768, %c0_14] : memref<2304x512xbf16, #tpu.memory_space<vmem>>, vector<256x512xbf16>
    %cst_15 = arith.constant dense<0.000000e+00> : vector<15x512xf32>
    %17 = tpu.matmul %15, %16, %cst_15 {dimension_numbers = #tpu.dot_dimension_numbers<[1], [0], [0], [1], [0, 0, 1, 1], [], []>} : vector<15x256xbf16>, vector<256x512xbf16>, vector<15x512xf32> -> vector<15x512xf32>
    %18 = arith.addf %13, %17 : vector<15x512xf32>
    %c0_16 = arith.constant 0 : index
    %c6 = arith.constant 6 : index
    %c0_17 = arith.constant 0 : index
    %19 = vector.load %arg1[%c0_16, %c6, %c0_17] : memref<1x32x256xbf16, #tpu.memory_space<vmem>>, vector<1x15x256xbf16>
    %20 = vector.shape_cast %19 : vector<1x15x256xbf16> to vector<15x256xbf16>
    %c1024 = arith.constant 1024 : index
    %c0_18 = arith.constant 0 : index
    %21 = vector.load %arg2[%c1024, %c0_18] : memref<2304x512xbf16, #tpu.memory_space<vmem>>, vector<256x512xbf16>
    %cst_19 = arith.constant dense<0.000000e+00> : vector<15x512xf32>
    %22 = tpu.matmul %20, %21, %cst_19 {dimension_numbers = #tpu.dot_dimension_numbers<[1], [0], [0], [1], [0, 0, 1, 1], [], []>} : vector<15x256xbf16>, vector<256x512xbf16>, vector<15x512xf32> -> vector<15x512xf32>
    %23 = arith.addf %18, %22 : vector<15x512xf32>
    %c0_20 = arith.constant 0 : index
    %c7 = arith.constant 7 : index
    %c0_21 = arith.constant 0 : index
    %24 = vector.load %arg1[%c0_20, %c7, %c0_21] : memref<1x32x256xbf16, #tpu.memory_space<vmem>>, vector<1x15x256xbf16>
    %25 = vector.shape_cast %24 : vector<1x15x256xbf16> to vector<15x256xbf16>
    %c1280 = arith.constant 1280 : index
    %c0_22 = arith.constant 0 : index
    %26 = vector.load %arg2[%c1280, %c0_22] : memref<2304x512xbf16, #tpu.memory_space<vmem>>, vector<256x512xbf16>
    %cst_23 = arith.constant dense<0.000000e+00> : vector<15x512xf32>
    %27 = tpu.matmul %25, %26, %cst_23 {dimension_numbers = #tpu.dot_dimension_numbers<[1], [0], [0], [1], [0, 0, 1, 1], [], []>} : vector<15x256xbf16>, vector<256x512xbf16>, vector<15x512xf32> -> vector<15x512xf32>
    %28 = arith.addf %23, %27 : vector<15x512xf32>
    %c0_24 = arith.constant 0 : index
    %c10 = arith.constant 10 : index
    %c0_25 = arith.constant 0 : index
    %29 = vector.load %arg1[%c0_24, %c10, %c0_25] : memref<1x32x256xbf16, #tpu.memory_space<vmem>>, vector<1x15x256xbf16>
    %30 = vector.shape_cast %29 : vector<1x15x256xbf16> to vector<15x256xbf16>
    %c1536 = arith.constant 1536 : index
    %c0_26 = arith.constant 0 : index
    %31 = vector.load %arg2[%c1536, %c0_26] : memref<2304x512xbf16, #tpu.memory_space<vmem>>, vector<256x512xbf16>
    %cst_27 = arith.constant dense<0.000000e+00> : vector<15x512xf32>
    %32 = tpu.matmul %30, %31, %cst_27 {dimension_numbers = #tpu.dot_dimension_numbers<[1], [0], [0], [1], [0, 0, 1, 1], [], []>} : vector<15x256xbf16>, vector<256x512xbf16>, vector<15x512xf32> -> vector<15x512xf32>
    %33 = arith.addf %28, %32 : vector<15x512xf32>
    %c0_28 = arith.constant 0 : index
    %c11 = arith.constant 11 : index
    %c0_29 = arith.constant 0 : index
    %34 = vector.load %arg1[%c0_28, %c11, %c0_29] : memref<1x32x256xbf16, #tpu.memory_space<vmem>>, vector<1x15x256xbf16>
    %35 = vector.shape_cast %34 : vector<1x15x256xbf16> to vector<15x256xbf16>
    %c1792 = arith.constant 1792 : index
    %c0_30 = arith.constant 0 : index
    %36 = vector.load %arg2[%c1792, %c0_30] : memref<2304x512xbf16, #tpu.memory_space<vmem>>, vector<256x512xbf16>
    %cst_31 = arith.constant dense<0.000000e+00> : vector<15x512xf32>
    %37 = tpu.matmul %35, %36, %cst_31 {dimension_numbers = #tpu.dot_dimension_numbers<[1], [0], [0], [1], [0, 0, 1, 1], [], []>} : vector<15x256xbf16>, vector<256x512xbf16>, vector<15x512xf32> -> vector<15x512xf32>
    %38 = arith.addf %33, %37 : vector<15x512xf32>
    %c0_32 = arith.constant 0 : index
    %c12 = arith.constant 12 : index
    %c0_33 = arith.constant 0 : index
    %39 = vector.load %arg1[%c0_32, %c12, %c0_33] : memref<1x32x256xbf16, #tpu.memory_space<vmem>>, vector<1x15x256xbf16>
    %40 = vector.shape_cast %39 : vector<1x15x256xbf16> to vector<15x256xbf16>
    %c2048 = arith.constant 2048 : index
    %c0_34 = arith.constant 0 : index
    %41 = vector.load %arg2[%c2048, %c0_34] : memref<2304x512xbf16, #tpu.memory_space<vmem>>, vector<256x512xbf16>
    %cst_35 = arith.constant dense<0.000000e+00> : vector<15x512xf32>
    %42 = tpu.matmul %40, %41, %cst_35 {dimension_numbers = #tpu.dot_dimension_numbers<[1], [0], [0], [1], [0, 0, 1, 1], [], []>} : vector<15x256xbf16>, vector<256x512xbf16>, vector<15x512xf32> -> vector<15x512xf32>
    %43 = arith.addf %38, %42 : vector<15x512xf32>
    %c0_36 = arith.constant 0 : index
    %c0_37 = arith.constant 0 : index
    %44 = vector.load %arg3[%c0_36, %c0_37] : memref<1x512xf32, #tpu.memory_space<vmem>>, vector<1x512xf32>
    %45 = vector.broadcast %44 : vector<1x512xf32> to vector<15x512xf32>
    %46 = arith.mulf %43, %45 : vector<15x512xf32>
    %c0_38 = arith.constant 0 : index
    %c0_39 = arith.constant 0 : index
    %47 = vector.load %arg4[%c0_38, %c0_39] : memref<1x512xf32, #tpu.memory_space<vmem>>, vector<1x512xf32>
    %48 = vector.broadcast %47 : vector<1x512xf32> to vector<15x512xf32>
    %49 = arith.addf %46, %48 : vector<15x512xf32>
    %cst_40 = arith.constant 0.000000e+00 : f32
    %50 = vector.broadcast %cst_40 : f32 to vector<15x512xf32>
    %51 = arith.maximumf %49, %50 : vector<15x512xf32>
    %52 = arith.truncf %51 : vector<15x512xf32> to vector<15x512xbf16>
    %c0_41 = arith.constant 0 : index
    %c0_42 = arith.constant 0 : index
    %c0_43 = arith.constant 0 : index
    %53 = vector.load %arg5[%c0_41, %c0_42, %c0_43] : memref<1x15x512xbf16, #tpu.memory_space<vmem>>, vector<1x15x512xbf16>
    %54 = vector.shape_cast %53 : vector<1x15x512xbf16> to vector<15x512xbf16>
    %55 = vector.shape_cast %52 : vector<15x512xbf16> to vector<1x15x512xbf16>
    tpu.vector_store %arg5[%c0_41, %c0_42, %c0_43], %55 {strides = array<i32>} : memref<1x15x512xbf16, #tpu.memory_space<vmem>>, vector<1x15x512xbf16>,
    return
  }
  func.func @transform_0(%arg0: i32) -> (i32, i32, i32) {
    %c0_i32 = arith.constant 0 : i32
    %c0_i32_0 = arith.constant 0 : i32
    %c0_i32_1 = arith.constant 0 : i32
    return %arg0, %c0_i32, %c0_i32_0 : i32, i32, i32
  }
  func.func @transform_1(%arg0: i32) -> (i32, i32) {
    %c0_i32 = arith.constant 0 : i32
    %c0_i32_0 = arith.constant 0 : i32
    %c0_i32_1 = arith.constant 0 : i32
    return %c0_i32, %c0_i32_0 : i32, i32
  }
  func.func @transform_2(%arg0: i32) -> (i32, i32) {
    %c0_i32 = arith.constant 0 : i32
    %c0_i32_0 = arith.constant 0 : i32
    %c0_i32_1 = arith.constant 0 : i32
    return %c0_i32, %c0_i32_0 : i32, i32
  }
  func.func @transform_3(%arg0: i32) -> (i32, i32) {
    %c0_i32 = arith.constant 0 : i32
    %c0_i32_0 = arith.constant 0 : i32
    %c0_i32_1 = arith.constant 0 : i32
    return %c0_i32, %c0_i32_0 : i32, i32
  }
  func.func @transform_4(%arg0: i32) -> (i32, i32, i32) {
    %c0_i32 = arith.constant 0 : i32
    %c0_i32_0 = arith.constant 0 : i32
    %c0_i32_1 = arith.constant 0 : i32
    return %arg0, %c0_i32, %c0_i32_0 : i32, i32, i32
  }
}

module attributes {stable_mosaic.version = 11 : i64} {
  func.func @_head_kernel(%arg0: i32, %arg1: memref<2x2048xbf16, #tpu.memory_space<vmem>>, %arg2: memref<2048x10xbf16, #tpu.memory_space<vmem>>, %arg3: memref<1x10xf32, #tpu.memory_space<vmem>>, %arg4: memref<2x10xf32, #tpu.memory_space<vmem>>) attributes {dimension_semantics = [#tpu.dimension_semantics<parallel>], iteration_bounds = array<i64: 1>, scalar_prefetch = 0 : i64, scratch_operands = 0 : i64, tpu.core_type = #tpu.core_type<tc>, window_params = [{transform_indices = @transform_0, window_bounds = array<i64: 2, 2048>}, {pipeline_mode = #tpu.pipeline_mode<synchronous>, transform_indices = @transform_1, window_bounds = array<i64: 2048, 10>}, {pipeline_mode = #tpu.pipeline_mode<synchronous>, transform_indices = @transform_2, window_bounds = array<i64: 1, 10>}, {transform_indices = @transform_3, window_bounds = array<i64: 2, 10>}]} {
    %c0 = arith.constant 0 : index
    %c0_0 = arith.constant 0 : index
    %0 = vector.load %arg1[%c0, %c0_0] : memref<2x2048xbf16, #tpu.memory_space<vmem>>, vector<2x2048xbf16>
    %c0_1 = arith.constant 0 : index
    %c0_2 = arith.constant 0 : index
    %1 = vector.load %arg2[%c0_1, %c0_2] : memref<2048x10xbf16, #tpu.memory_space<vmem>>, vector<2048x10xbf16>
    %cst = arith.constant dense<0.000000e+00> : vector<2x10xf32>
    %2 = tpu.matmul %0, %1, %cst {dimension_numbers = #tpu.dot_dimension_numbers<[1], [0], [0], [1], [0, 0, 1, 1], [], []>} : vector<2x2048xbf16>, vector<2048x10xbf16>, vector<2x10xf32> -> vector<2x10xf32>
    %c0_3 = arith.constant 0 : index
    %c0_4 = arith.constant 0 : index
    %3 = vector.load %arg3[%c0_3, %c0_4] : memref<1x10xf32, #tpu.memory_space<vmem>>, vector<1x10xf32>
    %4 = vector.broadcast %3 : vector<1x10xf32> to vector<2x10xf32>
    %5 = arith.addf %2, %4 : vector<2x10xf32>
    %cst_5 = arith.constant dense<0xFF800000> : vector<2xf32>
    %6 = vector.multi_reduction <maximumf>, %5, %cst_5 [1] : vector<2x10xf32> to vector<2xf32>
    %7 = vector.shape_cast %6 : vector<2xf32> to vector<2x1xf32>
    %8 = vector.broadcast %7 : vector<2x1xf32> to vector<2x10xf32>
    %9 = arith.subf %5, %8 : vector<2x10xf32>
    %10 = math.exp %9 : vector<2x10xf32>
    %cst_6 = arith.constant dense<0.000000e+00> : vector<2xf32>
    %11 = vector.multi_reduction <add>, %10, %cst_6 [1] : vector<2x10xf32> to vector<2xf32>
    %12 = vector.shape_cast %11 : vector<2xf32> to vector<2x1xf32>
    %13 = vector.broadcast %12 : vector<2x1xf32> to vector<2x10xf32>
    %14 = arith.divf %10, %13 : vector<2x10xf32>
    %c0_7 = arith.constant 0 : index
    %c0_8 = arith.constant 0 : index
    %15 = vector.load %arg4[%c0_7, %c0_8] : memref<2x10xf32, #tpu.memory_space<vmem>>, vector<2x10xf32>
    tpu.vector_store %arg4[%c0_7, %c0_8], %14 {strides = array<i32>} : memref<2x10xf32, #tpu.memory_space<vmem>>, vector<2x10xf32>,
    return
  }
  func.func @transform_0(%arg0: i32) -> (i32, i32) {
    %c0_i32 = arith.constant 0 : i32
    %c0_i32_0 = arith.constant 0 : i32
    return %arg0, %c0_i32 : i32, i32
  }
  func.func @transform_1(%arg0: i32) -> (i32, i32) {
    %c0_i32 = arith.constant 0 : i32
    %c0_i32_0 = arith.constant 0 : i32
    %c0_i32_1 = arith.constant 0 : i32
    return %c0_i32, %c0_i32_0 : i32, i32
  }
  func.func @transform_2(%arg0: i32) -> (i32, i32) {
    %c0_i32 = arith.constant 0 : i32
    %c0_i32_0 = arith.constant 0 : i32
    %c0_i32_1 = arith.constant 0 : i32
    return %c0_i32, %c0_i32_0 : i32, i32
  }
  func.func @transform_3(%arg0: i32) -> (i32, i32) {
    %c0_i32 = arith.constant 0 : i32
    %c0_i32_0 = arith.constant 0 : i32
    return %arg0, %c0_i32 : i32, i32
  }
}

</mosaic_0001>

<bundles_post_ra>
// kernel: supervised_net_forward.6
= control target key start
LH: loop header
LB: loop body
LE: loop exit
PB: predicated region body
PF: predicated region fallthrough
CT: control target
= control target key end

     0   :  { %s2165_s15 = smov 0   ;;  %s2698_s0 = inlined_call_operand.vmem [shape: bf16[2,128,64], index: 0, kind: input, shape index: {}]   ;;  %s2699_s1 = inlined_call_operand.vmem [shape: bf16[576,128], index: 1, kind: input, shape index: {}]   ;;  %s2700_s2 = inlined_call_operand.vmem [shape: f32[1,128], index: 2, kind: input, shape index: {}]   ;;  %s2701_s3 = inlined_call_operand.vmem [shape: f32[1,128], index: 3, kind: input, shape index: {}]   ;;  %s2702_s4 = inlined_call_operand.vmem [shape: bf16[2,99,128], index: 4, kind: output, shape index: {}]  }
   0x1 LB: > { %s1710_s16 = sadd.s32 4294967295, %s2138_s15   ;;  %p1714_p0 = scmp.ge.s32.totalorder %s2138_s15, 1  ;;  %s2138_s15 = sphi %s2165_s15, %s14_s15  }
   0x2   : > { %p162_p1 = scmp.lt.s32.totalorder %s2138_s15, 3 }
   0x4   : > { %p163_p2 = pnand %p1714_p0, %p162_p1 }
   0x5   : > { %p188_p3 = scmp.lt.s32.totalorder (!%p163_p2), %s1710_s16, 1 }
   0x6   : > { %166 = sbr.rel (%p163_p2) target bundleno = 414 (0x19e), region = 36 }
   0xb   : > { %v1980_v0 = vld [vmem:[%s2699_s1 + $0x38] sm:$0xff]  ;;  %v1979_v1 = vld [vmem:[%s2699_s1 + $0x30] sm:$0xff]  ;;  %s2704_s16 = smov (!%p188_p3, %s1710_s16), 1  ;;  %v1978_v2 = vld [vmem:[%s2699_s1 + $0x28] sm:$0xff]  ;;  %vm261_vm0 = vsmask.f32 7424 }
   0xc   : > { %367 = vmatpush.bf16.msra.mxu0 %v1980_v0  ;;  %2109 = vmatpush.bf16.msra.mxu1 %v1980_v0  ;;  %s1967_s21 = sshll.u32 %s2704_s16, 6  ;;  %v1977_v20 = vld [vmem:[%s2699_s1 + $0x20] sm:$0xff]  ;;  %v1976_v28 = vld [vmem:[%s2699_s1 + $0x18] sm:$0xff]  ;;  %vm341_vm1 = vcmask 523264   ;;  %v1992_v43 = vld [vmem:[%s2699_s1 + $0x70] sm:$0xff]  ;;  %vm503_vm2 = vcmask 1046528  }
   0xd   : > { %2111 = vmatpush.bf16.msra.mxu3 %v1980_v0  ;;  %2110 = vmatpush.bf16.msra.mxu2 %v1980_v0  ;;  %s2188_s26 = scalar_lea.vmem %s2698_s0, %s1967_s21  ;;  %v1993_v32 = vld [vmem:[%s2699_s1 + $0x78] sm:$0xff]  ;;  %v1975_v44 = vld [vmem:[%s2699_s1 + $0x10] sm:$0xff]  ;;  %v1991_v47 = vld [vmem:[%s2699_s1 + $0x68] sm:$0xff]  ;;  %vm852_vm3 = vcmask 1045504   ;;  %vm672_vm4 = vsmask.f32 6400 }
   0xe   : > { %v2191_v3 = vld [vmem:[%s2188_s26] sm:$0xff]   ;;  %v2194_v4 = vld [vmem:[%s2188_s26 + $0x8] sm:$0xff]  ;;  %v2197_v5 = vld [vmem:[%s2188_s26 + $0x10] sm:$0xff]  ;;  %vm1171_vm5 = vcmask 1044480   ;;  %vm975_vm6 = vsmask.f32 5376 }
   0xf   : > { %v263_v6 = vshrl.u32 %v2191_v3, 16  ;;  %v265_v7 = vshll.u32 %v2191_v3, 16  ;;  %v2202_v8 = vld [vmem:[%s2188_s26 + $0x18] sm:$0xff]  ;;  %v2205_v9 = vld [vmem:[%s2188_s26 + $0x28] sm:$0xff]  ;;  %v211_v10 = vld [vmem:[%s2188_s26 + $0x30] sm:$0x3] }
  0x10   : > { %368 = vmatpush.bf16.msra.mxu0 %v1979_v1  ;;  %2112 = vmatpush.bf16.msra.mxu1 %v1979_v1  ;;  %v270_v11 = vshll.u32 %v2194_v4, 16  ;;  %v278_v12 = vshll.u32 %v2197_v5, 16  ;;  %v282_v13 = vshrl.u32 %v2197_v5, 16  ;;  %v253_v14 = vunpack.c.l.b16 %v211_v10  ;;  %v2212_v15 = vld [vmem:[%s2188_s26 + $0x20] sm:$0xff]  ;;  %v1984_v39 = vld [vmem:[%s2699_s1 + $0x58] sm:$0xff]  ;;  %v1983_v45 = vld [vmem:[%s2699_s1 + $0x50] sm:$0xff] }
  0x11   : > { %2114 = vmatpush.bf16.msra.mxu3 %v1979_v1  ;;  %2113 = vmatpush.bf16.msra.mxu2 %v1979_v1  ;;  %v267_v16 = vrot.slane %v265_v7, 1  ;;  %v286_v17 = vshll.u32 %v2202_v8, 16  ;;  %v302_v18 = vshll.u32 %v2205_v9, 16  ;;  %v306_v19 = vshrl.u32 %v2205_v9, 16  ;;  %v1997_v40 = vld [vmem:[%s2699_s1 + $0x98] sm:$0xff]  ;;  %v1996_v46 = vld [vmem:[%s2699_s1 + $0x90] sm:$0xff] }
  0x12   : > { %v2220_v21 = vrot.slane %v270_v11, 1  ;;  %v2222_v22 = vrot.slane %v278_v12, 1  ;;  %v2224_v23 = vpack.c.b16 %v253_v14, %v253_v14  ;;  %v294_v24 = vshll.u32 %v2212_v15, 16  ;;  %v1974_v48 = vld [vmem:[%s2699_s1 + $0x8] sm:$0xff]  ;;  %v2068_v49 = vld [vmem:[%s2188_s26] sm:$0xf0] }
  0x13   : > { %v268_v25 = vor.u32 %v267_v16, %v263_v6  ;;  %v288_v26 = vrot.slane %v286_v17, 1  ;;  %v304_v27 = vrot.slane %v302_v18, 1  ;;  %v298_v29 = vshrl.u32 %v2212_v15, 16  ;;  %v2069_v50 = vld [vmem:[%s2188_s26] sm:$0xe]  ;;  %v1982_v51 = vld [vmem:[%s2699_s1 + $0x48] sm:$0xff] }
  0x14   : > { %369 = vmatpush.bf16.msra.mxu0 %v1978_v2  ;;  %2115 = vmatpush.bf16.msra.mxu1 %v1978_v2  ;;  %v284_v30 = vor.u32 %v282_v13, %v2222_v22  ;;  %v310_v31 = vshll.u32 %v2224_v23, 16  ;;  %v2236_v33 = vrot.slane %v294_v24, 1  ;;  %v274_v52 = vshrl.u32 %v2194_v4, 16  ;;  %v1990_v54 = vld [vmem:[%s2699_s1 + $0x60] sm:$0xff]  ;;  %v1995_v55 = vld [vmem:[%s2699_s1 + $0x88] sm:$0xff]  ;;  %v2009_v60 = vld [vmem:[%s2699_s1 + $0xf8] sm:$0xff] }
  0x15   : > { %2117 = vmatpush.bf16.msra.mxu3 %v1978_v2  ;;  %2116 = vmatpush.bf16.msra.mxu2 %v1978_v2  ;;  %v308_v34 = vor.u32 %v306_v19, %v304_v27  ;;  %v273_v35 = vsel %vm261_vm0, %v268_v25, %v2220_v21  ;;  %v290_v53 = vshrl.u32 %v2202_v8, 16  ;;  %v2070_v56 = vor.u32 %v2069_v50, %v2068_v49  ;;  %v1973_v57 = vld [vmem:[%s2699_s1] sm:$0xff]  ;;  %v2290_v59 = vld [vmem:[%s2188_s26 + $0x8] sm:$0xff]   ;;  %v2001_v61 = vld [vmem:[%s2699_s1 + $0xb8] sm:$0xff]  ;;  %s2121_s27 = smul.u32 52, %s2704_s16 }
  0x16   : > { %v289_v36 = vsel %vm261_vm0, %v284_v30, %v288_v26  ;;  %v312_v37 = vrot.slane %v310_v31, 1  ;;  %v300_v38 = vor.u32 %v298_v29, %v2236_v33  ;;  %v618_v58 = vld [vmem:[%s2188_s26 + $0x4] sm:$0xe]  ;;  %v276_v62 = vor.u32 %v274_v52, %v2220_v21  ;;  %v2005_v6 = vld [vmem:[%s2699_s1 + $0xd8] sm:$0xff]  ;;  %v2319_v18 = vld [vmem:[%s2188_s26 + $0xc] sm:$0xff] }
  0x17   : > { %v292_v63 = vor.u32 %v290_v53, %v288_v26  ;;  %v314_v0 = vshrl.u32 %v2224_v23, 16  ;;  %v1981_v1 = vld [vmem:[%s2699_s1 + $0x40] sm:$0xff]  ;;  %v652_v7 = vunpack.c.l.b16 %v618_v58  ;;  %v653_v10 = vunpack.c.l.b16 %v2290_v59  ;;  %v2013_v13 = vld [vmem:[%s2699_s1 + $0x118] sm:$0xff]  ;;  %v2008_v29 = vld [vmem:[%s2699_s1 + $0xf0] sm:$0xff]  ;;  %s2653_s30 = scalar_lea.vmem %s2702_s4, %s2121_s27 }
  0x18   : > { %370 = vmatpush.bf16.msra.mxu0 %v1977_v20  ;;  %2118 = vmatpush.bf16.msra.mxu1 %v1977_v20  ;;  %v313_v41 = vsel %vm261_vm0, %v308_v34, %v312_v37  ;;  %v305_v42 = vsel %vm261_vm0, %v300_v38, %v304_v27  ;;  %v1994_v2 = vld [vmem:[%s2699_s1 + $0x80] sm:$0xff]  ;;  %v504_v11 = vrot.slane %v2070_v56, 1  ;;  %v505_v12 = vrot.slane %v2194_v4, 1  ;;  %v2000_v30 = vld [vmem:[%s2699_s1 + $0xb0] sm:$0xff]  ;;  %v2003_v58 = vld [vmem:[%s2699_s1 + $0xc8] sm:$0xff] }
  0x19   : > { %2120 = vmatpush.bf16.msra.mxu3 %v1977_v20  ;;  %2119 = vmatpush.bf16.msra.mxu2 %v1977_v20  ;;  %v281_v14 = vsel %vm261_vm0, %v276_v62, %v2222_v22  ;;  %v297_v16 = vsel %vm261_vm0, %v292_v63, %v2236_v33  ;;  %v316_v17 = vor.u32 %v314_v0, %v312_v37  ;;  %v836_v20 = vld [vmem:[%s2188_s26 + $0x4] sm:$0xc]  ;;  %v682_v22 = vshrl.u32 %v2319_v18, 16 }
  0x1a   : > { %v665_v19 = vpack.c.b16 %v653_v10, %v652_v7  ;;  %v506_v21 = vsel %vm503_vm2, %v504_v11, %v505_v12  ;;  %v848_v24 = vunpack.c.l.b16 %v836_v20  ;;  %v685_v27 = vshll.u32 %v2319_v18, 16  ;;  %v2400_v7 = vld [vmem:[%s2188_s26 + $0x24] sm:$0xff] }
  0x1b   : > { %1754 = vmatmul.msk.bf16.vlgmr.msra.gmra.mxu0 %vm341_vm1, %v273_v35  ;;  %1756 = vmatmul.msk.bf16.vlgmr.msra.gmra.mxu1 %vm341_vm1, %v289_v36  ;;  %v684_v34 = vrot.slane %v682_v22, 1  ;;  %v854_v37 = vrot.slane %v2319_v18, 2  ;;  %v2011_v11 = vld [vmem:[%s2699_s1 + $0x108] sm:$0xff]  ;;  %vm1294_vm7 = vsmask.f32 4352  ;;  %vm1649_vm8 = vcmask 1041408  }
  0x1c   : > { %448 = vmatpush.bf16.msrb.mxu1 %v1976_v28  ;;  %1759 = vmatmul.msk.bf16.vlgmr.msra.gmra.mxu3 %vm341_vm1, %v313_v41  ;;  %v674_v25 = vshrl.u32 %v665_v19, 16  ;;  %v677_v26 = vshll.u32 %v665_v19, 16  ;;  %v2004_v28 = vld [vmem:[%s2699_s1 + $0xd0] sm:$0xff]  ;;  %v2338_v31 = vpack.c.b16 %v653_v10, %v848_v24  ;;  %v687_v35 = vrot.slane %v685_v27, 2 }
  0x1d   : > { %784 = vmatpush.bf16.msrb.mxu3 %v1993_v32  ;;  %566 = vmatpush.bf16.msrb.mxu2 %v1984_v39  ;;  %v513_v19 = vrot.slane %v2205_v9, 1  ;;  %v2422_v24 = vld [vmem:[%s2188_s26 + $0x2c] sm:$0xff]  ;;  %vm1650_vm9 = vsmask.f32 1280 }
  0x1e   : > { %1758 = vmatmul.msk.bf16.vlgmr.msra.gmra.mxu2 %vm341_vm1, %v305_v42  ;;  %915 = vmatpush.bf16.msrb.mxu0 %v1997_v40  ;;  %v676_v32 = vrot.slane %v674_v25, 1  ;;  %v679_v33 = vrot.slane %v677_v26, 2  ;;  %v853_v36 = vrot.slane %v2338_v31, 2  ;;  %v688_v39 = vor.u32 %v687_v35, %v684_v34  ;;  %v488_v26 = vld [vmem:[%s2188_s26 + $0x30] sm:$0x7]  ;;  %vm1651_vm10 = vmand %vm1649_vm8, %vm1650_vm9 }
  0x1f   : > { %v507_v40 = vrot.slane %v2197_v5, 1  ;;  %v500_v34 = vunpack.c.l.b16 %v488_v26 }
  0x20   : > { %449 = vmatpush.bf16.msrb.mxu1 %v1975_v44  ;;  %v680_v38 = vor.u32 %v679_v33, %v676_v32  ;;  %v855_v41 = vsel %vm852_vm3, %v853_v36, %v854_v37  ;;  %v1998_v32 = vld [vmem:[%s2699_s1 + $0xa0] sm:$0xff] }
  0x21   : > { %785 = vmatpush.bf16.msrb.mxu3 %v1992_v43  ;;  %567 = vmatpush.bf16.msrb.mxu2 %v1983_v45  ;;  %v2350_v43 = vld [vmem:[%s2188_s26 + $0x14] sm:$0xff]  ;;  %v508_v44 = vsel %vm503_vm2, %v505_v12, %v507_v40  ;;  %v709_v12 = vshrl.u32 %v2400_v7, 16  ;;  %v2010_v33 = vld [vmem:[%s2699_s1 + $0x100] sm:$0xff] }
  0x22   : > { %916 = vmatpush.bf16.msrb.mxu0 %v1996_v46  ;;  %v689_v42 = vsel %vm672_vm4, %v680_v38, %v688_v39  ;;  %v2012_v45 = vld [vmem:[%s2699_s1 + $0x110] sm:$0xff]  ;;  %v691_v46 = vshrl.u32 %v2350_v43, 16  ;;  %v856_v49 = vrot.slane %v2350_v43, 2 }
  0x23   : > { %v630_v38 = vld [vmem:[%s2188_s26 + $0x34] sm:$0x7] }
  0x24   : > { %450 = vmatpush.bf16.msrb.mxu1 %v1974_v48  ;;  %v693_v48 = vrot.slane %v691_v46, 1  ;;  %v857_v52 = vsel %vm852_vm3, %v854_v37, %v856_v49  ;;  %v502_v37 = vpack.c.b16 %v500_v34, %v500_v34 }
  0x25   : > { %786 = vmatpush.bf16.msrb.mxu3 %v1991_v47  ;;  %568 = vmatpush.bf16.msrb.mxu2 %v1982_v51  ;;  %v694_v47 = vshll.u32 %v2350_v43, 16  ;;  %v509_v51 = vrot.slane %v2202_v8, 1 }
  0x26   : > { %917 = vmatpush.bf16.msrb.mxu0 %v1995_v55 }
  0x27   : > { %v510_v55 = vsel %vm503_vm2, %v507_v40, %v509_v51 }
  0x28   : > { %451 = vmatpush.bf16.msrb.mxu1 %v1973_v57 }
  0x29   : > { %787 = vmatpush.bf16.msrb.mxu3 %v1990_v54  ;;  %569 = vmatpush.bf16.msrb.mxu2 %v1981_v1  ;;  %v2372_v54 = vld [vmem:[%s2188_s26 + $0x1c] sm:$0xff]  ;;  %v511_v1 = vrot.slane %v2212_v15, 1 }
  0x2a   : > { %918 = vmatpush.bf16.msrb.mxu0 %v1994_v2  ;;  %v700_v56 = vshrl.u32 %v2372_v54, 16  ;;  %v703_v57 = vshll.u32 %v2372_v54, 16  ;;  %v858_v63 = vrot.slane %v2372_v54, 2 }
  0x2b   : > { %1755 = vmatmul.msk.bf16.gmra.mxu0 %vm341_vm1, %v281_v14  ;;  %1757 = vmatmul.msk.bf16.gmra.mxu1 %vm341_vm1, %v297_v16  ;;  %v512_v10 = vsel %vm503_vm2, %v509_v51, %v511_v1  ;;  %v711_v14 = vrot.slane %v709_v12, 1  ;;  %v860_v16 = vrot.slane %v2400_v7, 2  ;;  %v514_v25 = vsel %vm503_vm2, %v511_v1, %v513_v19 }
  0x2c   : > { %1062 = vmatpush.bf16.msra.mxu1 %v2001_v61  ;;  %1760 = vmatmul.msk.bf16.gmra.mxu3 %vm341_vm1, %v316_v17  ;;  %v702_v61 = vrot.slane %v700_v56, 1  ;;  %v705_v62 = vrot.slane %v703_v57, 2  ;;  %v859_v2 = vsel %vm852_vm3, %v856_v49, %v858_v63 }
  0x2d   : > { %1406 = vmatpush.bf16.msra.mxu3 %v2009_v60  ;;  %1234 = vmatpush.bf16.msra.mxu2 %v2005_v6  ;;  %v2007_v60 = vld [vmem:[%s2699_s1 + $0xe8] sm:$0xff]  ;;  %v861_v20 = vsel %vm852_vm3, %v858_v63, %v860_v16 }
  0x2e   : > { %1525 = vmatpush.bf16.msra.mxu0 %v2013_v13  ;;  %1800 = vmatmul.msk.bf16.vlgmr.msrb.gmra.mxu2 %vm341_vm1, %v506_v21  ;;  %v706_v0 = vor.u32 %v705_v62, %v702_v61  ;;  %v712_v13 = vshll.u32 %v2400_v7, 16  ;;  %v1114_v62 = vld [vmem:[%s2188_s26 + $0x8] sm:$0x8] }
  0x2f   : > { %v1150_v63 = vunpack.c.l.b16 %v1114_v62 }
  0x30   : > { %1063 = vmatpush.bf16.msra.mxu1 %v2000_v30  ;;  %v718_v30 = vshrl.u32 %v2422_v24, 16 }
  0x31   : > { %1235 = vmatpush.bf16.msra.mxu2 %v2004_v28  ;;  %1407 = vmatpush.bf16.msra.mxu3 %v2008_v29  ;;  %v2002_v28 = vld [vmem:[%s2699_s1 + $0xc0] sm:$0xff] }
  0x32   : > { %1526 = vmatpush.bf16.msra.mxu0 %v2012_v45  ;;  %v2006_v29 = vld [vmem:[%s2699_s1 + $0xe0] sm:$0xff]  ;;  %v720_v35 = vrot.slane %v718_v30, 1 }
  0x35   : > { %1236 = vmatpush.bf16.msra.mxu2 %v2003_v58  ;;  %1408 = vmatpush.bf16.msra.mxu3 %v2007_v60 }
  0x36   : > { %1527 = vmatpush.bf16.msra.mxu0 %v2011_v11 }
  0x39   : > { %1237 = vmatpush.bf16.msra.mxu2 %v2002_v28  ;;  %1409 = vmatpush.bf16.msra.mxu3 %v2006_v29  ;;  %v984_v29 = vrot.slane %v682_v22, 2 }
  0x3a   : > { %1528 = vmatpush.bf16.msra.mxu0 %v2010_v33 }
  0x3b   : > { %1777 = vmatmul.msk.bf16.vlgmr.msrb.gmra.mxu1 %vm341_vm1, %v2191_v3  ;;  %1866 = vmatmul.msk.bf16.vlgmr.msrb.gmra.mxu0 %vm341_vm1, %v855_v41  ;;  %v696_v3 = vrot.slane %v694_v47, 2  ;;  %v664_v41 = vunpack.c.l.b16 %v630_v38  ;;  %v2072_v38 = vld [vmem:[%s2188_s26 + $0x18] sm:$0xff]  }
  0x3c   : > { %1843 = vmatmul.msk.bf16.vlgmr.msrb.gmra.mxu3 %vm341_vm1, %v689_v42  ;;  %v515_v42 = vrot.slane %v502_v37, 1 }
  0x3d   : > { %v697_v50 = vor.u32 %v696_v3, %v693_v48  ;;  %v671_v48 = vpack.c.b16 %v664_v41, %v664_v41  ;;  %v2454_v3 = vld [vmem:[%s2188_s26 + $0x34] sm:$0xff]  }
  0x3e   : > { %1801 = vmatmul.msk.bf16.gmra.mxu2 %vm341_vm1, %v508_v44  ;;  %v516_v49 = vsel %vm503_vm2, %v513_v19, %v515_v42 }
  0x3f   : > { %v698_v53 = vsel %vm672_vm4, %v688_v39, %v697_v50  ;;  %v707_v6 = vsel %vm672_vm4, %v697_v50, %v706_v0  ;;  %v862_v39 = vrot.slane %v2422_v24, 2  ;;  %v849_v50 = vunpack.c.l.b16 %v2454_v3 }
  0x40   : > { %v727_v51 = vshrl.u32 %v671_v48, 16 }
  0x41   : > { %v863_v44 = vsel %vm852_vm3, %v860_v16, %v862_v39 }
  0x4b   : > { %1778 = vmatmul.msk.bf16.gmra.mxu1 %vm341_vm1, %v2194_v4  ;;  %1867 = vmatmul.msk.bf16.gmra.mxu0 %vm341_vm1, %v857_v52  ;;  %v1999_v4 = vld [vmem:[%s2699_s1 + $0xa8] sm:$0xff]  ;;  %v730_v52 = vshll.u32 %v671_v48, 16 }
  0x4c   : > { %1844 = vmatmul.msk.bf16.gmra.mxu3 %vm341_vm1, %v698_v53  ;;  %1064 = vmatpush.bf16.msra.mxu1 %v1999_v4  ;;  %v2463_v53 = vpack.c.b16 %v849_v50, %v849_v50 }
  0x4d   : > { %v732_v58 = vrot.slane %v730_v52, 2  ;;  %v1313_v52 = vshrl.u32 %v2072_v38, 16 }
  0x4e   : > { %1802 = vmatmul.msk.bf16.gmra.mxu2 %vm341_vm1, %v510_v55  ;;  %v729_v55 = vrot.slane %v727_v51, 1  ;;  %v864_v60 = vrot.slane %v2463_v53, 2 }
  0x50   : > { %1065 = vmatpush.bf16.msra.mxu1 %v1998_v32  ;;  %v733_v4 = vor.u32 %v732_v58, %v729_v55  ;;  %v1316_v55 = vshll.u32 %v2072_v38, 16 }
  0x5b   : > { %1779 = vmatmul.msk.bf16.gmra.mxu1 %vm341_vm1, %v2197_v5  ;;  %1868 = vmatmul.msk.bf16.gmra.mxu0 %vm341_vm1, %v859_v2  ;;  %v714_v5 = vrot.slane %v712_v13, 2  ;;  %v2071_v2 = vld [vmem:[%s2188_s26 + $0x10] sm:$0xff]  }
  0x5c   : > { %1845 = vmatmul.msk.bf16.gmra.mxu3 %vm341_vm1, %v707_v6  ;;  %v1304_v19 = vshrl.u32 %v2071_v2, 16  ;;  %v2020_v37 = vunpack.c.l.b16 %v2071_v2 }
  0x5d   : > { %v715_v17 = vor.u32 %v714_v5, %v711_v14  ;;  %v980_v5 = vshll.u32 %v2338_v31, 16 }
  0x5e   : > { %1803 = vmatmul.msk.bf16.gmra.mxu2 %vm341_vm1, %v512_v10  ;;  %v1173_v10 = vrot.slane %v2071_v2, 3 }
  0x5f   : > { %v716_v21 = vsel %vm672_vm4, %v706_v0, %v715_v17  ;;  %v1151_v0 = vunpack.c.h.b16 %v2290_v59  ;;  %v977_v59 = vshrl.u32 %v2338_v31, 16  ;;  %v982_v28 = vrot.slane %v980_v5, 3 }
  0x60   : > { %v985_v31 = vrot.slane %v685_v27, 3 }
  0x61   : > { %v1164_v1 = vpack.c.b16 %v1151_v0, %v1150_v63  ;;  %v979_v26 = vrot.slane %v977_v59, 2  ;;  %v1469_v22 = vpack.c.b16 %v2020_v37, %v1151_v0  ;;  %v1315_v63 = vrot.slane %v1313_v52, 3  ;;  %v2103_v59 = vld [vmem:[%s2188_s26 + $0x14] sm:$0xff]  }
  0x62   : > { %v1318_v0 = vrot.slane %v1316_v55, 4 }
  0x63   : > { %v1172_v6 = vrot.slane %v1164_v1, 3  ;;  %v1296_v16 = vshrl.u32 %v1164_v1, 16 }
  0x65   : > { %v1298_v33 = vrot.slane %v1296_v16, 3 }
  0x6b   : > { %1780 = vmatmul.msk.bf16.gmra.mxu1 %vm341_vm1, %v2202_v8  ;;  %1869 = vmatmul.msk.bf16.gmra.mxu0 %vm341_vm1, %v861_v20  ;;  %v721_v8 = vshll.u32 %v2422_v24, 16  ;;  %v1307_v20 = vshll.u32 %v2071_v2, 16 }
  0x6c   : > { %1846 = vmatmul.msk.bf16.gmra.mxu3 %vm341_vm1, %v716_v21 }
  0x6d   : > { %v723_v36 = vrot.slane %v721_v8, 2 }
  0x6e   : > { %1804 = vmatmul.msk.bf16.gmra.mxu2 %vm341_vm1, %v514_v25 }
  0x6f   : > { %v724_v40 = vor.u32 %v723_v36, %v720_v35  ;;  %v1306_v35 = vrot.slane %v1304_v19, 3  ;;  %v1309_v36 = vrot.slane %v1307_v20, 4 }
  0x71   : > { %v725_v45 = vsel %vm672_vm4, %v715_v17, %v724_v40  ;;  %v734_v61 = vsel %vm672_vm4, %v724_v40, %v733_v4  ;;  %v1299_v17 = vshll.u32 %v1164_v1, 16  ;;  %v986_v40 = vor.u32 %v985_v31, %v984_v29  ;;  %v2073_v1 = vld [vmem:[%s2188_s26 + $0x20] sm:$0xff]  }
  0x73   : > { %v1301_v34 = vrot.slane %v1299_v17, 4 }
  0x75   : > { %v1302_v41 = vor.u32 %v1301_v34, %v1298_v33  ;;  %v992_v34 = vrot.slane %v700_v56, 2 }
  0x7b   : > { %1781 = vmatmul.msk.bf16.gmra.mxu1 %vm341_vm1, %v2212_v15  ;;  %1870 = vmatmul.msk.bf16.gmra.mxu0 %vm341_vm1, %v863_v44  ;;  %v865_v15 = vsel %vm852_vm3, %v862_v39, %v864_v60  ;;  %v983_v39 = vor.u32 %v982_v28, %v979_v26  ;;  %v1175_v44 = vrot.slane %v2072_v38, 3  ;;  %v1322_v26 = vshrl.u32 %v2073_v1, 16 }
  0x7c   : > { %1847 = vmatmul.msk.bf16.gmra.mxu3 %vm341_vm1, %v725_v45  ;;  %v1325_v28 = vshll.u32 %v2073_v1, 16 }
  0x7d   : > { %v987_v48 = vsel %vm975_vm6, %v983_v39, %v986_v40  ;;  %v1176_v51 = vsel %vm1171_vm5, %v1173_v10, %v1175_v44  ;;  %v1324_v38 = vrot.slane %v1322_v26, 3 }
  0x7e   : > { %1805 = vmatmul.msk.bf16.gmra.mxu2 %vm341_vm1, %v516_v49  ;;  %v1327_v39 = vrot.slane %v1325_v28, 4 }
  0x8b   : > { %1782 = vmatmul.msk.bf16.gmra.mxu1 %vm341_vm1, %v2205_v9  ;;  %1871 = vmatmul.msk.bf16.gmra.mxu0 %vm341_vm1, %v865_v15  ;;  %v1174_v9 = vsel %vm1171_vm5, %v1172_v6, %v1173_v10  ;;  %v988_v15 = vrot.slane %v691_v46, 2  ;;  %v1319_v6 = vor.u32 %v1318_v0, %v1315_v63  ;;  %v1177_v10 = vrot.slane %v2073_v1, 3 }
  0x8c   : > { %1848 = vmatmul.msk.bf16.gmra.mxu3 %vm341_vm1, %v734_v61  ;;  %v989_v61 = vrot.slane %v694_v47, 3 }
  0x8d   : > { %v1178_v43 = vsel %vm1171_vm5, %v1175_v44, %v1177_v10 }
  0x8e   : > { %1806 = vmatmul.msk.bf16.gmra.mxu2 %vm341_vm1, %v515_v42  ;;  %v1310_v42 = vor.u32 %v1309_v36, %v1306_v35  ;;  %v990_v2 = vor.u32 %v989_v61, %v988_v15  ;;  %v993_v35 = vrot.slane %v703_v57, 3 }
  0x90   : > { %v1311_v49 = vsel %vm1294_vm7, %v1302_v41, %v1310_v42  ;;  %v991_v17 = vsel %vm975_vm6, %v986_v40, %v990_v2  ;;  %v1320_v46 = vsel %vm1294_vm7, %v1310_v42, %v1319_v6  ;;  %v2074_v42 = vld [vmem:[%s2188_s26 + $0x28] sm:$0xff]   ;;  %v994_v44 = vor.u32 %v993_v35, %v992_v34 }
  0x91   : > { %v1331_v0 = vshrl.u32 %v2074_v42, 16  ;;  %v1334_v1 = vshll.u32 %v2074_v42, 16 }
  0x92   : > { %v995_v54 = vsel %vm975_vm6, %v990_v2, %v994_v44 }
  0x98   : > { %v2476_v11 = vpop.f32.mrf.mxu0  ;;  %v2478_v14 = vpop.f32.mrf.mxu1 }
  0x9b   : > { %1783 = vmatmul.msk.bf16.gmra.mxu1 %vm341_vm1, %v2224_v23  ;;  %1872 = vmatmul.msk.bf16.gmra.mxu0 %vm341_vm1, %v864_v60 }
  0x9c   : > { %1849 = vmatmul.msk.bf16.gmra.mxu3 %vm341_vm1, %v733_v4 }
  0x9e   : > { %1912 = vmatmul.msk.bf16.vlgmr.msra.gmra.mxu2 %vm341_vm1, %v1174_v9 }
  0x9f   : > { %v2488_v21 = vpop.f32.mrf.mxu3 }
  0xa0   : > { %v2490_v25 = vpop.f32.mrf.mxu0  ;;  %v2492_v23 = vpop.f32.mrf.mxu1 }
  0xa1   : > { %v2498_v32 = vpop.f32.mrf.mxu2 }
  0xa7   : > { %v2501_v45 = vpop.f32.mrf.mxu3 }
  0xa8   : > { %v2503_v18 = vpop.f32.mrf.mxu0  ;;  %v2505_v27 = vpop.f32.mrf.mxu1 }
  0xa9   : > { %v2509_v50 = vpop.f32.mrf.mxu2 }
  0xab   : > { %1889 = vmatmul.msk.bf16.vlgmr.msra.gmra.mxu1 %vm341_vm1, %v987_v48  ;;  %1958 = vmatmul.msk.bf16.vlgmr.msra.gmra.mxu0 %vm341_vm1, %v1469_v22  ;;  %v1328_v22 = vor.u32 %v1327_v39, %v1324_v38  ;;  %v1179_v48 = vrot.slane %v2074_v42, 3  ;;  %v1127_v38 = vld [vmem:[%s2188_s26 + $0x3c] sm:$0x1] }
  0xac   : > { %1935 = vmatmul.msk.bf16.vlgmr.msra.gmra.mxu3 %vm341_vm1, %v1311_v49  ;;  %v1163_v42 = vunpack.c.l.b16 %v1127_v38 }
  0xad   : > { %v1180_v61 = vsel %vm1171_vm5, %v1177_v10, %v1179_v48  ;;  %v996_v10 = vrot.slane %v709_v12, 2  ;;  %v2107_v12 = vld [vmem:[%s2188_s26 + $0x24] sm:$0xff]  }
  0xae   : > { %1913 = vmatmul.msk.bf16.gmra.mxu2 %vm341_vm1, %v1176_v51  ;;  %v2105_v51 = vld [vmem:[%s2188_s26 + $0x1c] sm:$0xff]  }
  0xaf   : > { %v2516_v58 = vpop.f32.mrf.mxu3 }
  0xb0   : > { %v2518_v60 = vpop.f32.mrf.mxu0  ;;  %v2520_v4 = vpop.f32.mrf.mxu1 }
  0xb1   : > { %v571_v62 = vpop.f32.mrf.mxu2 }
  0xb7   : > { %v404_v9 = vpop.f32.mrf.mxu3 }
  0xb8   : > { %v453_v5 = vpop.f32.mrf.mxu1  ;;  %v920_v16 = vpop.f32.mrf.mxu0 }
  0xb9   : > { %v454_v19 = vadd.f32 %v453_v5, %v2476_v11  ;;  %v573_v20 = vpop.f32.mrf.mxu2 }
  0xbb   : > { %1890 = vmatmul.msk.bf16.gmra.mxu1 %vm341_vm1, %v991_v17  ;;  %1959 = vmatmul.msk.bf16.gmra.mxu0 %vm341_vm1, %v2103_v59  ;;  %v605_v47 = vadd.f32 %v571_v62, %v454_v19  ;;  %v997_v59 = vrot.slane %v712_v13, 3  ;;  %v1333_v17 = vrot.slane %v1331_v0, 3  ;;  %v1336_v19 = vrot.slane %v1334_v1, 4 }
  0xbc   : > { %1936 = vmatmul.msk.bf16.gmra.mxu3 %vm341_vm1, %v1320_v46 }
  0xbd   : > { %v1337_v26 = vor.u32 %v1336_v19, %v1333_v17  ;;  %v1008_v17 = vshll.u32 %v2463_v53, 16 }
  0xbe   : > { %1914 = vmatmul.msk.bf16.gmra.mxu2 %vm341_vm1, %v1178_v43  ;;  %v2563_v43 = vld [vmem:[%s2188_s26 + $0x30] sm:$0xff]  }
  0xbf   : > { %v789_v29 = vpop.f32.mrf.mxu3  ;;  %v1181_v28 = vrot.slane %v2563_v43, 3  ;;  %v1340_v39 = vshrl.u32 %v2563_v43, 16 }
  0xc0   : > { %v823_v31 = vadd.f32 %v789_v29, %v605_v47  ;;  %v455_v11 = vpop.f32.mrf.mxu1  ;;  %v922_v33 = vpop.f32.mrf.mxu0  ;;  %v998_v47 = vor.u32 %v997_v59, %v996_v10 }
  0xc1   : > { %v456_v36 = vadd.f32 %v455_v11, %v2490_v25  ;;  %v576_v37 = vpop.f32.mrf.mxu2  ;;  %v1329_v25 = vsel %vm1294_vm7, %v1319_v6, %v1328_v22  ;;  %v1182_v35 = vsel %vm1171_vm5, %v1179_v48, %v1181_v28 }
  0xc2   : > { %v2541_v40 = vadd.f32 %v920_v16, %v823_v31 }
  0xc3   : > { %v606_v41 = vadd.f32 %v573_v20, %v456_v36 }
  0xc7   : > { %v791_v49 = vpop.f32.mrf.mxu3 }
  0xc8   : > { %v824_v52 = vadd.f32 %v791_v49, %v606_v41  ;;  %v458_v55 = vpop.f32.mrf.mxu1  ;;  %v925_v56 = vpop.f32.mrf.mxu0  ;;  %v1162_v41 = vunpack.c.h.b16 %v2454_v3 }
  0xc9   : > { %v459_v57 = vadd.f32 %v458_v55, %v2503_v18  ;;  %v578_v15 = vpop.f32.mrf.mxu2 }
  0xca   : > { %v2549_v62 = vadd.f32 %v922_v33, %v824_v52  ;;  %v1338_v33 = vsel %vm1294_vm7, %v1328_v22, %v1337_v26  ;;  %v1001_v52 = vrot.slane %v721_v8, 3 }
  0xcb   : > { %1891 = vmatmul.msk.bf16.gmra.mxu1 %vm341_vm1, %v995_v54  ;;  %1960 = vmatmul.msk.bf16.gmra.mxu0 %vm341_vm1, %v2105_v51  ;;  %v607_v63 = vadd.f32 %v576_v37, %v459_v57  ;;  %v1000_v51 = vrot.slane %v718_v30, 2  ;;  %v1342_v54 = vrot.slane %v1340_v39, 3 }
  0xcc   : > { %1937 = vmatmul.msk.bf16.gmra.mxu3 %vm341_vm1, %v1329_v25  ;;  %v1170_v25 = vpack.c.b16 %v1163_v42, %v1162_v41 }
  0xce   : > { %1915 = vmatmul.msk.bf16.gmra.mxu2 %vm341_vm1, %v1180_v61  ;;  %v1002_v61 = vor.u32 %v1001_v52, %v1000_v51  ;;  %v1183_v0 = vrot.slane %v1170_v25, 3  ;;  %v1352_v19 = vshll.u32 %v1170_v25, 16 }
  0xcf   : > { %v794_v18 = vpop.f32.mrf.mxu3 }
  0xd0   : > { %v825_v2 = vadd.f32 %v794_v18, %v607_v63  ;;  %v460_v6 = vpop.f32.mrf.mxu1  ;;  %v927_v9 = vpop.f32.mrf.mxu0  ;;  %v2108_v18 = vld [vmem:[%s2188_s26 + $0x2c] sm:$0xff]   ;;  %v1003_v24 = vsel %vm975_vm6, %v998_v47, %v1002_v61  ;;  %v1184_v10 = vsel %vm1171_vm5, %v1181_v28, %v1183_v0 }
  0xd1   : > { %v461_v5 = vadd.f32 %v460_v6, %v2518_v60  ;;  %v581_v16 = vpop.f32.mrf.mxu2  ;;  %v999_v60 = vsel %vm975_vm6, %v994_v44, %v998_v47 }
  0xd2   : > { %v2560_v46 = vadd.f32 %v925_v56, %v825_v2 }
  0xd3   : > { %v608_v20 = vadd.f32 %v578_v15, %v461_v5 }
  0xd7   : > { %v796_v29 = vpop.f32.mrf.mxu3 }
  0xd8   : > { %v826_v31 = vadd.f32 %v796_v29, %v608_v20  ;;  %v463_v7 = vpop.f32.mrf.mxu1  ;;  %v930_v13 = vpop.f32.mrf.mxu0 }
  0xd9   : > { %v464_v11 = vadd.f32 %v463_v7, %v2478_v14  ;;  %v583_v34 = vpop.f32.mrf.mxu2  ;;  %v1343_v14 = vshll.u32 %v2563_v43, 16 }
  0xda   : > { %v2571_v36 = vadd.f32 %v927_v9, %v826_v31 }
  0xdb   : > { %1892 = vmatmul.msk.bf16.gmra.mxu1 %vm341_vm1, %v999_v60  ;;  %1961 = vmatmul.msk.bf16.gmra.mxu0 %vm341_vm1, %v2107_v12  ;;  %v609_v37 = vadd.f32 %v581_v16, %v464_v11  ;;  %v1345_v57 = vrot.slane %v1343_v14, 4  ;;  %v1005_v16 = vshrl.u32 %v2463_v53, 16  ;;  %v1010_v12 = vrot.slane %v1008_v17, 3 }
  0xdc   : > { %1938 = vmatmul.msk.bf16.gmra.mxu3 %vm341_vm1, %v1338_v33  ;;  %v1354_v60 = vrot.slane %v1352_v19, 4  ;;  %v2037_v53 = vunpack.c.h.b16 %v2563_v43 }
  0xdd   : > { %v1346_v63 = vor.u32 %v1345_v57, %v1342_v54  ;;  %v1007_v29 = vrot.slane %v1005_v16, 2 }
  0xde   : > { %1916 = vmatmul.msk.bf16.gmra.mxu2 %vm341_vm1, %v1182_v35  ;;  %v1474_v38 = vpack.c.b16 %v1162_v41, %v2037_v53 }
  0xdf   : > { %v799_v44 = vpop.f32.mrf.mxu3 }
  0xe0   : > { %v827_v22 = vadd.f32 %v799_v44, %v609_v37  ;;  %v465_v48 = vpop.f32.mrf.mxu1  ;;  %v932_v49 = vpop.f32.mrf.mxu0 }
  0xe1   : > { %v466_v55 = vadd.f32 %v465_v48, %v2492_v23  ;;  %v586_v56 = vpop.f32.mrf.mxu2  ;;  %v1347_v23 = vsel %vm1294_vm7, %v1337_v26, %v1346_v63 }
  0xe2   : > { %v2586_v15 = vadd.f32 %v930_v13, %v827_v22 }
  0xe3   : > { %v610_v3 = vadd.f32 %v583_v34, %v466_v55  ;;  %v1011_v34 = vor.u32 %v1010_v12, %v1007_v29 }
  0xe5   : > { %v1012_v44 = vsel %vm975_vm6, %v1002_v61, %v1011_v34 }
  0xe7   : > { %v801_v1 = vpop.f32.mrf.mxu3 }
  0xe8   : > { %v828_v2 = vadd.f32 %v801_v1, %v610_v3  ;;  %v468_v6 = vpop.f32.mrf.mxu1  ;;  %v935_v30 = vpop.f32.mrf.mxu0 }
  0xe9   : > { %v469_v8 = vadd.f32 %v468_v6, %v2505_v27  ;;  %v588_v9 = vpop.f32.mrf.mxu2  ;;  %v1349_v27 = vshrl.u32 %v1170_v25, 16 }
  0xea   : > { %v2593_v59 = vadd.f32 %v932_v49, %v828_v2 }
  0xeb   : > { %1893 = vmatmul.msk.bf16.gmra.mxu1 %vm341_vm1, %v1003_v24  ;;  %1962 = vmatmul.msk.bf16.gmra.mxu0 %vm341_vm1, %v2108_v18  ;;  %v611_v5 = vadd.f32 %v586_v56, %v469_v8  ;;  %v1351_v13 = vrot.slane %v1349_v27, 3  ;;  %v1458_v56 = vld [vmem:[%s2188_s26 + $0x3c] sm:$0x3] }
  0xec   : > { %1939 = vmatmul.msk.bf16.gmra.mxu3 %vm341_vm1, %v1347_v23  ;;  %v1468_v3 = vunpack.c.l.b16 %v1458_v56 }
  0xed   : > { %v1355_v35 = vor.u32 %v1354_v60, %v1351_v13 }
  0xee   : > { %1917 = vmatmul.msk.bf16.gmra.mxu2 %vm341_vm1, %v1184_v10 }
  0xef   : > { %v804_v20 = vpop.f32.mrf.mxu3  ;;  %v1356_v22 = vsel %vm1294_vm7, %v1346_v63, %v1355_v35  ;;  %v1475_v63 = vpack.c.b16 %v1468_v3, %v1468_v3 }
  0xf0   : > { %v829_v47 = vadd.f32 %v804_v20, %v611_v5  ;;  %v470_v26 = vpop.f32.mrf.mxu1  ;;  %v937_v28 = vpop.f32.mrf.mxu0 }
  0xf1   : > { %v471_v31 = vadd.f32 %v470_v26, %v2520_v4  ;;  %v591_v7 = vpop.f32.mrf.mxu2 }
  0xf2   : > { %v2602_v11 = vadd.f32 %v935_v30, %v829_v47 }
  0xf3   : > { %v612_v33 = vadd.f32 %v588_v9, %v471_v31 }
  0xf7   : > { %v806_v37 = vpop.f32.mrf.mxu3 }
  0xf8   : > { %v830_v39 = vadd.f32 %v806_v37, %v612_v33  ;;  %v473_v14 = vpop.f32.mrf.mxu1  ;;  %v940_v42 = vpop.f32.mrf.mxu0 }
  0xf9   : > { %v474_v4 = vadd.f32 %v473_v14, %v2498_v32  ;;  %v593_v48 = vpop.f32.mrf.mxu2 }
  0xfa   : > { %v2608_v49 = vadd.f32 %v937_v28, %v830_v39 }
  0xfb   : > { %1894 = vmatmul.msk.bf16.gmra.mxu1 %vm341_vm1, %v1012_v44  ;;  %1963 = vmatmul.msk.bf16.gmra.mxu0 %vm341_vm1, %v1474_v38  ;;  %v613_v43 = vadd.f32 %v591_v7, %v474_v4 }
  0xfc   : > { %1940 = vmatmul.msk.bf16.gmra.mxu3 %vm341_vm1, %v1356_v22 }
  0xfe   : > { %1918 = vmatmul.msk.bf16.gmra.mxu2 %vm341_vm1, %v1183_v0 }
  0xff   : > { %v809_v41 = vpop.f32.mrf.mxu3 }
 0x100   : > { %v831_v51 = vadd.f32 %v809_v41, %v613_v43  ;;  %v475_v52 = vpop.f32.mrf.mxu1  ;;  %v942_v55 = vpop.f32.mrf.mxu0 }
 0x101   : > { %v476_v32 = vadd.f32 %v475_v52, %v2509_v50  ;;  %v596_v54 = vpop.f32.mrf.mxu2 }
 0x102   : > { %v2616_v57 = vadd.f32 %v940_v42, %v831_v51 }
 0x103   : > { %v614_v25 = vadd.f32 %v593_v48, %v476_v32  ;;  %v2637_v48 = vld [vmem:[%s2700_s2] ss:$0 sm:$0xff] }
 0x107   : > { %v811_v61 = vpop.f32.mrf.mxu3 }
 0x108   : > { %v832_v1 = vadd.f32 %v811_v61, %v614_v25  ;;  %v478_v18 = vpop.f32.mrf.mxu1  ;;  %v945_v2 = vpop.f32.mrf.mxu0 }
 0x109   : > { %v479_v6 = vadd.f32 %v478_v18, %v2488_v21  ;;  %v598_v0 = vpop.f32.mrf.mxu2 }
 0x10a   : > { %v2619_v30 = vadd.f32 %v942_v55, %v832_v1 }
 0x10b   : > { %1895 = vmatmul.msk.bf16.gmra.mxu1 %vm341_vm1, %v1011_v34  ;;  %1964 = vmatmul.msk.bf16.gmra.mxu0 %vm341_vm1, %v1475_v63  ;;  %v615_v50 = vadd.f32 %v596_v54, %v479_v6 }
 0x10c   : > { %1941 = vmatmul.msk.bf16.gmra.mxu3 %vm341_vm1, %v1355_v35 }
 0x10f   : > { %v814_v24 = vpop.f32.mrf.mxu3 }
 0x110   : > { %v833_v8 = vadd.f32 %v814_v24, %v615_v50  ;;  %v480_v23 = vpop.f32.mrf.mxu1  ;;  %v947_v9 = vpop.f32.mrf.mxu0 }
 0x111   : > { %v481_v10 = vadd.f32 %v480_v23, %v2501_v45  ;;  %v601_v5 = vpop.f32.mrf.mxu2 }
 0x112   : > { %v2625_v16 = vadd.f32 %v945_v2, %v833_v8 }
 0x113   : > { %v616_v21 = vadd.f32 %v598_v0, %v481_v10 }
 0x117   : > { %v816_v17 = vpop.f32.mrf.mxu3 }
 0x118   : > { %v834_v27 = vadd.f32 %v816_v17, %v616_v21  ;;  %v483_v19 = vpop.f32.mrf.mxu1  ;;  %v950_v20 = vpop.f32.mrf.mxu0 }
 0x119   : > { %v484_v47 = vadd.f32 %v483_v19, %v2516_v58  ;;  %v603_v26 = vpop.f32.mrf.mxu2 }
 0x11a   : > { %v2628_v28 = vadd.f32 %v947_v9, %v834_v27 }
 0x11b   : > { %v617_v29 = vadd.f32 %v601_v5, %v484_v47 }
 0x11f   : > { %v819_v12 = vpop.f32.mrf.mxu3 }
 0x120   : > { %v835_v31 = vadd.f32 %v819_v12, %v617_v29  ;;  %v485_v7 = vpop.f32.mrf.mxu1  ;;  %v952_v13 = vpop.f32.mrf.mxu0 }
 0x121   : > { %v1239_v60 = vpop.f32.mrf.mxu2 }
 0x122   : > { %v2630_v45 = vadd.f32 %v950_v20, %v835_v31 }
 0x127   : > { %v821_v33 = vpop.f32.mrf.mxu3 }
 0x128   : > { %v1067_v53 = vpop.f32.mrf.mxu1  ;;  %v1530_v34 = vpop.f32.mrf.mxu0 }
 0x129   : > { %v1241_v35 = vpop.f32.mrf.mxu2  ;;  %v1101_v37 = vadd.f32 %v1067_v53, %v2541_v40  ;;  %v2643_v40 = vld [vmem:[%s2701_s3] ss:$0 sm:$0xff] }
 0x12b   : > { %v1273_v38 = vadd.f32 %v1239_v60, %v1101_v37 }
 0x12f   : > { %v1411_v39 = vpop.f32.mrf.mxu3 }
 0x130   : > { %v1445_v58 = vadd.f32 %v1411_v39, %v1273_v38  ;;  %v1069_v14 = vpop.f32.mrf.mxu1  ;;  %v1532_v42 = vpop.f32.mrf.mxu0 }
 0x131   : > { %v1244_v44 = vpop.f32.mrf.mxu2  ;;  %v1102_v4 = vadd.f32 %v1069_v14, %v2549_v62 }
 0x132   : > { %v1564_v22 = vadd.f32 %v1530_v34, %v1445_v58 }
 0x133   : > { %v1274_v43 = vadd.f32 %v1241_v35, %v1102_v4 }
 0x134   : > { %v1581_v51 = vmul.f32 %v2637_v48, %v1564_v22 }
 0x136   : > { %v1598_v25 = vadd.f32 %v2643_v40, %v1581_v51 }
 0x137   : > { %v1413_v41 = vpop.f32.mrf.mxu3 }
 0x138   : > { %v1446_v52 = vadd.f32 %v1413_v41, %v1274_v43  ;;  %v1072_v55 = vpop.f32.mrf.mxu1  ;;  %v1535_v56 = vpop.f32.mrf.mxu0  ;;  %v1611_v18 = vmax.f32 %v1598_v25, 0.0 }
 0x139   : > { %v1246_v32 = vpop.f32.mrf.mxu2  ;;  %v1103_v54 = vadd.f32 %v1072_v55, %v2560_v46 }
 0x13a   : > { %v1565_v62 = vadd.f32 %v1532_v42, %v1446_v52 }
 0x13b   : > { %v1275_v63 = vadd.f32 %v1244_v44, %v1103_v54 }
 0x13c   : > { %v1582_v3 = vmul.f32 %v2637_v48, %v1565_v62 }
 0x13e   : > { %v1599_v61 = vadd.f32 %v2643_v40, %v1582_v3 }
 0x13f   : > { %v1416_v1 = vpop.f32.mrf.mxu3 }
 0x140   : > { %v1612_v2 = vmax.f32 %v1599_v61, 0.0  ;;  %v1447_v6 = vadd.f32 %v1416_v1, %v1275_v63  ;;  %v1074_v0 = vpop.f32.mrf.mxu1  ;;  %v1537_v50 = vpop.f32.mrf.mxu0 }
 0x141   : > { %v1249_v46 = vpop.f32.mrf.mxu2  ;;  %v1104_v8 = vadd.f32 %v1074_v0, %v2571_v36 }
 0x142   : > { %v2041_v24 = vpack.c.bf16 %v1612_v2, %v1611_v18  ;;  %v1566_v23 = vadd.f32 %v1535_v56, %v1447_v6 }
 0x143   : > { %v1276_v9 = vadd.f32 %v1246_v32, %v1104_v8 }
 0x144   : > { %2042 = vst [vmem:[%s2653_s30] sm:$0xff] %v2041_v24   ;;  %v1583_v5 = vmul.f32 %v2637_v48, %v1566_v23 }
 0x146   : > { %v1600_v26 = vadd.f32 %v2643_v40, %v1583_v5 }
 0x147   : > { %v1418_v10 = vpop.f32.mrf.mxu3 }
 0x148   : > { %v1448_v21 = vadd.f32 %v1418_v10, %v1276_v9  ;;  %v1077_v17 = vpop.f32.mrf.mxu1  ;;  %v1540_v27 = vpop.f32.mrf.mxu0  ;;  %v1613_v7 = vmax.f32 %v1600_v26, 0.0 }
 0x149   : > { %v1251_v19 = vpop.f32.mrf.mxu2  ;;  %v1105_v47 = vadd.f32 %v1077_v17, %v2586_v15 }
 0x14a   : > { %v1567_v20 = vadd.f32 %v1537_v50, %v1448_v21 }
 0x14b   : > { %v1277_v12 = vadd.f32 %v1249_v46, %v1105_v47 }
 0x14c   : > { %v1584_v29 = vmul.f32 %v2637_v48, %v1567_v20 }
 0x14e   : > { %v1601_v36 = vadd.f32 %v2643_v40, %v1584_v29 }
 0x14f   : > { %v1421_v31 = vpop.f32.mrf.mxu3 }
 0x150   : > { %v1614_v13 = vmax.f32 %v1601_v36, 0.0  ;;  %v1449_v60 = vadd.f32 %v1421_v31, %v1277_v12  ;;  %v1079_v33 = vpop.f32.mrf.mxu1  ;;  %v1542_v53 = vpop.f32.mrf.mxu0 }
 0x151   : > { %v1254_v34 = vpop.f32.mrf.mxu2  ;;  %v1106_v37 = vadd.f32 %v1079_v33, %v2593_v59 }
 0x152   : > { %v2046_v35 = vpack.c.bf16 %v1614_v13, %v1613_v7  ;;  %v1568_v38 = vadd.f32 %v1540_v27, %v1449_v60 }
 0x153   : > { %v1278_v15 = vadd.f32 %v1251_v19, %v1106_v37 }
 0x154   : > { %2096 = vst [vmem:[%s2653_s30 + $0x8] sm:$0xff] %v2046_v35   ;;  %v1585_v58 = vmul.f32 %v2637_v48, %v1568_v38 }
 0x156   : > { %v1602_v41 = vadd.f32 %v2643_v40, %v1585_v58 }
 0x157   : > { %v1423_v39 = vpop.f32.mrf.mxu3 }
 0x158   : > { %v1450_v14 = vadd.f32 %v1423_v39, %v1278_v15  ;;  %v1082_v42 = vpop.f32.mrf.mxu1  ;;  %v1545_v44 = vpop.f32.mrf.mxu0  ;;  %v1615_v56 = vmax.f32 %v1602_v41, 0.0 }
 0x159   : > { %v1256_v4 = vpop.f32.mrf.mxu2  ;;  %v1107_v43 = vadd.f32 %v1082_v42, %v2602_v11 }
 0x15a   : > { %v1569_v22 = vadd.f32 %v1542_v53, %v1450_v14 }
 0x15b   : > { %v1279_v52 = vadd.f32 %v1254_v34, %v1107_v43 }
 0x15c   : > { %v1586_v51 = vmul.f32 %v2637_v48, %v1569_v22 }
 0x15e   : > { %v1603_v59 = vadd.f32 %v2643_v40, %v1586_v51 }
 0x15f   : > { %v1426_v55 = vpop.f32.mrf.mxu3 }
 0x160   : > { %v1616_v32 = vmax.f32 %v1603_v59, 0.0  ;;  %v1451_v62 = vadd.f32 %v1426_v55, %v1279_v52  ;;  %v1084_v54 = vpop.f32.mrf.mxu1  ;;  %v1547_v25 = vpop.f32.mrf.mxu0 }
 0x161   : > { %v1259_v3 = vpop.f32.mrf.mxu2  ;;  %v1108_v63 = vadd.f32 %v1084_v54, %v2608_v49 }
 0x162   : > { %v2051_v61 = vpack.c.bf16 %v1616_v32, %v1615_v56  ;;  %v1570_v1 = vadd.f32 %v1545_v44, %v1451_v62 }
 0x163   : > { %v1280_v11 = vadd.f32 %v1256_v4, %v1108_v63 }
 0x164   : > { %2097 = vst [vmem:[%s2653_s30 + $0x10] sm:$0xff] %v2051_v61   ;;  %v1587_v2 = vmul.f32 %v2637_v48, %v1570_v1 }
 0x166   : > { %v1604_v23 = vadd.f32 %v2643_v40, %v1587_v2 }
 0x167   : > { %v1428_v18 = vpop.f32.mrf.mxu3 }
 0x168   : > { %v1452_v6 = vadd.f32 %v1428_v18, %v1280_v11  ;;  %v1087_v0 = vpop.f32.mrf.mxu1  ;;  %v1550_v50 = vpop.f32.mrf.mxu0  ;;  %v1617_v21 = vmax.f32 %v1604_v23, 0.0  ;;  %v1652_v23 = vld [vmem:[%s2653_s30 + $0x30] sm:$0x3] }
 0x169   : > { %v1261_v46 = vpop.f32.mrf.mxu2  ;;  %v1109_v8 = vadd.f32 %v1087_v0, %v2616_v57 }
 0x16a   : > { %v1571_v24 = vadd.f32 %v1547_v25, %v1452_v6 }
 0x16b   : > { %v1281_v10 = vadd.f32 %v1259_v3, %v1109_v8 }
 0x16c   : > { %v1588_v9 = vmul.f32 %v2637_v48, %v1571_v24 }
 0x16e   : > { %v1605_v49 = vadd.f32 %v2643_v40, %v1588_v9 }
 0x16f   : > { %v1431_v5 = vpop.f32.mrf.mxu3 }
 0x170   : > { %v1618_v17 = vmax.f32 %v1605_v49, 0.0  ;;  %v1453_v27 = vadd.f32 %v1431_v5, %v1281_v10  ;;  %v1089_v19 = vpop.f32.mrf.mxu1  ;;  %v1552_v20 = vpop.f32.mrf.mxu0 }
 0x171   : > { %v1264_v47 = vpop.f32.mrf.mxu2  ;;  %v1110_v29 = vadd.f32 %v1089_v19, %v2619_v30 }
 0x172   : > { %v2056_v26 = vpack.c.bf16 %v1618_v17, %v1617_v21  ;;  %v1572_v36 = vadd.f32 %v1550_v50, %v1453_v27 }
 0x173   : > { %v1282_v57 = vadd.f32 %v1261_v46, %v1110_v29 }
 0x174   : > { %2098 = vst [vmem:[%s2653_s30 + $0x18] sm:$0xff] %v2056_v26   ;;  %v1589_v31 = vmul.f32 %v2637_v48, %v1572_v36 }
 0x176   : > { %v1606_v35 = vadd.f32 %v2643_v40, %v1589_v31 }
 0x177   : > { %v1433_v12 = vpop.f32.mrf.mxu3 }
 0x178   : > { %v1454_v7 = vadd.f32 %v1433_v12, %v1282_v57  ;;  %v1092_v13 = vpop.f32.mrf.mxu1  ;;  %v1555_v60 = vpop.f32.mrf.mxu0  ;;  %v1619_v39 = vmax.f32 %v1606_v35, 0.0 }
 0x179   : > { %v1266_v33 = vpop.f32.mrf.mxu2  ;;  %v1111_v34 = vadd.f32 %v1092_v13, %v2625_v16 }
 0x17a   : > { %v1573_v53 = vadd.f32 %v1552_v20, %v1454_v7 }
 0x17b   : > { %v1283_v38 = vadd.f32 %v1264_v47, %v1111_v34 }
 0x17c   : > { %v1590_v37 = vmul.f32 %v2637_v48, %v1573_v53 }
 0x17e   : > { %v1607_v30 = vadd.f32 %v2643_v40, %v1590_v37 }
 0x17f   : > { %v1436_v15 = vpop.f32.mrf.mxu3 }
 0x180   : > { %v1620_v58 = vmax.f32 %v1607_v30, 0.0  ;;  %v1455_v14 = vadd.f32 %v1436_v15, %v1283_v38  ;;  %v1094_v42 = vpop.f32.mrf.mxu1  ;;  %v1557_v44 = vpop.f32.mrf.mxu0 }
 0x181   : > { %v1269_v4 = vpop.f32.mrf.mxu2  ;;  %v1112_v43 = vadd.f32 %v1094_v42, %v2628_v28 }
 0x182   : > { %v2061_v22 = vpack.c.bf16 %v1620_v58, %v1619_v39  ;;  %v1574_v41 = vadd.f32 %v1555_v60, %v1455_v14 }
 0x183   : > { %v1284_v16 = vadd.f32 %v1266_v33, %v1112_v43 }
 0x184   : > { %2099 = vst [vmem:[%s2653_s30 + $0x20] sm:$0xff] %v2061_v22   ;;  %v1591_v59 = vmul.f32 %v2637_v48, %v1574_v41 }
 0x186   : > { %v1608_v25 = vadd.f32 %v2643_v40, %v1591_v59 }
 0x187   : > { %v1438_v51 = vpop.f32.mrf.mxu3 }
 0x188   : > { %v1456_v52 = vadd.f32 %v1438_v51, %v1284_v16  ;;  %v1097_v55 = vpop.f32.mrf.mxu1  ;;  %v1560_v56 = vpop.f32.mrf.mxu0  ;;  %v1621_v1 = vmax.f32 %v1608_v25, 0.0 }
 0x189   : > { %v1271_v32 = vpop.f32.mrf.mxu2  ;;  %v1113_v54 = vadd.f32 %v1097_v55, %v2630_v45 }
 0x18a   : > { %v1575_v62 = vadd.f32 %v1557_v44, %v1456_v52 }
 0x18b   : > { %v1285_v61 = vadd.f32 %v1269_v4, %v1113_v54 }
 0x18c   : > { %v1592_v3 = vmul.f32 %v2637_v48, %v1575_v62 }
 0x18e   : > { %v1609_v28 = vadd.f32 %v2643_v40, %v1592_v3 }
 0x18f   : > { %v1441_v63 = vpop.f32.mrf.mxu3 }
 0x190   : > { %v1622_v11 = vmax.f32 %v1609_v28, 0.0  ;;  %v1457_v18 = vadd.f32 %v1441_v63, %v1285_v61  ;;  %v1099_v2 = vpop.f32.mrf.mxu1  ;;  %v1562_v6 = vpop.f32.mrf.mxu0 }
 0x192   : > { %v2066_v0 = vpack.c.bf16 %v1622_v11, %v1621_v1  ;;  %v1576_v50 = vadd.f32 %v1560_v56, %v1457_v18 }
 0x194   : > { %2100 = vst [vmem:[%s2653_s30 + $0x28] sm:$0xff] %v2066_v0   ;;  %v1593_v45 = vmul.f32 %v2637_v48, %v1576_v50 }
 0x196   : > { %v1610_v46 = vadd.f32 %v2643_v40, %v1593_v45 }
 0x197   : > { %v1443_v24 = vpop.f32.mrf.mxu3 }
 0x198   : > { %v1623_v8 = vmax.f32 %v1610_v46, 0.0 }
 0x19a   : > { %v1636_v9 = vpack.c.bf16 %v1623_v8, %v1623_v8 }
 0x19c   : > { %v1653_v49 = vsel %vm1651_vm10, %v1636_v9, %v1652_v23 }
 0x19d   : > { %1654 = vst [vmem:[%s2653_s30 + $0x30] sm:$0x3] %v1653_v49 }
 0x19e PF: > { %s14_s15 = sadd.s32 1, %s2138_s15  }
 0x19f   : > { %p11_p4 = scmp.ge.s32.totalorder %s14_s15, 4  }
 0x1a1   :  { %13 = sbr.rel (!%p11_p4) target bundleno = 1 (0x1), region = 66 }

// kernel: supervised_net_forward.5
= control target key start
LH: loop header
LB: loop body
LE: loop exit
PB: predicated region body
PF: predicated region fallthrough
CT: control target
= control target key end

     0   :  { %9 = vsyncpa [#allocation3], 0  ;;  %s5140_s0 = inlined_call_operand.vmem [shape: bf16[2,328,3], index: 0, kind: input, shape index: {}]   ;;  %s5141_s1 = inlined_call_operand.vmem [shape: bf16[27,64], index: 1, kind: input, shape index: {}]   ;;  %s5142_s2 = inlined_call_operand.hbm [shape: f32[1,64], index: 2, kind: input, shape index: {}]   ;;  %s5143_s3 = inlined_call_operand.hbm [shape: f32[1,64], index: 3, kind: input, shape index: {}]   ;;  %s5144_s4 = inlined_call_operand.vmem [shape: bf16[2,288,64], index: 4, kind: output, shape index: {}]  }
   0x1   :  { %10 = vsyncpa [#allocation5], 0  ;;  %s3907_s15 = smov 0  }
   0x2 LB: > { %s151_s18 = sshll.u32 %s5142_s2, 4  ;;  %s3297_s19 = sadd.s32 4294967295, %s3877_s15   ;;  %s3877_s15 = sphi %s3907_s15, %s16_s15   ;;  %s152_s18 = int_to_ptr.hbm [resolvable:$true] %s151_s18 }
   0x3   : > { %p3299_p0 = scmp.ge.s32.totalorder %s3877_s15, 1  ;;  %p136_p1 = scmp.lt.s32.totalorder %s3877_s15, 3 }
   0x4   : > { %p3764_p2 = scmp.eq.s32.totalorder %s3297_s19, 0  ;;  %s3879_s21 = smov [#allocation2]  }
   0x5   : > { %p3918_p3 = pnand %p3299_p0, %p136_p1  ;;  %s153_s22 = sshll.u32 %s3879_s21, 4  ;;  %s154_s22 = int_to_ptr.vmem [resolvable:$true] %s153_s22 }
   0x6   : > { %s163_s25 = sshll.u32 %s5143_s3, 4  ;;  %s3880_s26 = smov [#allocation4]   ;;  %s164_s25 = int_to_ptr.hbm [resolvable:$true] %s163_s25 }
   0x7   : > { %p3757_p4 = pneg %p3918_p3  ;;  %s165_s27 = sshll.u32 %s3880_s26, 4  ;;  %s166_s27 = int_to_ptr.vmem [resolvable:$true] %s165_s27 }
   0x8   : > { %186 = sbr.rel (%p3918_p3) target bundleno = 830 (0x33e), region = 36 }
   0x9   : > { %p3758_p5 = pnand %p3764_p2, %p3757_p4 }
   0xb   : > { %3760 = dma.hbm_to_vmem [thread:$0]  (!%p3758_p5), %s152_s18, 16, %s154_s22, [#allocation3]  }
   0xc   : > { %3763 = dma.hbm_to_vmem [thread:$0]  (!%p3758_p5), %s164_s25, 16, %s166_s27, [#allocation5]  }
   0xd   : > { %3868 = dma.done.wait (%p3764_p2), [#allocation3], 16  }
   0xe   : > { %3870 = vsyncadd (%p3764_p2), [#allocation3], 4294967280 }
   0xf   : > { %3872 = dma.done.wait (%p3764_p2), [#allocation5], 16  }
  0x10   : > { %3874 = vsyncadd (%p3764_p2), [#allocation5], 4294967280  ;;  %p218_p6 = scmp.lt.s32.totalorder %s3297_s19, 1  ;;  %v267_v0 = vld [vmem:[%s5141_s1] sm:$0x6]  ;;  %vm576_vm0 = vcmask 1040384  }
  0x11   : > { %v511_v3 = vunpack.c.l.b16 %v267_v0  ;;  %v3414_v6 = vld [vmem:[%s5141_s1] sm:$0x8]  ;;  %vm577_vm1 = vcmask 1041408   ;;  %v3701_v8 = vld [vmem:[%s5141_s1] sm:$0x10]  ;;  %v3881_v10 = vmov 65535  }
  0x12   : > { %s5175_s19 = smov (!%p218_p6, %s3297_s19), 1  ;;  %v578_v11 = vsel %vm576_vm0, 4294967295, %v3881_v10  ;;  %v3415_v19 = vor.u32 %v3701_v8, %v3414_v6  ;;  %v1433_v28 = vld [vmem:[%s5141_s1 + $0x4] sm:$0xc]  ;;  %v265_v35 = vld [vmem:[%s5141_s1] sm:$0x3] }
  0x13   : > { %s3747_s28 = smul.u32 164, %s5175_s19  ;;  %v512_v9 = vpack.c.b16 %v511_v3, %v511_v3  ;;  %v3986_v31 = vsel %vm577_vm1, %v578_v11, 0  ;;  %v1609_v39 = vunpack.c.l.b16 %v1433_v28  ;;  %vm361_vm2 = vsmask.f32 7424  ;;  %v1099_v61 = vld [vmem:[%s5141_s1 + $0x4] sm:$0x3] }
  0x14   : > { %v869_v24 = vrot.slane %v3415_v19, 3  ;;  %v719_v46 = vand.u32 %v3986_v31, %v265_v35  ;;  %vm521_vm3 = vcmask 23552   ;;  %v1231_v0 = vunpack.c.l.b16 %v1099_v61  ;;  %s3748_s30 = smul.u32 144, %s5175_s19 }
  0x15   : > { %s3940_s5 = scalar_lea.vmem %s5140_s0, %s3747_s28  ;;  %v514_v20 = vshrl.u32 %v512_v9, 16  ;;  %v517_v21 = vshll.u32 %v512_v9, 16  ;;  %v1610_v47 = vpack.c.b16 %v1609_v39, %v1609_v39  ;;  %vm826_vm4 = vcmask 1046528  }
  0x16   : > { %v3946_v1 = vld [vmem:[%s3940_s5 + $0x28] sm:$0xff]  ;;  %v3949_v2 = vld [vmem:[%s3940_s5 + $0x30] sm:$0xff]  ;;  %v3955_v5 = vld [vmem:[%s3940_s5 + $0x58] sm:$0xff]  ;;  %v925_v41 = vand.u32 %v869_v24, %v3986_v31  ;;  %v1232_v9 = vpack.c.b16 %v1231_v0, %v1231_v0  ;;  %vm1437_vm5 = vsmask.f32 6400  ;;  %vm1810_vm7 = vcmask 1045504   ;;  %s4788_s19 = scalar_lea.vmem %s5144_s4, %s3748_s30 }
  0x17   : > { %v3952_v4 = vld [vmem:[%s3940_s5 + $0x50] sm:$0xff]  ;;  %v402_v7 = vshll.u32 %v3946_v1, 16  ;;  %v406_v12 = vshrl.u32 %v3946_v1, 16  ;;  %v3967_v14 = vld [vmem:[%s3940_s5] sm:$0xff]   ;;  %v3970_v15 = vld [vmem:[%s3940_s5 + $0x8] sm:$0xff]  ;;  %v410_v16 = vshll.u32 %v3949_v2, 16 }
  0x18   : > { %v442_v13 = vshll.u32 %v3952_v4, 16  ;;  %v446_v17 = vshrl.u32 %v3952_v4, 16  ;;  %v450_v18 = vshll.u32 %v3955_v5, 16  ;;  %v363_v25 = vshrl.u32 %v3967_v14, 16  ;;  %v3698_v40 = vld [vmem:[%s3940_s5 + $0x78] sm:$0xff]  ;;  %v3699_v44 = vld [vmem:[%s3940_s5 + $0x80] sm:$0xff] }
  0x19   : > { %v3975_v22 = vrot.slane %v402_v7, 1  ;;  %v365_v26 = vshll.u32 %v3967_v14, 16  ;;  %v370_v27 = vshll.u32 %v3970_v15, 16  ;;  %v516_v29 = vrot.slane %v514_v20, 1  ;;  %v4007_v57 = vld [vmem:[%s3940_s5 + $0x38] sm:$0xff]  ;;  %v4010_v58 = vld [vmem:[%s3940_s5 + $0x60] sm:$0xff] }
  0x1a   : > { %v3977_v23 = vrot.slane %v442_v13, 1  ;;  %v519_v30 = vrot.slane %v517_v21, 2  ;;  %v412_v32 = vrot.slane %v410_v16, 1  ;;  %v452_v33 = vrot.slane %v450_v18, 1  ;;  %v4018_v62 = vld [vmem:[%s3940_s5 + $0x10] sm:$0xff]  ;;  %v3700_v10 = vld [vmem:[%s3940_s5 + $0x88] sm:$0xff] }
  0x1b   : > { %v367_v34 = vrot.slane %v365_v26, 1  ;;  %v408_v37 = vor.u32 %v406_v12, %v3975_v22  ;;  %v372_v43 = vrot.slane %v370_v27, 1  ;;  %v1611_v50 = vrot.slane %v1610_v47, 2  ;;  %v4030_v26 = vld [vmem:[%s3940_s5 + $0x48] sm:$0xff] }
  0x1c   : > { %v520_v36 = vor.u32 %v519_v30, %v516_v29  ;;  %v448_v38 = vor.u32 %v446_v17, %v3977_v23  ;;  %v482_v51 = vshll.u32 %v3698_v40, 16  ;;  %v486_v53 = vshrl.u32 %v3698_v40, 16  ;;  %v4043_v39 = vld [vmem:[%s3940_s5 + $0x68] sm:$0xff]  ;;  %v266_v40 = vld [vmem:[%s3940_s5 + $0x90] sm:$0x1] }
  0x1d   : > { %v368_v42 = vor.u32 %v367_v34, %v363_v25  ;;  %v413_v48 = vsel %vm361_vm2, %v408_v37, %v412_v32  ;;  %v490_v54 = vshll.u32 %v3699_v44, 16  ;;  %v1667_v55 = vand.u32 %v1611_v50, %v3986_v31 }
  0x1e   : > { %v581_v45 = vand.u32 %v3986_v31, %v520_v36  ;;  %v453_v49 = vsel %vm361_vm2, %v448_v38, %v452_v33  ;;  %v4002_v56 = vrot.slane %v482_v51, 1  ;;  %v414_v3 = vshrl.u32 %v3949_v2, 16  ;;  %v4040_v38 = vld [vmem:[%s3940_s5 + $0x40] sm:$0xff] }
  0x1f   : > { %v373_v52 = vsel %vm361_vm2, %v368_v42, %v372_v43  ;;  %v492_v59 = vrot.slane %v490_v54, 1  ;;  %v418_v6 = vshll.u32 %v4007_v57, 16  ;;  %v454_v7 = vshrl.u32 %v3955_v5, 16  ;;  %v4058_v51 = vld [vmem:[%s3940_s5 + $0x20] sm:$0xff] }
  0x20   : > { %3744 = vmatpush.bf16.msra.mxu1 %v581_v45  ;;  %3745 = vmatpush.bf16.msra.mxu2 %v581_v45  ;;  %v488_v60 = vor.u32 %v486_v53, %v4002_v56  ;;  %v458_v8 = vshll.u32 %v4010_v58, 16  ;;  %v374_v11 = vshrl.u32 %v3970_v15, 16  ;;  %v378_v12 = vshll.u32 %v4018_v62, 16 }
  0x21   : > { %590 = vmatpush.bf16.msra.mxu0 %v581_v45  ;;  %3746 = vmatpush.bf16.msra.mxu3 %v581_v45  ;;  %v1234_v13 = vshrl.u32 %v1232_v9, 16  ;;  %v1236_v16 = vshll.u32 %v1232_v9, 16  ;;  %v416_v17 = vor.u32 %v414_v3, %v412_v32  ;;  %v420_v18 = vrot.slane %v418_v6, 1  ;;  %v4050_v45 = vld [vmem:[%s3940_s5 + $0x18] sm:$0xff] }
  0x22   : > { %v493_v63 = vsel %vm361_vm2, %v488_v60, %v492_v59  ;;  %v456_v19 = vor.u32 %v454_v7, %v452_v33  ;;  %v460_v20 = vrot.slane %v458_v8, 1  ;;  %v494_v24 = vshrl.u32 %v3699_v44, 16 }
  0x23   : > { %3381 = vmatmul.msk.bf16.vlgmr.msra.gmra.mxu1 %vm521_vm3, %v413_v48  ;;  %3386 = vmatmul.msk.bf16.vlgmr.msra.gmra.mxu2 %vm521_vm3, %v453_v49  ;;  %v1238_v21 = vrot.slane %v1236_v16, 1  ;;  %v498_v25 = vshll.u32 %v3700_v10, 16  ;;  %v376_v27 = vor.u32 %v374_v11, %v372_v43  ;;  %v380_v28 = vrot.slane %v378_v12, 1 }
  0x24   : > { %934 = vmatpush.bf16.msrb.mxu2 %v925_v41  ;;  %728 = vmatpush.bf16.msrb.mxu1 %v719_v46  ;;  %v421_v30 = vsel %vm361_vm2, %v416_v17, %v420_v18  ;;  %v461_v34 = vsel %vm361_vm2, %v456_v19, %v460_v20  ;;  %v496_v33 = vor.u32 %v494_v24, %v492_v59  ;;  %v434_v36 = vshll.u32 %v4030_v26, 16  ;;  %v4087_v24 = vld [vmem:[%s3940_s5 + $0xc] sm:$0xf] }
  0x25   : > { %3376 = vmatmul.msk.bf16.vlgmr.msra.gmra.mxu0 %vm521_vm3, %v373_v52  ;;  %3391 = vmatmul.msk.bf16.vlgmr.msra.gmra.mxu3 %vm521_vm3, %v493_v63  ;;  %v1239_v29 = vor.u32 %v1238_v21, %v1234_v13  ;;  %v500_v35 = vrot.slane %v498_v25, 1  ;;  %v381_v37 = vsel %vm361_vm2, %v376_v27, %v380_v28  ;;  %v341_v43 = vunpack.c.l.b16 %v266_v40  ;;  %v1062_v21 = vld [vmem:[%s3940_s5 + $0x8] sm:$0xe] }
  0x26   : > { %1676 = vmatpush.bf16.msrb.mxu0 %v1667_v55  ;;  %v436_v42 = vrot.slane %v434_v36, 1  ;;  %v438_v44 = vshrl.u32 %v4030_v26, 16  ;;  %v422_v47 = vshrl.u32 %v4007_v57, 16  ;;  %v426_v48 = vshll.u32 %v4040_v38, 16 }
  0x27   : > { %v1295_v32 = vand.u32 %v1239_v29, %v3986_v31  ;;  %v501_v41 = vsel %vm361_vm2, %v496_v33, %v500_v35  ;;  %v462_v49 = vshrl.u32 %v4010_v58, 16  ;;  %v466_v50 = vshll.u32 %v4043_v39, 16 }
  0x28   : > { %v440_v46 = vor.u32 %v438_v44, %v436_v42  ;;  %v4060_v52 = vpack.c.b16 %v341_v43, %v341_v43  ;;  %v382_v54 = vshrl.u32 %v4018_v62, 16  ;;  %v386_v55 = vshll.u32 %v4050_v45, 16 }
  0x29   : > { %1304 = vmatpush.bf16.msrb.mxu3 %v1295_v32  ;;  %v424_v59 = vor.u32 %v422_v47, %v420_v18  ;;  %v428_v60 = vrot.slane %v426_v48, 1  ;;  %v464_v61 = vor.u32 %v462_v49, %v460_v20  ;;  %v468_v63 = vrot.slane %v466_v50, 1  ;;  %v2090_v47 = vld [vmem:[%s5141_s1 + $0x8] sm:$0x6]  ;;  %v3540_v50 = vld [vmem:[%s5141_s1 + $0x4] sm:$0x8] }
  0x2a   : > { %v4064_v53 = vsel %vm361_vm2, %v440_v46, %v3977_v23  ;;  %v394_v0 = vshll.u32 %v4058_v51, 16  ;;  %v502_v3 = vshrl.u32 %v3700_v10, 16  ;;  %v506_v6 = vshll.u32 %v4060_v52, 16  ;;  %v4078_v10 = vld [vmem:[%s3940_s5 + $0x70] sm:$0xff]  ;;  %v2418_v49 = vld [vmem:[%s5141_s1 + $0x8] sm:$0xc] }
  0x2b   : > { %v384_v7 = vor.u32 %v382_v54, %v380_v28  ;;  %v388_v8 = vrot.slane %v386_v55, 1  ;;  %v429_v23 = vsel %vm361_vm2, %v424_v59, %v428_v60  ;;  %v469_v9 = vsel %vm361_vm2, %v464_v61, %v468_v63  ;;  %v3719_v54 = vld [vmem:[%s5141_s1 + $0x4] sm:$0x10] }
  0x2c   : > { %v396_v11 = vrot.slane %v394_v0, 1  ;;  %v504_v12 = vor.u32 %v502_v3, %v500_v35  ;;  %v508_v13 = vrot.slane %v506_v6, 1  ;;  %v398_v16 = vshrl.u32 %v4058_v51, 16  ;;  %v4096_v35 = vld [vmem:[%s3940_s5 + $0x10] sm:$0xff] }
  0x2d   : > { %v389_v17 = vsel %vm361_vm2, %v384_v7, %v388_v8  ;;  %v430_v25 = vshrl.u32 %v4040_v38, 16  ;;  %v470_v27 = vshrl.u32 %v4043_v39, 16  ;;  %v474_v28 = vshll.u32 %v4078_v10, 16 }
  0x2e   : > { %v400_v18 = vor.u32 %v398_v16, %v396_v11  ;;  %v509_v19 = vsel %vm361_vm2, %v504_v12, %v508_v13  ;;  %v1137_v29 = vunpack.c.l.b16 %v1062_v21  ;;  %v1194_v44 = vrot.slane %v4096_v35, 1  ;;  %v3703_v21 = vld [vmem:[%s3940_s5 + $0x18] sm:$0xff] }
  0x2f   : > { %v432_v32 = vor.u32 %v430_v25, %v428_v60  ;;  %v472_v33 = vor.u32 %v470_v27, %v468_v63  ;;  %v2222_v48 = vunpack.c.l.b16 %v2090_v47  ;;  %v2594_v55 = vunpack.c.l.b16 %v2418_v49  ;;  %v2797_v60 = vld [vmem:[%s5141_s1 + $0xc] sm:$0x3] }
  0x30   : > { %v4083_v20 = vsel %vm361_vm2, %v400_v18, %v3975_v22  ;;  %v476_v22 = vrot.slane %v474_v28, 1  ;;  %v3541_v59 = vor.u32 %v3719_v54, %v3540_v50  ;;  %v2894_v63 = vand.u32 %v2797_v60, %v3986_v31 }
  0x31   : > { %v437_v40 = vsel %vm361_vm2, %v432_v32, %v436_v42  ;;  %v2223_v61 = vpack.c.b16 %v2222_v48, %v2222_v48  ;;  %v2595_v0 = vpack.c.b16 %v2594_v55, %v2594_v55  ;;  %v478_v7 = vshrl.u32 %v4078_v10, 16  ;;  %v3741_v32 = vld [vmem:[%s3940_s5] sm:$0xf0] }
  0x32   : > { %v1854_v3 = vshrl.u32 %v3541_v59, 16  ;;  %v1857_v6 = vshll.u32 %v3541_v59, 16  ;;  %2903 = vmatpush.bf16.msra.mxu0 %v2894_v63  ;;  %v3704_v48 = vld [vmem:[%s3940_s5 + $0x20] sm:$0xff]  ;;  %v1456_v55 = vshrl.u32 %v3703_v21, 16  ;;  %v1459_v59 = vshll.u32 %v3703_v21, 16 }
  0x33   : > { %3382 = vmatmul.msk.bf16.gmra.mxu1 %vm521_vm3, %v421_v30  ;;  %3387 = vmatmul.msk.bf16.gmra.mxu2 %vm521_vm3, %v461_v34  ;;  %v5145_v30 = vunpack.c.l.b16 %v4087_v24  ;;  %v390_v34 = vshrl.u32 %v4050_v45, 16  ;;  %v1198_v50 = vrot.slane %v3704_v48, 1  ;;  %v830_v63 = vrot.slane %v4018_v62, 1 }
  0x34   : > { %v1859_v12 = vrot.slane %v1857_v6, 4  ;;  %v1458_v60 = vrot.slane %v1456_v55, 1  ;;  %vm2422_vm6 = vsmask.f32 5376  ;;  %vm2801_vm8 = vcmask 1044480  }
  0x35   : > { %3377 = vmatmul.msk.bf16.gmra.mxu0 %vm521_vm3, %v381_v37  ;;  %3392 = vmatmul.msk.bf16.gmra.mxu3 %vm521_vm3, %v501_v41  ;;  %v1174_v36 = vpack.c.b16 %v5145_v30, %v1137_v29  ;;  %v392_v37 = vor.u32 %v390_v34, %v388_v8  ;;  %v477_v41 = vsel %vm361_vm2, %v472_v33, %v476_v22  ;;  %v2224_v8 = vrot.slane %v2223_v61, 1 }
  0x36   : > { %v1196_v34 = vrot.slane %v3703_v21, 1  ;;  %v1461_v61 = vrot.slane %v1459_v59, 2  ;;  %vm3183_vm9 = vcmask 519168  }
  0x37   : > { %v1193_v43 = vrot.slane %v1174_v36, 1  ;;  %v397_v46 = vsel %vm361_vm2, %v392_v37, %v396_v11  ;;  %v1856_v11 = vrot.slane %v1854_v3, 3  ;;  %v2280_v13 = vand.u32 %v2224_v8, %v3986_v31 }
  0x38   : > { %v1197_v33 = vsel %vm826_vm4, %v1194_v44, %v1196_v34  ;;  %v1442_v37 = vshll.u32 %v1174_v36, 16  ;;  %v1199_v54 = vsel %vm826_vm4, %v1196_v34, %v1198_v50  ;;  %v1462_v3 = vor.u32 %v1461_v61, %v1458_v60 }
  0x39   : > { %v1195_v42 = vsel %vm826_vm4, %v1193_v43, %v1194_v44  ;;  %v1860_v18 = vor.u32 %v1859_v12, %v1856_v11  ;;  %2289 = vmatpush.bf16.msra.mxu2 %v2280_v13  ;;  %v832_v13 = vrot.slane %v4050_v45, 1  ;;  %v834_v34 = vrot.slane %v4058_v51, 1 }
  0x3a   : > { %v1444_v43 = vrot.slane %v1442_v37, 2 }
  0x3b   : > { %v1916_v27 = vand.u32 %v1860_v18, %v3986_v31  ;;  %v833_v18 = vsel %vm826_vm4, %v830_v63, %v832_v13 }
  0x3d   : > { %1925 = vmatpush.bf16.msra.mxu1 %v1916_v27 }
  0x43   : > { %3383 = vmatmul.msk.bf16.gmra.mxu1 %vm521_vm3, %v429_v23  ;;  %3388 = vmatmul.msk.bf16.gmra.mxu2 %vm521_vm3, %v469_v9  ;;  %v2597_v23 = vshrl.u32 %v2595_v0, 16  ;;  %v2600_v9 = vshll.u32 %v2595_v0, 16  ;;  %v3705_v0 = vld [vmem:[%s3940_s5 + $0x28] sm:$0xff] }
  0x44   : > { %v1477_v27 = vshll.u32 %v3705_v0, 16 }
  0x45   : > { %3378 = vmatmul.msk.bf16.gmra.mxu0 %vm521_vm3, %v389_v17  ;;  %3393 = vmatmul.msk.bf16.gmra.mxu3 %vm521_vm3, %v509_v19  ;;  %v2599_v16 = vrot.slane %v2597_v23, 2  ;;  %v2602_v17 = vrot.slane %v2600_v9, 3  ;;  %v480_v19 = vor.u32 %v478_v7, %v476_v22  ;;  %v3742_v22 = vld [vmem:[%s3940_s5] sm:$0xe]  ;;  %v1465_v23 = vshrl.u32 %v3704_v48, 16 }
  0x46   : > { %v1468_v9 = vshll.u32 %v3704_v48, 16 }
  0x47   : > { %v2603_v25 = vor.u32 %v2602_v17, %v2599_v16  ;;  %v485_v29 = vsel %vm361_vm2, %v480_v19, %v4002_v56  ;;  %v1450_v56 = vshll.u32 %v4096_v35, 16  ;;  %v1467_v11 = vrot.slane %v1465_v23, 1  ;;  %v3706_v16 = vld [vmem:[%s3940_s5 + $0x30] sm:$0xff] }
  0x48   : > { %v1470_v12 = vrot.slane %v1468_v9, 2  ;;  %v3709_v9 = vld [vmem:[%s3940_s5 + $0x48] sm:$0xff] }
  0x49   : > { %v2659_v28 = vand.u32 %v2603_v25, %v3986_v31  ;;  %v1439_v31 = vshrl.u32 %v1174_v36, 16  ;;  %v1452_v47 = vrot.slane %v1450_v56, 2  ;;  %v1474_v25 = vshrl.u32 %v3705_v0, 16 }
  0x4a   : > { %v1471_v17 = vor.u32 %v1470_v12, %v1467_v11 }
  0x4b   : > { %2668 = vmatpush.bf16.msra.mxu3 %v2659_v28  ;;  %v1476_v28 = vrot.slane %v1474_v25, 1 }
  0x4c   : > { %v1472_v19 = vsel %vm1437_vm5, %v1462_v3, %v1471_v17 }
  0x53   : > { %3384 = vmatmul.msk.bf16.gmra.mxu1 %vm521_vm3, %v437_v40  ;;  %3389 = vmatmul.msk.bf16.gmra.mxu2 %vm521_vm3, %v477_v41  ;;  %v1447_v40 = vshrl.u32 %v4096_v35, 16  ;;  %v3743_v41 = vor.u32 %v3742_v22, %v3741_v32  ;;  %v3707_v32 = vld [vmem:[%s3940_s5 + $0x38] sm:$0xff] }
  0x55   : > { %3379 = vmatmul.msk.bf16.gmra.mxu0 %vm521_vm3, %v397_v46  ;;  %3502 = vmatmul.msk.bf16.vlgmr.msrb.gmra.mxu3 %vm521_vm3, %v1195_v42  ;;  %v1449_v46 = vrot.slane %v1447_v40, 1  ;;  %v827_v42 = vrot.slane %v3743_v41, 1  ;;  %v1483_v41 = vshrl.u32 %v3706_v16, 16 }
  0x57   : > { %v1453_v44 = vor.u32 %v1452_v47, %v1449_v46 }
  0x59   : > { %v1463_v7 = vsel %vm1437_vm5, %v1453_v44, %v1462_v3 }
  0x63   : > { %3385 = vmatmul.msk.bf16.gmra.mxu1 %vm521_vm3, %v4064_v53  ;;  %3390 = vmatmul.msk.bf16.gmra.mxu2 %vm521_vm3, %v485_v29  ;;  %v1441_v53 = vrot.slane %v1439_v31, 1  ;;  %v1479_v29 = vrot.slane %v1477_v27, 2  ;;  %v1204_v31 = vrot.slane %v3707_v32, 1 }
  0x65   : > { %3380 = vmatmul.msk.bf16.gmra.mxu0 %vm521_vm3, %v4083_v20  ;;  %3503 = vmatmul.msk.bf16.gmra.mxu3 %vm521_vm3, %v1197_v33  ;;  %v828_v20 = vrot.slane %v3970_v15, 1  ;;  %v1445_v49 = vor.u32 %v1444_v43, %v1441_v53  ;;  %v1480_v33 = vor.u32 %v1479_v29, %v1476_v28  ;;  %v1486_v53 = vshll.u32 %v3706_v16, 16 }
  0x67   : > { %v829_v36 = vsel %vm826_vm4, %v827_v42, %v828_v20  ;;  %v1454_v35 = vsel %vm1437_vm5, %v1445_v49, %v1453_v44  ;;  %v831_v6 = vsel %vm826_vm4, %v828_v20, %v830_v63  ;;  %v1481_v40 = vsel %vm1437_vm5, %v1471_v17, %v1480_v33  ;;  %v3708_v49 = vld [vmem:[%s3940_s5 + $0x40] sm:$0xff] }
  0x68   : > { %v1485_v42 = vrot.slane %v1483_v41, 1  ;;  %v1488_v20 = vrot.slane %v1486_v53, 2  ;;  %v1492_v63 = vshrl.u32 %v3707_v32, 16  ;;  %v1208_v17 = vrot.slane %v3709_v9, 1 }
  0x69   : > { %v1501_v25 = vshrl.u32 %v3708_v49, 16  ;;  %v1504_v27 = vshll.u32 %v3708_v49, 16 }
  0x6a   : > { %v1489_v44 = vor.u32 %v1488_v20, %v1485_v42 }
  0x6c   : > { %v1490_v59 = vsel %vm1437_vm5, %v1480_v33, %v1489_v44  ;;  %v1506_v33 = vrot.slane %v1504_v27, 2 }
  0x73   : > { %3394 = vmatmul.msk.bf16.vlgmr.msrb.gmra.mxu1 %vm521_vm3, %v3967_v14  ;;  %3416 = vmatmul.msk.bf16.vlgmr.msrb.gmra.mxu2 %vm521_vm3, %v829_v36  ;;  %v1200_v14 = vrot.slane %v3705_v0, 1  ;;  %v1495_v0 = vshll.u32 %v3707_v32, 16  ;;  %v1503_v32 = vrot.slane %v1501_v25, 1 }
  0x75   : > { %3520 = vmatmul.msk.bf16.vlgmr.msrb.gmra.mxu0 %vm521_vm3, %v1454_v35  ;;  %3504 = vmatmul.msk.bf16.gmra.mxu3 %vm521_vm3, %v1199_v54  ;;  %v1201_v8 = vsel %vm826_vm4, %v1198_v50, %v1200_v14  ;;  %v1206_v54 = vrot.slane %v3708_v49, 1 }
  0x77   : > { %v1207_v61 = vsel %vm826_vm4, %v1204_v31, %v1206_v54 }
  0x83   : > { %3395 = vmatmul.msk.bf16.gmra.mxu1 %vm521_vm3, %v3970_v15  ;;  %3417 = vmatmul.msk.bf16.gmra.mxu2 %vm521_vm3, %v831_v6  ;;  %v1202_v15 = vrot.slane %v3706_v16, 1 }
  0x85   : > { %3521 = vmatmul.msk.bf16.gmra.mxu0 %vm521_vm3, %v1463_v7  ;;  %3505 = vmatmul.msk.bf16.gmra.mxu3 %vm521_vm3, %v1201_v8  ;;  %v1203_v21 = vsel %vm826_vm4, %v1200_v14, %v1202_v15  ;;  %v1205_v56 = vsel %vm826_vm4, %v1202_v15, %v1204_v31  ;;  %v1494_v7 = vrot.slane %v1492_v63, 1  ;;  %v1497_v8 = vrot.slane %v1495_v0, 2  ;;  %v3710_v31 = vld [vmem:[%s3940_s5 + $0x50] sm:$0xff] }
  0x86   : > { %v1210_v42 = vrot.slane %v3710_v31, 1 }
  0x87   : > { %v1498_v11 = vor.u32 %v1497_v8, %v1494_v7 }
  0x89   : > { %v1499_v15 = vsel %vm1437_vm5, %v1489_v44, %v1498_v11  ;;  %v1211_v44 = vsel %vm826_vm4, %v1208_v17, %v1210_v42 }
  0x93   : > { %3396 = vmatmul.msk.bf16.gmra.mxu1 %vm521_vm3, %v4018_v62  ;;  %3418 = vmatmul.msk.bf16.gmra.mxu2 %vm521_vm3, %v833_v18  ;;  %v835_v62 = vsel %vm826_vm4, %v832_v13, %v834_v34 }
  0x95   : > { %3522 = vmatmul.msk.bf16.gmra.mxu0 %vm521_vm3, %v1472_v19  ;;  %3506 = vmatmul.msk.bf16.gmra.mxu3 %vm521_vm3, %v1203_v21  ;;  %v1209_v21 = vsel %vm826_vm4, %v1206_v54, %v1208_v17  ;;  %v1513_v54 = vshll.u32 %v3709_v9, 16 }
  0x97   : > { %v1515_v7 = vrot.slane %v1513_v54, 2 }
  0xa0   : > { %v4175_v22 = vpop.f32.mrf.mxu1 }
  0xa2   : > { %v4178_v37 = vpop.f32.mrf.mxu0 }
  0xa3   : > { %3397 = vmatmul.msk.bf16.gmra.mxu1 %vm521_vm3, %v4050_v45  ;;  %3419 = vmatmul.msk.bf16.gmra.mxu2 %vm521_vm3, %v835_v62  ;;  %v836_v45 = vrot.slane %v3946_v1, 1 }
  0xa5   : > { %3523 = vmatmul.msk.bf16.gmra.mxu0 %vm521_vm3, %v1481_v40  ;;  %3507 = vmatmul.msk.bf16.gmra.mxu3 %vm521_vm3, %v1205_v56  ;;  %v837_v35 = vsel %vm826_vm4, %v834_v34, %v836_v45  ;;  %v1507_v40 = vor.u32 %v1506_v33, %v1503_v32  ;;  %v1519_v33 = vshrl.u32 %v3710_v31, 16 }
  0xa6   : > { %v4186_v43 = vpop.f32.mrf.mxu2 }
  0xa8   : > { %v4189_v46 = vpop.f32.mrf.mxu1  ;;  %v4193_v48 = vpop.f32.mrf.mxu3 }
  0xa9   : > { %5148 = vst [vmem:[#allocation8_spill] sm:$0xff] %v4193_v48 }
  0xaa   : > { %v4191_v47 = vpop.f32.mrf.mxu0 }
  0xae   : > { %v4197_v36 = vpop.f32.mrf.mxu2 }
  0xb0   : > { %v4199_v50 = vpop.f32.mrf.mxu1  ;;  %v4205_v60 = vpop.f32.mrf.mxu3 }
  0xb1   : > { %5149 = vst [vmem:[#allocation9_spill] sm:$0xff] %v4205_v60 }
  0xb2   : > { %v4202_v55 = vpop.f32.mrf.mxu0 }
  0xb3   : > { %3398 = vmatmul.msk.bf16.gmra.mxu1 %vm521_vm3, %v4058_v51  ;;  %3420 = vmatmul.msk.bf16.gmra.mxu2 %vm521_vm3, %v837_v35  ;;  %v838_v51 = vrot.slane %v3949_v2, 1  ;;  %v1510_v35 = vshrl.u32 %v3709_v9, 16 }
  0xb5   : > { %3524 = vmatmul.msk.bf16.gmra.mxu0 %vm521_vm3, %v1490_v59  ;;  %3508 = vmatmul.msk.bf16.gmra.mxu3 %vm521_vm3, %v1207_v61  ;;  %v839_v16 = vsel %vm826_vm4, %v836_v45, %v838_v51  ;;  %v1508_v45 = vsel %vm1437_vm5, %v1498_v11, %v1507_v40  ;;  %v1512_v0 = vrot.slane %v1510_v35, 1 }
  0xb6   : > { %v4212_v3 = vpop.f32.mrf.mxu2 }
  0xb7   : > { %v1516_v11 = vor.u32 %v1515_v7, %v1512_v0  ;;  %v3712_v0 = vld [vmem:[%s3940_s5 + $0x60] sm:$0xff] }
  0xb8   : > { %v4215_v6 = vpop.f32.mrf.mxu1  ;;  %v4219_v23 = vpop.f32.mrf.mxu3 }
  0xb9   : > { %5150 = vst [vmem:[#allocation10_spill] sm:$0xff] %v4219_v23  ;;  %v1517_v25 = vsel %vm1437_vm5, %v1507_v40, %v1516_v11 }
  0xba   : > { %v4217_v14 = vpop.f32.mrf.mxu0 }
  0xbe   : > { %v4223_v12 = vpop.f32.mrf.mxu2 }
  0xc0   : > { %v4225_v13 = vpop.f32.mrf.mxu1  ;;  %v4231_v19 = vpop.f32.mrf.mxu3 }
  0xc1   : > { %5151 = vst [vmem:[#allocation11_spill] sm:$0xff] %v4231_v19 }
  0xc2   : > { %v4228_v18 = vpop.f32.mrf.mxu0 }
  0xc3   : > { %3399 = vmatmul.msk.bf16.gmra.mxu1 %vm521_vm3, %v3946_v1  ;;  %3421 = vmatmul.msk.bf16.gmra.mxu2 %vm521_vm3, %v839_v16  ;;  %v840_v1 = vrot.slane %v4007_v57, 1 }
  0xc5   : > { %3525 = vmatmul.msk.bf16.gmra.mxu0 %vm521_vm3, %v1499_v15  ;;  %3509 = vmatmul.msk.bf16.gmra.mxu3 %vm521_vm3, %v1209_v21  ;;  %v841_v53 = vsel %vm826_vm4, %v838_v51, %v840_v1  ;;  %v3711_v51 = vld [vmem:[%s3940_s5 + $0x58] sm:$0xff] }
  0xc6   : > { %v4238_v28 = vpop.f32.mrf.mxu2  ;;  %v1212_v15 = vrot.slane %v3711_v51, 1 }
  0xc8   : > { %v4241_v29 = vpop.f32.mrf.mxu1  ;;  %v4245_v62 = vpop.f32.mrf.mxu3  ;;  %v1213_v32 = vsel %vm826_vm4, %v1210_v42, %v1212_v15 }
  0xc9   : > { %5152 = vst [vmem:[#allocation12_spill] sm:$0xff] %v4245_v62 }
  0xca   : > { %v4243_v34 = vpop.f32.mrf.mxu0 }
  0xce   : > { %v4249_v56 = vpop.f32.mrf.mxu2 }
  0xd0   : > { %v4251_v41 = vpop.f32.mrf.mxu1  ;;  %v4257_v49 = vpop.f32.mrf.mxu3 }
  0xd1   : > { %5153 = vst [vmem:[#allocation13_spill] sm:$0xff] %v4257_v49 }
  0xd2   : > { %v4254_v20 = vpop.f32.mrf.mxu0 }
  0xd3   : > { %3400 = vmatmul.msk.bf16.gmra.mxu1 %vm521_vm3, %v3949_v2  ;;  %3422 = vmatmul.msk.bf16.gmra.mxu2 %vm521_vm3, %v841_v53  ;;  %v842_v2 = vrot.slane %v4040_v38, 1  ;;  %v1522_v53 = vshll.u32 %v3710_v31, 16 }
  0xd5   : > { %3526 = vmatmul.msk.bf16.gmra.mxu0 %vm521_vm3, %v1508_v45  ;;  %3510 = vmatmul.msk.bf16.gmra.mxu3 %vm521_vm3, %v1211_v44  ;;  %v843_v9 = vsel %vm826_vm4, %v840_v1, %v842_v2  ;;  %v1521_v44 = vrot.slane %v1519_v33, 1  ;;  %v1524_v35 = vrot.slane %v1522_v53, 2 }
  0xd6   : > { %v4264_v59 = vpop.f32.mrf.mxu2 }
  0xd7   : > { %v1525_v7 = vor.u32 %v1524_v35, %v1521_v44  ;;  %v1528_v44 = vshrl.u32 %v3711_v51, 16  ;;  %v1531_v35 = vshll.u32 %v3711_v51, 16 }
  0xd8   : > { %v4267_v61 = vpop.f32.mrf.mxu1  ;;  %v1306_v8 = vpop.f32.mrf.mxu3 }
  0xd9   : > { %v1530_v60 = vrot.slane %v1528_v44, 1 }
  0xda   : > { %v4269_v63 = vpop.f32.mrf.mxu0 }
  0xde   : > { %v4273_v16 = vpop.f32.mrf.mxu2 }
  0xe0   : > { %v4275_v17 = vpop.f32.mrf.mxu1  ;;  %v1308_v27 = vpop.f32.mrf.mxu3 }
  0xe2   : > { %v4278_v21 = vpop.f32.mrf.mxu0 }
  0xe3   : > { %3401 = vmatmul.msk.bf16.gmra.mxu1 %vm521_vm3, %v4007_v57  ;;  %3423 = vmatmul.msk.bf16.gmra.mxu2 %vm521_vm3, %v843_v9  ;;  %v844_v57 = vrot.slane %v4030_v26, 1 }
  0xe5   : > { %3527 = vmatmul.msk.bf16.gmra.mxu0 %vm521_vm3, %v1517_v25  ;;  %3511 = vmatmul.msk.bf16.gmra.mxu3 %vm521_vm3, %v1213_v32  ;;  %v845_v31 = vsel %vm826_vm4, %v842_v2, %v844_v57  ;;  %v1214_v25 = vrot.slane %v3712_v0, 1  ;;  %v1526_v32 = vsel %vm1437_vm5, %v1516_v11, %v1525_v7 }
  0xe6   : > { %v4286_v45 = vpop.f32.mrf.mxu2 }
  0xe7   : > { %5154 = vst [vmem:[#allocation14_spill] sm:$0xff] %v4286_v45  ;;  %v1215_v33 = vsel %vm826_vm4, %v1212_v15, %v1214_v25 }
  0xe8   : > { %v4289_v1 = vpop.f32.mrf.mxu1  ;;  %v1311_v54 = vpop.f32.mrf.mxu3 }
  0xea   : > { %v4291_v40 = vpop.f32.mrf.mxu0 }
  0xee   : > { %v4295_v9 = vpop.f32.mrf.mxu2 }
  0xef   : > { %5155 = vst [vmem:[#allocation15_spill] sm:$0xff] %v4295_v9  ;;  %v3713_v9 = vld [vmem:[%s3940_s5 + $0x68] sm:$0xff] }
  0xf0   : > { %v730_v42 = vpop.f32.mrf.mxu1  ;;  %v1313_v49 = vpop.f32.mrf.mxu3 }
  0xf1   : > { %v731_v53 = vadd.f32 %v730_v42, %v4178_v37 }
  0xf2   : > { %v1678_v30 = vpop.f32.mrf.mxu0 }
  0xf3   : > { %3402 = vmatmul.msk.bf16.gmra.mxu1 %vm521_vm3, %v4040_v38  ;;  %3424 = vmatmul.msk.bf16.gmra.mxu2 %vm521_vm3, %v845_v31  ;;  %v1533_v38 = vrot.slane %v1531_v35, 2 }
  0xf5   : > { %3528 = vmatmul.msk.bf16.gmra.mxu0 %vm521_vm3, %v1526_v32  ;;  %3512 = vmatmul.msk.bf16.gmra.mxu3 %vm521_vm3, %v1215_v33  ;;  %v846_v32 = vrot.slane %v3952_v4, 1  ;;  %v1534_v37 = vor.u32 %v1533_v38, %v1530_v60  ;;  %v1216_v33 = vrot.slane %v3713_v9, 1 }
  0xf6   : > { %v936_v2 = vpop.f32.mrf.mxu2 }
  0xf7   : > { %v1026_v62 = vadd.f32 %v936_v2, %v731_v53  ;;  %v847_v53 = vsel %vm826_vm4, %v844_v57, %v846_v32 }
  0xf8   : > { %v732_v11 = vpop.f32.mrf.mxu1  ;;  %v1316_v48 = vpop.f32.mrf.mxu3 }
  0xf9   : > { %v1396_v19 = vadd.f32 %v1306_v8, %v1026_v62  ;;  %v733_v15 = vadd.f32 %v732_v11, %v4191_v47  ;;  %v1535_v8 = vsel %vm1437_vm5, %v1525_v7, %v1534_v37  ;;  %v1217_v47 = vsel %vm826_vm4, %v1214_v25, %v1216_v33 }
  0xfa   : > { %v1680_v23 = vpop.f32.mrf.mxu0 }
  0xfb   : > { %v4306_v31 = vadd.f32 %v1678_v30, %v1396_v19  ;;  %v1537_v19 = vshrl.u32 %v3712_v0, 16 }
  0xfd   : > { %v1539_v38 = vrot.slane %v1537_v19, 1 }
  0xfe   : > { %v938_v42 = vpop.f32.mrf.mxu2 }
  0xff   : > { %v1027_v51 = vadd.f32 %v938_v42, %v733_v15 }
 0x100   : > { %v735_v45 = vpop.f32.mrf.mxu1  ;;  %v1318_v44 = vpop.f32.mrf.mxu3 }
 0x101   : > { %v1397_v2 = vadd.f32 %v1308_v27, %v1027_v51  ;;  %v736_v60 = vadd.f32 %v735_v45, %v4202_v55  ;;  %v1540_v27 = vshll.u32 %v3712_v0, 16  ;;  %v848_v51 = vrot.slane %v3955_v5, 1 }
 0x102   : > { %v1683_v62 = vpop.f32.mrf.mxu0 }
 0x103   : > { %3403 = vmatmul.msk.bf16.gmra.mxu1 %vm521_vm3, %v4030_v26  ;;  %3425 = vmatmul.msk.bf16.gmra.mxu2 %vm521_vm3, %v847_v53  ;;  %v4316_v30 = vadd.f32 %v1680_v23, %v1397_v2  ;;  %v1542_v15 = vrot.slane %v1540_v27, 2  ;;  %v3714_v53 = vld [vmem:[%s3940_s5 + $0x70] sm:$0xff] }
 0x105   : > { %3529 = vmatmul.msk.bf16.gmra.mxu0 %vm521_vm3, %v1535_v8  ;;  %3513 = vmatmul.msk.bf16.gmra.mxu3 %vm521_vm3, %v1217_v47  ;;  %v1543_v55 = vor.u32 %v1542_v15, %v1539_v38  ;;  %v849_v8 = vsel %vm826_vm4, %v846_v32, %v848_v51  ;;  %v1218_v47 = vrot.slane %v3714_v53, 1 }
 0x106   : > { %v941_v57 = vpop.f32.mrf.mxu2 }
 0x107   : > { %v1028_v35 = vadd.f32 %v941_v57, %v736_v60  ;;  %v1544_v19 = vsel %vm1437_vm5, %v1534_v37, %v1543_v55  ;;  %v1546_v57 = vshrl.u32 %v3713_v9, 16 }
 0x108   : > { %v737_v7 = vpop.f32.mrf.mxu1  ;;  %v1321_v23 = vpop.f32.mrf.mxu3 }
 0x109   : > { %v1398_v11 = vadd.f32 %v1311_v54, %v1028_v35  ;;  %v738_v25 = vadd.f32 %v737_v7, %v4217_v14  ;;  %v1219_v14 = vsel %vm826_vm4, %v1216_v33, %v1218_v47  ;;  %v1548_v38 = vrot.slane %v1546_v57, 1 }
 0x10a   : > { %v1685_v26 = vpop.f32.mrf.mxu0 }
 0x10b   : > { %v4322_v42 = vadd.f32 %v1683_v62, %v1398_v11 }
 0x10e   : > { %v943_v45 = vpop.f32.mrf.mxu2 }
 0x10f   : > { %v1029_v0 = vadd.f32 %v943_v45, %v738_v25  ;;  %v850_v45 = vrot.slane %v4010_v58, 1 }
 0x110   : > { %v740_v2 = vpop.f32.mrf.mxu1  ;;  %v1323_v27 = vpop.f32.mrf.mxu3 }
 0x111   : > { %v1399_v60 = vadd.f32 %v1313_v49, %v1029_v0  ;;  %v741_v32 = vadd.f32 %v740_v2, %v4228_v18  ;;  %v1549_v49 = vshll.u32 %v3713_v9, 16  ;;  %v3715_v0 = vld [vmem:[%s3940_s5 + $0x78] sm:$0xff] }
 0x112   : > { %v1688_v54 = vpop.f32.mrf.mxu0 }
 0x113   : > { %3404 = vmatmul.msk.bf16.gmra.mxu1 %vm521_vm3, %v3952_v4  ;;  %3426 = vmatmul.msk.bf16.gmra.mxu2 %vm521_vm3, %v849_v8  ;;  %v4332_v62 = vadd.f32 %v1685_v26, %v1399_v60  ;;  %v1551_v15 = vrot.slane %v1549_v49, 2  ;;  %v851_v60 = vsel %vm826_vm4, %v848_v51, %v850_v45  ;;  %v1555_v49 = vshrl.u32 %v3714_v53, 16 }
 0x115   : > { %3530 = vmatmul.msk.bf16.gmra.mxu0 %vm521_vm3, %v1544_v19  ;;  %3514 = vmatmul.msk.bf16.gmra.mxu3 %vm521_vm3, %v1219_v14  ;;  %v1552_v18 = vor.u32 %v1551_v15, %v1548_v38  ;;  %v1220_v19 = vrot.slane %v3715_v0, 1 }
 0x116   : > { %v946_v35 = vpop.f32.mrf.mxu2 }
 0x117   : > { %v1030_v7 = vadd.f32 %v946_v35, %v741_v32  ;;  %v1553_v32 = vsel %vm1437_vm5, %v1543_v55, %v1552_v18 }
 0x118   : > { %v742_v37 = vpop.f32.mrf.mxu1  ;;  %v1326_v26 = vpop.f32.mrf.mxu3 }
 0x119   : > { %v1400_v11 = vadd.f32 %v1316_v48, %v1030_v7  ;;  %v743_v33 = vadd.f32 %v742_v37, %v4243_v34  ;;  %v1221_v34 = vsel %vm826_vm4, %v1218_v47, %v1220_v19 }
 0x11a   : > { %v1690_v4 = vpop.f32.mrf.mxu0 }
 0x11b   : > { %v4338_v25 = vadd.f32 %v1688_v54, %v1400_v11  ;;  %v1557_v11 = vrot.slane %v1555_v49, 1  ;;  %v1564_v49 = vshrl.u32 %v3715_v0, 16 }
 0x11e   : > { %v948_v2 = vpop.f32.mrf.mxu2 }
 0x11f   : > { %v1031_v9 = vadd.f32 %v948_v2, %v743_v33  ;;  %v852_v33 = vrot.slane %v4043_v39, 1  ;;  %v3716_v2 = vld [vmem:[%s3940_s5 + $0x80] sm:$0xff] }
 0x120   : > { %v745_v8 = vpop.f32.mrf.mxu1  ;;  %v1328_v57 = vpop.f32.mrf.mxu3 }
 0x121   : > { %v1401_v14 = vadd.f32 %v1318_v44, %v1031_v9  ;;  %v746_v51 = vadd.f32 %v745_v8, %v4254_v20  ;;  %v1558_v44 = vshll.u32 %v3714_v53, 16 }
 0x122   : > { %v1693_v48 = vpop.f32.mrf.mxu0 }
 0x123   : > { %3405 = vmatmul.msk.bf16.gmra.mxu1 %vm521_vm3, %v3955_v5  ;;  %3427 = vmatmul.msk.bf16.gmra.mxu2 %vm521_vm3, %v851_v60  ;;  %v4348_v54 = vadd.f32 %v1690_v4, %v1401_v14  ;;  %v1560_v38 = vrot.slane %v1558_v44, 2  ;;  %v853_v60 = vsel %vm826_vm4, %v850_v45, %v852_v33  ;;  %v1222_v14 = vrot.slane %v3716_v2, 1 }
 0x125   : > { %3531 = vmatmul.msk.bf16.gmra.mxu0 %vm521_vm3, %v1553_v32  ;;  %3515 = vmatmul.msk.bf16.gmra.mxu3 %vm521_vm3, %v1221_v34  ;;  %v1561_v20 = vor.u32 %v1560_v38, %v1557_v11  ;;  %v854_v38 = vrot.slane %v4078_v10, 1 }
 0x126   : > { %v951_v35 = vpop.f32.mrf.mxu2 }
 0x127   : > { %v1032_v7 = vadd.f32 %v951_v35, %v746_v51  ;;  %v1562_v34 = vsel %vm1437_vm5, %v1552_v18, %v1561_v20 }
 0x128   : > { %v747_v55 = vpop.f32.mrf.mxu1  ;;  %v1331_v4 = vpop.f32.mrf.mxu3 }
 0x129   : > { %v1402_v37 = vadd.f32 %v1321_v23, %v1032_v7  ;;  %v748_v47 = vadd.f32 %v747_v55, %v4269_v63  ;;  %v1223_v63 = vsel %vm826_vm4, %v1220_v19, %v1222_v14  ;;  %v1566_v55 = vrot.slane %v1564_v49, 1 }
 0x12a   : > { %v1695_v5 = vpop.f32.mrf.mxu0 }
 0x12b   : > { %v4354_v15 = vadd.f32 %v1693_v48, %v1402_v37 }
 0x12e   : > { %v953_v9 = vpop.f32.mrf.mxu2 }
 0x12f   : > { %v1033_v53 = vadd.f32 %v953_v9, %v748_v47  ;;  %v3717_v47 = vld [vmem:[%s3940_s5 + $0x88] sm:$0xff] }
 0x130   : > { %v750_v8 = vpop.f32.mrf.mxu1  ;;  %v1333_v51 = vpop.f32.mrf.mxu3 }
 0x131   : > { %v1403_v32 = vadd.f32 %v1323_v27, %v1033_v53  ;;  %v751_v45 = vadd.f32 %v750_v8, %v4278_v21  ;;  %v1567_v27 = vshll.u32 %v3715_v0, 16  ;;  %v855_v8 = vsel %vm826_vm4, %v852_v33, %v854_v38 }
 0x132   : > { %v1698_v23 = vpop.f32.mrf.mxu0  ;;  %v1573_v33 = vshrl.u32 %v3716_v2, 16 }
 0x133   : > { %3406 = vmatmul.msk.bf16.gmra.mxu1 %vm521_vm3, %v4010_v58  ;;  %3428 = vmatmul.msk.bf16.gmra.mxu2 %vm521_vm3, %v853_v60  ;;  %v4364_v48 = vadd.f32 %v1695_v5, %v1403_v32  ;;  %v1569_v37 = vrot.slane %v1567_v27, 2  ;;  %v1224_v60 = vrot.slane %v3717_v47, 1 }
 0x135   : > { %3532 = vmatmul.msk.bf16.gmra.mxu0 %vm521_vm3, %v1562_v34  ;;  %3516 = vmatmul.msk.bf16.gmra.mxu3 %vm521_vm3, %v1223_v63  ;;  %v1570_v21 = vor.u32 %v1569_v37, %v1566_v55  ;;  %v3781_v55 = vld [vmem:[%s3940_s5 + $0x78] sm:$0xff]  ;;  %v4394_v37 = vld [vmem:[%s3940_s5 + $0x90] sm:$0xff] }
 0x136   : > { %v956_v44 = vpop.f32.mrf.mxu2 }
 0x137   : > { %v1034_v35 = vadd.f32 %v956_v44, %v751_v45  ;;  %v1571_v34 = vsel %vm1437_vm5, %v1561_v20, %v1570_v21  ;;  %v1576_v45 = vshll.u32 %v3716_v2, 16 }
 0x138   : > { %v752_v18 = vpop.f32.mrf.mxu1  ;;  %v1336_v5 = vpop.f32.mrf.mxu3 }
 0x139   : > { %v1404_v7 = vadd.f32 %v1326_v26, %v1034_v35  ;;  %v753_v19 = vadd.f32 %v752_v18, %v4291_v40  ;;  %v1225_v40 = vsel %vm826_vm4, %v1222_v14, %v1224_v60  ;;  %v1575_v35 = vrot.slane %v1573_v33, 1  ;;  %v1098_v33 = vld [vmem:[%s3940_s5 + $0x98] sm:$0x1] }
 0x13a   : > { %v1700_v58 = vpop.f32.mrf.mxu0  ;;  %v1578_v18 = vrot.slane %v1576_v45, 2  ;;  %v856_v14 = vrot.slane %v3781_v55, 1 }
 0x13b   : > { %v4370_v11 = vadd.f32 %v1698_v23, %v1404_v7 }
 0x13c   : > { %v1579_v2 = vor.u32 %v1578_v18, %v1575_v35 }
 0x13e   : > { %v958_v9 = vpop.f32.mrf.mxu2 }
 0x13f   : > { %v1035_v0 = vadd.f32 %v958_v9, %v753_v19 }
 0x140   : > { %v755_v53 = vpop.f32.mrf.mxu1  ;;  %v4377_v63 = vpop.f32.mrf.mxu3 }
 0x141   : > { %v1405_v32 = vadd.f32 %v1328_v57, %v1035_v0  ;;  %v756_v57 = vadd.f32 %v755_v53, %v4175_v22  ;;  %v1226_v53 = vrot.slane %v4394_v37, 1 }
 0x142   : > { %v1703_v26 = vpop.f32.mrf.mxu0 }
 0x143   : > { %3407 = vmatmul.msk.bf16.gmra.mxu1 %vm521_vm3, %v4043_v39  ;;  %3429 = vmatmul.msk.bf16.gmra.mxu2 %vm521_vm3, %v855_v8  ;;  %v4382_v23 = vadd.f32 %v1700_v58, %v1405_v32 }
 0x145   : > { %3533 = vmatmul.msk.bf16.gmra.mxu0 %vm521_vm3, %v1571_v34  ;;  %3517 = vmatmul.msk.bf16.gmra.mxu3 %vm521_vm3, %v1225_v40  ;;  %v1227_v40 = vsel %vm826_vm4, %v1224_v60, %v1226_v53 }
 0x146   : > { %v961_v20 = vpop.f32.mrf.mxu2 }
 0x147   : > { %v1036_v49 = vadd.f32 %v961_v20, %v756_v57  ;;  %v1585_v57 = vshll.u32 %v3717_v47, 16 }
 0x148   : > { %v757_v27 = vpop.f32.mrf.mxu1  ;;  %v4388_v7 = vpop.f32.mrf.mxu3 }
 0x149   : > { %v1406_v39 = vadd.f32 %v1331_v4, %v1036_v49  ;;  %v758_v22 = vadd.f32 %v757_v27, %v4189_v46  ;;  %v857_v4 = vsel %vm826_vm4, %v854_v38, %v856_v14 }
 0x14a   : > { %v1705_v44 = vpop.f32.mrf.mxu0 }
 0x14b   : > { %v4390_v58 = vadd.f32 %v1703_v26, %v1406_v39  ;;  %v1580_v26 = vsel %vm1437_vm5, %v1570_v21, %v1579_v2 }
 0x14e   : > { %v963_v19 = vpop.f32.mrf.mxu2 }
 0x14f   : > { %v1037_v9 = vadd.f32 %v963_v19, %v758_v22 }
 0x150   : > { %v760_v0 = vpop.f32.mrf.mxu1  ;;  %v4400_v34 = vpop.f32.mrf.mxu3 }
 0x151   : > { %v1407_v8 = vadd.f32 %v1333_v51, %v1037_v9  ;;  %v761_v38 = vadd.f32 %v760_v0, %v4199_v50  ;;  %v1582_v51 = vshrl.u32 %v3717_v47, 16  ;;  %v4417_v50 = vld [vmem:[%s3940_s5 + $0x80] sm:$0xff] }
 0x152   : > { %v1708_v32 = vpop.f32.mrf.mxu0  ;;  %v858_v47 = vrot.slane %v4417_v50, 1 }
 0x153   : > { %3408 = vmatmul.msk.bf16.gmra.mxu1 %vm521_vm3, %v4078_v10  ;;  %3430 = vmatmul.msk.bf16.gmra.mxu2 %vm521_vm3, %v857_v4  ;;  %v4405_v46 = vadd.f32 %v1705_v44, %v1407_v8  ;;  %v1173_v10 = vunpack.c.l.b16 %v1098_v33  ;;  %v1584_v39 = vrot.slane %v1582_v51, 1  ;;  %v1587_v44 = vrot.slane %v1585_v57, 2  ;;  %v4426_v51 = vld [vmem:[%s3940_s5 + $0x14] sm:$0xf] }
 0x154   : > { %v859_v4 = vsel %vm826_vm4, %v856_v14, %v858_v47  ;;  %v4438_v14 = vld [vmem:[%s3940_s5 + $0x18] sm:$0xff] }
 0x155   : > { %5156 = vst [vmem:[#allocation16_spill] sm:$0xff] %v4405_v46  ;;  %3534 = vmatmul.msk.bf16.gmra.mxu0 %vm521_vm3, %v1580_v26  ;;  %3518 = vmatmul.msk.bf16.gmra.mxu3 %vm521_vm3, %v1227_v40  ;;  %v1192_v18 = vpack.c.b16 %v1173_v10, %v1173_v10  ;;  %v1588_v19 = vor.u32 %v1587_v44, %v1584_v39  ;;  %v2432_v44 = vshrl.u32 %v4438_v14, 16 }
 0x156   : > { %v966_v21 = vpop.f32.mrf.mxu2 }
 0x157   : > { %v1038_v45 = vadd.f32 %v966_v21, %v761_v38  ;;  %v1228_v8 = vrot.slane %v1192_v18, 1  ;;  %v2053_v38 = vld [vmem:[%s3940_s5 + $0x10] sm:$0xc]  ;;  %v2435_v18 = vshll.u32 %v4438_v14, 16 }
 0x158   : > { %v762_v20 = vpop.f32.mrf.mxu1  ;;  %v4412_v35 = vpop.f32.mrf.mxu3  ;;  %v2128_v33 = vunpack.c.l.b16 %v2053_v38 }
 0x159   : > { %v1408_v49 = vadd.f32 %v1336_v5, %v1038_v45  ;;  %v763_v22 = vadd.f32 %v762_v20, %v4215_v6  ;;  %v5146_v6 = vunpack.c.l.b16 %v4426_v51  ;;  %v1591_v20 = vshrl.u32 %v4394_v37, 16 }
 0x15a   : > { %v1710_v27 = vpop.f32.mrf.mxu0 }
 0x15b   : > { %v4414_v60 = vadd.f32 %v1708_v32, %v1408_v49  ;;  %v1589_v32 = vsel %vm1437_vm5, %v1579_v2, %v1588_v19  ;;  %v4442_v2 = vpack.c.b16 %v5146_v6, %v2128_v33  ;;  %v2434_v33 = vrot.slane %v2432_v44, 2 }
 0x15d   : > { %5157 = vst [vmem:[#allocation17_spill] sm:$0xff] %v4414_v60  ;;  %v2427_v39 = vshll.u32 %v4442_v2, 16 }
 0x15e   : > { %v968_v9 = vpop.f32.mrf.mxu2 }
 0x15f   : > { %v1039_v0 = vadd.f32 %v968_v9, %v763_v22  ;;  %v1593_v9 = vrot.slane %v1591_v20, 1  ;;  %v2429_v38 = vrot.slane %v2427_v39, 3 }
 0x160   : > { %v765_v5 = vpop.f32.mrf.mxu1  ;;  %v4428_v57 = vpop.f32.mrf.mxu3 }
 0x161   : > { %v1409_v26 = vadd.f32 %v4377_v63, %v1039_v0  ;;  %v1229_v63 = vsel %vm826_vm4, %v1226_v53, %v1228_v8  ;;  %v766_v45 = vadd.f32 %v765_v5, %v4225_v13  ;;  %v2424_v53 = vshrl.u32 %v4442_v2, 16 }
 0x162   : > { %v1713_v40 = vpop.f32.mrf.mxu0 }
 0x163   : > { %3409 = vmatmul.msk.bf16.gmra.mxu1 %vm521_vm3, %v3781_v55  ;;  %3431 = vmatmul.msk.bf16.gmra.mxu2 %vm521_vm3, %v859_v4  ;;  %v4433_v21 = vadd.f32 %v1710_v27, %v1409_v26  ;;  %v1594_v55 = vshll.u32 %v4394_v37, 16  ;;  %v1432_v37 = vld [vmem:[%s3940_s5 + $0x98] sm:$0x3]  ;;  %v3783_v4 = vld [vmem:[%s3940_s5 + $0x88] sm:$0xff] }
 0x164   : > { %v860_v8 = vrot.slane %v3783_v4, 1  ;;  %v1435_v6 = vunpack.c.l.b16 %v1432_v37 }
 0x165   : > { %5158 = vst [vmem:[#allocation18_spill] sm:$0xff] %v4433_v21  ;;  %3535 = vmatmul.msk.bf16.gmra.mxu0 %vm521_vm3, %v1589_v32  ;;  %3519 = vmatmul.msk.bf16.gmra.mxu3 %vm521_vm3, %v1229_v63  ;;  %v1596_v0 = vrot.slane %v1594_v55, 2  ;;  %v2426_v32 = vrot.slane %v2424_v53, 2  ;;  %v2437_v63 = vrot.slane %v2435_v18, 3 }
 0x166   : > { %v971_v10 = vpop.f32.mrf.mxu2  ;;  %v861_v55 = vsel %vm826_vm4, %v858_v47, %v860_v8  ;;  %v4463_v39 = vpack.c.b16 %v1435_v6, %v1435_v6 }
 0x167   : > { %v1040_v49 = vadd.f32 %v971_v10, %v766_v45  ;;  %v1597_v10 = vor.u32 %v1596_v0, %v1593_v9  ;;  %v2438_v60 = vor.u32 %v2437_v63, %v2434_v33 }
 0x168   : > { %v767_v27 = vpop.f32.mrf.mxu1  ;;  %v4453_v5 = vpop.f32.mrf.mxu3  ;;  %v1600_v6 = vshrl.u32 %v4463_v39, 16 }
 0x169   : > { %v1410_v13 = vadd.f32 %v4388_v7, %v1040_v49  ;;  %v768_v45 = vadd.f32 %v767_v27, %v4241_v29  ;;  %v2430_v49 = vor.u32 %v2429_v38, %v2426_v32  ;;  %v1598_v53 = vsel %vm1437_vm5, %v1588_v19, %v1597_v10 }
 0x16a   : > { %v1715_v22 = vpop.f32.mrf.mxu0  ;;  %v1602_v0 = vrot.slane %v1600_v6, 1  ;;  %v862_v38 = vrot.slane %v4060_v52, 1 }
 0x16b   : > { %v4457_v26 = vadd.f32 %v1713_v40, %v1410_v13  ;;  %v2439_v47 = vsel %vm2422_vm6, %v2430_v49, %v2438_v60 }
 0x16e   : > { %v973_v21 = vpop.f32.mrf.mxu2 }
 0x16f   : > { %v1041_v7 = vadd.f32 %v973_v21, %v768_v45  ;;  %v1603_v21 = vshll.u32 %v4463_v39, 16 }
 0x170   : > { %v770_v20 = vpop.f32.mrf.mxu1  ;;  %v4465_v44 = vpop.f32.mrf.mxu3 }
 0x171   : > { %v1411_v46 = vadd.f32 %v4400_v34, %v1041_v7  ;;  %v4475_v34 = vld [vmem:[%s3940_s5 + $0x20] sm:$0xff]  ;;  %v771_v19 = vadd.f32 %v770_v20, %v4251_v41  ;;  %v1605_v37 = vrot.slane %v1603_v21, 2  ;;  %v2796_v21 = vld [vmem:[%s3940_s5 + $0x10] sm:$0x8] }
 0x172   : > { %v1718_v40 = vpop.f32.mrf.mxu0  ;;  %v2444_v13 = vshll.u32 %v4475_v34, 16 }
 0x173   : > { %3410 = vmatmul.msk.bf16.gmra.mxu1 %vm521_vm3, %v4417_v50  ;;  %3432 = vmatmul.msk.bf16.gmra.mxu2 %vm521_vm3, %v861_v55  ;;  %v4470_v29 = vadd.f32 %v1715_v22, %v1411_v46  ;;  %v2441_v46 = vshrl.u32 %v4475_v34, 16  ;;  %v1606_v7 = vor.u32 %v1605_v37, %v1602_v0 }
 0x174   : > { %v2446_v63 = vrot.slane %v2444_v13, 3  ;;  %v5159_v13 = vunpack.c.l.b16 %v4087_v24 }
 0x175   : > { %3536 = vmatmul.msk.bf16.gmra.mxu0 %vm521_vm3, %v1598_v53  ;;  %3646 = vmatmul.msk.bf16.vlgmr.msra.gmra.mxu3 %vm521_vm3, %v2439_v47  ;;  %v2443_v33 = vrot.slane %v2441_v46, 2  ;;  %v1804_v53 = vld [vmem:[%s3940_s5 + $0x8] sm:$0xc] }
 0x176   : > { %v976_v27 = vpop.f32.mrf.mxu2 }
 0x177   : > { %v1042_v18 = vadd.f32 %v976_v27, %v771_v19  ;;  %v2447_v47 = vor.u32 %v2446_v63, %v2443_v33 }
 0x178   : > { %v772_v50 = vpop.f32.mrf.mxu1  ;;  %v4484_v41 = vpop.f32.mrf.mxu3 }
 0x179   : > { %v1412_v22 = vadd.f32 %v4412_v35, %v1042_v18  ;;  %v773_v45 = vadd.f32 %v772_v50, %v4267_v61  ;;  %v863_v35 = vsel %vm826_vm4, %v860_v8, %v862_v38  ;;  %v1808_v61 = vunpack.c.l.b16 %v1804_v53  ;;  %v4504_v18 = vld [vmem:[%s3940_s5 + $0x28] sm:$0xff] }
 0x17a   : > { %v1720_v9 = vpop.f32.mrf.mxu0  ;;  %v2448_v8 = vsel %vm2422_vm6, %v2438_v60, %v2447_v47  ;;  %v2453_v0 = vshll.u32 %v4504_v18, 16  ;;  %v5160_v38 = vunpack.c.l.b16 %v4426_v51  ;;  %v2803_v51 = vrot.slane %v4438_v14, 3 }
 0x17b   : > { %v4486_v32 = vadd.f32 %v1718_v40, %v1412_v22  ;;  %v1607_v40 = vsel %vm1437_vm5, %v1597_v10, %v1606_v7  ;;  %v2799_v10 = vunpack.c.l.b16 %v2796_v21 }
 0x17d   : > { %v2800_v33 = vpack.c.b16 %v5160_v38, %v2799_v10 }
 0x17e   : > { %v978_v20 = vpop.f32.mrf.mxu2 }
 0x17f   : > { %v1043_v55 = vadd.f32 %v978_v20, %v773_v45  ;;  %v3784_v45 = vld [vmem:[%s3940_s5 + $0x10] sm:$0xff]  ;;  %v2184_v20 = vrot.slane %v4442_v2, 2 }
 0x180   : > { %v775_v49 = vpop.f32.mrf.mxu1  ;;  %v4495_v52 = vpop.f32.mrf.mxu3  ;;  %v1812_v7 = vrot.slane %v3784_v45, 2 }
 0x181   : > { %v1413_v19 = vadd.f32 %v4428_v57, %v1043_v55  ;;  %v776_v57 = vadd.f32 %v775_v49, %v4275_v17  ;;  %v2185_v55 = vrot.slane %v4438_v14, 2 }
 0x182   : > { %v1723_v6 = vpop.f32.mrf.mxu0 }
 0x183   : > { %3411 = vmatmul.msk.bf16.gmra.mxu1 %vm521_vm3, %v3783_v4  ;;  %3433 = vmatmul.msk.bf16.gmra.mxu2 %vm521_vm3, %v863_v35  ;;  %v4499_v27 = vadd.f32 %v1720_v9, %v1413_v19  ;;  %v1809_v4 = vpack.c.b16 %v5159_v13, %v1808_v61  ;;  %v2450_v9 = vshrl.u32 %v4504_v18, 16  ;;  %v2455_v35 = vrot.slane %v2453_v0, 3 }
 0x184   : > { %v2186_v61 = vsel %vm1810_vm7, %v2184_v20, %v2185_v55 }
 0x185   : > { %3537 = vmatmul.msk.bf16.gmra.mxu0 %vm521_vm3, %v1607_v40  ;;  %3647 = vmatmul.msk.bf16.gmra.mxu3 %vm521_vm3, %v2448_v8  ;;  %v1811_v63 = vrot.slane %v1809_v4, 2  ;;  %v2452_v49 = vrot.slane %v2450_v9, 2 }
 0x186   : > { %v981_v50 = vpop.f32.mrf.mxu2 }
 0x187   : > { %v1044_v46 = vadd.f32 %v981_v50, %v776_v57  ;;  %v2456_v2 = vor.u32 %v2455_v35, %v2452_v49  ;;  %v2805_v35 = vrot.slane %v4475_v34, 3 }
 0x188   : > { %v777_v22 = vpop.f32.mrf.mxu1  ;;  %v4515_v17 = vpop.f32.mrf.mxu3 }
 0x189   : > { %v1414_v60 = vadd.f32 %v4453_v5, %v1044_v46  ;;  %v778_v53 = vadd.f32 %v777_v22, %v4289_v1  ;;  %v2802_v5 = vrot.slane %v2800_v33, 3  ;;  %v2457_v50 = vsel %vm2422_vm6, %v2447_v47, %v2456_v2  ;;  %v4537_v46 = vld [vmem:[%s3940_s5 + $0x30] sm:$0xff]  ;;  %v3785_v47 = vld [vmem:[%s3940_s5 + $0x18] sm:$0xff] }
 0x18a   : > { %v1725_v37 = vpop.f32.mrf.mxu0  ;;  %v2459_v9 = vshrl.u32 %v4537_v46, 16  ;;  %v2462_v0 = vshll.u32 %v4537_v46, 16 }
 0x18b   : > { %v4518_v24 = vadd.f32 %v1723_v6, %v1414_v60  ;;  %v1813_v6 = vsel %vm1810_vm7, %v1811_v63, %v1812_v7  ;;  %v2804_v10 = vsel %vm2801_vm8, %v2802_v5, %v2803_v51  ;;  %v1814_v63 = vrot.slane %v3785_v47, 2 }
 0x18c   : > { %v2461_v45 = vrot.slane %v2459_v9, 2  ;;  %v2464_v20 = vrot.slane %v2462_v0, 3 }
 0x18e   : > { %v983_v19 = vpop.f32.mrf.mxu2 }
 0x18f   : > { %v1045_v40 = vadd.f32 %v983_v19, %v778_v53 }
 0x190   : > { %v780_v21 = vpop.f32.mrf.mxu1  ;;  %v4528_v1 = vpop.f32.mrf.mxu3 }
 0x191   : > { %v1415_v8 = vadd.f32 %v4465_v44, %v1045_v40  ;;  %v781_v44 = vadd.f32 %v780_v21, %v4186_v43  ;;  %v2187_v43 = vrot.slane %v4475_v34, 2  ;;  %v2465_v21 = vor.u32 %v2464_v20, %v2461_v45 }
 0x192   : > { %v1728_v57 = vpop.f32.mrf.mxu0  ;;  %v2807_v45 = vrot.slane %v4504_v18, 3 }
 0x193   : > { %3542 = vmatmul.msk.bf16.vlgmr.msra.gmra.mxu1 %vm521_vm3, %v1813_v6  ;;  %3628 = vmatmul.msk.bf16.vlgmr.msra.gmra.mxu2 %vm521_vm3, %v2186_v61  ;;  %v4532_v14 = vadd.f32 %v1725_v37, %v1415_v8  ;;  %v2188_v40 = vsel %vm1810_vm7, %v2185_v55, %v2187_v43  ;;  %v2806_v8 = vsel %vm2801_vm8, %v2803_v51, %v2805_v35 }
 0x194   : > { %v2466_v34 = vsel %vm2422_vm6, %v2456_v2, %v2465_v21  ;;  %v3786_v2 = vld [vmem:[%s3940_s5 + $0x20] sm:$0xff] }
 0x195   : > { %3664 = vmatmul.msk.bf16.vlgmr.msra.gmra.mxu0 %vm521_vm3, %v2804_v10  ;;  %3648 = vmatmul.msk.bf16.gmra.mxu3 %vm521_vm3, %v2457_v50  ;;  %v1816_v0 = vrot.slane %v3786_v2, 2 }
 0x196   : > { %v986_v13 = vpop.f32.mrf.mxu2 }
 0x197   : > { %v1046_v4 = vadd.f32 %v986_v13, %v781_v44 }
 0x198   : > { %v782_v22 = vpop.f32.mrf.mxu1  ;;  %v4544_v38 = vpop.f32.mrf.mxu3 }
 0x199   : > { %v1416_v60 = vadd.f32 %v4484_v41, %v1046_v4  ;;  %v783_v49 = vadd.f32 %v782_v22, %v4197_v36  ;;  %v1815_v41 = vsel %vm1810_vm7, %v1812_v7, %v1814_v63  ;;  %v4565_v7 = vld [vmem:[%s3940_s5 + $0x38] sm:$0xff] }
 0x19a   : > { %v1730_v37 = vpop.f32.mrf.mxu0  ;;  %v2468_v50 = vshrl.u32 %v4565_v7, 16  ;;  %v2471_v44 = vshll.u32 %v4565_v7, 16 }
 0x19b   : > { %v4546_v33 = vadd.f32 %v1728_v57, %v1416_v60 }
 0x19c   : > { %v2470_v60 = vrot.slane %v2468_v50, 2 }
 0x19e   : > { %v988_v53 = vpop.f32.mrf.mxu2 }
 0x19f   : > { %v1047_v5 = vadd.f32 %v988_v53, %v783_v49 }
 0x1a0   : > { %v785_v19 = vpop.f32.mrf.mxu1  ;;  %v4556_v57 = vpop.f32.mrf.mxu3 }
 0x1a1   : > { %v1417_v6 = vadd.f32 %v4495_v52, %v1047_v5  ;;  %v786_v52 = vadd.f32 %v785_v19, %v4212_v3  ;;  %v2189_v3 = vrot.slane %v4504_v18, 2 }
 0x1a2   : > { %v1733_v61 = vpop.f32.mrf.mxu0 }
 0x1a3   : > { %3543 = vmatmul.msk.bf16.gmra.mxu1 %vm521_vm3, %v1815_v41  ;;  %3629 = vmatmul.msk.bf16.gmra.mxu2 %vm521_vm3, %v2188_v40  ;;  %v4560_v36 = vadd.f32 %v1730_v37, %v1417_v6  ;;  %v2473_v37 = vrot.slane %v2471_v44, 3  ;;  %v2190_v5 = vsel %vm1810_vm7, %v2187_v43, %v2189_v3  ;;  %v2808_v6 = vsel %vm2801_vm8, %v2805_v35, %v2807_v45 }
 0x1a5   : > { %3665 = vmatmul.msk.bf16.gmra.mxu0 %vm521_vm3, %v2806_v8  ;;  %3649 = vmatmul.msk.bf16.gmra.mxu3 %vm521_vm3, %v2466_v34  ;;  %v2474_v19 = vor.u32 %v2473_v37, %v2470_v60  ;;  %v2809_v60 = vrot.slane %v4537_v46, 3 }
 0x1a6   : > { %v991_v55 = vpop.f32.mrf.mxu2 }
 0x1a7   : > { %v1048_v10 = vadd.f32 %v991_v55, %v786_v52  ;;  %v2475_v18 = vsel %vm2422_vm6, %v2465_v21, %v2474_v19  ;;  %v3787_v21 = vld [vmem:[%s3940_s5 + $0x28] sm:$0xff] }
 0x1a8   : > { %v787_v51 = vpop.f32.mrf.mxu1  ;;  %v4572_v22 = vpop.f32.mrf.mxu3  ;;  %v1818_v44 = vrot.slane %v3787_v21, 2 }
 0x1a9   : > { %v1418_v13 = vadd.f32 %v4515_v17, %v1048_v10  ;;  %v788_v47 = vadd.f32 %v787_v51, %v4223_v12  ;;  %v1817_v17 = vsel %vm1810_vm7, %v1814_v63, %v1816_v0  ;;  %v4593_v63 = vld [vmem:[%s3940_s5 + $0x40] sm:$0xff] }
 0x1aa   : > { %v1735_v4 = vpop.f32.mrf.mxu0  ;;  %v2477_v34 = vshrl.u32 %v4593_v63, 16  ;;  %v2480_v52 = vshll.u32 %v4593_v63, 16 }
 0x1ab   : > { %v4574_v9 = vadd.f32 %v1733_v61, %v1418_v13 }
 0x1ac   : > { %v2479_v13 = vrot.slane %v2477_v34, 2 }
 0x1ae   : > { %v993_v20 = vpop.f32.mrf.mxu2 }
 0x1af   : > { %v1049_v49 = vadd.f32 %v993_v20, %v788_v47 }
 0x1b0   : > { %v790_v53 = vpop.f32.mrf.mxu1  ;;  %v4584_v61 = vpop.f32.mrf.mxu3 }
 0x1b1   : > { %v1419_v41 = vadd.f32 %v4528_v1, %v1049_v49  ;;  %v791_v1 = vadd.f32 %v790_v53, %v4238_v28  ;;  %v2191_v28 = vrot.slane %v4537_v46, 2 }
 0x1b2   : > { %v1738_v40 = vpop.f32.mrf.mxu0 }
 0x1b3   : > { %3544 = vmatmul.msk.bf16.gmra.mxu1 %vm521_vm3, %v1817_v17  ;;  %3630 = vmatmul.msk.bf16.gmra.mxu2 %vm521_vm3, %v2190_v5  ;;  %v4588_v12 = vadd.f32 %v1735_v4, %v1419_v41  ;;  %v2482_v4 = vrot.slane %v2480_v52, 3  ;;  %v2192_v49 = vsel %vm1810_vm7, %v2189_v3, %v2191_v28  ;;  %v2810_v41 = vsel %vm2801_vm8, %v2807_v45, %v2809_v60 }
 0x1b5   : > { %3666 = vmatmul.msk.bf16.gmra.mxu0 %vm521_vm3, %v2808_v6  ;;  %3650 = vmatmul.msk.bf16.gmra.mxu3 %vm521_vm3, %v2475_v18  ;;  %v2483_v53 = vor.u32 %v2482_v4, %v2479_v13  ;;  %v2811_v13 = vrot.slane %v4565_v7, 3 }
 0x1b6   : > { %v996_v43 = vpop.f32.mrf.mxu2 }
 0x1b7   : > { %v1050_v8 = vadd.f32 %v996_v43, %v791_v1  ;;  %v2484_v46 = vsel %vm2422_vm6, %v2474_v19, %v2483_v53  ;;  %v3788_v19 = vld [vmem:[%s3940_s5 + $0x30] sm:$0xff] }
 0x1b8   : > { %v792_v35 = vpop.f32.mrf.mxu1  ;;  %v4600_v51 = vpop.f32.mrf.mxu3  ;;  %v1820_v52 = vrot.slane %v3788_v19, 2 }
 0x1b9   : > { %v1420_v55 = vadd.f32 %v4544_v38, %v1050_v8  ;;  %v793_v2 = vadd.f32 %v792_v35, %v4249_v56  ;;  %v1819_v38 = vsel %vm1810_vm7, %v1816_v0, %v1818_v44  ;;  %v4621_v0 = vld [vmem:[%s3940_s5 + $0x48] sm:$0xff] }
 0x1ba   : > { %v1740_v10 = vpop.f32.mrf.mxu0  ;;  %v2486_v18 = vshrl.u32 %v4621_v0, 16  ;;  %v2489_v1 = vshll.u32 %v4621_v0, 16 }
 0x1bb   : > { %v4602_v50 = vadd.f32 %v1738_v40, %v1420_v55 }
 0x1bc   : > { %v2488_v55 = vrot.slane %v2486_v18, 2 }
 0x1be   : > { %v998_v37 = vpop.f32.mrf.mxu2 }
 0x1bf   : > { %v1051_v47 = vadd.f32 %v998_v37, %v793_v2 }
 0x1c0   : > { %v795_v20 = vpop.f32.mrf.mxu1  ;;  %v4612_v40 = vpop.f32.mrf.mxu3 }
 0x1c1   : > { %v1421_v17 = vadd.f32 %v4556_v57, %v1051_v47  ;;  %v796_v57 = vadd.f32 %v795_v20, %v4264_v59  ;;  %v2193_v59 = vrot.slane %v4565_v7, 2 }
 0x1c2   : > { %v1743_v5 = vpop.f32.mrf.mxu0 }
 0x1c3   : > { %3545 = vmatmul.msk.bf16.gmra.mxu1 %vm521_vm3, %v1819_v38  ;;  %3631 = vmatmul.msk.bf16.gmra.mxu2 %vm521_vm3, %v2192_v49  ;;  %v4616_v56 = vadd.f32 %v1740_v10, %v1421_v17  ;;  %v2491_v10 = vrot.slane %v2489_v1, 3  ;;  %v2194_v47 = vsel %vm1810_vm7, %v2191_v28, %v2193_v59  ;;  %v2812_v17 = vsel %vm2801_vm8, %v2809_v60, %v2811_v13  ;;  %v5161_v28 = vld [vmem:[#allocation14_spill] sm:$0xff] }
 0x1c5   : > { %3667 = vmatmul.msk.bf16.gmra.mxu0 %vm521_vm3, %v2810_v41  ;;  %3651 = vmatmul.msk.bf16.gmra.mxu3 %vm521_vm3, %v2484_v46  ;;  %v2492_v20 = vor.u32 %v2491_v10, %v2488_v55  ;;  %v5162_v10 = vld [vmem:[#allocation15_spill] sm:$0xff] }
 0x1c6   : > { %v1001_v3 = vpop.f32.mrf.mxu2 }
 0x1c7   : > { %v1052_v6 = vadd.f32 %v1001_v3, %v796_v57  ;;  %v2493_v7 = vsel %vm2422_vm6, %v2483_v53, %v2492_v20  ;;  %v3789_v53 = vld [vmem:[%s3940_s5 + $0x38] sm:$0xff] }
 0x1c8   : > { %v797_v45 = vpop.f32.mrf.mxu1  ;;  %v4628_v35 = vpop.f32.mrf.mxu3 }
 0x1c9   : > { %v1422_v43 = vadd.f32 %v4572_v22, %v1052_v6  ;;  %v798_v21 = vadd.f32 %v797_v45, %v4273_v16  ;;  %v1821_v22 = vsel %vm1810_vm7, %v1818_v44, %v1820_v52  ;;  %v4649_v44 = vld [vmem:[%s3940_s5 + $0x50] sm:$0xff] }
 0x1ca   : > { %v1745_v8 = vpop.f32.mrf.mxu0  ;;  %v2495_v57 = vshrl.u32 %v4649_v44, 16  ;;  %v2498_v3 = vshll.u32 %v4649_v44, 16 }
 0x1cb   : > { %v4630_v34 = vadd.f32 %v1743_v5, %v1422_v43  ;;  %v1822_v43 = vrot.slane %v3789_v53, 2 }
 0x1cc   : > { %v2497_v19 = vrot.slane %v2495_v57, 2  ;;  %v2500_v55 = vrot.slane %v2498_v3, 3 }
 0x1ce   : > { %v1003_v4 = vpop.f32.mrf.mxu2 }
 0x1cf   : > { %v1053_v2 = vadd.f32 %v1003_v4, %v798_v21  ;;  %v2813_v4 = vrot.slane %v4593_v63, 3 }
 0x1d0   : > { %v800_v37 = vpop.f32.mrf.mxu1  ;;  %v4640_v5 = vpop.f32.mrf.mxu3 }
 0x1d1   : > { %v1423_v38 = vadd.f32 %v4584_v61, %v1053_v2  ;;  %v801_v61 = vadd.f32 %v800_v37, %v5161_v28 }
 0x1d2   : > { %v1748_v49 = vpop.f32.mrf.mxu0 }
 0x1d3   : > { %3546 = vmatmul.msk.bf16.gmra.mxu1 %vm521_vm3, %v1821_v22  ;;  %3632 = vmatmul.msk.bf16.gmra.mxu2 %vm521_vm3, %v2194_v47  ;;  %v4644_v16 = vadd.f32 %v1745_v8, %v1423_v38  ;;  %v2195_v8 = vrot.slane %v4593_v63, 2  ;;  %v2501_v38 = vor.u32 %v2500_v55, %v2497_v19  ;;  %v2197_v55 = vrot.slane %v4621_v0, 2 }
 0x1d5   : > { %3668 = vmatmul.msk.bf16.gmra.mxu0 %vm521_vm3, %v2812_v17  ;;  %3652 = vmatmul.msk.bf16.gmra.mxu3 %vm521_vm3, %v2493_v7  ;;  %v2196_v47 = vsel %vm1810_vm7, %v2193_v59, %v2195_v8  ;;  %v2814_v7 = vsel %vm2801_vm8, %v2811_v13, %v2813_v4  ;;  %v4677_v59 = vld [vmem:[%s3940_s5 + $0x58] sm:$0xff] }
 0x1d6   : > { %v1006_v41 = vpop.f32.mrf.mxu2  ;;  %v2507_v57 = vshll.u32 %v4677_v59, 16 }
 0x1d7   : > { %v1054_v46 = vadd.f32 %v1006_v41, %v801_v61  ;;  %v5163_v61 = vld [vmem:[#allocation8_spill] sm:$0xff] }
 0x1d8   : > { %v802_v60 = vpop.f32.mrf.mxu1  ;;  %v4656_v18 = vpop.f32.mrf.mxu3 }
 0x1d9   : > { %v1424_v6 = vadd.f32 %v4600_v51, %v1054_v46  ;;  %v803_v21 = vadd.f32 %v802_v60, %v5162_v10  ;;  %v1823_v51 = vsel %vm1810_vm7, %v1820_v52, %v1822_v43  ;;  %v2502_v52 = vsel %vm2422_vm6, %v2492_v20, %v2501_v38  ;;  %v3790_v20 = vld [vmem:[%s3940_s5 + $0x40] sm:$0xff] }
 0x1da   : > { %v1750_v45 = vpop.f32.mrf.mxu0  ;;  %v2504_v60 = vshrl.u32 %v4677_v59, 16  ;;  %v1824_v19 = vrot.slane %v3790_v20, 2 }
 0x1db   : > { %v4658_v1 = vadd.f32 %v1748_v49, %v1424_v6 }
 0x1dc   : > { %v2506_v10 = vrot.slane %v2504_v60, 2 }
 0x1de   : > { %v1008_v2 = vpop.f32.mrf.mxu2 }
 0x1df   : > { %v1055_v37 = vadd.f32 %v1008_v2, %v803_v21  ;;  %v2509_v21 = vrot.slane %v2507_v57, 3  ;;  %v5164_v2 = vld [vmem:[#allocation9_spill] sm:$0xff] }
 0x1e0   : > { %v805_v22 = vpop.f32.mrf.mxu1  ;;  %v4668_v28 = vpop.f32.mrf.mxu3 }
 0x1e1   : > { %v1425_v49 = vadd.f32 %v4612_v40, %v1055_v37  ;;  %v806_v40 = vadd.f32 %v805_v22, %v5163_v61  ;;  %v2815_v22 = vrot.slane %v4621_v0, 3 }
 0x1e2   : > { %v1753_v17 = vpop.f32.mrf.mxu0 }
 0x1e3   : > { %3547 = vmatmul.msk.bf16.gmra.mxu1 %vm521_vm3, %v1823_v51  ;;  %3633 = vmatmul.msk.bf16.gmra.mxu2 %vm521_vm3, %v2196_v47  ;;  %v4672_v63 = vadd.f32 %v1750_v45, %v1425_v49 }
 0x1e5   : > { %3669 = vmatmul.msk.bf16.gmra.mxu0 %vm521_vm3, %v2814_v7  ;;  %3653 = vmatmul.msk.bf16.gmra.mxu3 %vm521_vm3, %v2502_v52  ;;  %v2198_v7 = vsel %vm1810_vm7, %v2195_v8, %v2197_v55  ;;  %v4705_v8 = vld [vmem:[%s3940_s5 + $0x60] sm:$0xff] }
 0x1e6   : > { %v1011_v41 = vpop.f32.mrf.mxu2  ;;  %v2513_v57 = vshrl.u32 %v4705_v8, 16 }
 0x1e7   : > { %v1056_v46 = vadd.f32 %v1011_v41, %v806_v40  ;;  %v2816_v40 = vsel %vm2801_vm8, %v2813_v4, %v2815_v22 }
 0x1e8   : > { %v807_v13 = vpop.f32.mrf.mxu1  ;;  %v4684_v45 = vpop.f32.mrf.mxu3 }
 0x1e9   : > { %v1426_v3 = vadd.f32 %v4628_v35, %v1056_v46  ;;  %v808_v37 = vadd.f32 %v807_v13, %v5164_v2  ;;  %v1825_v35 = vsel %vm1810_vm7, %v1822_v43, %v1824_v19  ;;  %v5165_v46 = vld [vmem:[#allocation10_spill] sm:$0xff] }
 0x1ea   : > { %v1755_v6 = vpop.f32.mrf.mxu0 }
 0x1eb   : > { %v4686_v53 = vadd.f32 %v1753_v17, %v1426_v3  ;;  %v2510_v17 = vor.u32 %v2509_v21, %v2506_v10  ;;  %v2516_v3 = vshll.u32 %v4705_v8, 16 }
 0x1ed   : > { %v2511_v43 = vsel %vm2422_vm6, %v2501_v38, %v2510_v17  ;;  %v3791_v38 = vld [vmem:[%s3940_s5 + $0x48] sm:$0xff] }
 0x1ee   : > { %v1013_v51 = vpop.f32.mrf.mxu2  ;;  %v1826_v2 = vrot.slane %v3791_v38, 2 }
 0x1ef   : > { %v1057_v47 = vadd.f32 %v1013_v51, %v808_v37  ;;  %v2199_v37 = vrot.slane %v4649_v44, 2  ;;  %v2515_v51 = vrot.slane %v2513_v57, 2 }
 0x1f0   : > { %v810_v49 = vpop.f32.mrf.mxu1  ;;  %v4696_v41 = vpop.f32.mrf.mxu3 }
 0x1f1   : > { %v1427_v52 = vadd.f32 %v4640_v5, %v1057_v47  ;;  %v811_v5 = vadd.f32 %v810_v49, %v5165_v46  ;;  %v2518_v47 = vrot.slane %v2516_v3, 3  ;;  %v5166_v49 = vld [vmem:[#allocation11_spill] sm:$0xff]  ;;  %v2200_v46 = vsel %vm1810_vm7, %v2197_v55, %v2199_v37  ;;  %v4733_v55 = vld [vmem:[%s3940_s5 + $0x68] sm:$0xff] }
 0x1f2   : > { %v1758_v61 = vpop.f32.mrf.mxu0  ;;  %v2522_v38 = vshrl.u32 %v4733_v55, 16 }
 0x1f3   : > { %3548 = vmatmul.msk.bf16.gmra.mxu1 %vm521_vm3, %v1825_v35  ;;  %3634 = vmatmul.msk.bf16.gmra.mxu2 %vm521_vm3, %v2198_v7  ;;  %v4700_v0 = vadd.f32 %v1755_v6, %v1427_v52  ;;  %v2817_v7 = vrot.slane %v4649_v44, 3 }
 0x1f5   : > { %3670 = vmatmul.msk.bf16.gmra.mxu0 %vm521_vm3, %v2816_v40  ;;  %3654 = vmatmul.msk.bf16.gmra.mxu3 %vm521_vm3, %v2511_v43 }
 0x1f6   : > { %v1016_v13 = vpop.f32.mrf.mxu2 }
 0x1f7   : > { %v1058_v60 = vadd.f32 %v1016_v13, %v811_v5 }
 0x1f8   : > { %v812_v4 = vpop.f32.mrf.mxu1  ;;  %v4712_v10 = vpop.f32.mrf.mxu3 }
 0x1f9   : > { %v1428_v6 = vadd.f32 %v4656_v18, %v1058_v60  ;;  %v813_v35 = vadd.f32 %v812_v4, %v5166_v49  ;;  %v1827_v18 = vsel %vm1810_vm7, %v1824_v19, %v1826_v2  ;;  %v2818_v60 = vsel %vm2801_vm8, %v2815_v22, %v2817_v7  ;;  %v5167_v4 = vld [vmem:[#allocation12_spill] sm:$0xff] }
 0x1fa   : > { %v1760_v20 = vpop.f32.mrf.mxu0 }
 0x1fb   : > { %v4714_v21 = vadd.f32 %v1758_v61, %v1428_v6  ;;  %v2519_v61 = vor.u32 %v2518_v47, %v2515_v51  ;;  %v2525_v51 = vshll.u32 %v4733_v55, 16 }
 0x1fd   : > { %v2520_v19 = vsel %vm2422_vm6, %v2510_v17, %v2519_v61  ;;  %v3792_v17 = vld [vmem:[%s3940_s5 + $0x50] sm:$0xff] }
 0x1fe   : > { %v1018_v52 = vpop.f32.mrf.mxu2 }
 0x1ff   : > { %v1059_v40 = vadd.f32 %v1018_v52, %v813_v35  ;;  %v1828_v52 = vrot.slane %v3792_v17, 2 }
 0x200   : > { %v815_v43 = vpop.f32.mrf.mxu1  ;;  %v4724_v57 = vpop.f32.mrf.mxu3 }
 0x201   : > { %v1429_v5 = vadd.f32 %v4668_v28, %v1059_v40  ;;  %v816_v28 = vadd.f32 %v815_v43, %v5167_v4  ;;  %v2201_v40 = vrot.slane %v4677_v59, 2  ;;  %v2524_v43 = vrot.slane %v2522_v38, 2 }
 0x202   : > { %v1763_v13 = vpop.f32.mrf.mxu0 }
 0x203   : > { %3549 = vmatmul.msk.bf16.gmra.mxu1 %vm521_vm3, %v1827_v18  ;;  %3635 = vmatmul.msk.bf16.gmra.mxu2 %vm521_vm3, %v2200_v46  ;;  %v4728_v44 = vadd.f32 %v1760_v20, %v1429_v5  ;;  %v2527_v18 = vrot.slane %v2525_v51, 3  ;;  %v5168_v46 = vld [vmem:[#allocation13_spill] sm:$0xff] }
 0x205   : > { %3671 = vmatmul.msk.bf16.gmra.mxu0 %vm521_vm3, %v2818_v60  ;;  %3655 = vmatmul.msk.bf16.gmra.mxu3 %vm521_vm3, %v2520_v19  ;;  %v2819_v60 = vrot.slane %v4677_v59, 3 }
 0x206   : > { %v1021_v3 = vpop.f32.mrf.mxu2 }
 0x207   : > { %v1060_v6 = vadd.f32 %v1021_v3, %v816_v28  ;;  %v2202_v3 = vsel %vm1810_vm7, %v2199_v37, %v2201_v40  ;;  %v2820_v17 = vsel %vm2801_vm8, %v2817_v7, %v2819_v60  ;;  %v4761_v37 = vld [vmem:[%s3940_s5 + $0x70] sm:$0xff] }
 0x208   : > { %v817_v22 = vpop.f32.mrf.mxu1  ;;  %v4740_v49 = vpop.f32.mrf.mxu3 }
 0x209   : > { %v1430_v20 = vadd.f32 %v4684_v45, %v1060_v6  ;;  %v818_v5 = vadd.f32 %v817_v22, %v5168_v46  ;;  %v1829_v45 = vsel %vm1810_vm7, %v1826_v2, %v1828_v52  ;;  %v4768_v46 = vld [vmem:[#allocation2] ss:$0 sm:$0xff] }
 0x20a   : > { %v1765_v47 = vpop.f32.mrf.mxu0 }
 0x20b   : > { %v4742_v35 = vadd.f32 %v1763_v13, %v1430_v20  ;;  %v2528_v13 = vor.u32 %v2527_v18, %v2524_v43  ;;  %v2531_v43 = vshrl.u32 %v4761_v37, 16 }
 0x20d   : > { %v2529_v2 = vsel %vm2422_vm6, %v2519_v61, %v2528_v13 }
 0x20e   : > { %v1023_v19 = vpop.f32.mrf.mxu2 }
 0x20f   : > { %v1061_v4 = vadd.f32 %v1023_v19, %v818_v5 }
 0x210   : > { %v1927_v28 = vpop.f32.mrf.mxu1  ;;  %v4752_v38 = vpop.f32.mrf.mxu3 }
 0x211   : > { %v1431_v6 = vadd.f32 %v4696_v41, %v1061_v4  ;;  %v2017_v41 = vadd.f32 %v1927_v28, %v4306_v31  ;;  %v4772_v4 = vld [vmem:[#allocation4] ss:$0 sm:$0xff]  ;;  %v3793_v31 = vld [vmem:[%s3940_s5 + $0x58] sm:$0xff] }
 0x212   : > { %v2905_v20 = vpop.f32.mrf.mxu0  ;;  %v1830_v28 = vrot.slane %v3793_v31, 2 }
 0x213   : > { %3550 = vmatmul.msk.bf16.gmra.mxu1 %vm521_vm3, %v1829_v45  ;;  %3636 = vmatmul.msk.bf16.gmra.mxu2 %vm521_vm3, %v2202_v3  ;;  %v4756_v59 = vadd.f32 %v1765_v47, %v1431_v6  ;;  %v2534_v47 = vshll.u32 %v4761_v37, 16  ;;  %v2203_v45 = vrot.slane %v4705_v8, 2  ;;  %v2533_v3 = vrot.slane %v2531_v43, 2 }
 0x215   : > { %5169 = vst [vmem:[#allocation14_spill] sm:$0xff] %v4756_v59  ;;  %3672 = vmatmul.msk.bf16.gmra.mxu0 %vm521_vm3, %v2820_v17  ;;  %3656 = vmatmul.msk.bf16.gmra.mxu3 %vm521_vm3, %v2529_v2  ;;  %v2536_v6 = vrot.slane %v2534_v47, 3  ;;  %v2204_v31 = vsel %vm1810_vm7, %v2201_v40, %v2203_v45  ;;  %v4797_v40 = vld [vmem:[%s3940_s5 + $0x78] sm:$0xff] }
 0x216   : > { %v2291_v22 = vpop.f32.mrf.mxu2 }
 0x217   : > { %v2381_v51 = vadd.f32 %v2291_v22, %v2017_v41  ;;  %v2537_v59 = vor.u32 %v2536_v6, %v2533_v3 }
 0x218   : > { %v1929_v7 = vpop.f32.mrf.mxu1  ;;  %v4770_v61 = vpop.f32.mrf.mxu3 }
 0x219   : > { %v2760_v18 = vadd.f32 %v4712_v10, %v2381_v51  ;;  %v2018_v2 = vadd.f32 %v1929_v7, %v4316_v30  ;;  %v2821_v10 = vrot.slane %v4705_v8, 3 }
 0x21a   : > { %v2907_v5 = vpop.f32.mrf.mxu0 }
 0x21b   : > { %v2995_v19 = vadd.f32 %v2905_v20, %v2760_v18  ;;  %v1831_v18 = vsel %vm1810_vm7, %v1828_v52, %v1830_v28  ;;  %v2822_v30 = vsel %vm2801_vm8, %v2819_v60, %v2821_v10 }
 0x21d   : > { %v3035_v17 = vmul.f32 %v4768_v46, %v2995_v19 }
 0x21e   : > { %v2293_v41 = vpop.f32.mrf.mxu2 }
 0x21f   : > { %v3075_v22 = vadd.f32 %v4772_v4, %v3035_v17  ;;  %v2382_v51 = vadd.f32 %v2293_v41, %v2018_v2  ;;  %v2540_v41 = vshrl.u32 %v4797_v40, 16 }
 0x220   : > { %v1932_v20 = vpop.f32.mrf.mxu1  ;;  %v4790_v8 = vpop.f32.mrf.mxu3 }
 0x221   : > { %v3111_v43 = vmax.f32 %v3075_v22, 0.0  ;;  %v2761_v47 = vadd.f32 %v4724_v57, %v2382_v51  ;;  %v2538_v57 = vsel %vm2422_vm6, %v2528_v13, %v2537_v59  ;;  %v2019_v3 = vadd.f32 %v1932_v20, %v4322_v42  ;;  %v3794_v20 = vld [vmem:[%s3940_s5 + $0x60] sm:$0xff] }
 0x222   : > { %v2910_v19 = vpop.f32.mrf.mxu0  ;;  %v2543_v13 = vshll.u32 %v4797_v40, 16 }
 0x223   : > { %v3147_v52 = vpack.c.bf16 %v3111_v43, %v3111_v43  ;;  %v2996_v7 = vadd.f32 %v2907_v5, %v2761_v47  ;;  %3551 = vmatmul.msk.bf16.gmra.mxu1 %vm521_vm3, %v1831_v18  ;;  %3637 = vmatmul.msk.bf16.gmra.mxu2 %vm521_vm3, %v2204_v31  ;;  %v1832_v47 = vrot.slane %v3794_v20, 2 }
 0x225   : > { %3673 = vmatmul.msk.bf16.gmra.mxu0 %vm521_vm3, %v2822_v30  ;;  %3184 = vst.msk [vmem:[%s4788_s19] sm:$0xf] %vm3183_vm9, %v3147_v52  ;;  %v3036_v60 = vmul.f32 %v4768_v46, %v2996_v7  ;;  %3657 = vmatmul.msk.bf16.gmra.mxu3 %vm521_vm3, %v2538_v57  ;;  %v2205_v30 = vrot.slane %v4733_v55, 2  ;;  %v2542_v52 = vrot.slane %v2540_v41, 2  ;;  %v2545_v7 = vrot.slane %v2543_v13, 3 }
 0x226   : > { %v2296_v6 = vpop.f32.mrf.mxu2 }
 0x227   : > { %v3076_v5 = vadd.f32 %v4772_v4, %v3036_v60  ;;  %v2383_v17 = vadd.f32 %v2296_v6, %v2019_v3  ;;  %v2823_v3 = vrot.slane %v4733_v55, 3  ;;  %v2206_v41 = vsel %vm1810_vm7, %v2203_v45, %v2205_v30  ;;  %v4829_v45 = vld [vmem:[%s3940_s5 + $0x80] sm:$0xff] }
 0x228   : > { %v1934_v2 = vpop.f32.mrf.mxu1  ;;  %v4808_v31 = vpop.f32.mrf.mxu3  ;;  %v2546_v13 = vor.u32 %v2545_v7, %v2542_v52 }
 0x229   : > { %v3112_v22 = vmax.f32 %v3076_v5, 0.0  ;;  %v2762_v51 = vadd.f32 %v4740_v49, %v2383_v17  ;;  %v2020_v60 = vadd.f32 %v1934_v2, %v4332_v62  ;;  %v1833_v17 = vsel %vm1810_vm7, %v1830_v28, %v1832_v47 }
 0x22a   : > { %v2912_v18 = vpop.f32.mrf.mxu0  ;;  %v2824_v62 = vsel %vm2801_vm8, %v2821_v10, %v2823_v3  ;;  %v2547_v28 = vsel %vm2422_vm6, %v2537_v59, %v2546_v13  ;;  %v2552_v59 = vshll.u32 %v4829_v45, 16 }
 0x22b   : > { %v3148_v43 = vpack.c.bf16 %v3112_v22, %v3112_v22  ;;  %v2997_v42 = vadd.f32 %v2910_v19, %v2762_v51 }
 0x22d   : > { %3185 = vst.msk [vmem:[%s4788_s19 + $0x4] sm:$0xf] %vm3183_vm9, %v3148_v43  ;;  %v3037_v57 = vmul.f32 %v4768_v46, %v2997_v42 }
 0x22e   : > { %v2298_v49 = vpop.f32.mrf.mxu2 }
 0x22f   : > { %v3077_v6 = vadd.f32 %v4772_v4, %v3037_v57  ;;  %v2384_v5 = vadd.f32 %v2298_v49, %v2020_v60  ;;  %v2549_v57 = vshrl.u32 %v4829_v45, 16 }
 0x230   : > { %v1937_v19 = vpop.f32.mrf.mxu1  ;;  %v4822_v2 = vpop.f32.mrf.mxu3 }
 0x231   : > { %v3113_v22 = vmax.f32 %v3077_v6, 0.0  ;;  %v2763_v51 = vadd.f32 %v4752_v38, %v2384_v5  ;;  %v2021_v10 = vadd.f32 %v1937_v19, %v4338_v25  ;;  %v3795_v19 = vld [vmem:[%s3940_s5 + $0x68] sm:$0xff] }
 0x232   : > { %v2915_v43 = vpop.f32.mrf.mxu0 }
 0x233   : > { %v3149_v55 = vpack.c.bf16 %v3113_v22, %v3113_v22  ;;  %v2998_v42 = vadd.f32 %v2912_v18, %v2763_v51  ;;  %3552 = vmatmul.msk.bf16.gmra.mxu1 %vm521_vm3, %v1833_v17  ;;  %3638 = vmatmul.msk.bf16.gmra.mxu2 %vm521_vm3, %v2206_v41  ;;  %v1834_v41 = vrot.slane %v3795_v19, 2  ;;  %v2207_v22 = vrot.slane %v4761_v37, 2 }
 0x234   : > { %v2551_v51 = vrot.slane %v2549_v57, 2 }
 0x235   : > { %3674 = vmatmul.msk.bf16.gmra.mxu0 %vm521_vm3, %v2824_v62  ;;  %3186 = vst.msk [vmem:[%s4788_s19 + $0x8] sm:$0xf] %vm3183_vm9, %v3149_v55  ;;  %v3038_v38 = vmul.f32 %v4768_v46, %v2998_v42  ;;  %3658 = vmatmul.msk.bf16.gmra.mxu3 %vm521_vm3, %v2547_v28  ;;  %v2554_v62 = vrot.slane %v2552_v59, 3  ;;  %v2825_v28 = vrot.slane %v4761_v37, 3 }
 0x236   : > { %v2301_v20 = vpop.f32.mrf.mxu2 }
 0x237   : > { %v3078_v18 = vadd.f32 %v4772_v4, %v3038_v38  ;;  %v2385_v52 = vadd.f32 %v2301_v20, %v2021_v10  ;;  %v1835_v20 = vsel %vm1810_vm7, %v1832_v47, %v1834_v41 }
 0x238   : > { %v1939_v7 = vpop.f32.mrf.mxu1  ;;  %v4840_v5 = vpop.f32.mrf.mxu3 }
 0x239   : > { %v3114_v60 = vmax.f32 %v3078_v18, 0.0  ;;  %v2764_v49 = vadd.f32 %v4770_v61, %v2385_v52  ;;  %v2022_v42 = vadd.f32 %v1939_v7, %v4348_v54  ;;  %v2208_v18 = vsel %vm1810_vm7, %v2205_v30, %v2207_v22  ;;  %v4861_v30 = vld [vmem:[%s3940_s5 + $0x88] sm:$0xff] }
 0x23a   : > { %v2917_v6 = vpop.f32.mrf.mxu0  ;;  %v2555_v52 = vor.u32 %v2554_v62, %v2551_v51  ;;  %v2826_v54 = vsel %vm2801_vm8, %v2823_v3, %v2825_v28  ;;  %v2558_v51 = vshrl.u32 %v4861_v30, 16 }
 0x23b   : > { %v3150_v17 = vpack.c.bf16 %v3114_v60, %v3114_v60  ;;  %v2999_v25 = vadd.f32 %v2915_v43, %v2764_v49 }
 0x23c   : > { %v2556_v47 = vsel %vm2422_vm6, %v2546_v13, %v2555_v52  ;;  %v2561_v13 = vshll.u32 %v4861_v30, 16 }
 0x23d   : > { %3187 = vst.msk [vmem:[%s4788_s19 + $0xc] sm:$0xf] %vm3183_vm9, %v3150_v17  ;;  %v3039_v55 = vmul.f32 %v4768_v46, %v2999_v25 }
 0x23e   : > { %v2303_v61 = vpop.f32.mrf.mxu2 }
 0x23f   : > { %v3079_v38 = vadd.f32 %v4772_v4, %v3039_v55  ;;  %v2386_v10 = vadd.f32 %v2303_v61, %v2022_v42 }
 0x240   : > { %v1942_v43 = vpop.f32.mrf.mxu1  ;;  %v4854_v7 = vpop.f32.mrf.mxu3 }
 0x241   : > { %v3115_v57 = vmax.f32 %v3079_v38, 0.0  ;;  %v2765_v59 = vadd.f32 %v4790_v8, %v2386_v10  ;;  %v2023_v3 = vadd.f32 %v1942_v43, %v4354_v15  ;;  %v3796_v10 = vld [vmem:[%s3940_s5 + $0x70] sm:$0xff] }
 0x242   : > { %v2920_v60 = vpop.f32.mrf.mxu0  ;;  %v1836_v43 = vrot.slane %v3796_v10, 2 }
 0x243   : > { %v3151_v37 = vpack.c.bf16 %v3115_v57, %v3115_v57  ;;  %v3000_v49 = vadd.f32 %v2917_v6, %v2765_v59  ;;  %3553 = vmatmul.msk.bf16.gmra.mxu1 %vm521_vm3, %v1835_v20  ;;  %3639 = vmatmul.msk.bf16.gmra.mxu2 %vm521_vm3, %v2208_v18  ;;  %v2209_v20 = vrot.slane %v4797_v40, 2  ;;  %v2560_v18 = vrot.slane %v2558_v51, 2 }
 0x244   : > { %v2563_v57 = vrot.slane %v2561_v13, 3 }
 0x245   : > { %3675 = vmatmul.msk.bf16.gmra.mxu0 %vm521_vm3, %v2826_v54  ;;  %3188 = vst.msk [vmem:[%s4788_s19 + $0x10] sm:$0xf] %vm3183_vm9, %v3151_v37  ;;  %v3040_v8 = vmul.f32 %v4768_v46, %v3000_v49  ;;  %3659 = vmatmul.msk.bf16.gmra.mxu3 %vm521_vm3, %v2556_v47  ;;  %v2827_v37 = vrot.slane %v4797_v40, 3 }
 0x246   : > { %v2306_v17 = vpop.f32.mrf.mxu2 }
 0x247   : > { %v3080_v6 = vadd.f32 %v4772_v4, %v3040_v8  ;;  %v2387_v25 = vadd.f32 %v2306_v17, %v2023_v3  ;;  %v1837_v8 = vsel %vm1810_vm7, %v1834_v41, %v1836_v43  ;;  %v2210_v3 = vsel %vm1810_vm7, %v2207_v22, %v2209_v20  ;;  %v4893_v22 = vld [vmem:[%s3940_s5 + $0x90] sm:$0xff] }
 0x248   : > { %v1944_v19 = vpop.f32.mrf.mxu1  ;;  %v4872_v61 = vpop.f32.mrf.mxu3  ;;  %v2564_v17 = vor.u32 %v2563_v57, %v2560_v18 }
 0x249   : > { %v3116_v62 = vmax.f32 %v3080_v6, 0.0  ;;  %v2766_v55 = vadd.f32 %v4808_v31, %v2387_v25  ;;  %v2024_v54 = vadd.f32 %v1944_v19, %v4364_v48  ;;  %v2828_v48 = vsel %vm2801_vm8, %v2825_v28, %v2827_v37 }
 0x24a   : > { %v2922_v42 = vpop.f32.mrf.mxu0  ;;  %v2565_v41 = vsel %vm2422_vm6, %v2555_v52, %v2564_v17  ;;  %v2570_v52 = vshll.u32 %v4893_v22, 16 }
 0x24b   : > { %v3152_v38 = vpack.c.bf16 %v3116_v62, %v3116_v62  ;;  %v3001_v15 = vadd.f32 %v2920_v60, %v2766_v55 }
 0x24d   : > { %3189 = vst.msk [vmem:[%s4788_s19 + $0x14] sm:$0xf] %vm3183_vm9, %v3152_v38  ;;  %v3041_v59 = vmul.f32 %v4768_v46, %v3001_v15  ;;  %v2567_v15 = vshrl.u32 %v4893_v22, 16 }
 0x24e   : > { %v2308_v31 = vpop.f32.mrf.mxu2 }
 0x24f   : > { %v3081_v49 = vadd.f32 %v4772_v4, %v3041_v59  ;;  %v2388_v47 = vadd.f32 %v2308_v31, %v2024_v54  ;;  %v3797_v31 = vld [vmem:[%s3940_s5 + $0x78] sm:$0xff] }
 0x250   : > { %v1947_v60 = vpop.f32.mrf.mxu1  ;;  %v4886_v19 = vpop.f32.mrf.mxu3 }
 0x251   : > { %v3117_v6 = vmax.f32 %v3081_v49, 0.0  ;;  %v2767_v25 = vadd.f32 %v4822_v2, %v2388_v47  ;;  %v2025_v28 = vadd.f32 %v1947_v60, %v4370_v11  ;;  %v1838_v49 = vrot.slane %v3797_v31, 2 }
 0x252   : > { %v2925_v51 = vpop.f32.mrf.mxu0  ;;  %v2211_v47 = vrot.slane %v4829_v45, 2  ;;  %v2569_v60 = vrot.slane %v2567_v15, 2 }
 0x253   : > { %v3153_v40 = vpack.c.bf16 %v3117_v6, %v3117_v6  ;;  %v3002_v13 = vadd.f32 %v2922_v42, %v2767_v25  ;;  %3554 = vmatmul.msk.bf16.gmra.mxu1 %vm521_vm3, %v1837_v8  ;;  %3640 = vmatmul.msk.bf16.gmra.mxu2 %vm521_vm3, %v2210_v3  ;;  %v2572_v8 = vrot.slane %v2570_v52, 3  ;;  %v2829_v25 = vrot.slane %v4829_v45, 3 }
 0x255   : > { %3676 = vmatmul.msk.bf16.gmra.mxu0 %vm521_vm3, %v2828_v48  ;;  %3190 = vst.msk [vmem:[%s4788_s19 + $0x18] sm:$0xf] %vm3183_vm9, %v3153_v40  ;;  %v3042_v2 = vmul.f32 %v4768_v46, %v3002_v13  ;;  %3660 = vmatmul.msk.bf16.gmra.mxu3 %vm521_vm3, %v2565_v41  ;;  %v1839_v13 = vsel %vm1810_vm7, %v1836_v43, %v1838_v49 }
 0x256   : > { %v2311_v62 = vpop.f32.mrf.mxu2  ;;  %v2212_v41 = vsel %vm1810_vm7, %v2209_v20, %v2211_v47  ;;  %v4925_v20 = vld [vmem:[%s3940_s5 + $0x98] sm:$0xff] }
 0x257   : > { %v3082_v55 = vadd.f32 %v4772_v4, %v3042_v2  ;;  %v2389_v42 = vadd.f32 %v2311_v62, %v2025_v28  ;;  %v2573_v2 = vor.u32 %v2572_v8, %v2569_v60 }
 0x258   : > { %v1949_v38 = vpop.f32.mrf.mxu1  ;;  %v4904_v59 = vpop.f32.mrf.mxu3 }
 0x259   : > { %v3118_v10 = vmax.f32 %v3082_v55, 0.0  ;;  %v2768_v18 = vadd.f32 %v4840_v5, %v2389_v42  ;;  %v2026_v6 = vadd.f32 %v1949_v38, %v4382_v23  ;;  %v2830_v23 = vsel %vm2801_vm8, %v2827_v37, %v2829_v25 }
 0x25a   : > { %v2927_v57 = vpop.f32.mrf.mxu0  ;;  %v2574_v43 = vsel %vm2422_vm6, %v2564_v17, %v2573_v2  ;;  %v2579_v17 = vshll.u32 %v4925_v20, 16 }
 0x25b   : > { %v3154_v54 = vpack.c.bf16 %v3118_v10, %v3118_v10  ;;  %v3003_v11 = vadd.f32 %v2925_v51, %v2768_v18 }
 0x25d   : > { %3191 = vst.msk [vmem:[%s4788_s19 + $0x1c] sm:$0xf] %vm3183_vm9, %v3154_v54  ;;  %v3043_v3 = vmul.f32 %v4768_v46, %v3003_v11 }
 0x25e   : > { %v2313_v5 = vpop.f32.mrf.mxu2 }
 0x25f   : > { %v3083_v48 = vadd.f32 %v4772_v4, %v3043_v3  ;;  %v2390_v40 = vadd.f32 %v2313_v5, %v2026_v6  ;;  %v3798_v3 = vld [vmem:[%s3940_s5 + $0x80] sm:$0xff]  ;;  %v2213_v5 = vrot.slane %v4861_v30, 2 }
 0x260   : > { %v1952_v51 = vpop.f32.mrf.mxu1  ;;  %v4918_v42 = vpop.f32.mrf.mxu3  ;;  %v1840_v6 = vrot.slane %v3798_v3, 2 }
 0x261   : > { %v3119_v28 = vmax.f32 %v3083_v48, 0.0  ;;  %v2769_v62 = vadd.f32 %v4854_v7, %v2390_v40  ;;  %v2027_v37 = vadd.f32 %v1952_v51, %v4390_v58  ;;  %v2581_v40 = vrot.slane %v2579_v17, 3 }
 0x262   : > { %v2930_v55 = vpop.f32.mrf.mxu0 }
 0x263   : > { %v3155_v45 = vpack.c.bf16 %v3119_v28, %v3119_v28  ;;  %v3004_v38 = vadd.f32 %v2927_v57, %v2769_v62  ;;  %3555 = vmatmul.msk.bf16.gmra.mxu1 %vm521_vm3, %v1839_v13  ;;  %3641 = vmatmul.msk.bf16.gmra.mxu2 %vm521_vm3, %v2212_v41  ;;  %v2576_v57 = vshrl.u32 %v4925_v20, 16  ;;  %v5170_v13 = vld [vmem:[#allocation16_spill] sm:$0xff] }
 0x265   : > { %3677 = vmatmul.msk.bf16.gmra.mxu0 %vm521_vm3, %v2830_v23  ;;  %3192 = vst.msk [vmem:[%s4788_s19 + $0x20] sm:$0xf] %vm3183_vm9, %v3155_v45  ;;  %v3044_v7 = vmul.f32 %v4768_v46, %v3004_v38  ;;  %3661 = vmatmul.msk.bf16.gmra.mxu3 %vm521_vm3, %v2574_v43  ;;  %v2578_v48 = vrot.slane %v2576_v57, 2  ;;  %v1841_v45 = vsel %vm1810_vm7, %v1838_v49, %v1840_v6 }
 0x266   : > { %v2316_v15 = vpop.f32.mrf.mxu2  ;;  %v2214_v38 = vsel %vm1810_vm7, %v2211_v47, %v2213_v5 }
 0x267   : > { %v3084_v52 = vadd.f32 %v4772_v4, %v3044_v7  ;;  %v2391_v10 = vadd.f32 %v2316_v15, %v2027_v37  ;;  %v2582_v43 = vor.u32 %v2581_v40, %v2578_v48 }
 0x268   : > { %v1954_v18 = vpop.f32.mrf.mxu1  ;;  %v4936_v60 = vpop.f32.mrf.mxu3 }
 0x269   : > { %v3120_v54 = vmax.f32 %v3084_v52, 0.0  ;;  %v2770_v11 = vadd.f32 %v4872_v61, %v2391_v10  ;;  %v2028_v41 = vadd.f32 %v1954_v18, %v5170_v13  ;;  %v2831_v61 = vrot.slane %v4861_v30, 3  ;;  %v2417_v10 = vld [vmem:[%s3940_s5 + $0xa0] sm:$0x7] }
 0x26a   : > { %v2932_v31 = vpop.f32.mrf.mxu0  ;;  %v2420_v30 = vunpack.c.l.b16 %v2417_v10  ;;  %v2583_v49 = vsel %vm2422_vm6, %v2573_v2, %v2582_v43  ;;  %v2833_v10 = vrot.slane %v4893_v22, 3 }
 0x26b   : > { %v3156_v8 = vpack.c.bf16 %v3120_v54, %v3120_v54  ;;  %v3005_v58 = vadd.f32 %v2930_v55, %v2770_v11  ;;  %v2832_v52 = vsel %vm2801_vm8, %v2829_v25, %v2831_v61  ;;  %v5171_v25 = vld [vmem:[#allocation17_spill] sm:$0xff] }
 0x26c   : > { %v4957_v47 = vpack.c.b16 %v2420_v30, %v2420_v30 }
 0x26d   : > { %3193 = vst.msk [vmem:[%s4788_s19 + $0x24] sm:$0xf] %vm3183_vm9, %v3156_v8  ;;  %v3045_v51 = vmul.f32 %v4768_v46, %v3005_v58 }
 0x26e   : > { %v2318_v28 = vpop.f32.mrf.mxu2  ;;  %v2585_v3 = vshrl.u32 %v4957_v47, 16  ;;  %v2588_v2 = vshll.u32 %v4957_v47, 16 }
 0x26f   : > { %v3085_v62 = vadd.f32 %v4772_v4, %v3045_v51  ;;  %v2392_v23 = vadd.f32 %v2318_v28, %v2028_v41 }
 0x270   : > { %v1957_v55 = vpop.f32.mrf.mxu1  ;;  %v4951_v18 = vpop.f32.mrf.mxu3 }
 0x271   : > { %v3121_v7 = vmax.f32 %v3085_v62, 0.0  ;;  %v2771_v37 = vadd.f32 %v4886_v19, %v2392_v23  ;;  %v2029_v54 = vadd.f32 %v1957_v55, %v5171_v25  ;;  %v3799_v62 = vld [vmem:[%s3940_s5 + $0x88] sm:$0xff]  ;;  %v2215_v55 = vrot.slane %v4893_v22, 2 }
 0x272   : > { %v2935_v15 = vpop.f32.mrf.mxu0  ;;  %v1842_v23 = vrot.slane %v3799_v62, 2 }
 0x273   : > { %v3157_v57 = vpack.c.bf16 %v3121_v7, %v3121_v7  ;;  %v3006_v17 = vadd.f32 %v2932_v31, %v2771_v37  ;;  %3556 = vmatmul.msk.bf16.gmra.mxu1 %vm521_vm3, %v1841_v45  ;;  %3642 = vmatmul.msk.bf16.gmra.mxu2 %vm521_vm3, %v2214_v38  ;;  %v2587_v45 = vrot.slane %v2585_v3, 2  ;;  %v2590_v38 = vrot.slane %v2588_v2, 3  ;;  %v5172_v37 = vld [vmem:[#allocation18_spill] sm:$0xff] }
 0x275   : > { %3678 = vmatmul.msk.bf16.gmra.mxu0 %vm521_vm3, %v2832_v52  ;;  %3194 = vst.msk [vmem:[%s4788_s19 + $0x28] sm:$0xf] %vm3183_vm9, %v3157_v57  ;;  %v3046_v19 = vmul.f32 %v4768_v46, %v3006_v17  ;;  %3662 = vmatmul.msk.bf16.gmra.mxu3 %vm521_vm3, %v2583_v49  ;;  %v1843_v17 = vsel %vm1810_vm7, %v1840_v6, %v1842_v23 }
 0x276   : > { %v2321_v11 = vpop.f32.mrf.mxu2  ;;  %v2216_v49 = vsel %vm1810_vm7, %v2213_v5, %v2215_v55 }
 0x277   : > { %v3086_v31 = vadd.f32 %v4772_v4, %v3046_v19  ;;  %v2393_v8 = vadd.f32 %v2321_v11, %v2029_v54  ;;  %v2591_v19 = vor.u32 %v2590_v38, %v2587_v45  ;;  %v3800_v45 = vld [vmem:[%s3940_s5 + $0x90] sm:$0xff] }
 0x278   : > { %v1959_v58 = vpop.f32.mrf.mxu1  ;;  %v4968_v13 = vpop.f32.mrf.mxu3  ;;  %v1844_v38 = vrot.slane %v3800_v45, 2 }
 0x279   : > { %v3122_v48 = vmax.f32 %v3086_v31, 0.0  ;;  %v2772_v40 = vadd.f32 %v4904_v59, %v2393_v8  ;;  %v2030_v52 = vadd.f32 %v1959_v58, %v5172_v37  ;;  %v2834_v31 = vsel %vm2801_vm8, %v2831_v61, %v2833_v10 }
 0x27a   : > { %v2937_v51 = vpop.f32.mrf.mxu0  ;;  %v2592_v6 = vsel %vm2422_vm6, %v2582_v43, %v2591_v19 }
 0x27b   : > { %v3158_v41 = vpack.c.bf16 %v3122_v48, %v3122_v48  ;;  %v3007_v28 = vadd.f32 %v2935_v15, %v2772_v40 }
 0x27d   : > { %3195 = vst.msk [vmem:[%s4788_s19 + $0x2c] sm:$0xf] %vm3183_vm9, %v3158_v41  ;;  %v3047_v7 = vmul.f32 %v4768_v46, %v3007_v28 }
 0x27e   : > { %v2323_v59 = vpop.f32.mrf.mxu2 }
 0x27f   : > { %v3087_v30 = vadd.f32 %v4772_v4, %v3047_v7  ;;  %v2394_v57 = vadd.f32 %v2323_v59, %v2030_v52  ;;  %v2835_v52 = vrot.slane %v4925_v20, 3 }
 0x280   : > { %v1962_v15 = vpop.f32.mrf.mxu1  ;;  %v4982_v8 = vpop.f32.mrf.mxu3 }
 0x281   : > { %v3123_v25 = vmax.f32 %v3087_v30, 0.0  ;;  %v2773_v54 = vadd.f32 %v4918_v42, %v2394_v57  ;;  %v2031_v5 = vadd.f32 %v1962_v15, %v4457_v26  ;;  %v2217_v26 = vrot.slane %v4925_v20, 2 }
 0x282   : > { %v2940_v11 = vpop.f32.mrf.mxu0  ;;  %v1845_v15 = vsel %vm1810_vm7, %v1842_v23, %v1844_v38 }
 0x283   : > { %v3159_v22 = vpack.c.bf16 %v3123_v25, %v3123_v25  ;;  %v3008_v58 = vadd.f32 %v2937_v51, %v2773_v54  ;;  %3557 = vmatmul.msk.bf16.gmra.mxu1 %vm521_vm3, %v1843_v17  ;;  %3643 = vmatmul.msk.bf16.gmra.mxu2 %vm521_vm3, %v2216_v49  ;;  %v2218_v17 = vsel %vm1810_vm7, %v2215_v55, %v2217_v26 }
 0x284   : > { %v2836_v54 = vsel %vm2801_vm8, %v2833_v10, %v2835_v52 }
 0x285   : > { %3679 = vmatmul.msk.bf16.gmra.mxu0 %vm521_vm3, %v2834_v31  ;;  %3196 = vst.msk [vmem:[%s4788_s19 + $0x30] sm:$0xf] %vm3183_vm9, %v3159_v22  ;;  %v3048_v42 = vmul.f32 %v4768_v46, %v3008_v58  ;;  %3663 = vmatmul.msk.bf16.gmra.mxu3 %vm521_vm3, %v2592_v6 }
 0x286   : > { %v2326_v61 = vpop.f32.mrf.mxu2 }
 0x287   : > { %v3088_v3 = vadd.f32 %v4772_v4, %v3048_v42  ;;  %v2395_v2 = vadd.f32 %v2326_v61, %v2031_v5 }
 0x288   : > { %v1964_v48 = vpop.f32.mrf.mxu1  ;;  %v4995_v28 = vpop.f32.mrf.mxu3 }
 0x289   : > { %v3124_v40 = vmax.f32 %v3088_v3, 0.0  ;;  %v2774_v51 = vadd.f32 %v4936_v60, %v2395_v2  ;;  %v2032_v37 = vadd.f32 %v1964_v48, %v4470_v29 }
 0x28a   : > { %v2942_v41 = vpop.f32.mrf.mxu0 }
 0x28b   : > { %v3160_v43 = vpack.c.bf16 %v3124_v40, %v3124_v40  ;;  %v3009_v62 = vadd.f32 %v2940_v11, %v2774_v51  ;;  %v2089_v11 = vld [vmem:[%s3940_s5 + $0xa0] sm:$0x3]  ;;  %v1846_v51 = vrot.slane %v4463_v39, 2 }
 0x28c   : > { %v2164_v23 = vunpack.c.l.b16 %v2089_v11 }
 0x28d   : > { %3197 = vst.msk [vmem:[%s4788_s19 + $0x34] sm:$0xf] %vm3183_vm9, %v3160_v43  ;;  %v3049_v7 = vmul.f32 %v4768_v46, %v3009_v62  ;;  %v2837_v62 = vrot.slane %v4957_v47, 3 }
 0x28e   : > { %v2328_v59 = vpop.f32.mrf.mxu2  ;;  %v2183_v42 = vpack.c.b16 %v2164_v23, %v2164_v23 }
 0x28f   : > { %v3089_v60 = vadd.f32 %v4772_v4, %v3049_v7  ;;  %v2396_v30 = vadd.f32 %v2328_v59, %v2032_v37  ;;  %v1847_v59 = vsel %vm1810_vm7, %v1844_v38, %v1846_v51 }
 0x290   : > { %v1967_v57 = vpop.f32.mrf.mxu1  ;;  %v5010_v29 = vpop.f32.mrf.mxu3 }
 0x291   : > { %v3125_v49 = vmax.f32 %v3089_v60, 0.0  ;;  %v2775_v19 = vadd.f32 %v4951_v18, %v2396_v30  ;;  %v2033_v55 = vadd.f32 %v1967_v57, %v4486_v32 }
 0x292   : > { %v2945_v25 = vpop.f32.mrf.mxu0 }
 0x293   : > { %v3161_v20 = vpack.c.bf16 %v3125_v49, %v3125_v49  ;;  %v3010_v31 = vadd.f32 %v2942_v41, %v2775_v19  ;;  %3558 = vmatmul.msk.bf16.gmra.mxu1 %vm521_vm3, %v1845_v15  ;;  %3644 = vmatmul.msk.bf16.gmra.mxu2 %vm521_vm3, %v2218_v17  ;;  %v2219_v41 = vrot.slane %v2183_v42, 2  ;;  %v2838_v15 = vsel %vm2801_vm8, %v2835_v52, %v2837_v62 }
 0x295   : > { %3680 = vmatmul.msk.bf16.gmra.mxu0 %vm521_vm3, %v2836_v54  ;;  %3198 = vst.msk [vmem:[%s4788_s19 + $0x38] sm:$0xf] %vm3183_vm9, %v3161_v20  ;;  %v3050_v18 = vmul.f32 %v4768_v46, %v3010_v31  ;;  %v2220_v60 = vsel %vm1810_vm7, %v2217_v26, %v2219_v41 }
 0x296   : > { %v2331_v10 = vpop.f32.mrf.mxu2 }
 0x297   : > { %v3090_v22 = vadd.f32 %v4772_v4, %v3050_v18  ;;  %v2397_v58 = vadd.f32 %v2331_v10, %v2033_v55 }
 0x298   : > { %v1969_v6 = vpop.f32.mrf.mxu1  ;;  %v2720_v2 = vpop.f32.mrf.mxu3 }
 0x299   : > { %v3126_v5 = vmax.f32 %v3090_v22, 0.0  ;;  %v2776_v61 = vadd.f32 %v4968_v13, %v2397_v58  ;;  %v2034_v43 = vadd.f32 %v1969_v6, %v4499_v27 }
 0x29a   : > { %v2947_v3 = vpop.f32.mrf.mxu0 }
 0x29b   : > { %v3162_v48 = vpack.c.bf16 %v3126_v5, %v3126_v5  ;;  %v3011_v40 = vadd.f32 %v2945_v25, %v2776_v61 }
 0x29d   : > { %3199 = vst.msk [vmem:[%s4788_s19 + $0x3c] sm:$0xf] %vm3183_vm9, %v3162_v48  ;;  %v3051_v32 = vmul.f32 %v4768_v46, %v3011_v40 }
 0x29e   : > { %v2333_v45 = vpop.f32.mrf.mxu2 }
 0x29f   : > { %v3091_v7 = vadd.f32 %v4772_v4, %v3051_v32  ;;  %v2398_v13 = vadd.f32 %v2333_v45, %v2034_v43 }
 0x2a0   : > { %v1972_v37 = vpop.f32.mrf.mxu1  ;;  %v2722_v47 = vpop.f32.mrf.mxu3 }
 0x2a1   : > { %v3127_v39 = vmax.f32 %v3091_v7, 0.0  ;;  %v2777_v30 = vadd.f32 %v4982_v8, %v2398_v13  ;;  %v2035_v26 = vadd.f32 %v1972_v37, %v4518_v24 }
 0x2a2   : > { %v2950_v57 = vpop.f32.mrf.mxu0 }
 0x2a3   : > { %v3163_v17 = vpack.c.bf16 %v3127_v39, %v3127_v39  ;;  %v3012_v27 = vadd.f32 %v2947_v3, %v2777_v30  ;;  %3559 = vmatmul.msk.bf16.gmra.mxu1 %vm521_vm3, %v1847_v59  ;;  %3645 = vmatmul.msk.bf16.gmra.mxu2 %vm521_vm3, %v2220_v60 }
 0x2a5   : > { %3681 = vmatmul.msk.bf16.gmra.mxu0 %vm521_vm3, %v2838_v15  ;;  %3200 = vst.msk [vmem:[%s4788_s19 + $0x40] sm:$0xf] %vm3183_vm9, %v3163_v17  ;;  %v3052_v38 = vmul.f32 %v4768_v46, %v3012_v27 }
 0x2a6   : > { %v2336_v8 = vpop.f32.mrf.mxu2 }
 0x2a7   : > { %v3092_v49 = vadd.f32 %v4772_v4, %v3052_v38  ;;  %v2399_v52 = vadd.f32 %v2336_v8, %v2035_v26 }
 0x2a8   : > { %v1974_v19 = vpop.f32.mrf.mxu1  ;;  %v2725_v24 = vpop.f32.mrf.mxu3 }
 0x2a9   : > { %v3128_v25 = vmax.f32 %v3092_v49, 0.0  ;;  %v2778_v54 = vadd.f32 %v4995_v28, %v2399_v52  ;;  %v2036_v18 = vadd.f32 %v1974_v19, %v4532_v14 }
 0x2aa   : > { %v2952_v11 = vpop.f32.mrf.mxu0 }
 0x2ab   : > { %v3164_v20 = vpack.c.bf16 %v3128_v25, %v3128_v25  ;;  %v3013_v31 = vadd.f32 %v2950_v57, %v2778_v54 }
 0x2ad   : > { %3201 = vst.msk [vmem:[%s4788_s19 + $0x44] sm:$0xf] %vm3183_vm9, %v3164_v20  ;;  %v3053_v23 = vmul.f32 %v4768_v46, %v3013_v31 }
 0x2ae   : > { %v2338_v55 = vpop.f32.mrf.mxu2 }
 0x2af   : > { %v3093_v10 = vadd.f32 %v4772_v4, %v3053_v23  ;;  %v2400_v22 = vadd.f32 %v2338_v55, %v2036_v18 }
 0x2b0   : > { %v1977_v58 = vpop.f32.mrf.mxu1  ;;  %v2727_v32 = vpop.f32.mrf.mxu3 }
 0x2b1   : > { %v3129_v6 = vmax.f32 %v3093_v10, 0.0  ;;  %v2779_v42 = vadd.f32 %v5010_v29, %v2400_v22  ;;  %v2037_v48 = vadd.f32 %v1977_v58, %v4546_v33 }
 0x2b2   : > { %v2955_v28 = vpop.f32.mrf.mxu0 }
 0x2b3   : > { %v3165_v5 = vpack.c.bf16 %v3129_v6, %v3129_v6  ;;  %v3014_v61 = vadd.f32 %v2952_v11, %v2779_v42 }
 0x2b5   : > { %3202 = vst.msk [vmem:[%s4788_s19 + $0x48] sm:$0xf] %vm3183_vm9, %v3165_v5  ;;  %v3054_v3 = vmul.f32 %v4768_v46, %v3014_v61 }
 0x2b6   : > { %v2341_v14 = vpop.f32.mrf.mxu2 }
 0x2b7   : > { %v3094_v40 = vadd.f32 %v4772_v4, %v3054_v3  ;;  %v2401_v51 = vadd.f32 %v2341_v14, %v2037_v48 }
 0x2b8   : > { %v1979_v41 = vpop.f32.mrf.mxu1  ;;  %v2730_v17 = vpop.f32.mrf.mxu3 }
 0x2b9   : > { %v3130_v43 = vmax.f32 %v3094_v40, 0.0  ;;  %v2780_v62 = vadd.f32 %v2720_v2, %v2401_v51  ;;  %v2038_v37 = vadd.f32 %v1979_v41, %v4560_v36 }
 0x2ba   : > { %v2957_v45 = vpop.f32.mrf.mxu0 }
 0x2bb   : > { %v3166_v29 = vpack.c.bf16 %v3130_v43, %v3130_v43  ;;  %v3015_v7 = vadd.f32 %v2955_v28, %v2780_v62 }
 0x2bd   : > { %3203 = vst.msk [vmem:[%s4788_s19 + $0x4c] sm:$0xf] %vm3183_vm9, %v3166_v29  ;;  %v3055_v13 = vmul.f32 %v4768_v46, %v3015_v7 }
 0x2be   : > { %v2343_v59 = vpop.f32.mrf.mxu2 }
 0x2bf   : > { %v3095_v33 = vadd.f32 %v4772_v4, %v3055_v13  ;;  %v2402_v60 = vadd.f32 %v2343_v59, %v2038_v37 }
 0x2c0   : > { %v1982_v39 = vpop.f32.mrf.mxu1  ;;  %v2732_v20 = vpop.f32.mrf.mxu3 }
 0x2c1   : > { %v3131_v30 = vmax.f32 %v3095_v33, 0.0  ;;  %v2781_v57 = vadd.f32 %v2722_v47, %v2402_v60  ;;  %v2039_v26 = vadd.f32 %v1982_v39, %v4574_v9 }
 0x2c2   : > { %v2960_v15 = vpop.f32.mrf.mxu0 }
 0x2c3   : > { %v3167_v2 = vpack.c.bf16 %v3131_v30, %v3131_v30  ;;  %v3016_v27 = vadd.f32 %v2957_v45, %v2781_v57 }
 0x2c5   : > { %3204 = vst.msk [vmem:[%s4788_s19 + $0x50] sm:$0xf] %vm3183_vm9, %v3167_v2  ;;  %v3056_v38 = vmul.f32 %v4768_v46, %v3016_v27 }
 0x2c6   : > { %v2346_v8 = vpop.f32.mrf.mxu2 }
 0x2c7   : > { %v3096_v36 = vadd.f32 %v4772_v4, %v3056_v38  ;;  %v2403_v49 = vadd.f32 %v2346_v8, %v2039_v26 }
 0x2c8   : > { %v1984_v52 = vpop.f32.mrf.mxu1  ;;  %v2735_v3 = vpop.f32.mrf.mxu3 }
 0x2c9   : > { %v3132_v19 = vmax.f32 %v3096_v36, 0.0  ;;  %v2782_v25 = vadd.f32 %v2725_v24, %v2403_v49  ;;  %v2040_v23 = vadd.f32 %v1984_v52, %v4588_v12 }
 0x2ca   : > { %v2962_v54 = vpop.f32.mrf.mxu0 }
 0x2cb   : > { %v3168_v47 = vpack.c.bf16 %v3132_v19, %v3132_v19  ;;  %v3017_v11 = vadd.f32 %v2960_v15, %v2782_v25 }
 0x2cd   : > { %3205 = vst.msk [vmem:[%s4788_s19 + $0x54] sm:$0xf] %vm3183_vm9, %v3168_v47  ;;  %v3057_v31 = vmul.f32 %v4768_v46, %v3017_v11 }
 0x2ce   : > { %v2348_v18 = vpop.f32.mrf.mxu2 }
 0x2cf   : > { %v3097_v9 = vadd.f32 %v4772_v4, %v3057_v31  ;;  %v2404_v55 = vadd.f32 %v2348_v18, %v2040_v23 }
 0x2d0   : > { %v1987_v10 = vpop.f32.mrf.mxu1  ;;  %v2737_v37 = vpop.f32.mrf.mxu3 }
 0x2d1   : > { %v3133_v22 = vmax.f32 %v3097_v9, 0.0  ;;  %v2783_v58 = vadd.f32 %v2727_v32, %v2404_v55  ;;  %v2041_v5 = vadd.f32 %v1987_v10, %v4602_v50 }
 0x2d2   : > { %v2965_v6 = vpop.f32.mrf.mxu0 }
 0x2d3   : > { %v3169_v24 = vpack.c.bf16 %v3133_v22, %v3133_v22  ;;  %v3018_v42 = vadd.f32 %v2962_v54, %v2783_v58 }
 0x2d5   : > { %3206 = vst.msk [vmem:[%s4788_s19 + $0x58] sm:$0xf] %vm3183_vm9, %v3169_v24  ;;  %v3058_v28 = vmul.f32 %v4768_v46, %v3018_v42 }
 0x2d6   : > { %v2351_v61 = vpop.f32.mrf.mxu2 }
 0x2d7   : > { %v3098_v12 = vadd.f32 %v4772_v4, %v3058_v28  ;;  %v2405_v48 = vadd.f32 %v2351_v61, %v2041_v5 }
 0x2d8   : > { %v1989_v14 = vpop.f32.mrf.mxu1  ;;  %v2740_v36 = vpop.f32.mrf.mxu3 }
 0x2d9   : > { %v3134_v40 = vmax.f32 %v3098_v12, 0.0  ;;  %v2784_v51 = vadd.f32 %v2730_v17, %v2405_v48  ;;  %v2042_v45 = vadd.f32 %v1989_v14, %v4616_v56 }
 0x2da   : > { %v2967_v41 = vpop.f32.mrf.mxu0 }
 0x2db   : > { %v3170_v32 = vpack.c.bf16 %v3134_v40, %v3134_v40  ;;  %v3019_v43 = vadd.f32 %v2965_v6, %v2784_v51 }
 0x2dd   : > { %3207 = vst.msk [vmem:[%s4788_s19 + $0x5c] sm:$0xf] %vm3183_vm9, %v3170_v32  ;;  %v3059_v62 = vmul.f32 %v4768_v46, %v3019_v43 }
 0x2de   : > { %v2353_v29 = vpop.f32.mrf.mxu2 }
 0x2df   : > { %v3099_v50 = vadd.f32 %v4772_v4, %v3059_v62  ;;  %v2406_v7 = vadd.f32 %v2353_v29, %v2042_v45 }
 0x2e0   : > { %v1992_v13 = vpop.f32.mrf.mxu1  ;;  %v2742_v55 = vpop.f32.mrf.mxu3 }
 0x2e1   : > { %v3135_v59 = vmax.f32 %v3099_v50, 0.0  ;;  %v2785_v33 = vadd.f32 %v2732_v20, %v2406_v7  ;;  %v2043_v15 = vadd.f32 %v1992_v13, %v4630_v34  ;;  %v5099_v50 = vld [vmem:[#allocation2] ss:$0 sm:$0xff]  ;;  %v5103_v13 = vld [vmem:[#allocation4] ss:$0 sm:$0xff] }
 0x2e2   : > { %v2970_v60 = vpop.f32.mrf.mxu0 }
 0x2e3   : > { %v3171_v39 = vpack.c.bf16 %v3135_v59, %v3135_v59  ;;  %v3020_v30 = vadd.f32 %v2967_v41, %v2785_v33 }
 0x2e5   : > { %3208 = vst.msk [vmem:[%s4788_s19 + $0x60] sm:$0xf] %vm3183_vm9, %v3171_v39  ;;  %v3060_v57 = vmul.f32 %v4768_v46, %v3020_v30 }
 0x2e6   : > { %v2356_v17 = vpop.f32.mrf.mxu2 }
 0x2e7   : > { %v3100_v56 = vadd.f32 %v4772_v4, %v3060_v57  ;;  %v2407_v2 = vadd.f32 %v2356_v17, %v2043_v15 }
 0x2e8   : > { %v1994_v27 = vpop.f32.mrf.mxu1  ;;  %v2745_v40 = vpop.f32.mrf.mxu3 }
 0x2e9   : > { %v3136_v38 = vmax.f32 %v3100_v56, 0.0  ;;  %v2786_v26 = vadd.f32 %v2735_v3, %v2407_v2  ;;  %v2044_v25 = vadd.f32 %v1994_v27, %v4644_v16 }
 0x2ea   : > { %v2972_v8 = vpop.f32.mrf.mxu0 }
 0x2eb   : > { %v3172_v49 = vpack.c.bf16 %v3136_v38, %v3136_v38  ;;  %v3021_v52 = vadd.f32 %v2970_v60, %v2786_v26 }
 0x2ed   : > { %3209 = vst.msk [vmem:[%s4788_s19 + $0x64] sm:$0xf] %vm3183_vm9, %v3172_v49  ;;  %v3061_v19 = vmul.f32 %v4768_v46, %v3021_v52 }
 0x2ee   : > { %v2358_v54 = vpop.f32.mrf.mxu2 }
 0x2ef   : > { %v3101_v34 = vadd.f32 %v4772_v4, %v3061_v19  ;;  %v2408_v47 = vadd.f32 %v2358_v54, %v2044_v25 }
 0x2f0   : > { %v1997_v11 = vpop.f32.mrf.mxu1  ;;  %v2747_v33 = vpop.f32.mrf.mxu3 }
 0x2f1   : > { %v3137_v20 = vmax.f32 %v3101_v34, 0.0  ;;  %v2787_v31 = vadd.f32 %v2737_v37, %v2408_v47  ;;  %v2045_v22 = vadd.f32 %v1997_v11, %v4658_v1 }
 0x2f2   : > { %v2975_v23 = vpop.f32.mrf.mxu0 }
 0x2f3   : > { %v3173_v18 = vpack.c.bf16 %v3137_v20, %v3137_v20  ;;  %v3022_v9 = vadd.f32 %v2972_v8, %v2787_v31 }
 0x2f5   : > { %3210 = vst.msk [vmem:[%s4788_s19 + $0x68] sm:$0xf] %vm3183_vm9, %v3173_v18  ;;  %v3062_v10 = vmul.f32 %v4768_v46, %v3022_v9 }
 0x2f6   : > { %v2361_v58 = vpop.f32.mrf.mxu2 }
 0x2f7   : > { %v3102_v16 = vadd.f32 %v4772_v4, %v3062_v10  ;;  %v2409_v6 = vadd.f32 %v2361_v58, %v2045_v22 }
 0x2f8   : > { %v1999_v24 = vpop.f32.mrf.mxu1 }
 0x2f9   : > { %v3138_v42 = vmax.f32 %v3102_v16, 0.0  ;;  %v2788_v28 = vadd.f32 %v2740_v36, %v2409_v6  ;;  %v2046_v48 = vadd.f32 %v1999_v24, %v4672_v63  ;;  %v2750_v36 = vpop.f32.mrf.mxu3 }
 0x2fa   : > { %v2977_v5 = vpop.f32.mrf.mxu0 }
 0x2fb   : > { %v3174_v61 = vpack.c.bf16 %v3138_v42, %v3138_v42  ;;  %v3023_v3 = vadd.f32 %v2975_v23, %v2788_v28 }
 0x2fd   : > { %3211 = vst.msk [vmem:[%s4788_s19 + $0x6c] sm:$0xf] %vm3183_vm9, %v3174_v61  ;;  %v3063_v12 = vmul.f32 %v4768_v46, %v3023_v3 }
 0x2fe   : > { %v2363_v14 = vpop.f32.mrf.mxu2 }
 0x2ff   : > { %v3103_v1 = vadd.f32 %v4772_v4, %v3063_v12  ;;  %v2410_v51 = vadd.f32 %v2363_v14, %v2046_v48 }
 0x300   : > { %v2002_v41 = vpop.f32.mrf.mxu1 }
 0x301   : > { %v3139_v32 = vmax.f32 %v3103_v1, 0.0  ;;  %v2789_v43 = vadd.f32 %v2742_v55, %v2410_v51  ;;  %v2047_v63 = vadd.f32 %v2002_v41, %v4686_v53  ;;  %v2752_v9 = vpop.f32.mrf.mxu3 }
 0x302   : > { %v2980_v62 = vpop.f32.mrf.mxu0 }
 0x303   : > { %v3175_v45 = vpack.c.bf16 %v3139_v32, %v3139_v32  ;;  %v3024_v29 = vadd.f32 %v2977_v5, %v2789_v43 }
 0x305   : > { %3212 = vst.msk [vmem:[%s4788_s19 + $0x70] sm:$0xf] %vm3183_vm9, %v3175_v45  ;;  %v3064_v46 = vmul.f32 %v5099_v50, %v3024_v29  ;;  %v5173_v45 = vld [vmem:[#allocation14_spill] sm:$0xff] }
 0x306   : > { %v2366_v7 = vpop.f32.mrf.mxu2 }
 0x307   : > { %v3104_v4 = vadd.f32 %v5103_v13, %v3064_v46  ;;  %v2411_v37 = vadd.f32 %v2366_v7, %v2047_v63 }
 0x308   : > { %v2004_v59 = vpop.f32.mrf.mxu1 }
 0x309   : > { %v3140_v60 = vmax.f32 %v3104_v4, 0.0  ;;  %v2790_v39 = vadd.f32 %v2745_v40, %v2411_v37  ;;  %v2048_v53 = vadd.f32 %v2004_v59, %v4700_v0  ;;  %v2755_v12 = vpop.f32.mrf.mxu3 }
 0x30a   : > { %v2982_v30 = vpop.f32.mrf.mxu0 }
 0x30b   : > { %v3176_v57 = vpack.c.bf16 %v3140_v60, %v3140_v60  ;;  %v3025_v15 = vadd.f32 %v2980_v62, %v2790_v39 }
 0x30d   : > { %3213 = vst.msk [vmem:[%s4788_s19 + $0x74] sm:$0xf] %vm3183_vm9, %v3176_v57  ;;  %v3065_v17 = vmul.f32 %v5099_v50, %v3025_v15 }
 0x30e   : > { %v2368_v56 = vpop.f32.mrf.mxu2 }
 0x30f   : > { %v3105_v2 = vadd.f32 %v5103_v13, %v3065_v17  ;;  %v2412_v27 = vadd.f32 %v2368_v56, %v2048_v53 }
 0x310   : > { %v2007_v38 = vpop.f32.mrf.mxu1 }
 0x311   : > { %v3141_v26 = vmax.f32 %v3105_v2, 0.0  ;;  %v2791_v8 = vadd.f32 %v2747_v33, %v2412_v27  ;;  %v2049_v54 = vadd.f32 %v2007_v38, %v4714_v21  ;;  %v2757_v7 = vpop.f32.mrf.mxu3 }
 0x312   : > { %v2985_v19 = vpop.f32.mrf.mxu0 }
 0x313   : > { %v3177_v49 = vpack.c.bf16 %v3141_v26, %v3141_v26  ;;  %v3026_v52 = vadd.f32 %v2982_v30, %v2791_v8 }
 0x315   : > { %3214 = vst.msk [vmem:[%s4788_s19 + $0x78] sm:$0xf] %vm3183_vm9, %v3177_v49  ;;  %v3066_v25 = vmul.f32 %v5099_v50, %v3026_v52 }
 0x316   : > { %v2371_v34 = vpop.f32.mrf.mxu2 }
 0x317   : > { %v3106_v0 = vadd.f32 %v5103_v13, %v3066_v25  ;;  %v2413_v47 = vadd.f32 %v2371_v34, %v2049_v54 }
 0x318   : > { %v2009_v11 = vpop.f32.mrf.mxu1 }
 0x319   : > { %v3142_v20 = vmax.f32 %v3106_v0, 0.0  ;;  %v2792_v31 = vadd.f32 %v2750_v36, %v2413_v47  ;;  %v2050_v10 = vadd.f32 %v2009_v11, %v4728_v44 }
 0x31a   : > { %v2987_v22 = vpop.f32.mrf.mxu0 }
 0x31b   : > { %v3178_v23 = vpack.c.bf16 %v3142_v20, %v3142_v20  ;;  %v3027_v18 = vadd.f32 %v2985_v19, %v2792_v31 }
 0x31d   : > { %3215 = vst.msk [vmem:[%s4788_s19 + $0x7c] sm:$0xf] %vm3183_vm9, %v3178_v23  ;;  %v3067_v55 = vmul.f32 %v5099_v50, %v3027_v18 }
 0x31e   : > { %v2373_v58 = vpop.f32.mrf.mxu2 }
 0x31f   : > { %v3107_v21 = vadd.f32 %v5103_v13, %v3067_v55  ;;  %v2414_v16 = vadd.f32 %v2373_v58, %v2050_v10 }
 0x320   : > { %v2012_v6 = vpop.f32.mrf.mxu1 }
 0x321   : > { %v3143_v24 = vmax.f32 %v3107_v21, 0.0  ;;  %v2793_v42 = vadd.f32 %v2752_v9, %v2414_v16  ;;  %v2051_v3 = vadd.f32 %v2012_v6, %v4742_v35 }
 0x322   : > { %v2990_v40 = vpop.f32.mrf.mxu0 }
 0x323   : > { %v3179_v28 = vpack.c.bf16 %v3143_v24, %v3143_v24  ;;  %v3028_v5 = vadd.f32 %v2987_v22, %v2793_v42 }
 0x325   : > { %3216 = vst.msk [vmem:[%s4788_s19 + $0x80] sm:$0xf] %vm3183_vm9, %v3179_v28  ;;  %v3068_v61 = vmul.f32 %v5099_v50, %v3028_v5 }
 0x326   : > { %v2376_v48 = vpop.f32.mrf.mxu2 }
 0x327   : > { %v3108_v44 = vadd.f32 %v5103_v13, %v3068_v61  ;;  %v2415_v14 = vadd.f32 %v2376_v48, %v2051_v3 }
 0x328   : > { %v2014_v41 = vpop.f32.mrf.mxu1 }
 0x329   : > { %v3144_v1 = vmax.f32 %v3108_v44, 0.0  ;;  %v2794_v51 = vadd.f32 %v2755_v12, %v2415_v14  ;;  %v2052_v29 = vadd.f32 %v2014_v41, %v5173_v45 }
 0x32a   : > { %v2992_v59 = vpop.f32.mrf.mxu0 }
 0x32b   : > { %v3180_v32 = vpack.c.bf16 %v3144_v1, %v3144_v1  ;;  %v3029_v43 = vadd.f32 %v2990_v40, %v2794_v51 }
 0x32d   : > { %3217 = vst.msk [vmem:[%s4788_s19 + $0x84] sm:$0xf] %vm3183_vm9, %v3180_v32  ;;  %v3069_v62 = vmul.f32 %v5099_v50, %v3029_v43 }
 0x32e   : > { %v2378_v35 = vpop.f32.mrf.mxu2 }
 0x32f   : > { %v3109_v46 = vadd.f32 %v5103_v13, %v3069_v62  ;;  %v2416_v63 = vadd.f32 %v2378_v35, %v2052_v29 }
 0x331   : > { %v3145_v4 = vmax.f32 %v3109_v46, 0.0  ;;  %v2795_v37 = vadd.f32 %v2757_v7, %v2416_v63 }
 0x333   : > { %v3181_v33 = vpack.c.bf16 %v3145_v4, %v3145_v4  ;;  %v3030_v60 = vadd.f32 %v2992_v59, %v2795_v37 }
 0x335   : > { %3218 = vst.msk [vmem:[%s4788_s19 + $0x88] sm:$0xf] %vm3183_vm9, %v3181_v33  ;;  %v3070_v39 = vmul.f32 %v5099_v50, %v3030_v60 }
 0x337   : > { %v3110_v30 = vadd.f32 %v5103_v13, %v3070_v39 }
 0x339   : > { %v3146_v57 = vmax.f32 %v3110_v30, 0.0 }
 0x33b   : > { %v3182_v15 = vpack.c.bf16 %v3146_v57, %v3146_v57 }
 0x33d   : > { %3219 = vst.msk [vmem:[%s4788_s19 + $0x8c] sm:$0xf] %vm3183_vm9, %v3182_v15 }
 0x33e PF: > { %s16_s15 = sadd.s32 1, %s3877_s15  }
 0x33f   : > { %p13_p7 = scmp.ge.s32.totalorder %s16_s15, 4  }
 0x341   :  { %15 = sbr.rel (!%p13_p7) target bundleno = 2 (0x2), region = 75 }
 0x346   :  { %3241 = vsyncpa [#allocation3], 1 }
 0x347   :  { %3243 = vsyncpa [#allocation3 + $0x1], 1 }
 0x348   :  { %3244 = vsyncpa [#allocation5], 1 }

// kernel: supervised_net_forward.7
= control target key start
LH: loop header
LB: loop body
LE: loop exit
PB: predicated region body
PF: predicated region fallthrough
CT: control target
= control target key end

     0   :  { %s2715_s15 = smov 0   ;;  %s3871_s0 = inlined_call_operand.vmem [shape: bf16[2,56,128], index: 0, kind: input, shape index: {}]   ;;  %s3872_s1 = inlined_call_operand.vmem [shape: bf16[1152,256], index: 1, kind: input, shape index: {}]   ;;  %s3873_s2 = inlined_call_operand.vmem [shape: f32[1,256], index: 2, kind: input, shape index: {}]   ;;  %s3874_s3 = inlined_call_operand.vmem [shape: f32[1,256], index: 3, kind: input, shape index: {}]   ;;  %s3875_s4 = inlined_call_operand.vmem [shape: bf16[2,35,256], index: 4, kind: output, shape index: {}]  }
   0x1 LB: > { %s1881_s16 = sadd.s32 4294967295, %s2688_s15   ;;  %p1885_p0 = scmp.ge.s32.totalorder %s2688_s15, 1  ;;  %s2688_s15 = sphi %s2715_s15, %s14_s15  }
   0x2   : > { %p162_p1 = scmp.lt.s32.totalorder %s2688_s15, 3 }
   0x4   : > { %p163_p2 = pnand %p1885_p0, %p162_p1 }
   0x5   : > { %p188_p3 = scmp.lt.s32.totalorder (!%p163_p2), %s1881_s16, 1 }
   0x6   : > { %166 = sbr.rel (%p163_p2) target bundleno = 400 (0x190), region = 36 }
   0xb   : > { %v1950_v0 = vld [vmem:[%s3872_s1 + $0xf0] sm:$0xf]  ;;  %v2502_v1 = vld [vmem:[%s3872_s1 + $0xf4] sm:$0xf0]  ;;  %v2501_v2 = vld [vmem:[%s3872_s1 + $0xf4] sm:$0xf] }
   0xc   : > { %v1951_v3 = vor.u32 %v2502_v1, %v1950_v0  ;;  %v1952_v4 = vld [vmem:[%s3872_s1 + $0xf8] sm:$0xf0]  ;;  %v1942_v5 = vld [vmem:[%s3872_s1 + $0xe0] sm:$0xf]  ;;  %v2500_v6 = vld [vmem:[%s3872_s1 + $0xe4] sm:$0xf0] }
   0xd   : > { %v1955_v7 = vor.u32 %v2501_v2, %v1952_v4  ;;  %v2499_v8 = vld [vmem:[%s3872_s1 + $0xe4] sm:$0xf]  ;;  %v1944_v9 = vld [vmem:[%s3872_s1 + $0xe8] sm:$0xf0]  ;;  %v1943_v10 = vor.u32 %v2500_v6, %v1942_v5  ;;  %v1934_v12 = vld [vmem:[%s3872_s1 + $0xd0] sm:$0xf] }
   0xe   : > { %355 = vmatpush.bf16.msra.mxu0 %v1951_v3  ;;  %2651 = vmatpush.bf16.msra.mxu2 %v1951_v3  ;;  %v1947_v11 = vor.u32 %v2499_v8, %v1944_v9  ;;  %v2498_v13 = vld [vmem:[%s3872_s1 + $0xd4] sm:$0xf0]  ;;  %v2497_v14 = vld [vmem:[%s3872_s1 + $0xd4] sm:$0xf]  ;;  %v1936_v15 = vld [vmem:[%s3872_s1 + $0xd8] sm:$0xf0] }
   0xf   : > { %378 = vmatpush.bf16.msra.mxu1 %v1955_v7  ;;  %2659 = vmatpush.bf16.msra.mxu3 %v1955_v7  ;;  %v1935_v16 = vor.u32 %v2498_v13, %v1934_v12  ;;  %v1939_v17 = vor.u32 %v2497_v14, %v1936_v15  ;;  %v1926_v18 = vld [vmem:[%s3872_s1 + $0xc0] sm:$0xf]  ;;  %v2496_v19 = vld [vmem:[%s3872_s1 + $0xc4] sm:$0xf0]  ;;  %v2495_v20 = vld [vmem:[%s3872_s1 + $0xc4] sm:$0xf] }
  0x10   : > { %v1928_v21 = vld [vmem:[%s3872_s1 + $0xc8] sm:$0xf0]  ;;  %v1927_v22 = vor.u32 %v2496_v19, %v1926_v18  ;;  %v1918_v24 = vld [vmem:[%s3872_s1 + $0xb0] sm:$0xf]  ;;  %v2494_v25 = vld [vmem:[%s3872_s1 + $0xb4] sm:$0xf0] }
  0x11   : > { %v1931_v23 = vor.u32 %v2495_v20, %v1928_v21  ;;  %v2493_v26 = vld [vmem:[%s3872_s1 + $0xb4] sm:$0xf]  ;;  %v1920_v27 = vld [vmem:[%s3872_s1 + $0xb8] sm:$0xf0]  ;;  %s3877_s16 = smov (!%p188_p3, %s1881_s16), 1  ;;  %v1919_v28 = vor.u32 %v2494_v25, %v1918_v24  ;;  %vm554_vm1 = vcmask 1046528  }
  0x12   : > { %356 = vmatpush.bf16.msra.mxu0 %v1943_v10  ;;  %2652 = vmatpush.bf16.msra.mxu2 %v1943_v10  ;;  %v1923_v29 = vor.u32 %v2493_v26, %v1920_v27  ;;  %v1910_v30 = vld [vmem:[%s3872_s1 + $0xa0] sm:$0xf]  ;;  %v2492_v31 = vld [vmem:[%s3872_s1 + $0xa4] sm:$0xf0]  ;;  %s2672_s11 = smul.u32 28, %s3877_s16  ;;  %vm1278_vm3 = vcmask 1044480  }
  0x13   : > { %379 = vmatpush.bf16.msra.mxu1 %v1947_v11  ;;  %2660 = vmatpush.bf16.msra.mxu3 %v1947_v11  ;;  %v2491_v32 = vld [vmem:[%s3872_s1 + $0xa4] sm:$0xf]  ;;  %v1912_v33 = vld [vmem:[%s3872_s1 + $0xa8] sm:$0xf0]  ;;  %v1911_v34 = vor.u32 %v2492_v31, %v1910_v30  ;;  %v1902_v39 = vld [vmem:[%s3872_s1 + $0x90] sm:$0xf] }
  0x14   : > { %s2805_s20 = scalar_lea.vmem %s3871_s0, %s2672_s11  ;;  %v1915_v38 = vor.u32 %v2491_v32, %v1912_v33  ;;  %v2490_v40 = vld [vmem:[%s3872_s1 + $0x94] sm:$0xf0]  ;;  %v2489_v43 = vld [vmem:[%s3872_s1 + $0x94] sm:$0xf]  ;;  %v1904_v44 = vld [vmem:[%s3872_s1 + $0x98] sm:$0xf0] }
  0x15   : > { %v2808_v35 = vld [vmem:[%s2805_s20] sm:$0xff]   ;;  %v2811_v36 = vld [vmem:[%s2805_s20 + $0x8] sm:$0xff]  ;;  %v202_v37 = vld [vmem:[%s2805_s20 + $0x10] sm:$0x3]  ;;  %v1903_v46 = vor.u32 %v2490_v40, %v1902_v39  ;;  %v1907_v51 = vor.u32 %v2489_v43, %v1904_v44  ;;  %vm248_vm0 = vsmask.f32 7424 }
  0x16   : > { %357 = vmatpush.bf16.msra.mxu0 %v1935_v16  ;;  %2653 = vmatpush.bf16.msra.mxu2 %v1935_v16  ;;  %v252_v41 = vshll.u32 %v2808_v35, 16  ;;  %v244_v42 = vunpack.c.l.b16 %v202_v37  ;;  %v1894_v47 = vld [vmem:[%s3872_s1 + $0x80] sm:$0xf]  ;;  %v250_v48 = vshrl.u32 %v2808_v35, 16  ;;  %v257_v50 = vshll.u32 %v2811_v36, 16  ;;  %s2673_s23 = smul.u32 40, %s3877_s16 }
  0x17   : > { %380 = vmatpush.bf16.msra.mxu1 %v1939_v17  ;;  %2661 = vmatpush.bf16.msra.mxu3 %v1939_v17  ;;  %v2488_v52 = vld [vmem:[%s3872_s1 + $0x84] sm:$0xf0]  ;;  %v2487_v53 = vld [vmem:[%s3872_s1 + $0x84] sm:$0xf]  ;;  %v1896_v55 = vld [vmem:[%s3872_s1 + $0x88] sm:$0xf0] }
  0x18   : > { %v2827_v45 = vpack.c.b16 %v244_v42, %v244_v42  ;;  %v254_v49 = vrot.slane %v252_v41, 1  ;;  %v2014_v56 = vld [vmem:[%s3872_s1 + $0x70] sm:$0xf]  ;;  %v2486_v57 = vld [vmem:[%s3872_s1 + $0x74] sm:$0xf0]  ;;  %v1895_v60 = vor.u32 %v2488_v52, %v1894_v47  ;;  %v2856_v62 = vrot.slane %v257_v50, 1  ;;  %s3829_s26 = scalar_lea.vmem %s3875_s4, %s2673_s23 }
  0x19   : > { %v2485_v58 = vld [vmem:[%s3872_s1 + $0x74] sm:$0xf]  ;;  %v2016_v59 = vld [vmem:[%s3872_s1 + $0x78] sm:$0xf0]  ;;  %v1899_v1 = vor.u32 %v2487_v53, %v1896_v55  ;;  %v2078_v2 = vld [vmem:[%s3872_s1 + $0x170] sm:$0xf]  ;;  %v2015_v6 = vor.u32 %v2486_v57, %v2014_v56 }
  0x1a   : > { %358 = vmatpush.bf16.msra.mxu0 %v1927_v22  ;;  %2654 = vmatpush.bf16.msra.mxu2 %v1927_v22  ;;  %v265_v54 = vshll.u32 %v2827_v45, 16  ;;  %v255_v61 = vor.u32 %v254_v49, %v250_v48  ;;  %v2517_v63 = vld [vmem:[%s3872_s1 + $0x174] sm:$0xf]  ;;  %v2080_v0 = vld [vmem:[%s3872_s1 + $0x178] sm:$0xf0]  ;;  %v269_v5 = vshrl.u32 %v2827_v45, 16  ;;  %v2019_v7 = vor.u32 %v2485_v58, %v2016_v59 }
  0x1b   : > { %381 = vmatpush.bf16.msra.mxu1 %v1931_v23  ;;  %2662 = vmatpush.bf16.msra.mxu3 %v1931_v23  ;;  %v2518_v3 = vld [vmem:[%s3872_s1 + $0x174] sm:$0xf0]  ;;  %v2006_v8 = vld [vmem:[%s3872_s1 + $0x60] sm:$0xf]  ;;  %v2083_v9 = vor.u32 %v2517_v63, %v2080_v0  ;;  %v2484_v10 = vld [vmem:[%s3872_s1 + $0x64] sm:$0xf0] }
  0x1c   : > { %v2870_v4 = vrot.slane %v265_v54, 1  ;;  %v2483_v11 = vld [vmem:[%s3872_s1 + $0x64] sm:$0xf]  ;;  %v2008_v12 = vld [vmem:[%s3872_s1 + $0x68] sm:$0xf0]  ;;  %v260_v13 = vsel %vm248_vm0, %v255_v61, %v2856_v62  ;;  %v2079_v14 = vor.u32 %v2518_v3, %v2078_v2  ;;  %v2007_v20 = vor.u32 %v2484_v10, %v2006_v8 }
  0x1d   : > { %v2515_v15 = vld [vmem:[%s3872_s1 + $0x164] sm:$0xf]  ;;  %v2072_v16 = vld [vmem:[%s3872_s1 + $0x168] sm:$0xf0]  ;;  %v2070_v18 = vld [vmem:[%s3872_s1 + $0x160] sm:$0xf]  ;;  %v2011_v21 = vor.u32 %v2483_v11, %v2008_v12 }
  0x1e   : > { %359 = vmatpush.bf16.msra.mxu0 %v1919_v28  ;;  %2655 = vmatpush.bf16.msra.mxu2 %v1919_v28  ;;  %v271_v17 = vor.u32 %v269_v5, %v2870_v4  ;;  %v2516_v19 = vld [vmem:[%s3872_s1 + $0x164] sm:$0xf0]  ;;  %v1998_v22 = vld [vmem:[%s3872_s1 + $0x50] sm:$0xf]  ;;  %v2075_v23 = vor.u32 %v2515_v15, %v2072_v16  ;;  %v2482_v24 = vld [vmem:[%s3872_s1 + $0x54] sm:$0xf0] }
  0x1f   : > { %382 = vmatpush.bf16.msra.mxu1 %v1923_v29  ;;  %2663 = vmatpush.bf16.msra.mxu3 %v1923_v29  ;;  %v2481_v25 = vld [vmem:[%s3872_s1 + $0x54] sm:$0xf]  ;;  %v2000_v26 = vld [vmem:[%s3872_s1 + $0x58] sm:$0xf0]  ;;  %v2071_v27 = vor.u32 %v2516_v19, %v2070_v18  ;;  %v2062_v30 = vld [vmem:[%s3872_s1 + $0x150] sm:$0xf]  ;;  %v1999_v32 = vor.u32 %v2482_v24, %v1998_v22 }
  0x20   : > { %v2513_v28 = vld [vmem:[%s3872_s1 + $0x154] sm:$0xf]  ;;  %v2064_v29 = vld [vmem:[%s3872_s1 + $0x158] sm:$0xf0]  ;;  %v2514_v31 = vld [vmem:[%s3872_s1 + $0x154] sm:$0xf0]  ;;  %v2003_v33 = vor.u32 %v2481_v25, %v2000_v26 }
  0x21   : > { %v2067_v37 = vor.u32 %v2513_v28, %v2064_v29  ;;  %v2479_v39 = vld [vmem:[%s3872_s1 + $0x44] sm:$0xf]  ;;  %v1992_v40 = vld [vmem:[%s3872_s1 + $0x48] sm:$0xf0]  ;;  %v2063_v41 = vor.u32 %v2514_v31, %v2062_v30  ;;  %v261_v44 = vshrl.u32 %v2811_v36, 16  ;;  %vm1816_vm4 = vcmask 1041408  }
  0x22   : > { %360 = vmatpush.bf16.msra.mxu0 %v1911_v34  ;;  %2656 = vmatpush.bf16.msra.mxu2 %v1911_v34  ;;  %v1990_v34 = vld [vmem:[%s3872_s1 + $0x40] sm:$0xf]  ;;  %v2511_v42 = vld [vmem:[%s3872_s1 + $0x144] sm:$0xf]  ;;  %v2056_v43 = vld [vmem:[%s3872_s1 + $0x148] sm:$0xf0]  ;;  %v1995_v49 = vor.u32 %v2479_v39, %v1992_v40 }
  0x23   : > { %383 = vmatpush.bf16.msra.mxu1 %v1915_v38  ;;  %2664 = vmatpush.bf16.msra.mxu3 %v1915_v38  ;;  %v2480_v38 = vld [vmem:[%s3872_s1 + $0x44] sm:$0xf0]  ;;  %v1982_v50 = vld [vmem:[%s3872_s1 + $0x30] sm:$0xf]  ;;  %v2478_v52 = vld [vmem:[%s3872_s1 + $0x34] sm:$0xf0]  ;;  %v263_v56 = vor.u32 %v261_v44, %v2856_v62 }
  0x24   : > { %v2512_v47 = vld [vmem:[%s3872_s1 + $0x144] sm:$0xf0]  ;;  %v1991_v48 = vor.u32 %v2480_v38, %v1990_v34  ;;  %v2477_v53 = vld [vmem:[%s3872_s1 + $0x34] sm:$0xf]  ;;  %v1984_v54 = vld [vmem:[%s3872_s1 + $0x38] sm:$0xf0]  ;;  %v1983_v61 = vor.u32 %v2478_v52, %v1982_v50 }
  0x25   : > { %v2509_v57 = vld [vmem:[%s3872_s1 + $0x134] sm:$0xf]  ;;  %v2048_v58 = vld [vmem:[%s3872_s1 + $0x138] sm:$0xf0]  ;;  %v2046_v59 = vld [vmem:[%s3872_s1 + $0x130] sm:$0xf]  ;;  %v1987_v62 = vor.u32 %v2477_v53, %v1984_v54  ;;  %v268_v5 = vsel %vm248_vm0, %v263_v56, %v2870_v4 }
  0x26   : > { %361 = vmatpush.bf16.msra.mxu0 %v1903_v46  ;;  %2657 = vmatpush.bf16.msra.mxu2 %v1903_v46  ;;  %v2054_v46 = vld [vmem:[%s3872_s1 + $0x140] sm:$0xf]  ;;  %v2051_v0 = vor.u32 %v2509_v57, %v2048_v58  ;;  %v2475_v2 = vld [vmem:[%s3872_s1 + $0x24] sm:$0xf]  ;;  %v1976_v3 = vld [vmem:[%s3872_s1 + $0x28] sm:$0xf0] }
  0x27   : > { %384 = vmatpush.bf16.msra.mxu1 %v1907_v51  ;;  %2665 = vmatpush.bf16.msra.mxu3 %v1907_v51  ;;  %v2059_v51 = vor.u32 %v2511_v42, %v2056_v43  ;;  %v2055_v55 = vor.u32 %v2512_v47, %v2054_v46  ;;  %v1974_v63 = vld [vmem:[%s3872_s1 + $0x20] sm:$0xf]  ;;  %v2040_v8 = vld [vmem:[%s3872_s1 + $0x128] sm:$0xf0]  ;;  %v2508_v10 = vld [vmem:[%s3872_s1 + $0x124] sm:$0xf0]  ;;  %v1979_v11 = vor.u32 %v2475_v2, %v1976_v3 }
  0x28   : > { %v1966_v12 = vld [vmem:[%s3872_s1 + $0x10] sm:$0xf]  ;;  %v2473_v15 = vld [vmem:[%s3872_s1 + $0x14] sm:$0xf]  ;;  %v1968_v16 = vld [vmem:[%s3872_s1 + $0x18] sm:$0xf0] }
  0x29   : > { %v2030_v18 = vld [vmem:[%s3872_s1 + $0x110] sm:$0xf]  ;;  %v2505_v19 = vld [vmem:[%s3872_s1 + $0x114] sm:$0xf]  ;;  %v2631_v22 = vld [vmem:[%s2805_s20] sm:$0xf0]  ;;  %v1971_v25 = vor.u32 %v2473_v15, %v1968_v16 }
  0x2a   : > { %362 = vmatpush.bf16.msra.mxu0 %v1895_v60  ;;  %2658 = vmatpush.bf16.msra.mxu2 %v1895_v60  ;;  %v2510_v60 = vld [vmem:[%s3872_s1 + $0x134] sm:$0xf0]  ;;  %v1958_v26 = vld [vmem:[%s3872_s1] sm:$0xf]  ;;  %v2471_v28 = vld [vmem:[%s3872_s1 + $0x4] sm:$0xf] }
  0x2b   : > { %385 = vmatpush.bf16.msra.mxu1 %v1899_v1  ;;  %2666 = vmatpush.bf16.msra.mxu3 %v1899_v1  ;;  %v2476_v1 = vld [vmem:[%s3872_s1 + $0x24] sm:$0xf0]  ;;  %v1960_v30 = vld [vmem:[%s3872_s1 + $0x8] sm:$0xf0]  ;;  %v2022_v31 = vld [vmem:[%s3872_s1 + $0x100] sm:$0xf] }
  0x2c   : > { %v1975_v4 = vor.u32 %v2476_v1, %v1974_v63  ;;  %v2024_v34 = vld [vmem:[%s3872_s1 + $0x108] sm:$0xf0]  ;;  %v2534_v38 = vld [vmem:[%s3872_s1 + $0x1f4] sm:$0xf0]  ;;  %v2504_v40 = vld [vmem:[%s3872_s1 + $0x104] sm:$0xf0]  ;;  %v1963_v44 = vor.u32 %v2471_v28, %v1960_v30 }
  0x2d   : > { %363 = vmatmul.bf16.vlgmr.msra.gmra.mxu0 %v260_v13  ;;  %373 = vmatmul.bf16.vlgmr.msra.gmra.mxu2 %v271_v17  ;;  %v2144_v42 = vld [vmem:[%s3872_s1 + $0x1f8] sm:$0xf0]  ;;  %v2206_v46 = vld [vmem:[%s3872_s1 + $0x270] sm:$0xf]  ;;  %v2549_v50 = vld [vmem:[%s3872_s1 + $0x274] sm:$0xf]  ;;  %v2023_v52 = vor.u32 %v2504_v40, %v2022_v31 }
  0x2e   : > { %484 = vmatpush.bf16.msrb.mxu2 %v2015_v6  ;;  %386 = vmatmul.bf16.vlgmr.msra.gmra.mxu1 %v260_v13  ;;  %v2047_v6 = vor.u32 %v2510_v60, %v2046_v59  ;;  %v2134_v56 = vld [vmem:[%s3872_s1 + $0x1e0] sm:$0xf]  ;;  %v2532_v57 = vld [vmem:[%s3872_s1 + $0x1e4] sm:$0xf0]  ;;  %v2531_v58 = vld [vmem:[%s3872_s1 + $0x1e4] sm:$0xf] }
  0x2f   : > { %507 = vmatpush.bf16.msrb.mxu3 %v2019_v7  ;;  %666 = vmatpush.bf16.msrb.mxu1 %v2083_v9  ;;  %v2507_v7 = vld [vmem:[%s3872_s1 + $0x124] sm:$0xf]  ;;  %v2038_v9 = vld [vmem:[%s3872_s1 + $0x120] sm:$0xf]  ;;  %v2136_v59 = vld [vmem:[%s3872_s1 + $0x1e8] sm:$0xf0]  ;;  %v2135_v63 = vor.u32 %v2532_v57, %v2134_v56 }
  0x30   : > { %643 = vmatpush.bf16.msrb.mxu0 %v2079_v14  ;;  %396 = vmatmul.bf16.vlgmr.msra.gmra.mxu3 %v271_v17  ;;  %v2043_v13 = vor.u32 %v2507_v7, %v2040_v8  ;;  %v2474_v14 = vld [vmem:[%s3872_s1 + $0x14] sm:$0xf0]  ;;  %v2039_v17 = vor.u32 %v2508_v10, %v2038_v9  ;;  %v2547_v1 = vld [vmem:[%s3872_s1 + $0x264] sm:$0xf]  ;;  %v2200_v2 = vld [vmem:[%s3872_s1 + $0x268] sm:$0xf0] }
  0x31   : > { %v1967_v24 = vor.u32 %v2474_v14, %v1966_v12  ;;  %v2530_v7 = vld [vmem:[%s3872_s1 + $0x1d4] sm:$0xf0]  ;;  %v2529_v8 = vld [vmem:[%s3872_s1 + $0x1d4] sm:$0xf]  ;;  %v2128_v9 = vld [vmem:[%s3872_s1 + $0x1d8] sm:$0xf0] }
  0x32   : > { %485 = vmatpush.bf16.msrb.mxu2 %v2007_v20  ;;  %v2032_v20 = vld [vmem:[%s3872_s1 + $0x118] sm:$0xf0]  ;;  %v531_v10 = vld [vmem:[%s2805_s20 + $0x10] sm:$0x7]  ;;  %v2545_v14 = vld [vmem:[%s3872_s1 + $0x254] sm:$0xf]  ;;  %v2131_v16 = vor.u32 %v2529_v8, %v2128_v9 }
  0x33   : > { %508 = vmatpush.bf16.msrb.mxu3 %v2011_v21  ;;  %667 = vmatpush.bf16.msrb.mxu1 %v2075_v23  ;;  %v2506_v21 = vld [vmem:[%s3872_s1 + $0x114] sm:$0xf0]  ;;  %v2632_v23 = vld [vmem:[%s2805_s20] sm:$0xe]  ;;  %v2035_v29 = vor.u32 %v2505_v19, %v2032_v20  ;;  %v2190_v12 = vld [vmem:[%s3872_s1 + $0x250] sm:$0xf]  ;;  %v551_v19 = vunpack.c.l.b16 %v531_v10 }
  0x34   : > { %644 = vmatpush.bf16.msrb.mxu0 %v2071_v27  ;;  %v2472_v27 = vld [vmem:[%s3872_s1 + $0x4] sm:$0xf0]  ;;  %v2633_v39 = vor.u32 %v2632_v23, %v2631_v22  ;;  %v2192_v15 = vld [vmem:[%s3872_s1 + $0x258] sm:$0xf0]  ;;  %v2527_v20 = vld [vmem:[%s3872_s1 + $0x1c4] sm:$0xf] }
  0x35   : > { %v1959_v43 = vor.u32 %v2472_v27, %v1958_v26  ;;  %v2195_v23 = vor.u32 %v2545_v14, %v2192_v15  ;;  %v2544_v26 = vld [vmem:[%s3872_s1 + $0x244] sm:$0xf0]  ;;  %v2543_v27 = vld [vmem:[%s3872_s1 + $0x244] sm:$0xf]  ;;  %v2184_v28 = vld [vmem:[%s3872_s1 + $0x248] sm:$0xf0]  ;;  %v553_v30 = vpack.c.b16 %v551_v19, %v551_v19 }
  0x36   : > { %486 = vmatpush.bf16.msrb.mxu2 %v1999_v32  ;;  %v2503_v32 = vld [vmem:[%s3872_s1 + $0x104] sm:$0xf]  ;;  %v555_v54 = vrot.slane %v2633_v39, 1  ;;  %v2110_v31 = vld [vmem:[%s3872_s1 + $0x1b0] sm:$0xf]  ;;  %vm1819_vm6 = vcmask 1045508  }
  0x37   : > { %509 = vmatpush.bf16.msrb.mxu3 %v2003_v33  ;;  %668 = vmatpush.bf16.msrb.mxu1 %v2067_v37  ;;  %v2031_v33 = vor.u32 %v2506_v21, %v2030_v18  ;;  %v2142_v37 = vld [vmem:[%s3872_s1 + $0x1f0] sm:$0xf]  ;;  %v2027_v47 = vor.u32 %v2503_v32, %v2024_v34  ;;  %v2528_v18 = vld [vmem:[%s3872_s1 + $0x1c4] sm:$0xf0]  ;;  %v2120_v21 = vld [vmem:[%s3872_s1 + $0x1c8] sm:$0xf0] }
  0x38   : > { %645 = vmatpush.bf16.msrb.mxu0 %v2063_v41  ;;  %v2533_v41 = vld [vmem:[%s3872_s1 + $0x1f4] sm:$0xf]  ;;  %v2526_v32 = vld [vmem:[%s3872_s1 + $0x1b4] sm:$0xf0]  ;;  %v2112_v34 = vld [vmem:[%s3872_s1 + $0x1b8] sm:$0xf0] }
  0x39   : > { %v2147_v53 = vor.u32 %v2533_v41, %v2144_v42  ;;  %v2174_v39 = vld [vmem:[%s3872_s1 + $0x230] sm:$0xf]  ;;  %v2111_v40 = vor.u32 %v2526_v32, %v2110_v31  ;;  %v2542_v41 = vld [vmem:[%s3872_s1 + $0x234] sm:$0xf0]  ;;  %v2541_v42 = vld [vmem:[%s3872_s1 + $0x234] sm:$0xf] }
  0x3a   : > { %487 = vmatpush.bf16.msrb.mxu2 %v1991_v48  ;;  %v2143_v48 = vor.u32 %v2534_v38, %v2142_v37  ;;  %v2187_v38 = vor.u32 %v2543_v27, %v2184_v28  ;;  %v2540_v56 = vld [vmem:[%s3872_s1 + $0x224] sm:$0xf0]  ;;  %v2539_v57 = vld [vmem:[%s3872_s1 + $0x224] sm:$0xf]  ;;  %v699_v8 = vld [vmem:[%s2805_s20] sm:$0x8] }
  0x3b   : > { %510 = vmatpush.bf16.msrb.mxu3 %v1995_v49  ;;  %669 = vmatpush.bf16.msrb.mxu1 %v2059_v51  ;;  %v2550_v49 = vld [vmem:[%s3872_s1 + $0x274] sm:$0xf0]  ;;  %v2208_v51 = vld [vmem:[%s3872_s1 + $0x278] sm:$0xf0]  ;;  %v3238_v9 = vld [vmem:[%s2805_s20 + $0x4] sm:$0xf] }
  0x3c   : > { %646 = vmatpush.bf16.msrb.mxu0 %v2055_v55  ;;  %v556_v55 = vrot.slane %v2811_v36, 1  ;;  %v2207_v60 = vor.u32 %v2550_v49, %v2206_v46  ;;  %v2523_v49 = vld [vmem:[%s3872_s1 + $0x1a4] sm:$0xf]  ;;  %v2566_v14 = vld [vmem:[%s3872_s1 + $0x2f4] sm:$0xf0] }
  0x3d   : > { %368 = vmatmul.bf16.gmra.mxu0 %v268_v5  ;;  %v2536_v19 = vld [vmem:[%s3872_s1 + $0x204] sm:$0xf0]  ;;  %v2582_v28 = vld [vmem:[%s3872_s1 + $0x374] sm:$0xf0]  ;;  %v2262_v32 = vld [vmem:[%s3872_s1 + $0x2e0] sm:$0xf] }
  0x3e   : > { %488 = vmatpush.bf16.msrb.mxu2 %v1983_v61  ;;  %391 = vmatmul.bf16.gmra.mxu1 %v268_v5  ;;  %v2211_v61 = vor.u32 %v2549_v50, %v2208_v51  ;;  %v557_v3 = vsel %vm554_vm1, %v555_v54, %v556_v55  ;;  %v2139_v5 = vor.u32 %v2531_v58, %v2136_v59  ;;  %v2104_v50 = vld [vmem:[%s3872_s1 + $0x1a8] sm:$0xf0]  ;;  %vm736_vm2 = vsmask.f32 4352 }
  0x3f   : > { %511 = vmatpush.bf16.msrb.mxu3 %v1987_v62  ;;  %670 = vmatpush.bf16.msrb.mxu1 %v2051_v0  ;;  %v2198_v62 = vld [vmem:[%s3872_s1 + $0x260] sm:$0xf]  ;;  %v2548_v0 = vld [vmem:[%s3872_s1 + $0x264] sm:$0xf0]  ;;  %v2175_v51 = vor.u32 %v2542_v41, %v2174_v39  ;;  %v2168_v58 = vld [vmem:[%s3872_s1 + $0x228] sm:$0xf0] }
  0x40   : > { %647 = vmatpush.bf16.msrb.mxu0 %v2047_v6  ;;  %v2126_v6 = vld [vmem:[%s3872_s1 + $0x1d0] sm:$0xf]  ;;  %v2264_v41 = vld [vmem:[%s3872_s1 + $0x2e8] sm:$0xf0]  ;;  %vm1817_vm5 = vsmask.f32 1280 }
  0x41   : > { %vm1820_vm7 = vsmask.f32 5376  ;;  %vm1818_vm8 = vmand %vm1816_vm4, %vm1817_vm5 }
  0x42   : > { %489 = vmatpush.bf16.msrb.mxu2 %v1975_v4  ;;  %v2199_v4 = vor.u32 %v2548_v0, %v2198_v62  ;;  %v2522_v62 = vld [vmem:[%s3872_s1 + $0x194] sm:$0xf0]  ;;  %vm1821_vm9 = vmand %vm1819_vm6, %vm1820_vm7 }
  0x43   : > { %512 = vmatpush.bf16.msrb.mxu3 %v1979_v11  ;;  %671 = vmatpush.bf16.msrb.mxu1 %v2043_v13  ;;  %v2203_v11 = vor.u32 %v2547_v1, %v2200_v2  ;;  %v2546_v13 = vld [vmem:[%s3872_s1 + $0x254] sm:$0xf0]  ;;  %v2171_v1 = vor.u32 %v2539_v57, %v2168_v58  ;;  %v2086_v2 = vld [vmem:[%s3872_s1 + $0x180] sm:$0xf]  ;;  %v2580_v58 = vld [vmem:[%s3872_s1 + $0x364] sm:$0xf0] }
  0x44   : > { %648 = vmatpush.bf16.msrb.mxu0 %v2039_v17  ;;  %v2118_v17 = vld [vmem:[%s3872_s1 + $0x1c0] sm:$0xf]  ;;  %v2191_v22 = vor.u32 %v2546_v13, %v2190_v12  ;;  %v2088_v12 = vld [vmem:[%s3872_s1 + $0x188] sm:$0xf0]  ;;  %v2270_v13 = vld [vmem:[%s3872_s1 + $0x2f0] sm:$0xf] }
  0x45   : > { %v2271_v27 = vor.u32 %v2566_v14, %v2270_v13  ;;  %v2326_v57 = vld [vmem:[%s3872_s1 + $0x360] sm:$0xf]  ;;  %v2238_v13 = vld [vmem:[%s3872_s1 + $0x2b0] sm:$0xf]  ;;  %v2558_v14 = vld [vmem:[%s3872_s1 + $0x2b4] sm:$0xf0] }
  0x46   : > { %490 = vmatpush.bf16.msrb.mxu2 %v1967_v24  ;;  %v2182_v24 = vld [vmem:[%s3872_s1 + $0x240] sm:$0xf]  ;;  %vm1822_vm10 = vmor %vm1821_vm9, %vm1818_vm8 }
  0x47   : > { %513 = vmatpush.bf16.msrb.mxu3 %v1971_v25  ;;  %672 = vmatpush.bf16.msrb.mxu1 %v2035_v29  ;;  %v2119_v25 = vor.u32 %v2528_v18, %v2118_v17  ;;  %v2123_v29 = vor.u32 %v2527_v20, %v2120_v21  ;;  %v2183_v37 = vor.u32 %v2544_v26, %v2182_v24  ;;  %v727_v17 = vunpack.c.l.b16 %v699_v8  ;;  %v2565_v20 = vld [vmem:[%s3872_s1 + $0x2f4] sm:$0xf]  ;;  %v2272_v21 = vld [vmem:[%s3872_s1 + $0x2f8] sm:$0xf0]  ;;  %v2152_v24 = vld [vmem:[%s3872_s1 + $0x208] sm:$0xf0] }
  0x48   : > { %649 = vmatpush.bf16.msrb.mxu0 %v2031_v33  ;;  %v2525_v33 = vld [vmem:[%s3872_s1 + $0x1b4] sm:$0xf]  ;;  %v728_v18 = vunpack.c.l.b16 %v3238_v9  ;;  %v2275_v31 = vor.u32 %v2565_v20, %v2272_v21  ;;  %v2248_v8 = vld [vmem:[%s3872_s1 + $0x2c8] sm:$0xf0]  ;;  %v2310_v20 = vld [vmem:[%s3872_s1 + $0x340] sm:$0xf] }
  0x49   : > { %v2115_v46 = vor.u32 %v2525_v33, %v2112_v34  ;;  %v2564_v33 = vld [vmem:[%s3872_s1 + $0x2e4] sm:$0xf0] }
  0x4a   : > { %491 = vmatpush.bf16.msrb.mxu2 %v1959_v43  ;;  %v2176_v43 = vld [vmem:[%s3872_s1 + $0x238] sm:$0xf0]  ;;  %v3293_v34 = vld [vmem:[%s2805_s20 + $0x8] sm:$0xff]  }
  0x4b   : > { %514 = vmatpush.bf16.msrb.mxu3 %v1963_v44  ;;  %673 = vmatpush.bf16.msrb.mxu1 %v2027_v47  ;;  %v3177_v44 = vrot.slane %v553_v30, 1  ;;  %v2102_v47 = vld [vmem:[%s3872_s1 + $0x1a0] sm:$0xf]  ;;  %v2336_v30 = vld [vmem:[%s3872_s1 + $0x378] sm:$0xf0] }
  0x4c   : > { %650 = vmatpush.bf16.msrb.mxu0 %v2023_v52  ;;  %v2179_v52 = vor.u32 %v2541_v42, %v2176_v43 }
  0x4d   : > { %492 = vmatmul.bf16.vlgmr.msrb.gmra.mxu2 %v2808_v35  ;;  %v559_v59 = vsel %vm554_vm1, %v556_v55, %v3177_v44  ;;  %v2521_v55 = vld [vmem:[%s3872_s1 + $0x194] sm:$0xf] }
  0x4e   : > { %846 = vmatpush.bf16.msra.mxu2 %v2143_v48  ;;  %515 = vmatmul.bf16.vlgmr.msrb.gmra.mxu3 %v2808_v35  ;;  %v2127_v35 = vor.u32 %v2530_v7, %v2126_v6  ;;  %v2524_v48 = vld [vmem:[%s3872_s1 + $0x1a4] sm:$0xf0]  ;;  %v2160_v7 = vld [vmem:[%s3872_s1 + $0x218] sm:$0xf0] }
  0x4f   : > { %869 = vmatpush.bf16.msra.mxu3 %v2147_v53  ;;  %1030 = vmatpush.bf16.msra.mxu1 %v2211_v61  ;;  %v2166_v53 = vld [vmem:[%s3872_s1 + $0x220] sm:$0xf]  ;;  %v2103_v54 = vor.u32 %v2524_v48, %v2102_v47  ;;  %v2094_v61 = vld [vmem:[%s3872_s1 + $0x190] sm:$0xf]  ;;  %v2579_v47 = vld [vmem:[%s3872_s1 + $0x364] sm:$0xf] }
  0x50   : > { %1007 = vmatpush.bf16.msra.mxu0 %v2207_v60  ;;  %674 = vmatmul.bf16.vlgmr.msrb.gmra.mxu1 %v557_v3  ;;  %v2107_v60 = vor.u32 %v2523_v49, %v2104_v50  ;;  %v2167_v0 = vor.u32 %v2540_v56, %v2166_v53  ;;  %v2095_v6 = vor.u32 %v2522_v62, %v2094_v61  ;;  %v2328_v48 = vld [vmem:[%s3872_s1 + $0x368] sm:$0xf0]  ;;  %v746_v49 = vshrl.u32 %v3293_v34, 16 }
  0x51   : > { %651 = vmatmul.bf16.vlgmr.msrb.gmra.mxu0 %v557_v3  ;;  %v2538_v3 = vld [vmem:[%s3872_s1 + $0x214] sm:$0xf0]  ;;  %v749_v50 = vshll.u32 %v3293_v34, 16  ;;  %v2331_v61 = vor.u32 %v2579_v47, %v2328_v48 }
  0x52   : > { %847 = vmatpush.bf16.msra.mxu2 %v2135_v63  ;;  %v2096_v63 = vld [vmem:[%s3872_s1 + $0x198] sm:$0xf0] }
  0x53   : > { %870 = vmatpush.bf16.msra.mxu3 %v2139_v5  ;;  %1031 = vmatpush.bf16.msra.mxu1 %v2203_v11  ;;  %v2537_v5 = vld [vmem:[%s3872_s1 + $0x214] sm:$0xf]  ;;  %v2099_v10 = vor.u32 %v2521_v55, %v2096_v63  ;;  %v2519_v11 = vld [vmem:[%s3872_s1 + $0x184] sm:$0xf]  ;;  %v748_v55 = vrot.slane %v746_v49, 3  ;;  %v2327_v63 = vor.u32 %v2580_v58, %v2326_v57 }
  0x54   : > { %1008 = vmatpush.bf16.msra.mxu0 %v2199_v4  ;;  %v2520_v4 = vld [vmem:[%s3872_s1 + $0x184] sm:$0xf0]  ;;  %v2091_v26 = vor.u32 %v2519_v11, %v2088_v12  ;;  %v2578_v11 = vld [vmem:[%s3872_s1 + $0x354] sm:$0xf0]  ;;  %v2577_v12 = vld [vmem:[%s3872_s1 + $0x354] sm:$0xf] }
  0x55   : > { %v2302_v49 = vld [vmem:[%s3872_s1 + $0x330] sm:$0xf]  ;;  %v2554_v57 = vld [vmem:[%s3872_s1 + $0x294] sm:$0xf0]  ;;  %v2553_v58 = vld [vmem:[%s3872_s1 + $0x294] sm:$0xf] }
  0x56   : > { %848 = vmatpush.bf16.msra.mxu2 %v2127_v35  ;;  %v2150_v35 = vld [vmem:[%s3872_s1 + $0x200] sm:$0xf] }
  0x57   : > { %871 = vmatpush.bf16.msra.mxu3 %v2131_v16  ;;  %1032 = vmatpush.bf16.msra.mxu1 %v2195_v23  ;;  %v2163_v16 = vor.u32 %v2537_v5, %v2160_v7  ;;  %v2535_v23 = vld [vmem:[%s3872_s1 + $0x204] sm:$0xf] }
  0x58   : > { %1009 = vmatpush.bf16.msra.mxu0 %v2191_v22  ;;  %v2087_v22 = vor.u32 %v2520_v4, %v2086_v2  ;;  %v2155_v39 = vor.u32 %v2535_v23, %v2152_v24  ;;  %v2559_v7 = vld [vmem:[%s3872_s1 + $0x2c4] sm:$0xf]  ;;  %v2318_v4 = vld [vmem:[%s3872_s1 + $0x350] sm:$0xf]  ;;  %v2576_v23 = vld [vmem:[%s3872_s1 + $0x344] sm:$0xf0] }
  0x59   : > { %v2575_v24 = vld [vmem:[%s3872_s1 + $0x344] sm:$0xf] }
  0x5a   : > { %849 = vmatpush.bf16.msra.mxu2 %v2119_v25  ;;  %v2334_v25 = vld [vmem:[%s3872_s1 + $0x370] sm:$0xf] }
  0x5b   : > { %872 = vmatpush.bf16.msra.mxu3 %v2123_v29  ;;  %1033 = vmatpush.bf16.msra.mxu1 %v2187_v38  ;;  %v2581_v29 = vld [vmem:[%s3872_s1 + $0x374] sm:$0xf]  ;;  %v2151_v38 = vor.u32 %v2536_v19, %v2150_v35  ;;  %v2335_v42 = vor.u32 %v2582_v28, %v2334_v25  ;;  %v2319_v35 = vor.u32 %v2578_v11, %v2318_v4  ;;  %v2240_v19 = vld [vmem:[%s3872_s1 + $0x2b8] sm:$0xf0]  ;;  %v2312_v25 = vld [vmem:[%s3872_s1 + $0x348] sm:$0xf0] }
  0x5c   : > { %1010 = vmatpush.bf16.msra.mxu0 %v2183_v37  ;;  %v733_v37 = vpack.c.b16 %v728_v18, %v727_v17  ;;  %v2339_v43 = vor.u32 %v2581_v29, %v2336_v30  ;;  %v2557_v17 = vld [vmem:[%s3872_s1 + $0x2b4] sm:$0xf]  ;;  %v2311_v28 = vor.u32 %v2576_v23, %v2310_v20  ;;  %v2230_v29 = vld [vmem:[%s3872_s1 + $0x2a0] sm:$0xf]  ;;  %v2556_v30 = vld [vmem:[%s3872_s1 + $0x2a4] sm:$0xf0] }
  0x5d   : > { %497 = vmatmul.bf16.gmra.mxu2 %v2811_v36  ;;  %v2570_v4 = vld [vmem:[%s3872_s1 + $0x314] sm:$0xf0]  ;;  %v2569_v11 = vld [vmem:[%s3872_s1 + $0x314] sm:$0xf]  ;;  %v2280_v23 = vld [vmem:[%s3872_s1 + $0x308] sm:$0xf0] }
  0x5e   : > { %850 = vmatpush.bf16.msra.mxu2 %v2111_v40  ;;  %520 = vmatmul.bf16.gmra.mxu3 %v2811_v36  ;;  %v2158_v36 = vld [vmem:[%s3872_s1 + $0x210] sm:$0xf]  ;;  %v2563_v40 = vld [vmem:[%s3872_s1 + $0x2e4] sm:$0xf]  ;;  %v738_v53 = vshrl.u32 %v733_v37, 16 }
  0x5f   : > { %873 = vmatpush.bf16.msra.mxu3 %v2115_v46  ;;  %1034 = vmatpush.bf16.msra.mxu1 %v2179_v52  ;;  %v2159_v15 = vor.u32 %v2538_v3, %v2158_v36  ;;  %v2263_v46 = vor.u32 %v2564_v33, %v2262_v32  ;;  %v2562_v52 = vld [vmem:[%s3872_s1 + $0x2d4] sm:$0xf0]  ;;  %v2267_v56 = vor.u32 %v2563_v40, %v2264_v41  ;;  %v751_v3 = vrot.slane %v749_v50, 4  ;;  %v2232_v40 = vld [vmem:[%s3872_s1 + $0x2a8] sm:$0xf0] }
  0x60   : > { %1011 = vmatpush.bf16.msra.mxu0 %v2175_v51  ;;  %679 = vmatmul.bf16.gmra.mxu1 %v559_v59  ;;  %v2254_v51 = vld [vmem:[%s3872_s1 + $0x2d0] sm:$0xf]  ;;  %v740_v2 = vrot.slane %v738_v53, 3  ;;  %v2243_v33 = vor.u32 %v2557_v17, %v2240_v19  ;;  %v2231_v41 = vor.u32 %v2556_v30, %v2230_v29  ;;  %v2574_v50 = vld [vmem:[%s3872_s1 + $0x334] sm:$0xf0] }
  0x61   : > { %656 = vmatmul.bf16.gmra.mxu0 %v559_v59  ;;  %v2561_v59 = vld [vmem:[%s3872_s1 + $0x2d4] sm:$0xf]  ;;  %v2255_v62 = vor.u32 %v2562_v52, %v2254_v51  ;;  %v3392_v32 = vor.u32 %v751_v3, %v748_v55  ;;  %v2303_v9 = vor.u32 %v2574_v50, %v2302_v49  ;;  %v2552_v3 = vld [vmem:[%s3872_s1 + $0x284] sm:$0xf0]  ;;  %v2390_v29 = vld [vmem:[%s3872_s1 + $0x3e0] sm:$0xf] }
  0x62   : > { %851 = vmatpush.bf16.msra.mxu2 %v2103_v54  ;;  %v741_v54 = vshll.u32 %v733_v37, 16  ;;  %v2621_v37 = vunpack.c.l.b16 %v3293_v34  ;;  %v2573_v51 = vld [vmem:[%s3872_s1 + $0x334] sm:$0xf]  ;;  %v2568_v17 = vld [vmem:[%s3872_s1 + $0x304] sm:$0xf0] }
  0x63   : > { %874 = vmatpush.bf16.msra.mxu3 %v2107_v60  ;;  %1035 = vmatpush.bf16.msra.mxu1 %v2171_v1  ;;  %v2256_v60 = vld [vmem:[%s3872_s1 + $0x2d8] sm:$0xf0]  ;;  %v2560_v1 = vld [vmem:[%s3872_s1 + $0x2c4] sm:$0xf0] }
  0x64   : > { %1012 = vmatpush.bf16.msra.mxu0 %v2167_v0  ;;  %v2246_v0 = vld [vmem:[%s3872_s1 + $0x2c0] sm:$0xf]  ;;  %v743_v36 = vrot.slane %v741_v54, 4  ;;  %v2259_v5 = vor.u32 %v2561_v59, %v2256_v60  ;;  %v2224_v60 = vld [vmem:[%s3872_s1 + $0x298] sm:$0xf0] }
  0x65   : > { %v2227_v55 = vor.u32 %v2553_v58, %v2224_v60  ;;  %v2596_v30 = vld [vmem:[%s3872_s1 + $0x3e4] sm:$0xf0] }
  0x66   : > { %852 = vmatpush.bf16.msra.mxu2 %v2095_v6  ;;  %v3338_v6 = vld [vmem:[%s2805_s20 + $0x10] sm:$0xf] }
  0x67   : > { %875 = vmatpush.bf16.msra.mxu3 %v2099_v10  ;;  %1036 = vmatpush.bf16.msra.mxu1 %v2163_v16  ;;  %v2247_v10 = vor.u32 %v2560_v1, %v2246_v0  ;;  %v731_v21 = vunpack.c.l.b16 %v3338_v6  ;;  %v2571_v0 = vld [vmem:[%s3872_s1 + $0x324] sm:$0xf]  ;;  %v2296_v1 = vld [vmem:[%s3872_s1 + $0x328] sm:$0xf0]  ;;  %v2598_v6 = vld [vmem:[%s3872_s1 + $0x3f4] sm:$0xf0] }
  0x68   : > { %1013 = vmatpush.bf16.msra.mxu0 %v2159_v15  ;;  %v2251_v15 = vor.u32 %v2559_v7, %v2248_v8 }
  0x6a   : > { %853 = vmatpush.bf16.msra.mxu2 %v2087_v22 }
  0x6b   : > { %876 = vmatpush.bf16.msra.mxu3 %v2091_v26  ;;  %1037 = vmatpush.bf16.msra.mxu1 %v2155_v39  ;;  %v2239_v26 = vor.u32 %v2558_v14, %v2238_v13  ;;  %v2555_v39 = vld [vmem:[%s3872_s1 + $0x2a4] sm:$0xf]  ;;  %v2622_v14 = vunpack.c.h.b16 %v3293_v34 }
  0x6c   : > { %1014 = vmatpush.bf16.msra.mxu0 %v2151_v38 }
  0x6d   : > { %502 = vmatmul.bf16.gmra.mxu2 %v2827_v45  ;;  %v3485_v19 = vpack.c.b16 %v731_v21, %v2622_v14 }
  0x6e   : > { %1185 = vmatpush.bf16.msrb.mxu2 %v2271_v27  ;;  %525 = vmatmul.bf16.gmra.mxu3 %v2827_v45  ;;  %v704_v45 = vld [vmem:[%s2805_s20 + $0x14] sm:$0x1]  ;;  %v2315_v27 = vor.u32 %v2575_v24, %v2312_v25  ;;  %v2398_v25 = vld [vmem:[%s3872_s1 + $0x3f0] sm:$0xf] }
  0x6f   : > { %1208 = vmatpush.bf16.msrb.mxu3 %v2275_v31  ;;  %1390 = vmatpush.bf16.msrb.mxu1 %v2339_v43  ;;  %v732_v22 = vunpack.c.l.b16 %v704_v45  ;;  %v744_v31 = vor.u32 %v743_v36, %v740_v2  ;;  %v2235_v43 = vor.u32 %v2555_v39, %v2232_v40  ;;  %v2214_v2 = vld [vmem:[%s3872_s1 + $0x280] sm:$0xf]  ;;  %v2299_v36 = vor.u32 %v2571_v0, %v2296_v1  ;;  %v2216_v45 = vld [vmem:[%s3872_s1 + $0x288] sm:$0xf0]  ;;  %v2462_v39 = vld [vmem:[%s3872_s1 + $0x470] sm:$0xf] }
  0x70   : > { %1367 = vmatpush.bf16.msrb.mxu0 %v2335_v42  ;;  %684 = vmatmul.bf16.gmra.mxu1 %v3177_v44  ;;  %v2215_v7 = vor.u32 %v2552_v3, %v2214_v2  ;;  %v2614_v40 = vld [vmem:[%s3872_s1 + $0x474] sm:$0xf0]  ;;  %v2591_v0 = vld [vmem:[%s3872_s1 + $0x3c4] sm:$0xf]  ;;  %v1087_v3 = vshll.u32 %v3485_v19, 16 }
  0x71   : > { %661 = vmatmul.bf16.gmra.mxu0 %v3177_v44  ;;  %v2320_v44 = vld [vmem:[%s3872_s1 + $0x358] sm:$0xf0]  ;;  %v735_v38 = vpack.c.b16 %v732_v22, %v731_v21  ;;  %v753_v42 = vsel %vm736_vm2, %v744_v31, %v3392_v32  ;;  %v2567_v22 = vld [vmem:[%s3872_s1 + $0x304] sm:$0xf]  ;;  %v2597_v21 = vld [vmem:[%s3872_s1 + $0x3f4] sm:$0xf] }
  0x72   : > { %1186 = vmatpush.bf16.msrb.mxu2 %v2263_v46  ;;  %v2323_v16 = vor.u32 %v2577_v12, %v2320_v44  ;;  %v3407_v46 = vpack.c.b16 %v2621_v37, %v728_v18  ;;  %v2304_v18 = vld [vmem:[%s3872_s1 + $0x338] sm:$0xf0]  ;;  %v2283_v24 = vor.u32 %v2567_v22, %v2280_v23  ;;  %v2595_v31 = vld [vmem:[%s3872_s1 + $0x3e4] sm:$0xf]  ;;  %v3596_v14 = vrot.slane %v1087_v3, 1 }
  0x73   : > { %1209 = vmatpush.bf16.msrb.mxu3 %v2267_v56  ;;  %1391 = vmatpush.bf16.msrb.mxu1 %v2331_v61  ;;  %v755_v47 = vshrl.u32 %v735_v38, 16  ;;  %v758_v48 = vshll.u32 %v735_v38, 16  ;;  %v2307_v54 = vor.u32 %v2573_v51, %v2304_v18  ;;  %v2222_v56 = vld [vmem:[%s3872_s1 + $0x290] sm:$0xf]  ;;  %v2294_v61 = vld [vmem:[%s3872_s1 + $0x320] sm:$0xf] }
  0x74   : > { %1368 = vmatpush.bf16.msrb.mxu0 %v2327_v63  ;;  %v2223_v59 = vor.u32 %v2554_v57, %v2222_v56  ;;  %v902_v38 = vld [vmem:[%s2805_s20 + $0x14] sm:$0x3]  ;;  %v2384_v18 = vld [vmem:[%s3872_s1 + $0x3d8] sm:$0xf0]  ;;  %v2611_v56 = vld [vmem:[%s3872_s1 + $0x464] sm:$0xf] }
  0x75   : > { %v757_v52 = vrot.slane %v755_v47, 3  ;;  %v760_v53 = vrot.slane %v758_v48, 4  ;;  %v2382_v47 = vld [vmem:[%s3872_s1 + $0x3d0] sm:$0xf]  ;;  %v2594_v48 = vld [vmem:[%s3872_s1 + $0x3d4] sm:$0xf0]  ;;  %v920_v49 = vunpack.c.l.b16 %v902_v38 }
  0x76   : > { %1187 = vmatpush.bf16.msrb.mxu2 %v2255_v62  ;;  %v2572_v62 = vld [vmem:[%s3872_s1 + $0x324] sm:$0xf0]  ;;  %v2383_v51 = vor.u32 %v2594_v48, %v2382_v47  ;;  %v2456_v57 = vld [vmem:[%s3872_s1 + $0x468] sm:$0xf0]  ;;  %v1082_v1 = vshll.u32 %v3407_v46, 16 }
  0x77   : > { %1210 = vmatpush.bf16.msrb.mxu3 %v2259_v5  ;;  %1392 = vmatpush.bf16.msrb.mxu1 %v2323_v16  ;;  %v2295_v63 = vor.u32 %v2572_v62, %v2294_v61  ;;  %v2551_v5 = vld [vmem:[%s3872_s1 + $0x284] sm:$0xf]  ;;  %v3471_v44 = vor.u32 %v760_v53, %v757_v52  ;;  %v2278_v16 = vld [vmem:[%s3872_s1 + $0x300] sm:$0xf]  ;;  %v3556_v60 = vpack.c.b16 %v920_v49, %v920_v49  ;;  %v2668_v62 = vld [vmem:[%s2805_s20 + $0x4] sm:$0xf0]  }
  0x78   : > { %1369 = vmatpush.bf16.msrb.mxu0 %v2319_v35  ;;  %v2219_v8 = vor.u32 %v2551_v5, %v2216_v45  ;;  %v2288_v35 = vld [vmem:[%s3872_s1 + $0x318] sm:$0xf0]  ;;  %v2279_v20 = vor.u32 %v2568_v17, %v2278_v16  ;;  %v2454_v52 = vld [vmem:[%s3872_s1 + $0x460] sm:$0xf]  ;;  %v2639_v61 = vld [vmem:[%s2805_s20 + $0x4] sm:$0x8] }
  0x79   : > { %v2291_v13 = vor.u32 %v2569_v11, %v2288_v35  ;;  %v3578_v5 = vld [vmem:[%s2805_s20 + $0xc] sm:$0xff]   ;;  %v1080_v35 = vshrl.u32 %v3407_v46, 16  ;;  %v2606_v47 = vld [vmem:[%s3872_s1 + $0x434] sm:$0xf0]  ;;  %v2605_v48 = vld [vmem:[%s3872_s1 + $0x434] sm:$0xf] }
  0x7a   : > { %1188 = vmatpush.bf16.msrb.mxu2 %v2247_v10  ;;  %v2286_v10 = vld [vmem:[%s3872_s1 + $0x310] sm:$0xf]  ;;  %v1280_v16 = vrot.slane %v3578_v5, 3 }
  0x7b   : > { %1211 = vmatpush.bf16.msrb.mxu3 %v2251_v15  ;;  %1393 = vmatpush.bf16.msrb.mxu1 %v2315_v27  ;;  %v2287_v12 = vor.u32 %v2570_v4, %v2286_v10  ;;  %v762_v15 = vsel %vm736_vm2, %v3392_v32, %v3471_v44  ;;  %v2400_v27 = vld [vmem:[%s3872_s1 + $0x3f8] sm:$0xf0]  ;;  %v2391_v32 = vor.u32 %v2596_v30, %v2390_v29  ;;  %v2610_v10 = vld [vmem:[%s3872_s1 + $0x454] sm:$0xf0]  ;;  %v2609_v4 = vld [vmem:[%s3872_s1 + $0x454] sm:$0xf] }
  0x7c   : > { %1370 = vmatpush.bf16.msrb.mxu0 %v2311_v28  ;;  %v2403_v28 = vor.u32 %v2597_v21, %v2400_v27  ;;  %v2366_v17 = vld [vmem:[%s3872_s1 + $0x3b0] sm:$0xf]  ;;  %v2607_v27 = vld [vmem:[%s3872_s1 + $0x444] sm:$0xf]  ;;  %v2358_v29 = vld [vmem:[%s3872_s1 + $0x3a0] sm:$0xf] }
  0x7d   : > { %854 = vmatmul.bf16.vlgmr.msra.gmra.mxu2 %v753_v42 }
  0x7e   : > { %1189 = vmatpush.bf16.msrb.mxu2 %v2239_v26  ;;  %877 = vmatmul.bf16.vlgmr.msra.gmra.mxu3 %v753_v42  ;;  %v2399_v26 = vor.u32 %v2598_v6, %v2398_v25  ;;  %v2463_v42 = vor.u32 %v2614_v40, %v2462_v39  ;;  %v2438_v25 = vld [vmem:[%s3872_s1 + $0x440] sm:$0xf]  ;;  %v2608_v6 = vld [vmem:[%s3872_s1 + $0x444] sm:$0xf0] }
  0x7f   : > { %1212 = vmatpush.bf16.msrb.mxu3 %v2243_v33  ;;  %1394 = vmatpush.bf16.msrb.mxu1 %v2307_v54  ;;  %v2392_v33 = vld [vmem:[%s3872_s1 + $0x3e8] sm:$0xf0]  ;;  %v2612_v54 = vld [vmem:[%s3872_s1 + $0x464] sm:$0xf0] }
  0x80   : > { %1038 = vmatmul.bf16.vlgmr.msra.gmra.mxu1 %v3407_v46  ;;  %1371 = vmatpush.bf16.msrb.mxu0 %v2303_v9  ;;  %v2395_v37 = vor.u32 %v2595_v31, %v2392_v33  ;;  %v2593_v9 = vld [vmem:[%s3872_s1 + $0x3d4] sm:$0xf]  ;;  %v2455_v58 = vor.u32 %v2612_v54, %v2454_v52  ;;  %v2588_v31 = vld [vmem:[%s3872_s1 + $0x3a4] sm:$0xf0]  ;;  %v2360_v33 = vld [vmem:[%s3872_s1 + $0x3a8] sm:$0xf0] }
  0x81   : > { %1015 = vmatmul.bf16.vlgmr.msra.gmra.mxu0 %v3407_v46  ;;  %v2387_v53 = vor.u32 %v2593_v9, %v2384_v18  ;;  %v2589_v46 = vld [vmem:[%s3872_s1 + $0x3b4] sm:$0xf]  ;;  %v1091_v9 = vshrl.u32 %v3485_v19, 16  ;;  %v1095_v18 = vshll.u32 %v3556_v60, 16  ;;  %v2350_v54 = vld [vmem:[%s3872_s1 + $0x390] sm:$0xf] }
  0x82   : > { %1190 = vmatpush.bf16.msrb.mxu2 %v2231_v41  ;;  %v2613_v41 = vld [vmem:[%s3872_s1 + $0x474] sm:$0xf] }
  0x83   : > { %1213 = vmatpush.bf16.msrb.mxu3 %v2235_v43  ;;  %1395 = vmatpush.bf16.msrb.mxu1 %v2299_v36  ;;  %v2464_v43 = vld [vmem:[%s3872_s1 + $0x478] sm:$0xf0]  ;;  %v2376_v36 = vld [vmem:[%s3872_s1 + $0x3c8] sm:$0xf0]  ;;  %v2669_v52 = vld [vmem:[%s2805_s20 + $0x14] sm:$0xf] }
  0x84   : > { %1372 = vmatpush.bf16.msrb.mxu0 %v2295_v63  ;;  %v2467_v50 = vor.u32 %v2613_v41, %v2464_v43  ;;  %v2592_v63 = vld [vmem:[%s3872_s1 + $0x3c4] sm:$0xf0]  ;;  %v2379_v45 = vor.u32 %v2591_v0, %v2376_v36  ;;  %v2430_v43 = vld [vmem:[%s3872_s1 + $0x430] sm:$0xf]  ;;  %v2424_v0 = vld [vmem:[%s3872_s1 + $0x428] sm:$0xf0] }
  0x85   : > { %v2431_v49 = vor.u32 %v2606_v47, %v2430_v43  ;;  %v1097_v36 = vrot.slane %v1095_v18, 1 }
  0x86   : > { %1191 = vmatpush.bf16.msrb.mxu2 %v2223_v59  ;;  %v2459_v59 = vor.u32 %v2611_v56, %v2456_v57  ;;  %v2586_v56 = vld [vmem:[%s3872_s1 + $0x394] sm:$0xf0]  ;;  %v2585_v57 = vld [vmem:[%s3872_s1 + $0x394] sm:$0xf] }
  0x87   : > { %1214 = vmatpush.bf16.msrb.mxu3 %v2227_v55  ;;  %1396 = vmatpush.bf16.msrb.mxu1 %v2291_v13  ;;  %v2374_v55 = vld [vmem:[%s3872_s1 + $0x3c0] sm:$0xf] }
  0x88   : > { %1373 = vmatpush.bf16.msrb.mxu0 %v2287_v12  ;;  %v2375_v2 = vor.u32 %v2592_v63, %v2374_v55  ;;  %v2448_v12 = vld [vmem:[%s3872_s1 + $0x458] sm:$0xf0]  ;;  %v2603_v63 = vld [vmem:[%s3872_s1 + $0x424] sm:$0xf] }
  0x89   : > { %v2451_v13 = vor.u32 %v2609_v4, %v2448_v12  ;;  %v2342_v4 = vld [vmem:[%s3872_s1 + $0x380] sm:$0xf]  ;;  %v2583_v12 = vld [vmem:[%s3872_s1 + $0x384] sm:$0xf] }
  0x8a   : > { %1192 = vmatpush.bf16.msrb.mxu2 %v2215_v7  ;;  %v3581_v7 = vor.u32 %v2668_v62, %v2639_v61  ;;  %v2604_v61 = vld [vmem:[%s3872_s1 + $0x424] sm:$0xf0] }
  0x8b   : > { %1215 = vmatpush.bf16.msrb.mxu3 %v2219_v8  ;;  %1397 = vmatpush.bf16.msrb.mxu1 %v2283_v24  ;;  %v2446_v8 = vld [vmem:[%s3872_s1 + $0x450] sm:$0xf]  ;;  %v2368_v24 = vld [vmem:[%s3872_s1 + $0x3b8] sm:$0xf0] }
  0x8c   : > { %1374 = vmatpush.bf16.msrb.mxu0 %v2279_v20  ;;  %v2447_v11 = vor.u32 %v2610_v10, %v2446_v8  ;;  %v2590_v20 = vld [vmem:[%s3872_s1 + $0x3b4] sm:$0xf0]  ;;  %v2371_v21 = vor.u32 %v2589_v46, %v2368_v24 }
  0x8d   : > { %859 = vmatmul.bf16.gmra.mxu2 %v762_v15  ;;  %v2367_v23 = vor.u32 %v2590_v20, %v2366_v17  ;;  %v2602_v17 = vld [vmem:[%s3872_s1 + $0x414] sm:$0xf0] }
  0x8e   : > { %882 = vmatmul.bf16.gmra.mxu3 %v762_v15  ;;  %1548 = vmatpush.bf16.msra.mxu2 %v2399_v26  ;;  %v1279_v15 = vrot.slane %v3581_v7, 3  ;;  %v2439_v26 = vor.u32 %v2608_v6, %v2438_v25  ;;  %v2406_v6 = vld [vmem:[%s3872_s1 + $0x400] sm:$0xf] }
  0x8f   : > { %1571 = vmatpush.bf16.msra.mxu3 %v2403_v28  ;;  %1732 = vmatpush.bf16.msra.mxu1 %v2467_v50  ;;  %v2440_v28 = vld [vmem:[%s3872_s1 + $0x448] sm:$0xf0]  ;;  %v2432_v50 = vld [vmem:[%s3872_s1 + $0x438] sm:$0xf0] }
  0x90   : > { %1043 = vmatmul.bf16.gmra.mxu1 %v3485_v19  ;;  %1709 = vmatpush.bf16.msra.mxu0 %v2463_v42  ;;  %v2443_v30 = vor.u32 %v2607_v27, %v2440_v28  ;;  %v1281_v41 = vsel %vm1278_vm3, %v1279_v15, %v1280_v16  ;;  %v2414_v15 = vld [vmem:[%s3872_s1 + $0x410] sm:$0xf]  ;;  %v2599_v27 = vld [vmem:[%s3872_s1 + $0x404] sm:$0xf]  ;;  %v2408_v28 = vld [vmem:[%s3872_s1 + $0x408] sm:$0xf0] }
  0x91   : > { %1020 = vmatmul.bf16.gmra.mxu0 %v3485_v19  ;;  %v2352_v19 = vld [vmem:[%s3872_s1 + $0x398] sm:$0xf0]  ;;  %v2415_v46 = vor.u32 %v2602_v17, %v2414_v15 }
  0x92   : > { %1549 = vmatpush.bf16.msra.mxu2 %v2391_v32  ;;  %v2587_v32 = vld [vmem:[%s3872_s1 + $0x3a4] sm:$0xf]  ;;  %v2355_v62 = vor.u32 %v2585_v57, %v2352_v19 }
  0x93   : > { %1572 = vmatpush.bf16.msra.mxu3 %v2395_v37  ;;  %1733 = vmatpush.bf16.msra.mxu1 %v2459_v59  ;;  %v2359_v37 = vor.u32 %v2588_v31, %v2358_v29  ;;  %v2363_v39 = vor.u32 %v2587_v32, %v2360_v33  ;;  %v2422_v59 = vld [vmem:[%s3872_s1 + $0x420] sm:$0xf]  ;;  %v2411_v32 = vor.u32 %v2599_v27, %v2408_v28  ;;  %v2636_v27 = vld [vmem:[%s2805_s20 + $0x10] sm:$0xff]  }
  0x94   : > { %1710 = vmatpush.bf16.msra.mxu0 %v2455_v58  ;;  %v2351_v58 = vor.u32 %v2586_v56, %v2350_v54  ;;  %v2423_v55 = vor.u32 %v2604_v61, %v2422_v59 }
  0x96   : > { %1550 = vmatpush.bf16.msra.mxu2 %v2383_v51  ;;  %v2435_v51 = vor.u32 %v2605_v48, %v2432_v50  ;;  %v1448_v50 = vshrl.u32 %v3578_v5, 16 }
  0x97   : > { %1573 = vmatpush.bf16.msra.mxu3 %v2387_v53  ;;  %1734 = vmatpush.bf16.msra.mxu1 %v2451_v13  ;;  %v2671_v53 = vld [vmem:[%s2805_s20 + $0x14] sm:$0x10]  ;;  %v2344_v13 = vld [vmem:[%s3872_s1 + $0x388] sm:$0xf0] }
  0x98   : > { %1711 = vmatpush.bf16.msra.mxu0 %v2447_v11  ;;  %v3689_v3 = vor.u32 %v2671_v53, %v2669_v52  ;;  %v2584_v11 = vld [vmem:[%s3872_s1 + $0x384] sm:$0xf0]  ;;  %v2347_v20 = vor.u32 %v2583_v12, %v2344_v13  ;;  %v1450_v56 = vrot.slane %v1448_v50, 3 }
  0x9a   : > { %1551 = vmatpush.bf16.msra.mxu2 %v2375_v2  ;;  %v1460_v12 = vshll.u32 %v3689_v3, 16 }
  0x9b   : > { %1574 = vmatpush.bf16.msra.mxu3 %v2379_v45  ;;  %1735 = vmatpush.bf16.msra.mxu1 %v2443_v30  ;;  %v2427_v45 = vor.u32 %v2603_v63, %v2424_v0 }
  0x9c   : > { %1712 = vmatpush.bf16.msra.mxu0 %v2439_v26  ;;  %v1462_v15 = vrot.slane %v1460_v12, 4 }
  0x9d   : > { %864 = vmatmul.bf16.gmra.mxu2 %v3471_v44 }
  0x9e   : > { %887 = vmatmul.bf16.gmra.mxu3 %v3471_v44  ;;  %v1084_v44 = vrot.slane %v1082_v1, 1  ;;  %1552 = vmatpush.bf16.msra.mxu2 %v2367_v23  ;;  %v1282_v23 = vrot.slane %v3689_v3, 3 }
  0x9f   : > { %1575 = vmatpush.bf16.msra.mxu3 %v2371_v21  ;;  %1736 = vmatpush.bf16.msra.mxu1 %v2435_v51  ;;  %v2600_v21 = vld [vmem:[%s3872_s1 + $0x404] sm:$0xf0]  ;;  %v1451_v51 = vshll.u32 %v3578_v5, 16 }
  0xa0   : > { %1048 = vmatmul.bf16.gmra.mxu1 %v3556_v60  ;;  %v1085_v22 = vor.u32 %v1084_v44, %v1080_v35  ;;  %1713 = vmatpush.bf16.msra.mxu0 %v2431_v49  ;;  %v1093_v35 = vor.u32 %v1091_v9, %v3596_v14  ;;  %v2343_v44 = vor.u32 %v2584_v11, %v2342_v4  ;;  %v1443_v49 = vshll.u32 %v3581_v7, 16 }
  0xa1   : > { %1025 = vmatmul.bf16.gmra.mxu0 %v3556_v60  ;;  %v2407_v26 = vor.u32 %v2600_v21, %v2406_v6  ;;  %v1283_v31 = vsel %vm1278_vm3, %v1280_v16, %v1282_v23  ;;  %v1440_v16 = vshrl.u32 %v3581_v7, 16  ;;  %v1453_v57 = vrot.slane %v1451_v51, 4 }
  0xa2   : > { %v1090_v38 = vsel %vm248_vm0, %v1085_v22, %v3596_v14  ;;  %1553 = vmatpush.bf16.msra.mxu2 %v2359_v37  ;;  %v2601_v14 = vld [vmem:[%s3872_s1 + $0x414] sm:$0xf]  ;;  %v2416_v22 = vld [vmem:[%s3872_s1 + $0x418] sm:$0xf0]  ;;  %v1098_v25 = vsel %vm248_vm0, %v1093_v35, %v1097_v36  ;;  %v1445_v54 = vrot.slane %v1443_v49, 4  ;;  %v1457_v11 = vshrl.u32 %v3689_v3, 16 }
  0xa3   : > { %1576 = vmatpush.bf16.msra.mxu3 %v2363_v39  ;;  %1737 = vmatpush.bf16.msra.mxu1 %v2427_v45  ;;  %v2419_v24 = vor.u32 %v2601_v14, %v2416_v22  ;;  %v1442_v53 = vrot.slane %v1440_v16, 3  ;;  %v1454_v5 = vor.u32 %v1453_v57, %v1450_v56 }
  0xa4   : > { %1714 = vmatpush.bf16.msra.mxu0 %v2423_v55  ;;  %v1459_v13 = vrot.slane %v1457_v11, 3 }
  0xa5   : > { %v1446_v61 = vor.u32 %v1445_v54, %v1442_v53 }
  0xa6   : > { %1554 = vmatpush.bf16.msra.mxu2 %v2351_v58  ;;  %v1463_v22 = vor.u32 %v1462_v15, %v1459_v13 }
  0xa7   : > { %1577 = vmatpush.bf16.msra.mxu3 %v2355_v62  ;;  %1738 = vmatpush.bf16.msra.mxu1 %v2419_v24 }
  0xa8   : > { %1715 = vmatpush.bf16.msra.mxu0 %v2415_v46  ;;  %v1464_v6 = vsel %vm736_vm2, %v1454_v5, %v1463_v22 }
  0xaa   : > { %v3638_v40 = vpop.f32.mrf.mxu0  ;;  %1555 = vmatpush.bf16.msra.mxu2 %v2343_v44 }
  0xab   : > { %v3643_v42 = vpop.f32.mrf.mxu1  ;;  %1578 = vmatpush.bf16.msra.mxu3 %v2347_v20  ;;  %1739 = vmatpush.bf16.msra.mxu1 %v2411_v32 }
  0xac   : > { %1716 = vmatpush.bf16.msra.mxu0 %v2407_v26 }
  0xad   : > { %1193 = vmatmul.bf16.vlgmr.msrb.gmra.mxu2 %v1090_v38 }
  0xae   : > { %1216 = vmatmul.bf16.vlgmr.msrb.gmra.mxu3 %v1090_v38 }
  0xb0   : > { %1398 = vmatmul.bf16.vlgmr.msrb.gmra.mxu1 %v1281_v41  ;;  %v3687_v2 = vpop.f32.mrf.mxu2 }
  0xb1   : > { %1375 = vmatmul.bf16.vlgmr.msrb.gmra.mxu0 %v1281_v41  ;;  %v1099_v41 = vshrl.u32 %v3556_v60, 16 }
  0xb2   : > { %v3685_v1 = vpop.f32.mrf.mxu0 }
  0xb3   : > { %v3691_v8 = vpop.f32.mrf.mxu1  ;;  %v3693_v10 = vpop.f32.mrf.mxu3  ;;  %v1101_v43 = vor.u32 %v1099_v41, %v1097_v36 }
  0xb8   : > { %v376_v30 = vpop.f32.mrf.mxu2 }
  0xba   : > { %v369_v29 = vpop.f32.mrf.mxu0 }
  0xbb   : > { %v392_v33 = vpop.f32.mrf.mxu1  ;;  %v399_v37 = vpop.f32.mrf.mxu3 }
  0xbd   : > { %1198 = vmatmul.bf16.gmra.mxu2 %v1098_v25 }
  0xbe   : > { %1221 = vmatmul.bf16.gmra.mxu3 %v1098_v25 }
  0xc0   : > { %1403 = vmatmul.bf16.gmra.mxu1 %v1283_v31 }
  0xc1   : > { %1380 = vmatmul.bf16.gmra.mxu0 %v1283_v31 }
  0xc2   : > { %v371_v38 = vpop.f32.mrf.mxu0 }
  0xc3   : > { %v394_v39 = vpop.f32.mrf.mxu1 }
  0xcd   : > { %v675_v48 = vpop.f32.mrf.mxu1  ;;  %1203 = vmatmul.bf16.gmra.mxu2 %v1101_v43 }
  0xce   : > { %v652_v47 = vpop.f32.mrf.mxu0  ;;  %1226 = vmatmul.bf16.gmra.mxu3 %v1101_v43 }
  0xd0   : > { %v493_v9 = vpop.f32.mrf.mxu2  ;;  %1408 = vmatmul.bf16.gmra.mxu1 %v1282_v23 }
  0xd1   : > { %1385 = vmatmul.bf16.gmra.mxu0 %v1282_v23  ;;  %v516_v18 = vpop.f32.mrf.mxu3  ;;  %v494_v52 = vadd.f32 %v493_v9, %v3638_v40 }
  0xd2   : > { %v517_v60 = vadd.f32 %v516_v18, %v3643_v42  ;;  %v1455_v42 = vsel %vm736_vm2, %v1446_v61, %v1454_v5 }
  0xd3   : > { %v3744_v58 = vadd.f32 %v652_v47, %v494_v52 }
  0xd4   : > { %v3746_v19 = vadd.f32 %v675_v48, %v517_v60 }
  0xd5   : > { %v677_v59 = vpop.f32.mrf.mxu1 }
  0xd6   : > { %v654_v7 = vpop.f32.mrf.mxu0 }
  0xd8   : > { %v495_v62 = vpop.f32.mrf.mxu2 }
  0xd9   : > { %v518_v55 = vpop.f32.mrf.mxu3  ;;  %v496_v63 = vadd.f32 %v495_v62, %v3685_v1 }
  0xda   : > { %v519_v40 = vadd.f32 %v518_v55, %v3691_v8 }
  0xdb   : > { %v3751_v0 = vadd.f32 %v654_v7, %v496_v63 }
  0xdc   : > { %v3753_v36 = vadd.f32 %v677_v59, %v519_v40 }
  0xdd   : > { %v680_v4 = vpop.f32.mrf.mxu1  ;;  %1556 = vmatmul.bf16.vlgmr.msra.gmra.mxu2 %v1455_v42 }
  0xde   : > { %v657_v45 = vpop.f32.mrf.mxu0  ;;  %1579 = vmatmul.bf16.vlgmr.msra.gmra.mxu3 %v1455_v42 }
  0xe0   : > { %v498_v35 = vpop.f32.mrf.mxu2  ;;  %1740 = vmatmul.bf16.vlgmr.msra.gmra.mxu1 %v3293_v34 }
  0xe1   : > { %1717 = vmatmul.bf16.vlgmr.msra.gmra.mxu0 %v3293_v34  ;;  %v521_v1 = vpop.f32.mrf.mxu3  ;;  %v499_v8 = vadd.f32 %v498_v35, %v369_v29 }
  0xe2   : > { %v522_v44 = vadd.f32 %v521_v1, %v392_v33 }
  0xe3   : > { %v693_v17 = vadd.f32 %v657_v45, %v499_v8 }
  0xe4   : > { %v694_v20 = vadd.f32 %v680_v4, %v522_v44 }
  0xe5   : > { %v682_v14 = vpop.f32.mrf.mxu1 }
  0xe6   : > { %v659_v46 = vpop.f32.mrf.mxu0 }
  0xe8   : > { %v500_v23 = vpop.f32.mrf.mxu2 }
  0xe9   : > { %v523_v24 = vpop.f32.mrf.mxu3  ;;  %v501_v25 = vadd.f32 %v500_v23, %v371_v38 }
  0xea   : > { %v524_v3 = vadd.f32 %v523_v24, %v394_v39  ;;  %v1604_v39 = vld [vmem:[%s2805_s20 + $0x18] sm:$0x3] }
  0xeb   : > { %v695_v21 = vadd.f32 %v659_v46, %v501_v25  ;;  %v1622_v43 = vunpack.c.l.b16 %v1604_v39 }
  0xec   : > { %v696_v26 = vadd.f32 %v682_v14, %v524_v3 }
  0xed   : > { %v685_v28 = vpop.f32.mrf.mxu1  ;;  %1561 = vmatmul.bf16.gmra.mxu2 %v1464_v6  ;;  %v1625_v16 = vpack.c.b16 %v1622_v43, %v1622_v43 }
  0xee   : > { %v662_v34 = vpop.f32.mrf.mxu0  ;;  %1584 = vmatmul.bf16.gmra.mxu3 %v1464_v6 }
  0xf0   : > { %v503_v29 = vpop.f32.mrf.mxu2  ;;  %1745 = vmatmul.bf16.gmra.mxu1 %v2636_v27 }
  0xf1   : > { %1722 = vmatmul.bf16.gmra.mxu0 %v2636_v27  ;;  %v526_v30 = vpop.f32.mrf.mxu3  ;;  %v504_v31 = vadd.f32 %v503_v29, %v3687_v2 }
  0xf2   : > { %v527_v32 = vadd.f32 %v526_v30, %v3693_v10 }
  0xf3   : > { %v697_v33 = vadd.f32 %v662_v34, %v504_v31 }
  0xf4   : > { %v698_v37 = vadd.f32 %v685_v28, %v527_v32 }
  0xf5   : > { %v687_v41 = vpop.f32.mrf.mxu1 }
  0xf6   : > { %v664_v38 = vpop.f32.mrf.mxu0 }
  0xf8   : > { %v505_v47 = vpop.f32.mrf.mxu2 }
  0xf9   : > { %v528_v48 = vpop.f32.mrf.mxu3 }
  0xfd   : > { %v1039_v50 = vpop.f32.mrf.mxu1  ;;  %1566 = vmatmul.bf16.gmra.mxu2 %v1463_v22 }
  0xfe   : > { %v1016_v49 = vpop.f32.mrf.mxu0  ;;  %1589 = vmatmul.bf16.gmra.mxu3 %v1463_v22 }
 0x100   : > { %v855_v51 = vpop.f32.mrf.mxu2  ;;  %1750 = vmatmul.bf16.gmra.mxu1 %v1625_v16 }
 0x101   : > { %1727 = vmatmul.bf16.gmra.mxu0 %v1625_v16  ;;  %v878_v9 = vpop.f32.mrf.mxu3  ;;  %v892_v2 = vadd.f32 %v855_v51, %v3744_v58 }
 0x102   : > { %v893_v10 = vadd.f32 %v878_v9, %v3746_v19 }
 0x103   : > { %v1053_v18 = vadd.f32 %v1016_v49, %v892_v2 }
 0x104   : > { %v1054_v52 = vadd.f32 %v1039_v50, %v893_v10 }
 0x105   : > { %v1041_v53 = vpop.f32.mrf.mxu1 }
 0x106   : > { %v1018_v60 = vpop.f32.mrf.mxu0 }
 0x108   : > { %v857_v54 = vpop.f32.mrf.mxu2 }
 0x109   : > { %v880_v56 = vpop.f32.mrf.mxu3  ;;  %v894_v57 = vadd.f32 %v857_v54, %v3751_v0  ;;  %v1765_v54 = vld [vmem:[%s3873_s2] sm:$0x3] }
 0x10a   : > { %v895_v7 = vadd.f32 %v880_v56, %v3753_v36 }
 0x10b   : > { %v3768_v59 = vadd.f32 %v1018_v60, %v894_v57 }
 0x10c   : > { %v3770_v61 = vadd.f32 %v1041_v53, %v895_v7 }
 0x10d   : > { %v1044_v62 = vpop.f32.mrf.mxu1 }
 0x10e   : > { %v1021_v5 = vpop.f32.mrf.mxu0 }
 0x110   : > { %v860_v55 = vpop.f32.mrf.mxu2 }
 0x111   : > { %v883_v58 = vpop.f32.mrf.mxu3  ;;  %v896_v63 = vadd.f32 %v860_v55, %v693_v17 }
 0x112   : > { %v897_v19 = vadd.f32 %v883_v58, %v694_v20  ;;  %v3810_v58 = vperm.slane %v1765_v54, 0 }
 0x113   : > { %v3772_v40 = vadd.f32 %v1021_v5, %v896_v63  ;;  %v1781_v5 = vld [vmem:[%s3874_s3] sm:$0x3] }
 0x114   : > { %v3774_v42 = vadd.f32 %v1044_v62, %v897_v19 }
 0x115   : > { %v1046_v4 = vpop.f32.mrf.mxu1 }
 0x116   : > { %v1023_v45 = vpop.f32.mrf.mxu0 }
 0x118   : > { %v862_v11 = vpop.f32.mrf.mxu2 }
 0x119   : > { %v885_v0 = vpop.f32.mrf.mxu3  ;;  %v898_v12 = vadd.f32 %v862_v11, %v695_v21 }
 0x11a   : > { %v899_v36 = vadd.f32 %v885_v0, %v696_v26  ;;  %v3818_v0 = vperm.slane %v1781_v5, 1 }
 0x11b   : > { %v3776_v35 = vadd.f32 %v1023_v45, %v898_v12 }
 0x11c   : > { %v3778_v1 = vadd.f32 %v1046_v4, %v899_v36  ;;  %v3816_v4 = vperm.slane %v1781_v5, 0 }
 0x11d   : > { %v1049_v44 = vpop.f32.mrf.mxu1 }
 0x11e   : > { %v1026_v8 = vpop.f32.mrf.mxu0 }
 0x120   : > { %v865_v13 = vpop.f32.mrf.mxu2 }
 0x121   : > { %v888_v15 = vpop.f32.mrf.mxu3  ;;  %v900_v17 = vadd.f32 %v865_v13, %v697_v33 }
 0x122   : > { %v901_v20 = vadd.f32 %v888_v15, %v698_v37 }
 0x123   : > { %v3780_v46 = vadd.f32 %v1026_v8, %v900_v17 }
 0x124   : > { %v3782_v14 = vadd.f32 %v1049_v44, %v901_v20 }
 0x125   : > { %v1051_v23 = vpop.f32.mrf.mxu1 }
 0x126   : > { %v1028_v22 = vpop.f32.mrf.mxu0 }
 0x128   : > { %v867_v24 = vpop.f32.mrf.mxu2 }
 0x129   : > { %v890_v25 = vpop.f32.mrf.mxu3 }
 0x12d   : > { %v1399_v6 = vpop.f32.mrf.mxu1 }
 0x12e   : > { %v1376_v3 = vpop.f32.mrf.mxu0 }
 0x130   : > { %v1194_v21 = vpop.f32.mrf.mxu2 }
 0x131   : > { %v1217_v26 = vpop.f32.mrf.mxu3  ;;  %v1231_v2 = vadd.f32 %v1194_v21, %v1053_v18 }
 0x132   : > { %v1232_v10 = vadd.f32 %v1217_v26, %v1054_v52  ;;  %v3812_v52 = vperm.slane %v1765_v54, 1 }
 0x133   : > { %v1413_v56 = vadd.f32 %v1376_v3, %v1231_v2 }
 0x134   : > { %v1414_v57 = vadd.f32 %v1399_v6, %v1232_v10 }
 0x135   : > { %v1401_v27 = vpop.f32.mrf.mxu1 }
 0x136   : > { %v1378_v34 = vpop.f32.mrf.mxu0 }
 0x138   : > { %v1196_v28 = vpop.f32.mrf.mxu2 }
 0x139   : > { %v1219_v29 = vpop.f32.mrf.mxu3  ;;  %v1233_v63 = vadd.f32 %v1196_v28, %v3768_v59 }
 0x13a   : > { %v1234_v19 = vadd.f32 %v1219_v29, %v3770_v61 }
 0x13b   : > { %v1415_v59 = vadd.f32 %v1378_v34, %v1233_v63 }
 0x13c   : > { %v1416_v17 = vadd.f32 %v1401_v27, %v1234_v19 }
 0x13d   : > { %v3786_v31 = vpop.f32.mrf.mxu1 }
 0x13e   : > { %v3784_v30 = vpop.f32.mrf.mxu0 }
 0x140   : > { %v1199_v32 = vpop.f32.mrf.mxu2 }
 0x141   : > { %v1222_v33 = vpop.f32.mrf.mxu3  ;;  %v1235_v3 = vadd.f32 %v1199_v32, %v3772_v40 }
 0x142   : > { %v1236_v6 = vadd.f32 %v1222_v33, %v3774_v42 }
 0x145   : > { %v3790_v38 = vpop.f32.mrf.mxu1 }
 0x146   : > { %v3788_v37 = vpop.f32.mrf.mxu0 }
 0x148   : > { %v3792_v39 = vpop.f32.mrf.mxu2 }
 0x149   : > { %v3794_v41 = vpop.f32.mrf.mxu3 }
 0x14a   : > { %v1238_v54 = vadd.f32 %v3794_v41, %v3778_v1 }
 0x14d   : > { %v3798_v47 = vpop.f32.mrf.mxu1 }
 0x14e   : > { %v3796_v43 = vpop.f32.mrf.mxu0 }
 0x150   : > { %v3800_v48 = vpop.f32.mrf.mxu2 }
 0x151   : > { %v3802_v16 = vpop.f32.mrf.mxu3 }
 0x155   : > { %v1411_v50 = vpop.f32.mrf.mxu1 }
 0x156   : > { %v1388_v49 = vpop.f32.mrf.mxu0  ;;  %v1417_v50 = vadd.f32 %v3784_v30, %v1235_v3 }
 0x158   : > { %v1206_v51 = vpop.f32.mrf.mxu2 }
 0x159   : > { %v1229_v9 = vpop.f32.mrf.mxu3  ;;  %v1418_v51 = vadd.f32 %v3786_v31, %v1236_v6 }
 0x15d   : > { %v1741_v53 = vpop.f32.mrf.mxu1 }
 0x15e   : > { %v1718_v60 = vpop.f32.mrf.mxu0 }
 0x160   : > { %v1557_v7 = vpop.f32.mrf.mxu2 }
 0x161   : > { %v1580_v62 = vpop.f32.mrf.mxu3  ;;  %v1594_v55 = vadd.f32 %v1557_v7, %v1413_v56 }
 0x162   : > { %v1595_v18 = vadd.f32 %v1580_v62, %v1414_v57 }
 0x163   : > { %v1755_v45 = vadd.f32 %v1718_v60, %v1594_v55 }
 0x164   : > { %v1756_v11 = vadd.f32 %v1741_v53, %v1595_v18  ;;  %v1237_v53 = vadd.f32 %v3792_v39, %v3776_v35  ;;  %v1420_v39 = vadd.f32 %v3790_v38, %v1238_v54 }
 0x165   : > { %v1771_v36 = vmul.f32 %v3810_v58, %v1755_v45  ;;  %v1743_v44 = vpop.f32.mrf.mxu1 }
 0x166   : > { %v1720_v12 = vpop.f32.mrf.mxu0  ;;  %v1772_v8 = vmul.f32 %v3812_v52, %v1756_v11  ;;  %v1419_v35 = vadd.f32 %v3788_v37, %v1237_v53 }
 0x167   : > { %v1787_v13 = vadd.f32 %v3816_v4, %v1771_v36  ;;  %v1240_v36 = vadd.f32 %v3802_v16, %v3782_v14 }
 0x168   : > { %v1788_v15 = vadd.f32 %v3818_v0, %v1772_v8  ;;  %v1559_v61 = vpop.f32.mrf.mxu2 }
 0x169   : > { %v1582_v20 = vpop.f32.mrf.mxu3  ;;  %v1797_v22 = vmax.f32 %v1787_v13, 0.0  ;;  %v1596_v24 = vadd.f32 %v1559_v61, %v1415_v59 }
 0x16a   : > { %v1798_v23 = vmax.f32 %v1788_v15, 0.0  ;;  %v1597_v25 = vadd.f32 %v1582_v20, %v1416_v17 }
 0x16b   : > { %v1757_v26 = vadd.f32 %v1720_v12, %v1596_v24  ;;  %v1239_v12 = vadd.f32 %v3800_v48, %v3780_v46  ;;  %v1422_v46 = vadd.f32 %v3798_v47, %v1240_v36 }
 0x16c   : > { %v1807_v21 = vpack.c.bf16 %v1798_v23, %v1797_v22  ;;  %v1758_v34 = vadd.f32 %v1743_v44, %v1597_v25 }
 0x16d   : > { %v1773_v28 = vmul.f32 %v3810_v58, %v1757_v26  ;;  %v1746_v49 = vpop.f32.mrf.mxu1  ;;  %v1421_v20 = vadd.f32 %v3796_v43, %v1239_v12 }
 0x16e   : > { %v1723_v27 = vpop.f32.mrf.mxu0  ;;  %1812 = vst [vmem:[%s3829_s26] sm:$0xff] %v1807_v21  ;;  %v1774_v29 = vmul.f32 %v3812_v52, %v1758_v34 }
 0x16f   : > { %v1789_v40 = vadd.f32 %v3816_v4, %v1773_v28 }
 0x170   : > { %v1790_v32 = vadd.f32 %v3818_v0, %v1774_v29  ;;  %v1562_v42 = vpop.f32.mrf.mxu2 }
 0x171   : > { %v1585_v33 = vpop.f32.mrf.mxu3  ;;  %v1799_v9 = vmax.f32 %v1789_v40, 0.0  ;;  %v1598_v10 = vadd.f32 %v1562_v42, %v1417_v50 }
 0x172   : > { %v1800_v2 = vmax.f32 %v1790_v32, 0.0  ;;  %v1599_v60 = vadd.f32 %v1585_v33, %v1418_v51  ;;  %v1823_v32 = vld [vmem:[%s3829_s26 + $0x20] sm:$0x33] }
 0x173   : > { %v1759_v57 = vadd.f32 %v1723_v27, %v1598_v10 }
 0x174   : > { %v1808_v56 = vpack.c.bf16 %v1800_v2, %v1799_v9  ;;  %v1760_v7 = vadd.f32 %v1746_v49, %v1599_v60 }
 0x175   : > { %v1775_v30 = vmul.f32 %v3810_v58, %v1759_v57  ;;  %v1748_v62 = vpop.f32.mrf.mxu1 }
 0x176   : > { %v1725_v5 = vpop.f32.mrf.mxu0  ;;  %1813 = vst [vmem:[%s3829_s26 + $0x8] sm:$0xff] %v1808_v56  ;;  %v1776_v31 = vmul.f32 %v3812_v52, %v1760_v7 }
 0x177   : > { %v1791_v55 = vadd.f32 %v3816_v4, %v1775_v30 }
 0x178   : > { %v1792_v18 = vadd.f32 %v3818_v0, %v1776_v31  ;;  %v1564_v1 = vpop.f32.mrf.mxu2 }
 0x179   : > { %v1587_v41 = vpop.f32.mrf.mxu3  ;;  %v1801_v63 = vmax.f32 %v1791_v55, 0.0  ;;  %v1600_v45 = vadd.f32 %v1564_v1, %v1419_v35 }
 0x17a   : > { %v1802_v19 = vmax.f32 %v1792_v18, 0.0  ;;  %v1601_v11 = vadd.f32 %v1587_v41, %v1420_v39 }
 0x17b   : > { %v1761_v44 = vadd.f32 %v1725_v5, %v1600_v45 }
 0x17c   : > { %v1809_v8 = vpack.c.bf16 %v1802_v19, %v1801_v63  ;;  %v1762_v13 = vadd.f32 %v1748_v62, %v1601_v11 }
 0x17d   : > { %v1777_v37 = vmul.f32 %v3810_v58, %v1761_v44  ;;  %v1751_v59 = vpop.f32.mrf.mxu1 }
 0x17e   : > { %v1728_v15 = vpop.f32.mrf.mxu0  ;;  %1814 = vst [vmem:[%s3829_s26 + $0x10] sm:$0xff] %v1809_v8  ;;  %v1778_v38 = vmul.f32 %v3812_v52, %v1762_v13 }
 0x17f   : > { %v1793_v17 = vadd.f32 %v3816_v4, %v1777_v37 }
 0x180   : > { %v1794_v61 = vadd.f32 %v3818_v0, %v1778_v38  ;;  %v1567_v14 = vpop.f32.mrf.mxu2 }
 0x181   : > { %v1590_v48 = vpop.f32.mrf.mxu3  ;;  %v1803_v16 = vmax.f32 %v1793_v17, 0.0  ;;  %v1602_v23 = vadd.f32 %v1567_v14, %v1421_v20 }
 0x182   : > { %v1804_v22 = vmax.f32 %v1794_v61, 0.0  ;;  %v1603_v24 = vadd.f32 %v1590_v48, %v1422_v46 }
 0x183   : > { %v1763_v3 = vadd.f32 %v1728_v15, %v1602_v23 }
 0x184   : > { %v1810_v25 = vpack.c.bf16 %v1804_v22, %v1803_v16  ;;  %v1764_v6 = vadd.f32 %v1751_v59, %v1603_v24 }
 0x185   : > { %v1779_v43 = vmul.f32 %v3810_v58, %v1763_v3  ;;  %v1753_v26 = vpop.f32.mrf.mxu1 }
 0x186   : > { %v1730_v21 = vpop.f32.mrf.mxu0  ;;  %1815 = vst [vmem:[%s3829_s26 + $0x18] sm:$0xff] %v1810_v25  ;;  %v1780_v47 = vmul.f32 %v3812_v52, %v1764_v6 }
 0x187   : > { %v1795_v34 = vadd.f32 %v3816_v4, %v1779_v43 }
 0x188   : > { %v1796_v27 = vadd.f32 %v3818_v0, %v1780_v47  ;;  %v1569_v28 = vpop.f32.mrf.mxu2 }
 0x189   : > { %v1592_v29 = vpop.f32.mrf.mxu3  ;;  %v1805_v49 = vmax.f32 %v1795_v34, 0.0 }
 0x18a   : > { %v1806_v40 = vmax.f32 %v1796_v27, 0.0 }
 0x18c   : > { %v1811_v50 = vpack.c.bf16 %v1806_v40, %v1805_v49 }
 0x18e   : > { %v1824_v51 = vsel %vm1822_vm10, %v1811_v50, %v1823_v32 }
 0x18f   : > { %1825 = vst [vmem:[%s3829_s26 + $0x20] sm:$0x33] %v1824_v51 }
 0x190 PF: > { %s14_s15 = sadd.s32 1, %s2688_s15  }
 0x191   : > { %p11_p4 = scmp.ge.s32.totalorder %s14_s15, 4  }
 0x193   :  { %13 = sbr.rel (!%p11_p4) target bundleno = 1 (0x1), region = 66 }

// kernel: supervised_net_forward.9
= control target key start
LH: loop header
LB: loop body
LE: loop exit
PB: predicated region body
PF: predicated region fallthrough
CT: control target
= control target key end

     0   :  { %s2423_s0 = inlined_call_operand.vmem [shape: bf16[2,2048], index: 0, kind: input, shape index: {}]   ;;  %s2424_s1 = inlined_call_operand.vmem [shape: bf16[2048,10], index: 1, kind: input, shape index: {}]   ;;  %s2425_s2 = inlined_call_operand.vmem [shape: f32[1,10], index: 2, kind: input, shape index: {}]   ;;  %s2426_s3 = inlined_call_operand.hbm [shape: f32[2,10], index: 3, kind: output, shape index: {}]  }
   0x1   :  { %v1850_v0 = vld [vmem:[%s2424_s1 + $0x38] sm:$0xff]  ;;  %v1849_v4 = vld [vmem:[%s2424_s1 + $0x30] sm:$0xff]  ;;  %v1848_v8 = vld [vmem:[%s2424_s1 + $0x28] sm:$0xff] }
   0x2   :  { %v1858_v1 = vld [vmem:[%s2424_s1 + $0x78] sm:$0xff]  ;;  %1081 = vmatpush.bf16.msra.mxu0 %v1850_v0  ;;  %v1857_v5 = vld [vmem:[%s2424_s1 + $0x70] sm:$0xff]  ;;  %v1856_v9 = vld [vmem:[%s2424_s1 + $0x68] sm:$0xff] }
   0x3   :  { %v1866_v2 = vld [vmem:[%s2424_s1 + $0xb8] sm:$0xff]  ;;  %1094 = vmatpush.bf16.msra.mxu1 %v1858_v1  ;;  %v1865_v6 = vld [vmem:[%s2424_s1 + $0xb0] sm:$0xff]  ;;  %v1864_v10 = vld [vmem:[%s2424_s1 + $0xa8] sm:$0xff] }
   0x4   :  { %v1874_v3 = vld [vmem:[%s2424_s1 + $0xf8] sm:$0xff]  ;;  %1107 = vmatpush.bf16.msra.mxu2 %v1866_v2  ;;  %v1873_v7 = vld [vmem:[%s2424_s1 + $0xf0] sm:$0xff]  ;;  %v1872_v11 = vld [vmem:[%s2424_s1 + $0xe8] sm:$0xff] }
   0x5   :  { %1120 = vmatpush.bf16.msra.mxu3 %v1874_v3  ;;  %v1847_v12 = vld [vmem:[%s2424_s1 + $0x20] sm:$0xff]  ;;  %v1846_v16 = vld [vmem:[%s2424_s1 + $0x18] sm:$0xff]  ;;  %v1845_v20 = vld [vmem:[%s2424_s1 + $0x10] sm:$0xff] }
   0x6   :  { %1082 = vmatpush.bf16.msra.mxu0 %v1849_v4  ;;  %v1855_v13 = vld [vmem:[%s2424_s1 + $0x60] sm:$0xff]  ;;  %v1854_v17 = vld [vmem:[%s2424_s1 + $0x58] sm:$0xff]  ;;  %v1853_v21 = vld [vmem:[%s2424_s1 + $0x50] sm:$0xff] }
   0x7   :  { %1095 = vmatpush.bf16.msra.mxu1 %v1857_v5  ;;  %v1863_v14 = vld [vmem:[%s2424_s1 + $0xa0] sm:$0xff]  ;;  %v1862_v18 = vld [vmem:[%s2424_s1 + $0x98] sm:$0xff] }
   0x8   :  { %1108 = vmatpush.bf16.msra.mxu2 %v1865_v6  ;;  %v1871_v15 = vld [vmem:[%s2424_s1 + $0xe0] sm:$0xff]  ;;  %v1870_v19 = vld [vmem:[%s2424_s1 + $0xd8] sm:$0xff] }
   0x9   :  { %1121 = vmatpush.bf16.msra.mxu3 %v1873_v7  ;;  %v15_v22 = vld [vmem:[%s2423_s0] sm:$0xff] }
   0xa   :  { %1083 = vmatpush.bf16.msra.mxu0 %v1848_v8  ;;  %278 = vst [vmem:[#allocation1] ss:$9 sm:$0xff] %v15_v22 }
   0xb   :  { %1096 = vmatpush.bf16.msra.mxu1 %v1856_v9 }
   0xc   :  { %1109 = vmatpush.bf16.msra.mxu2 %v1864_v10 }
   0xd   :  { %1122 = vmatpush.bf16.msra.mxu3 %v1872_v11 }
   0xe   :  { %1084 = vmatpush.bf16.msra.mxu0 %v1847_v12 }
   0xf   :  { %1097 = vmatpush.bf16.msra.mxu1 %v1855_v13 }
  0x10   :  { %1110 = vmatpush.bf16.msra.mxu2 %v1863_v14 }
  0x11   :  { %1123 = vmatpush.bf16.msra.mxu3 %v1871_v15 }
  0x12   :  { %1085 = vmatpush.bf16.msra.mxu0 %v1846_v16 }
  0x13   :  { %1098 = vmatpush.bf16.msra.mxu1 %v1854_v17 }
  0x14   :  { %8 = vsyncpa [#allocation3], 0  ;;  %1111 = vmatpush.bf16.msra.mxu2 %v1862_v18  ;;  %v1861_v23 = vld [vmem:[%s2424_s1 + $0x90] sm:$0xff]  ;;  %v1844_v25 = vld [vmem:[%s2424_s1 + $0x8] sm:$0xff]  ;;  %vm1289_vm0 = vcmask 74752   ;;  %s1322_s27 = sshll.u32 %s2426_s3, 4  ;;  %s1323_s27 = int_to_ptr.hbm [resolvable:$true] %s1322_s27 }
  0x15   :  { %1124 = vmatpush.bf16.msra.mxu3 %v1870_v19  ;;  %v1869_v24 = vld [vmem:[%s2424_s1 + $0xd0] sm:$0xff]  ;;  %v1852_v26 = vld [vmem:[%s2424_s1 + $0x48] sm:$0xff]  ;;  %v1843_v29 = vld [vmem:[%s2424_s1] sm:$0xff] }
  0x16   :  { %1086 = vmatpush.bf16.msra.mxu0 %v1845_v20  ;;  %v1860_v27 = vld [vmem:[%s2424_s1 + $0x88] sm:$0xff]  ;;  %v1851_v30 = vld [vmem:[%s2424_s1 + $0x40] sm:$0xff]  ;;  %v1882_v33 = vld [vmem:[%s2424_s1 + $0x138] sm:$0xff] }
  0x17   :  { %1099 = vmatpush.bf16.msra.mxu1 %v1853_v21  ;;  %v1868_v28 = vld [vmem:[%s2424_s1 + $0xc8] sm:$0xff]  ;;  %v1859_v31 = vld [vmem:[%s2424_s1 + $0x80] sm:$0xff]  ;;  %v1890_v34 = vld [vmem:[%s2424_s1 + $0x178] sm:$0xff] }
  0x18   :  { %1112 = vmatpush.bf16.msra.mxu2 %v1861_v23  ;;  %v1867_v32 = vld [vmem:[%s2424_s1 + $0xc0] sm:$0xff]  ;;  %v1898_v35 = vld [vmem:[%s2424_s1 + $0x1b8] sm:$0xff]  ;;  %v1881_v37 = vld [vmem:[%s2424_s1 + $0x130] sm:$0xff] }
  0x19   :  { %1125 = vmatpush.bf16.msra.mxu3 %v1869_v24  ;;  %v1906_v36 = vld [vmem:[%s2424_s1 + $0x1f8] sm:$0xff]  ;;  %v279_v39 = vld [vmem:[#allocation1] sm:$0xff]  ;;  %v1889_v40 = vld [vmem:[%s2424_s1 + $0x170] sm:$0xff] }
  0x1a   :  { %1087 = vmatpush.bf16.msra.mxu0 %v1844_v25  ;;  %v281_v38 = vld [vmem:[#allocation1 + $0x12] sm:$0xff]  ;;  %v282_v41 = vld [vmem:[#allocation1 + $0x1b] sm:$0xff]  ;;  %v280_v42 = vld [vmem:[#allocation1 + $0x9] sm:$0xff] }
  0x1b   :  { %1100 = vmatpush.bf16.msra.mxu1 %v1852_v26  ;;  %v1897_v43 = vld [vmem:[%s2424_s1 + $0x1b0] sm:$0xff]  ;;  %v1880_v45 = vld [vmem:[%s2424_s1 + $0x128] sm:$0xff]  ;;  %v1879_v49 = vld [vmem:[%s2424_s1 + $0x120] sm:$0xff] }
  0x1c   :  { %1113 = vmatpush.bf16.msra.mxu2 %v1860_v27  ;;  %v1905_v44 = vld [vmem:[%s2424_s1 + $0x1f0] sm:$0xff]  ;;  %v1888_v46 = vld [vmem:[%s2424_s1 + $0x168] sm:$0xff]  ;;  %v1887_v50 = vld [vmem:[%s2424_s1 + $0x160] sm:$0xff] }
  0x1d   :  { %1126 = vmatpush.bf16.msra.mxu3 %v1868_v28  ;;  %v1896_v47 = vld [vmem:[%s2424_s1 + $0x1a8] sm:$0xff]  ;;  %v285_v51 = vld [vmem:[#allocation1 + $0x36] sm:$0xff]  ;;  %v286_v54 = vld [vmem:[#allocation1 + $0x3f] sm:$0xff] }
  0x1e   :  { %1088 = vmatpush.bf16.msra.mxu0 %v1843_v29  ;;  %v1904_v48 = vld [vmem:[%s2424_s1 + $0x1e8] sm:$0xff]  ;;  %v1895_v56 = vld [vmem:[%s2424_s1 + $0x1a0] sm:$0xff]  ;;  %v1878_v58 = vld [vmem:[%s2424_s1 + $0x118] sm:$0xff] }
  0x1f   :  { %1101 = vmatpush.bf16.msra.mxu1 %v1851_v30  ;;  %v16_v52 = vld [vmem:[%s2423_s0 + $0x8] sm:$0xff]  ;;  %v1903_v57 = vld [vmem:[%s2424_s1 + $0x1e0] sm:$0xff]  ;;  %v1886_v59 = vld [vmem:[%s2424_s1 + $0x158] sm:$0xff] }
  0x20   :  { %1114 = vmatpush.bf16.msra.mxu2 %v1859_v31  ;;  %v283_v53 = vld [vmem:[#allocation1 + $0x24] sm:$0xff]  ;;  %v284_v55 = vld [vmem:[#allocation1 + $0x2d] sm:$0xff]  ;;  %v1894_v60 = vld [vmem:[%s2424_s1 + $0x198] sm:$0xff] }
  0x21   :  { %1127 = vmatpush.bf16.msra.mxu3 %v1867_v32  ;;  %1089 = vmatmul.bf16.vlgmr.msra.gmra.mxu0 %v279_v39  ;;  %288 = vst [vmem:[#allocation1] ss:$9 sm:$0xff] %v16_v52  ;;  %v1902_v61 = vld [vmem:[%s2424_s1 + $0x1d8] sm:$0xff]  ;;  %v1877_v62 = vld [vmem:[%s2424_s1 + $0x110] sm:$0xff]  ;;  %v1876_v2 = vld [vmem:[%s2424_s1 + $0x108] sm:$0xff] }
  0x22   :  { %1133 = vmatpush.bf16.msrb.mxu0 %v1882_v33  ;;  %1102 = vmatmul.bf16.vlgmr.msra.gmra.mxu1 %v280_v42  ;;  %v1885_v63 = vld [vmem:[%s2424_s1 + $0x150] sm:$0xff]  ;;  %v1884_v3 = vld [vmem:[%s2424_s1 + $0x148] sm:$0xff]  ;;  %v1875_v6 = vld [vmem:[%s2424_s1 + $0x100] sm:$0xff] }
  0x23   :  { %1146 = vmatpush.bf16.msrb.mxu1 %v1890_v34  ;;  %1115 = vmatmul.bf16.vlgmr.msra.gmra.mxu2 %v281_v38  ;;  %v1893_v0 = vld [vmem:[%s2424_s1 + $0x190] sm:$0xff]  ;;  %v1892_v4 = vld [vmem:[%s2424_s1 + $0x188] sm:$0xff]  ;;  %v1883_v7 = vld [vmem:[%s2424_s1 + $0x140] sm:$0xff] }
  0x24   :  { %1159 = vmatpush.bf16.msrb.mxu2 %v1898_v35  ;;  %1128 = vmatmul.bf16.vlgmr.msra.gmra.mxu3 %v282_v41  ;;  %v1901_v1 = vld [vmem:[%s2424_s1 + $0x1d0] sm:$0xff]  ;;  %v1900_v5 = vld [vmem:[%s2424_s1 + $0x1c8] sm:$0xff]  ;;  %v1891_v8 = vld [vmem:[%s2424_s1 + $0x180] sm:$0xff] }
  0x25   :  { %1172 = vmatpush.bf16.msrb.mxu3 %v1906_v36  ;;  %v1899_v9 = vld [vmem:[%s2424_s1 + $0x1c0] sm:$0xff]  ;;  %v1914_v10 = vld [vmem:[%s2424_s1 + $0x238] sm:$0xff]  ;;  %v1913_v14 = vld [vmem:[%s2424_s1 + $0x230] sm:$0xff] }
  0x26   :  { %1134 = vmatpush.bf16.msrb.mxu0 %v1881_v37  ;;  %v1922_v11 = vld [vmem:[%s2424_s1 + $0x278] sm:$0xff]  ;;  %v1921_v15 = vld [vmem:[%s2424_s1 + $0x270] sm:$0xff]  ;;  %v1912_v18 = vld [vmem:[%s2424_s1 + $0x228] sm:$0xff] }
  0x27   :  { %1147 = vmatpush.bf16.msrb.mxu1 %v1889_v40  ;;  %v1930_v12 = vld [vmem:[%s2424_s1 + $0x2b8] sm:$0xff]  ;;  %v1929_v16 = vld [vmem:[%s2424_s1 + $0x2b0] sm:$0xff]  ;;  %v1920_v19 = vld [vmem:[%s2424_s1 + $0x268] sm:$0xff] }
  0x28   :  { %1160 = vmatpush.bf16.msrb.mxu2 %v1897_v43  ;;  %v1938_v13 = vld [vmem:[%s2424_s1 + $0x2f8] sm:$0xff]  ;;  %v1937_v17 = vld [vmem:[%s2424_s1 + $0x2f0] sm:$0xff]  ;;  %v1928_v20 = vld [vmem:[%s2424_s1 + $0x2a8] sm:$0xff] }
  0x29   :  { %1173 = vmatpush.bf16.msrb.mxu3 %v1905_v44  ;;  %v1936_v21 = vld [vmem:[%s2424_s1 + $0x2e8] sm:$0xff]  ;;  %v1911_v22 = vld [vmem:[%s2424_s1 + $0x220] sm:$0xff]  ;;  %v1910_v26 = vld [vmem:[%s2424_s1 + $0x218] sm:$0xff] }
  0x2a   :  { %1135 = vmatpush.bf16.msrb.mxu0 %v1880_v45  ;;  %v1919_v23 = vld [vmem:[%s2424_s1 + $0x260] sm:$0xff]  ;;  %v1918_v27 = vld [vmem:[%s2424_s1 + $0x258] sm:$0xff]  ;;  %v1909_v30 = vld [vmem:[%s2424_s1 + $0x210] sm:$0xff] }
  0x2b   :  { %1148 = vmatpush.bf16.msrb.mxu1 %v1888_v46  ;;  %v1927_v24 = vld [vmem:[%s2424_s1 + $0x2a0] sm:$0xff]  ;;  %v1926_v28 = vld [vmem:[%s2424_s1 + $0x298] sm:$0xff]  ;;  %v1917_v31 = vld [vmem:[%s2424_s1 + $0x250] sm:$0xff] }
  0x2c   :  { %1161 = vmatpush.bf16.msrb.mxu2 %v1896_v47  ;;  %v1935_v25 = vld [vmem:[%s2424_s1 + $0x2e0] sm:$0xff]  ;;  %v1934_v29 = vld [vmem:[%s2424_s1 + $0x2d8] sm:$0xff]  ;;  %v1925_v32 = vld [vmem:[%s2424_s1 + $0x290] sm:$0xff] }
  0x2d   :  { %1174 = vmatpush.bf16.msrb.mxu3 %v1904_v48  ;;  %v1933_v33 = vld [vmem:[%s2424_s1 + $0x2d0] sm:$0xff]  ;;  %v1908_v34 = vld [vmem:[%s2424_s1 + $0x208] sm:$0xff]  ;;  %v1907_v38 = vld [vmem:[%s2424_s1 + $0x200] sm:$0xff] }
  0x2e   :  { %1136 = vmatpush.bf16.msrb.mxu0 %v1879_v49  ;;  %v1916_v35 = vld [vmem:[%s2424_s1 + $0x248] sm:$0xff]  ;;  %v1915_v39 = vld [vmem:[%s2424_s1 + $0x240] sm:$0xff]  ;;  %v1946_v42 = vld [vmem:[%s2424_s1 + $0x338] sm:$0xff] }
  0x2f   :  { %1149 = vmatpush.bf16.msrb.mxu1 %v1887_v50  ;;  %v1924_v36 = vld [vmem:[%s2424_s1 + $0x288] sm:$0xff]  ;;  %v1923_v40 = vld [vmem:[%s2424_s1 + $0x280] sm:$0xff]  ;;  %v1954_v43 = vld [vmem:[%s2424_s1 + $0x378] sm:$0xff] }
  0x30   :  { %1162 = vmatpush.bf16.msrb.mxu2 %v1895_v56  ;;  %v1932_v37 = vld [vmem:[%s2424_s1 + $0x2c8] sm:$0xff]  ;;  %v1931_v41 = vld [vmem:[%s2424_s1 + $0x2c0] sm:$0xff]  ;;  %v1962_v44 = vld [vmem:[%s2424_s1 + $0x3b8] sm:$0xff] }
  0x31   :  { %1175 = vmatpush.bf16.msrb.mxu3 %v1903_v57  ;;  %v1970_v45 = vld [vmem:[%s2424_s1 + $0x3f8] sm:$0xff]  ;;  %v289_v46 = vld [vmem:[#allocation1] sm:$0xff]  ;;  %v290_v48 = vld [vmem:[#allocation1 + $0x9] sm:$0xff] }
  0x32   :  { %1137 = vmatpush.bf16.msrb.mxu0 %v1878_v58  ;;  %v291_v47 = vld [vmem:[#allocation1 + $0x12] sm:$0xff]  ;;  %v292_v49 = vld [vmem:[#allocation1 + $0x1b] sm:$0xff]  ;;  %v1960_v56 = vld [vmem:[%s2424_s1 + $0x3a8] sm:$0xff] }
  0x33   :  { %1150 = vmatpush.bf16.msrb.mxu1 %v1886_v59  ;;  %v1945_v50 = vld [vmem:[%s2424_s1 + $0x330] sm:$0xff]  ;;  %v1968_v57 = vld [vmem:[%s2424_s1 + $0x3e8] sm:$0xff]  ;;  %v1943_v58 = vld [vmem:[%s2424_s1 + $0x320] sm:$0xff] }
  0x34   :  { %1163 = vmatpush.bf16.msrb.mxu2 %v1894_v60  ;;  %v1961_v52 = vld [vmem:[%s2424_s1 + $0x3b0] sm:$0xff]  ;;  %v1951_v59 = vld [vmem:[%s2424_s1 + $0x360] sm:$0xff] }
  0x35   :  { %1176 = vmatpush.bf16.msrb.mxu3 %v1902_v61  ;;  %v1959_v60 = vld [vmem:[%s2424_s1 + $0x3a0] sm:$0xff] }
  0x36   :  { %1138 = vmatpush.bf16.msrb.mxu0 %v1877_v62  ;;  %v1967_v61 = vld [vmem:[%s2424_s1 + $0x3e0] sm:$0xff]  ;;  %v1942_v62 = vld [vmem:[%s2424_s1 + $0x318] sm:$0xff] }
  0x37   :  { %1151 = vmatpush.bf16.msrb.mxu1 %v1885_v63  ;;  %v1950_v63 = vld [vmem:[%s2424_s1 + $0x358] sm:$0xff] }
  0x38   :  { %1164 = vmatpush.bf16.msrb.mxu2 %v1893_v0  ;;  %v1958_v0 = vld [vmem:[%s2424_s1 + $0x398] sm:$0xff] }
  0x39   :  { %1177 = vmatpush.bf16.msrb.mxu3 %v1901_v1  ;;  %v1966_v1 = vld [vmem:[%s2424_s1 + $0x3d8] sm:$0xff] }
  0x3a   :  { %1139 = vmatpush.bf16.msrb.mxu0 %v1876_v2  ;;  %v1941_v2 = vld [vmem:[%s2424_s1 + $0x310] sm:$0xff] }
  0x3b   :  { %1152 = vmatpush.bf16.msrb.mxu1 %v1884_v3  ;;  %v1949_v3 = vld [vmem:[%s2424_s1 + $0x350] sm:$0xff] }
  0x3c   :  { %1165 = vmatpush.bf16.msrb.mxu2 %v1892_v4  ;;  %v1957_v4 = vld [vmem:[%s2424_s1 + $0x390] sm:$0xff] }
  0x3d   :  { %1178 = vmatpush.bf16.msrb.mxu3 %v1900_v5  ;;  %v1965_v5 = vld [vmem:[%s2424_s1 + $0x3d0] sm:$0xff] }
  0x3e   :  { %1140 = vmatpush.bf16.msrb.mxu0 %v1875_v6  ;;  %v1940_v6 = vld [vmem:[%s2424_s1 + $0x308] sm:$0xff] }
  0x3f   :  { %1153 = vmatpush.bf16.msrb.mxu1 %v1883_v7  ;;  %v1948_v7 = vld [vmem:[%s2424_s1 + $0x348] sm:$0xff] }
  0x40   :  { %1166 = vmatpush.bf16.msrb.mxu2 %v1891_v8  ;;  %v1956_v8 = vld [vmem:[%s2424_s1 + $0x388] sm:$0xff] }
  0x41   :  { %1179 = vmatpush.bf16.msrb.mxu3 %v1899_v9  ;;  %1141 = vmatmul.bf16.vlgmr.msrb.gmra.mxu0 %v283_v53  ;;  %v1969_v53 = vld [vmem:[%s2424_s1 + $0x3f0] sm:$0xff]  ;;  %v1964_v9 = vld [vmem:[%s2424_s1 + $0x3c8] sm:$0xff] }
  0x42   :  { %1185 = vmatpush.bf16.msra.mxu0 %v1914_v10  ;;  %1154 = vmatmul.bf16.vlgmr.msrb.gmra.mxu1 %v284_v55  ;;  %v1952_v55 = vld [vmem:[%s2424_s1 + $0x368] sm:$0xff]  ;;  %v1939_v10 = vld [vmem:[%s2424_s1 + $0x300] sm:$0xff] }
  0x43   :  { %1198 = vmatpush.bf16.msra.mxu1 %v1922_v11  ;;  %1167 = vmatmul.bf16.vlgmr.msrb.gmra.mxu2 %v285_v51  ;;  %v1953_v51 = vld [vmem:[%s2424_s1 + $0x370] sm:$0xff]  ;;  %v1947_v11 = vld [vmem:[%s2424_s1 + $0x340] sm:$0xff] }
  0x44   :  { %1211 = vmatpush.bf16.msra.mxu2 %v1930_v12  ;;  %1180 = vmatmul.bf16.vlgmr.msrb.gmra.mxu3 %v286_v54  ;;  %v1944_v54 = vld [vmem:[%s2424_s1 + $0x328] sm:$0xff]  ;;  %v1955_v12 = vld [vmem:[%s2424_s1 + $0x380] sm:$0xff] }
  0x45   :  { %1224 = vmatpush.bf16.msra.mxu3 %v1938_v13  ;;  %v1963_v13 = vld [vmem:[%s2424_s1 + $0x3c0] sm:$0xff]  ;;  %s2003_s1 = smov [#allocation2]  }
  0x46   :  { %1186 = vmatpush.bf16.msra.mxu0 %v1913_v14  ;;  %v293_v14 = vld [vmem:[#allocation1 + $0x24] sm:$0xff] }
  0x47   :  { %1199 = vmatpush.bf16.msra.mxu1 %v1921_v15  ;;  %v294_v15 = vld [vmem:[#allocation1 + $0x2d] sm:$0xff] }
  0x48   :  { %1212 = vmatpush.bf16.msra.mxu2 %v1929_v16  ;;  %v295_v16 = vld [vmem:[#allocation1 + $0x36] sm:$0xff] }
  0x49   :  { %1225 = vmatpush.bf16.msra.mxu3 %v1937_v17  ;;  %v296_v17 = vld [vmem:[#allocation1 + $0x3f] sm:$0xff] }
  0x4a   :  { %1187 = vmatpush.bf16.msra.mxu0 %v1912_v18  ;;  %v1972_v18 = vld [vmem:[%s2425_s2] ss:$0 sm:$0xff]  ;;  %s1320_s2 = sshll.u32 %s2003_s1, 4  ;;  %s1321_s2 = int_to_ptr.vmem [resolvable:$true] %s1320_s2 }
  0x4b   :  { %1200 = vmatpush.bf16.msra.mxu1 %v1920_v19 }
  0x4c   :  { %1213 = vmatpush.bf16.msra.mxu2 %v1928_v20 }
  0x4d   :  { %1226 = vmatpush.bf16.msra.mxu3 %v1936_v21 }
  0x4e   :  { %1188 = vmatpush.bf16.msra.mxu0 %v1911_v22 }
  0x4f   :  { %1201 = vmatpush.bf16.msra.mxu1 %v1919_v23 }
  0x50   :  { %1214 = vmatpush.bf16.msra.mxu2 %v1927_v24 }
  0x51   :  { %1227 = vmatpush.bf16.msra.mxu3 %v1935_v25 }
  0x52   :  { %1189 = vmatpush.bf16.msra.mxu0 %v1910_v26 }
  0x53   :  { %1202 = vmatpush.bf16.msra.mxu1 %v1918_v27 }
  0x54   :  { %1215 = vmatpush.bf16.msra.mxu2 %v1926_v28 }
  0x55   :  { %1228 = vmatpush.bf16.msra.mxu3 %v1934_v29 }
  0x56   :  { %1190 = vmatpush.bf16.msra.mxu0 %v1909_v30 }
  0x57   :  { %1203 = vmatpush.bf16.msra.mxu1 %v1917_v31 }
  0x58   :  { %1216 = vmatpush.bf16.msra.mxu2 %v1925_v32 }
  0x59   :  { %1229 = vmatpush.bf16.msra.mxu3 %v1933_v33 }
  0x5a   :  { %1191 = vmatpush.bf16.msra.mxu0 %v1908_v34 }
  0x5b   :  { %1204 = vmatpush.bf16.msra.mxu1 %v1916_v35 }
  0x5c   :  { %1217 = vmatpush.bf16.msra.mxu2 %v1924_v36 }
  0x5d   :  { %1230 = vmatpush.bf16.msra.mxu3 %v1932_v37 }
  0x5e   :  { %1192 = vmatpush.bf16.msra.mxu0 %v1907_v38 }
  0x5f   :  { %1205 = vmatpush.bf16.msra.mxu1 %v1915_v39 }
  0x60   :  { %1218 = vmatpush.bf16.msra.mxu2 %v1923_v40 }
  0x61   :  { %1231 = vmatpush.bf16.msra.mxu3 %v1931_v41  ;;  %1193 = vmatmul.bf16.vlgmr.msra.gmra.mxu0 %v289_v46 }
  0x62   :  { %1237 = vmatpush.bf16.msrb.mxu0 %v1946_v42  ;;  %1206 = vmatmul.bf16.vlgmr.msra.gmra.mxu1 %v290_v48 }
  0x63   :  { %1250 = vmatpush.bf16.msrb.mxu1 %v1954_v43  ;;  %1219 = vmatmul.bf16.vlgmr.msra.gmra.mxu2 %v291_v47 }
  0x64   :  { %1263 = vmatpush.bf16.msrb.mxu2 %v1962_v44  ;;  %1232 = vmatmul.bf16.vlgmr.msra.gmra.mxu3 %v292_v49 }
  0x65   :  { %1276 = vmatpush.bf16.msrb.mxu3 %v1970_v45 }
  0x66   :  { %1238 = vmatpush.bf16.msrb.mxu0 %v1945_v50 }
  0x67   :  { %1251 = vmatpush.bf16.msrb.mxu1 %v1953_v51 }
  0x68   :  { %1264 = vmatpush.bf16.msrb.mxu2 %v1961_v52 }
  0x69   :  { %1277 = vmatpush.bf16.msrb.mxu3 %v1969_v53 }
  0x6a   :  { %1239 = vmatpush.bf16.msrb.mxu0 %v1944_v54 }
  0x6b   :  { %1252 = vmatpush.bf16.msrb.mxu1 %v1952_v55 }
  0x6c   :  { %1265 = vmatpush.bf16.msrb.mxu2 %v1960_v56 }
  0x6d   :  { %1278 = vmatpush.bf16.msrb.mxu3 %v1968_v57 }
  0x6e   :  { %1240 = vmatpush.bf16.msrb.mxu0 %v1943_v58 }
  0x6f   :  { %1253 = vmatpush.bf16.msrb.mxu1 %v1951_v59 }
  0x70   :  { %1266 = vmatpush.bf16.msrb.mxu2 %v1959_v60 }
  0x71   :  { %1279 = vmatpush.bf16.msrb.mxu3 %v1967_v61 }
  0x72   :  { %1241 = vmatpush.bf16.msrb.mxu0 %v1942_v62 }
  0x73   :  { %1254 = vmatpush.bf16.msrb.mxu1 %v1950_v63 }
  0x74   :  { %1267 = vmatpush.bf16.msrb.mxu2 %v1958_v0 }
  0x75   :  { %1280 = vmatpush.bf16.msrb.mxu3 %v1966_v1 }
  0x76   :  { %1242 = vmatpush.bf16.msrb.mxu0 %v1941_v2 }
  0x77   :  { %1255 = vmatpush.bf16.msrb.mxu1 %v1949_v3 }
  0x78   :  { %1268 = vmatpush.bf16.msrb.mxu2 %v1957_v4 }
  0x79   :  { %1281 = vmatpush.bf16.msrb.mxu3 %v1965_v5 }
  0x7a   :  { %1243 = vmatpush.bf16.msrb.mxu0 %v1940_v6 }
  0x7b   :  { %1256 = vmatpush.bf16.msrb.mxu1 %v1948_v7 }
  0x7c   :  { %1269 = vmatpush.bf16.msrb.mxu2 %v1956_v8 }
  0x7d   :  { %1282 = vmatpush.bf16.msrb.mxu3 %v1964_v9 }
  0x7e   :  { %1244 = vmatpush.bf16.msrb.mxu0 %v1939_v10 }
  0x7f   :  { %1257 = vmatpush.bf16.msrb.mxu1 %v1947_v11 }
  0x80   :  { %1270 = vmatpush.bf16.msrb.mxu2 %v1955_v12 }
  0x81   :  { %1283 = vmatpush.bf16.msrb.mxu3 %v1963_v13  ;;  %1245 = vmatmul.bf16.vlgmr.msrb.gmra.mxu0 %v293_v14 }
  0x82   :  { %1258 = vmatmul.bf16.vlgmr.msrb.gmra.mxu1 %v294_v15 }
  0x83   :  { %1271 = vmatmul.bf16.vlgmr.msrb.gmra.mxu2 %v295_v16 }
  0x84   :  { %1284 = vmatmul.bf16.vlgmr.msrb.gmra.mxu3 %v296_v17 }
  0x9e   :  { %v1090_v19 = vpop.f32.mrf.mxu0 }
  0x9f   :  { %v1091_v20 = vadd.f32 %v1972_v18, %v1090_v19  ;;  %v1103_v21 = vpop.f32.mrf.mxu1 }
  0xa1   :  { %v1104_v22 = vadd.f32 %v1103_v21, %v1091_v20 }
  0xa6   :  { %v1116_v23 = vpop.f32.mrf.mxu2  ;;  %v1092_v26 = vpop.f32.mrf.mxu0 }
  0xa7   :  { %v1117_v24 = vadd.f32 %v1116_v23, %v1104_v22  ;;  %v1129_v25 = vpop.f32.mrf.mxu3  ;;  %v1105_v28 = vpop.f32.mrf.mxu1 }
  0xa9   :  { %v1130_v27 = vadd.f32 %v1129_v25, %v1117_v24 }
  0xae   :  { %v1118_v29 = vpop.f32.mrf.mxu2 }
  0xaf   :  { %v1131_v30 = vpop.f32.mrf.mxu3 }
  0xbe   :  { %v1142_v31 = vpop.f32.mrf.mxu0 }
  0xbf   :  { %v1155_v32 = vpop.f32.mrf.mxu1  ;;  %v1143_v41 = vadd.f32 %v1142_v31, %v1130_v27 }
  0xc1   :  { %v1156_v45 = vadd.f32 %v1155_v32, %v1143_v41 }
  0xc6   :  { %v1168_v33 = vpop.f32.mrf.mxu2  ;;  %v1144_v35 = vpop.f32.mrf.mxu0 }
  0xc7   :  { %v1181_v34 = vpop.f32.mrf.mxu3  ;;  %v1157_v36 = vpop.f32.mrf.mxu1  ;;  %v1169_v47 = vadd.f32 %v1168_v33, %v1156_v45 }
  0xc9   :  { %v1182_v50 = vadd.f32 %v1181_v34, %v1169_v47 }
  0xce   :  { %v1170_v37 = vpop.f32.mrf.mxu2 }
  0xcf   :  { %v1183_v38 = vpop.f32.mrf.mxu3 }
  0xde   :  { %v1194_v39 = vpop.f32.mrf.mxu0 }
  0xdf   :  { %v1207_v40 = vpop.f32.mrf.mxu1  ;;  %v1195_v51 = vadd.f32 %v1194_v39, %v1182_v50 }
  0xe1   :  { %v1208_v52 = vadd.f32 %v1207_v40, %v1195_v51 }
  0xe6   :  { %v1220_v42 = vpop.f32.mrf.mxu2  ;;  %v1196_v44 = vpop.f32.mrf.mxu0 }
  0xe7   :  { %v1233_v43 = vpop.f32.mrf.mxu3  ;;  %v1209_v46 = vpop.f32.mrf.mxu1  ;;  %v1221_v53 = vadd.f32 %v1220_v42, %v1208_v52 }
  0xe9   :  { %v1234_v54 = vadd.f32 %v1233_v43, %v1221_v53 }
  0xee   :  { %v1222_v48 = vpop.f32.mrf.mxu2 }
  0xef   :  { %v1235_v49 = vpop.f32.mrf.mxu3 }
  0xfe   :  { %v1246_v55 = vpop.f32.mrf.mxu0 }
  0xff   :  { %v1259_v56 = vpop.f32.mrf.mxu1  ;;  %v1247_v57 = vadd.f32 %v1246_v55, %v1234_v54 }
 0x101   :  { %v1260_v58 = vadd.f32 %v1259_v56, %v1247_v57 }
 0x106   :  { %v1272_v59 = vpop.f32.mrf.mxu2  ;;  %v1248_v62 = vpop.f32.mrf.mxu0 }
 0x107   :  { %v1285_v60 = vpop.f32.mrf.mxu3  ;;  %v1273_v61 = vadd.f32 %v1272_v59, %v1260_v58  ;;  %v1261_v63 = vpop.f32.mrf.mxu1 }
 0x109   :  { %v1286_v0 = vadd.f32 %v1285_v60, %v1273_v61 }
 0x10b   :  { %v1290_v1 = vsel %vm1289_vm0, %v1286_v0, -inf }
 0x10c   :  { %1291 = vmax.xlane.f32.xlu0 %v1290_v1 }
 0x10e   :  { %v1274_v2 = vpop.f32.mrf.mxu2 }
 0x10f   :  { %v1287_v3 = vpop.f32.mrf.mxu3 }
 0x17f   :  { %v1292_v4 = vpop.xlane.xlu0 %1291 }
 0x180   :  { %v1293_v5 = vsub.f32 %v1286_v0, %v1292_v4 }
 0x182   :  { %v1294_v6 = vmul.f32 1.442695, %v1293_v5 }
 0x184   :  { %1973 = vpow2.f32 %v1294_v6 }
 0x18a   :  { %v1974_v7 = vpop.eup %1973 }
 0x18b   :  { %v1296_v8 = vsel %vm1289_vm0, %v1974_v7, 0.0 }
 0x18c   :  { %1297 = vadd.xlane.f32.xlu0 %v1296_v8 }
 0x1ff   :  { %v1298_v9 = vpop.xlane.xlu0 %1297 }
 0x200   :  { %1975 = vrcp.f32 %v1298_v9  ;;  %v1310_v13 = vand.u32 2147483648, %v1298_v9  ;;  %v1308_v15 = vand.u32 2147483647, %v1298_v9  ;;  %vm1304_vm2 = vweird.f32 %v1298_v9 }
 0x202   :  { %v1311_v17 = vor.u32 1.1754944e-38, %v1310_v13  ;;  %vm1309_vm4 = vcmp.eq.f32.partialorder %v1308_v15, 8.507059e+37 }
 0x206   :  { %v1976_v10 = vpop.eup %1975 }
 0x207   :  { %v1300_v11 = vmul.f32 %v1976_v10, %v1298_v9  ;;  %vm1305_vm1 = vweird.f32 %v1976_v10 }
 0x208   :  { %vm1306_vm3 = vmor %vm1304_vm2, %vm1305_vm1 }
 0x209   :  { %v1301_v12 = vsub.f32 1.0, %v1300_v11 }
 0x20b   :  { %v1302_v14 = vmul.f32 %v1976_v10, %v1301_v12 }
 0x20d   :  { %v1303_v16 = vadd.f32 %v1976_v10, %v1302_v14 }
 0x20f   :  { %v1307_v18 = vsel %vm1306_vm3, %v1976_v10, %v1303_v16 }
 0x210   :  { %v1312_v19 = vsel %vm1309_vm4, %v1311_v17, %v1307_v18 }
 0x211   :  { %v1313_v20 = vmul.f32 %v1974_v7, %v1312_v19 }
 0x213   :  { %1314 = vst.msk [vmem:[#allocation2] sm:$0x3] %vm1289_vm0, %v1313_v20 }
 0x214   :  { %1325 = dma.vmem_to_hbm [thread:$0]  %s1321_s2, 32, %s1323_s27, [#allocation3]  }
 0x215   :  { %2001 = dma.done.wait [#allocation3], 32  }
 0x216   :  { %2002 = vsyncadd [#allocation3], 4294967264 }
 0x217   :  { %1330 = vsyncpa [#allocation3], 1 }

// kernel: supervised_net_forward.8
= control target key start
LH: loop header
LB: loop body
LE: loop exit
PB: predicated region body
PF: predicated region fallthrough
CT: control target
= control target key end

     0   :  { %s8022_s15 = smov 0   ;;  %s11997_s0 = inlined_call_operand.vmem [shape: bf16[2,32,256], index: 0, kind: input, shape index: {}]   ;;  %s11998_s1 = inlined_call_operand.vmem [shape: bf16[2304,512], index: 1, kind: input, shape index: {}]   ;;  %s11999_s2 = inlined_call_operand.vmem [shape: f32[1,512], index: 2, kind: input, shape index: {}]   ;;  %s12000_s3 = inlined_call_operand.vmem [shape: f32[1,512], index: 3, kind: input, shape index: {}]   ;;  %s12001_s4 = inlined_call_operand.vmem [shape: bf16[2,15,512], index: 4, kind: output, shape index: {}]  }
   0x1 LB: > { %s5078_s16 = sadd.s32 4294967295, %s7995_s15   ;;  %p5082_p0 = scmp.ge.s32.totalorder %s7995_s15, 1  ;;  %s7995_s15 = sphi %s8022_s15, %s14_s15  }
   0x2   : > { %p162_p1 = scmp.lt.s32.totalorder %s7995_s15, 3 }
   0x4   : > { %p163_p2 = pnand %p5082_p0, %p162_p1 }
   0x5   : > { %p188_p3 = scmp.lt.s32.totalorder (!%p163_p2), %s5078_s16, 1 }
   0x6   : > { %166 = sbr.rel (%p163_p2) target bundleno = 745 (0x2e9), region = 36 }
   0xb   : > { %v5209_v0 = vld [vmem:[%s11998_s1 + $0x2e0] sm:$0xf]  ;;  %v7499_v1 = vld [vmem:[%s11998_s1 + $0x2ec] sm:$0xf0]  ;;  %v7497_v5 = vld [vmem:[%s11998_s1 + $0x2e4] sm:$0xf] }
   0xc   : > { %v5337_v2 = vld [vmem:[%s11998_s1 + $0x3e0] sm:$0xf]  ;;  %v5210_v3 = vor.u32 %v7499_v1, %v5209_v0  ;;  %v7531_v4 = vld [vmem:[%s11998_s1 + $0x3ec] sm:$0xf0]  ;;  %v5211_v6 = vld [vmem:[%s11998_s1 + $0x2f0] sm:$0xf0] }
   0xd   : > { %v5338_v7 = vor.u32 %v7531_v4, %v5337_v2  ;;  %v5214_v8 = vor.u32 %v7497_v5, %v5211_v6  ;;  %v7529_v9 = vld [vmem:[%s11998_s1 + $0x3e4] sm:$0xf]  ;;  %v5339_v10 = vld [vmem:[%s11998_s1 + $0x3f0] sm:$0xf0]  ;;  %v5193_v11 = vld [vmem:[%s11998_s1 + $0x2c0] sm:$0xf] }
   0xe   : > { %672 = vmatpush.bf16.msra.mxu0 %v5210_v3  ;;  %v5342_v12 = vor.u32 %v7529_v9, %v5339_v10  ;;  %v7495_v13 = vld [vmem:[%s11998_s1 + $0x2cc] sm:$0xf0]  ;;  %v5321_v14 = vld [vmem:[%s11998_s1 + $0x3c0] sm:$0xf]  ;;  %v7493_v18 = vld [vmem:[%s11998_s1 + $0x2c4] sm:$0xf] }
   0xf   : > { %v7527_v15 = vld [vmem:[%s11998_s1 + $0x3cc] sm:$0xf0]  ;;  %686 = vmatpush.bf16.msra.mxu1 %v5338_v7  ;;  %700 = vmatpush.bf16.msra.mxu2 %v5214_v8  ;;  %v5194_v16 = vor.u32 %v7495_v13, %v5193_v11  ;;  %v5195_v19 = vld [vmem:[%s11998_s1 + $0x2d0] sm:$0xf0]  ;;  %v7525_v20 = vld [vmem:[%s11998_s1 + $0x3c4] sm:$0xf] }
  0x10   : > { %v5322_v17 = vor.u32 %v7527_v15, %v5321_v14  ;;  %714 = vmatpush.bf16.msra.mxu3 %v5342_v12  ;;  %v5198_v21 = vor.u32 %v7493_v18, %v5195_v19  ;;  %v5323_v22 = vld [vmem:[%s11998_s1 + $0x3d0] sm:$0xf0]  ;;  %v5177_v23 = vld [vmem:[%s11998_s1 + $0x2a0] sm:$0xf]  ;;  %v7491_v24 = vld [vmem:[%s11998_s1 + $0x2ac] sm:$0xf0] }
  0x11   : > { %v5326_v25 = vor.u32 %v7525_v20, %v5323_v22  ;;  %v5305_v26 = vld [vmem:[%s11998_s1 + $0x3a0] sm:$0xf]  ;;  %v7523_v27 = vld [vmem:[%s11998_s1 + $0x3ac] sm:$0xf0]  ;;  %v7489_v28 = vld [vmem:[%s11998_s1 + $0x2a4] sm:$0xf]  ;;  %v5178_v29 = vor.u32 %v7491_v24, %v5177_v23 }
  0x12   : > { %673 = vmatpush.bf16.msra.mxu0 %v5194_v16  ;;  %v5179_v30 = vld [vmem:[%s11998_s1 + $0x2b0] sm:$0xf0]  ;;  %v7521_v31 = vld [vmem:[%s11998_s1 + $0x3a4] sm:$0xf]  ;;  %v5306_v33 = vor.u32 %v7523_v27, %v5305_v26  ;;  %v5161_v35 = vld [vmem:[%s11998_s1 + $0x280] sm:$0xf] }
  0x13   : > { %v5307_v32 = vld [vmem:[%s11998_s1 + $0x3b0] sm:$0xf0]  ;;  %687 = vmatpush.bf16.msra.mxu1 %v5322_v17  ;;  %701 = vmatpush.bf16.msra.mxu2 %v5198_v21  ;;  %v5182_v34 = vor.u32 %v7489_v28, %v5179_v30  ;;  %v7487_v36 = vld [vmem:[%s11998_s1 + $0x28c] sm:$0xf0]  ;;  %v5289_v37 = vld [vmem:[%s11998_s1 + $0x380] sm:$0xf] }
  0x14   : > { %715 = vmatpush.bf16.msra.mxu3 %v5326_v25  ;;  %v5310_v38 = vor.u32 %v7521_v31, %v5307_v32  ;;  %v7519_v39 = vld [vmem:[%s11998_s1 + $0x38c] sm:$0xf0]  ;;  %v7485_v40 = vld [vmem:[%s11998_s1 + $0x284] sm:$0xf]  ;;  %v5163_v41 = vld [vmem:[%s11998_s1 + $0x290] sm:$0xf0]  ;;  %v5162_v44 = vor.u32 %v7487_v36, %v5161_v35 }
  0x15   : > { %v7517_v42 = vld [vmem:[%s11998_s1 + $0x384] sm:$0xf]  ;;  %v5291_v43 = vld [vmem:[%s11998_s1 + $0x390] sm:$0xf0]  ;;  %v5290_v45 = vor.u32 %v7519_v39, %v5289_v37  ;;  %v5166_v46 = vor.u32 %v7485_v40, %v5163_v41  ;;  %v5145_v47 = vld [vmem:[%s11998_s1 + $0x260] sm:$0xf] }
  0x16   : > { %674 = vmatpush.bf16.msra.mxu0 %v5178_v29  ;;  %v7483_v48 = vld [vmem:[%s11998_s1 + $0x26c] sm:$0xf0]  ;;  %v5273_v49 = vld [vmem:[%s11998_s1 + $0x360] sm:$0xf]  ;;  %v5294_v50 = vor.u32 %v7517_v42, %v5291_v43  ;;  %v7481_v52 = vld [vmem:[%s11998_s1 + $0x264] sm:$0xf] }
  0x17   : > { %688 = vmatpush.bf16.msra.mxu1 %v5306_v33  ;;  %702 = vmatpush.bf16.msra.mxu2 %v5182_v34  ;;  %v7515_v51 = vld [vmem:[%s11998_s1 + $0x36c] sm:$0xf0]  ;;  %v5147_v53 = vld [vmem:[%s11998_s1 + $0x270] sm:$0xf0]  ;;  %v7513_v54 = vld [vmem:[%s11998_s1 + $0x364] sm:$0xf]  ;;  %v5146_v56 = vor.u32 %v7483_v48, %v5145_v47 }
  0x18   : > { %716 = vmatpush.bf16.msra.mxu3 %v5310_v38  ;;  %v5275_v55 = vld [vmem:[%s11998_s1 + $0x370] sm:$0xf0]  ;;  %v5274_v57 = vor.u32 %v7515_v51, %v5273_v49  ;;  %v5150_v58 = vor.u32 %v7481_v52, %v5147_v53  ;;  %v5129_v59 = vld [vmem:[%s11998_s1 + $0x240] sm:$0xf]  ;;  %v7479_v60 = vld [vmem:[%s11998_s1 + $0x24c] sm:$0xf0] }
  0x19   : > { %v5257_v61 = vld [vmem:[%s11998_s1 + $0x340] sm:$0xf]  ;;  %v5278_v62 = vor.u32 %v7513_v54, %v5275_v55  ;;  %v7511_v63 = vld [vmem:[%s11998_s1 + $0x34c] sm:$0xf0]  ;;  %v7477_v0 = vld [vmem:[%s11998_s1 + $0x244] sm:$0xf]  ;;  %v5130_v4 = vor.u32 %v7479_v60, %v5129_v59 }
  0x1a   : > { %675 = vmatpush.bf16.msra.mxu0 %v5162_v44  ;;  %v5131_v1 = vld [vmem:[%s11998_s1 + $0x250] sm:$0xf0]  ;;  %v7509_v2 = vld [vmem:[%s11998_s1 + $0x344] sm:$0xf]  ;;  %v5258_v5 = vor.u32 %v7511_v63, %v5257_v61  ;;  %v5113_v7 = vld [vmem:[%s11998_s1 + $0x220] sm:$0xf] }
  0x1b   : > { %689 = vmatpush.bf16.msra.mxu1 %v5290_v45  ;;  %703 = vmatpush.bf16.msra.mxu2 %v5166_v46  ;;  %v5259_v3 = vld [vmem:[%s11998_s1 + $0x350] sm:$0xf0]  ;;  %v5134_v6 = vor.u32 %v7477_v0, %v5131_v1  ;;  %v7475_v8 = vld [vmem:[%s11998_s1 + $0x22c] sm:$0xf0]  ;;  %v5241_v9 = vld [vmem:[%s11998_s1 + $0x320] sm:$0xf] }
  0x1c   : > { %717 = vmatpush.bf16.msra.mxu3 %v5294_v50  ;;  %v5262_v10 = vor.u32 %v7509_v2, %v5259_v3  ;;  %v7507_v11 = vld [vmem:[%s11998_s1 + $0x32c] sm:$0xf0]  ;;  %v7473_v12 = vld [vmem:[%s11998_s1 + $0x224] sm:$0xf]  ;;  %v5115_v13 = vld [vmem:[%s11998_s1 + $0x230] sm:$0xf0]  ;;  %v5114_v16 = vor.u32 %v7475_v8, %v5113_v7 }
  0x1d   : > { %v7505_v14 = vld [vmem:[%s11998_s1 + $0x324] sm:$0xf]  ;;  %v5243_v15 = vld [vmem:[%s11998_s1 + $0x330] sm:$0xf0]  ;;  %v5097_v17 = vld [vmem:[%s11998_s1 + $0x200] sm:$0xf]  ;;  %v5242_v19 = vor.u32 %v7507_v11, %v5241_v9  ;;  %v5118_v20 = vor.u32 %v7473_v12, %v5115_v13 }
  0x1e   : > { %676 = vmatpush.bf16.msra.mxu0 %v5146_v56  ;;  %v7471_v18 = vld [vmem:[%s11998_s1 + $0x20c] sm:$0xf0]  ;;  %v5225_v21 = vld [vmem:[%s11998_s1 + $0x300] sm:$0xf]  ;;  %v7469_v23 = vld [vmem:[%s11998_s1 + $0x204] sm:$0xf]  ;;  %v5246_v24 = vor.u32 %v7505_v14, %v5243_v15 }
  0x1f   : > { %690 = vmatpush.bf16.msra.mxu1 %v5274_v57  ;;  %704 = vmatpush.bf16.msra.mxu2 %v5150_v58  ;;  %v7503_v22 = vld [vmem:[%s11998_s1 + $0x30c] sm:$0xf0]  ;;  %v5099_v25 = vld [vmem:[%s11998_s1 + $0x210] sm:$0xf0]  ;;  %v7501_v26 = vld [vmem:[%s11998_s1 + $0x304] sm:$0xf]  ;;  %v5098_v31 = vor.u32 %v7471_v18, %v5097_v17 }
  0x20   : > { %718 = vmatpush.bf16.msra.mxu3 %v5278_v62  ;;  %v5227_v27 = vld [vmem:[%s11998_s1 + $0x310] sm:$0xf0]  ;;  %v5217_v28 = vld [vmem:[%s11998_s1 + $0x2e8] sm:$0xf]  ;;  %v7500_v29 = vld [vmem:[%s11998_s1 + $0x2f4] sm:$0xf0]  ;;  %v5226_v35 = vor.u32 %v7503_v22, %v5225_v21  ;;  %v5102_v36 = vor.u32 %v7469_v23, %v5099_v25 }
  0x21   : > { %v5345_v30 = vld [vmem:[%s11998_s1 + $0x3e8] sm:$0xf]  ;;  %v7532_v32 = vld [vmem:[%s11998_s1 + $0x3f4] sm:$0xf0]  ;;  %v7498_v33 = vld [vmem:[%s11998_s1 + $0x2ec] sm:$0xf]  ;;  %v5230_v39 = vor.u32 %v7501_v26, %v5227_v27  ;;  %v5218_v40 = vor.u32 %v7500_v29, %v5217_v28 }
  0x22   : > { %677 = vmatpush.bf16.msra.mxu0 %v5130_v4  ;;  %v5219_v34 = vld [vmem:[%s11998_s1 + $0x2f8] sm:$0xf0]  ;;  %v7530_v37 = vld [vmem:[%s11998_s1 + $0x3ec] sm:$0xf]  ;;  %v5346_v41 = vor.u32 %v7532_v32, %v5345_v30  ;;  %v5201_v43 = vld [vmem:[%s11998_s1 + $0x2c8] sm:$0xf] }
  0x23   : > { %691 = vmatpush.bf16.msra.mxu1 %v5258_v5  ;;  %705 = vmatpush.bf16.msra.mxu2 %v5134_v6  ;;  %v5347_v38 = vld [vmem:[%s11998_s1 + $0x3f8] sm:$0xf0]  ;;  %v5222_v42 = vor.u32 %v7498_v33, %v5219_v34  ;;  %v7496_v44 = vld [vmem:[%s11998_s1 + $0x2d4] sm:$0xf0]  ;;  %v5329_v45 = vld [vmem:[%s11998_s1 + $0x3c8] sm:$0xf] }
  0x24   : > { %719 = vmatpush.bf16.msra.mxu3 %v5262_v10  ;;  %v5350_v46 = vor.u32 %v7530_v37, %v5347_v38  ;;  %v7528_v47 = vld [vmem:[%s11998_s1 + $0x3d4] sm:$0xf0]  ;;  %v7494_v48 = vld [vmem:[%s11998_s1 + $0x2cc] sm:$0xf]  ;;  %v5203_v49 = vld [vmem:[%s11998_s1 + $0x2d8] sm:$0xf0]  ;;  %v5202_v52 = vor.u32 %v7496_v44, %v5201_v43 }
  0x25   : > { %v7526_v50 = vld [vmem:[%s11998_s1 + $0x3cc] sm:$0xf]  ;;  %v5331_v51 = vld [vmem:[%s11998_s1 + $0x3d8] sm:$0xf0]  ;;  %v5330_v53 = vor.u32 %v7528_v47, %v5329_v45  ;;  %v5206_v54 = vor.u32 %v7494_v48, %v5203_v49  ;;  %v5185_v55 = vld [vmem:[%s11998_s1 + $0x2a8] sm:$0xf] }
  0x26   : > { %678 = vmatpush.bf16.msra.mxu0 %v5114_v16  ;;  %v7492_v56 = vld [vmem:[%s11998_s1 + $0x2b4] sm:$0xf0]  ;;  %v5313_v57 = vld [vmem:[%s11998_s1 + $0x3a8] sm:$0xf]  ;;  %v5334_v58 = vor.u32 %v7526_v50, %v5331_v51  ;;  %v7490_v60 = vld [vmem:[%s11998_s1 + $0x2ac] sm:$0xf] }
  0x27   : > { %692 = vmatpush.bf16.msra.mxu1 %v5242_v19  ;;  %706 = vmatpush.bf16.msra.mxu2 %v5118_v20  ;;  %v7524_v59 = vld [vmem:[%s11998_s1 + $0x3b4] sm:$0xf0]  ;;  %v5187_v61 = vld [vmem:[%s11998_s1 + $0x2b8] sm:$0xf0]  ;;  %v7522_v62 = vld [vmem:[%s11998_s1 + $0x3ac] sm:$0xf]  ;;  %v5186_v0 = vor.u32 %v7492_v56, %v5185_v55 }
  0x28   : > { %720 = vmatpush.bf16.msra.mxu3 %v5246_v24  ;;  %v5315_v63 = vld [vmem:[%s11998_s1 + $0x3b8] sm:$0xf0]  ;;  %v5169_v1 = vld [vmem:[%s11998_s1 + $0x288] sm:$0xf]  ;;  %v5314_v2 = vor.u32 %v7524_v59, %v5313_v57  ;;  %v5190_v3 = vor.u32 %v7490_v60, %v5187_v61  ;;  %v7488_v4 = vld [vmem:[%s11998_s1 + $0x294] sm:$0xf0] }
  0x29   : > { %v5297_v5 = vld [vmem:[%s11998_s1 + $0x388] sm:$0xf]  ;;  %v7520_v6 = vld [vmem:[%s11998_s1 + $0x394] sm:$0xf0]  ;;  %v5318_v7 = vor.u32 %v7522_v62, %v5315_v63  ;;  %v7486_v8 = vld [vmem:[%s11998_s1 + $0x28c] sm:$0xf]  ;;  %v5170_v13 = vor.u32 %v7488_v4, %v5169_v1 }
  0x2a   : > { %679 = vmatpush.bf16.msra.mxu0 %v5098_v31  ;;  %v5171_v9 = vld [vmem:[%s11998_s1 + $0x298] sm:$0xf0]  ;;  %s12007_s16 = smov (!%p188_p3, %s5078_s16), 1  ;;  %v7518_v10 = vld [vmem:[%s11998_s1 + $0x38c] sm:$0xf]  ;;  %v5298_v16 = vor.u32 %v7520_v6, %v5297_v5  ;;  %vm1298_vm0 = vcmask 1046528  }
  0x2b   : > { %693 = vmatpush.bf16.msra.mxu1 %v5226_v35  ;;  %707 = vmatpush.bf16.msra.mxu2 %v5102_v36  ;;  %v5299_v11 = vld [vmem:[%s11998_s1 + $0x398] sm:$0xf0]  ;;  %v5153_v12 = vld [vmem:[%s11998_s1 + $0x268] sm:$0xf]  ;;  %v7484_v14 = vld [vmem:[%s11998_s1 + $0x274] sm:$0xf0]  ;;  %v5174_v17 = vor.u32 %v7486_v8, %v5171_v9 }
  0x2c   : > { %721 = vmatpush.bf16.msra.mxu3 %v5230_v39  ;;  %v5281_v15 = vld [vmem:[%s11998_s1 + $0x368] sm:$0xf]  ;;  %s7401_s23 = sshll.u32 %s12007_s16, 5  ;;  %v7516_v18 = vld [vmem:[%s11998_s1 + $0x374] sm:$0xf0]  ;;  %v5302_v21 = vor.u32 %v7518_v10, %v5299_v11  ;;  %v5154_v29 = vor.u32 %v7484_v14, %v5153_v12  ;;  %vm2376_vm2 = vcmask 1044480  }
  0x2d   : > { %v7482_v19 = vld [vmem:[%s11998_s1 + $0x26c] sm:$0xf]  ;;  %v5155_v20 = vld [vmem:[%s11998_s1 + $0x278] sm:$0xf0]  ;;  %s8348_s6 = scalar_lea.vmem %s11997_s0, %s7401_s23  ;;  %v5137_v30 = vld [vmem:[%s11998_s1 + $0x248] sm:$0xf]  ;;  %v5282_v33 = vor.u32 %v7516_v18, %v5281_v15  ;;  %s11948_s17 = scalar_lea.vmem %s12001_s4, %s7401_s23 }
  0x2e   : > { %728 = vmatpush.bf16.msrb.mxu0 %v5218_v40  ;;  %v5089_v22 = vld [vmem:[%s8348_s6] sm:$0xf]  ;;  %v7404_v23 = vld [vmem:[%s8348_s6 + $0x4] sm:$0xf0]  ;;  %v7403_v24 = vld [vmem:[%s8348_s6 + $0x4] sm:$0xf]  ;;  %v5158_v34 = vor.u32 %v7482_v19, %v5155_v20 }
  0x2f   : > { %742 = vmatpush.bf16.msrb.mxu1 %v5346_v41  ;;  %756 = vmatpush.bf16.msrb.mxu2 %v5222_v42  ;;  %v7514_v25 = vld [vmem:[%s11998_s1 + $0x36c] sm:$0xf]  ;;  %v5283_v26 = vld [vmem:[%s11998_s1 + $0x378] sm:$0xf0]  ;;  %v8359_v27 = vor.u32 %v7404_v23, %v5089_v22  ;;  %v7480_v31 = vld [vmem:[%s11998_s1 + $0x254] sm:$0xf0] }
  0x30   : > { %770 = vmatpush.bf16.msrb.mxu3 %v5350_v46  ;;  %v5091_v28 = vld [vmem:[%s8348_s6 + $0x8] sm:$0xf0]  ;;  %v5265_v35 = vld [vmem:[%s11998_s1 + $0x348] sm:$0xf]  ;;  %v7512_v36 = vld [vmem:[%s11998_s1 + $0x354] sm:$0xf0]  ;;  %v5286_v39 = vor.u32 %v7514_v25, %v5283_v26  ;;  %v5138_v47 = vor.u32 %v7480_v31, %v5137_v30 }
  0x31   : > { %v8368_v32 = vor.u32 %v7403_v24, %v5091_v28  ;;  %v337_v37 = vshrl.u32 %v8359_v27, 16  ;;  %v339_v38 = vshll.u32 %v8359_v27, 16  ;;  %v7478_v40 = vld [vmem:[%s11998_s1 + $0x24c] sm:$0xf]  ;;  %v5139_v41 = vld [vmem:[%s11998_s1 + $0x258] sm:$0xf0]  ;;  %v5266_v49 = vor.u32 %v7512_v36, %v5265_v35 }
  0x32   : > { %729 = vmatpush.bf16.msrb.mxu0 %v5202_v52  ;;  %v7510_v44 = vld [vmem:[%s11998_s1 + $0x34c] sm:$0xf]  ;;  %v5267_v45 = vld [vmem:[%s11998_s1 + $0x358] sm:$0xf0]  ;;  %v5142_v50 = vor.u32 %v7478_v40, %v5139_v41  ;;  %v5121_v52 = vld [vmem:[%s11998_s1 + $0x228] sm:$0xf] }
  0x33   : > { %743 = vmatpush.bf16.msrb.mxu1 %v5330_v53  ;;  %757 = vmatpush.bf16.msrb.mxu2 %v5206_v54  ;;  %v344_v42 = vshrl.u32 %v8368_v32, 16  ;;  %v346_v43 = vshll.u32 %v8368_v32, 16  ;;  %v341_v46 = vrot.slane %v339_v38, 1  ;;  %v7476_v53 = vld [vmem:[%s11998_s1 + $0x234] sm:$0xf0]  ;;  %v5270_v55 = vor.u32 %v7510_v44, %v5267_v45 }
  0x34   : > { %771 = vmatpush.bf16.msrb.mxu3 %v5334_v58  ;;  %v5249_v54 = vld [vmem:[%s11998_s1 + $0x328] sm:$0xf]  ;;  %v7508_v57 = vld [vmem:[%s11998_s1 + $0x334] sm:$0xf0]  ;;  %v7474_v58 = vld [vmem:[%s11998_s1 + $0x22c] sm:$0xf]  ;;  %v5122_v62 = vor.u32 %v7476_v53, %v5121_v52 }
  0x35   : > { %v348_v48 = vrot.slane %v346_v43, 1  ;;  %v8392_v51 = vor.u32 %v341_v46, %v337_v37  ;;  %v5123_v59 = vld [vmem:[%s11998_s1 + $0x238] sm:$0xf0]  ;;  %v7506_v60 = vld [vmem:[%s11998_s1 + $0x32c] sm:$0xf]  ;;  %v5250_v1 = vor.u32 %v7508_v57, %v5249_v54  ;;  %vm4511_vm5 = vcmask 1045504  }
  0x36   : > { %730 = vmatpush.bf16.msrb.mxu0 %v5186_v0  ;;  %v5251_v61 = vld [vmem:[%s11998_s1 + $0x338] sm:$0xf0]  ;;  %v5105_v63 = vld [vmem:[%s11998_s1 + $0x208] sm:$0xf]  ;;  %v7472_v0 = vld [vmem:[%s11998_s1 + $0x214] sm:$0xf0] }
  0x37   : > { %744 = vmatpush.bf16.msrb.mxu1 %v5314_v2  ;;  %758 = vmatpush.bf16.msrb.mxu2 %v5190_v3  ;;  %v8403_v56 = vor.u32 %v348_v48, %v344_v42  ;;  %v5126_v2 = vor.u32 %v7474_v58, %v5123_v59  ;;  %v5233_v3 = vld [vmem:[%s11998_s1 + $0x308] sm:$0xf]  ;;  %v7504_v4 = vld [vmem:[%s11998_s1 + $0x314] sm:$0xf0]  ;;  %v7470_v5 = vld [vmem:[%s11998_s1 + $0x20c] sm:$0xf]  ;;  %v5254_v6 = vor.u32 %v7506_v60, %v5251_v61 }
  0x38   : > { %772 = vmatpush.bf16.msrb.mxu3 %v5318_v7  ;;  %708 = vmatmul.bf16.vlgmr.msra.gmra.mxu2 %v8392_v51  ;;  %v5107_v7 = vld [vmem:[%s11998_s1 + $0x218] sm:$0xf0]  ;;  %v7502_v8 = vld [vmem:[%s11998_s1 + $0x30c] sm:$0xf]  ;;  %v5465_v10 = vld [vmem:[%s11998_s1 + $0xe0] sm:$0xf] }
  0x39   : > { %680 = vmatmul.bf16.vlgmr.msra.gmra.mxu0 %v8392_v51  ;;  %722 = vmatmul.bf16.vlgmr.msra.gmra.mxu3 %v8403_v56  ;;  %v5235_v9 = vld [vmem:[%s11998_s1 + $0x318] sm:$0xf0]  ;;  %v7435_v11 = vld [vmem:[%s11998_s1 + $0xec] sm:$0xf0]  ;;  %v5593_v12 = vld [vmem:[%s11998_s1 + $0x1e0] sm:$0xf]  ;;  %v5110_v18 = vor.u32 %v7470_v5, %v5107_v7 }
  0x3a   : > { %731 = vmatpush.bf16.msrb.mxu0 %v5170_v13  ;;  %694 = vmatmul.bf16.vlgmr.msra.gmra.mxu1 %v8403_v56  ;;  %v5106_v13 = vor.u32 %v7472_v0, %v5105_v63  ;;  %v7467_v14 = vld [vmem:[%s11998_s1 + $0x1ec] sm:$0xf0]  ;;  %v7433_v15 = vld [vmem:[%s11998_s1 + $0xe4] sm:$0xf]  ;;  %v5595_v20 = vld [vmem:[%s11998_s1 + $0x1f0] sm:$0xf0]  ;;  %v5466_v22 = vor.u32 %v7435_v11, %v5465_v10 }
  0x3b   : > { %745 = vmatpush.bf16.msrb.mxu1 %v5298_v16  ;;  %759 = vmatpush.bf16.msrb.mxu2 %v5174_v17  ;;  %v5467_v16 = vld [vmem:[%s11998_s1 + $0xf0] sm:$0xf0]  ;;  %v5234_v17 = vor.u32 %v7504_v4, %v5233_v3  ;;  %v7465_v19 = vld [vmem:[%s11998_s1 + $0x1e4] sm:$0xf]  ;;  %v5594_v23 = vor.u32 %v7467_v14, %v5593_v12  ;;  %v5449_v25 = vld [vmem:[%s11998_s1 + $0xc0] sm:$0xf] }
  0x3c   : > { %773 = vmatpush.bf16.msrb.mxu3 %v5302_v21  ;;  %v5238_v21 = vor.u32 %v7502_v8, %v5235_v9  ;;  %v5470_v24 = vor.u32 %v7433_v15, %v5467_v16  ;;  %v7431_v26 = vld [vmem:[%s11998_s1 + $0xcc] sm:$0xf0]  ;;  %v5577_v28 = vld [vmem:[%s11998_s1 + $0x1c0] sm:$0xf]  ;;  %v7429_v31 = vld [vmem:[%s11998_s1 + $0xc4] sm:$0xf] }
  0x3d   : > { %v7463_v30 = vld [vmem:[%s11998_s1 + $0x1cc] sm:$0xf0]  ;;  %v5579_v35 = vld [vmem:[%s11998_s1 + $0x1d0] sm:$0xf0]  ;;  %v5450_v36 = vor.u32 %v7431_v26, %v5449_v25  ;;  %v5561_v41 = vld [vmem:[%s11998_s1 + $0x1a0] sm:$0xf] }
  0x3e   : > { %732 = vmatpush.bf16.msrb.mxu0 %v5154_v29  ;;  %v5598_v29 = vor.u32 %v7465_v19, %v5595_v20  ;;  %v5578_v37 = vor.u32 %v7463_v30, %v5577_v28  ;;  %v7427_v40 = vld [vmem:[%s11998_s1 + $0xac] sm:$0xf0]  ;;  %v7425_v44 = vld [vmem:[%s11998_s1 + $0xa4] sm:$0xf]  ;;  %v5435_v45 = vld [vmem:[%s11998_s1 + $0xb0] sm:$0xf0] }
  0x3f   : > { %746 = vmatpush.bf16.msrb.mxu1 %v5282_v33  ;;  %760 = vmatpush.bf16.msrb.mxu2 %v5158_v34  ;;  %v5451_v33 = vld [vmem:[%s11998_s1 + $0xd0] sm:$0xf0]  ;;  %v7461_v34 = vld [vmem:[%s11998_s1 + $0x1c4] sm:$0xf]  ;;  %v7459_v43 = vld [vmem:[%s11998_s1 + $0x1ac] sm:$0xf0] }
  0x40   : > { %774 = vmatpush.bf16.msrb.mxu3 %v5286_v39  ;;  %v5454_v38 = vor.u32 %v7429_v31, %v5451_v33  ;;  %v5433_v39 = vld [vmem:[%s11998_s1 + $0xa0] sm:$0xf]  ;;  %v5582_v42 = vor.u32 %v7461_v34, %v5579_v35  ;;  %v7457_v46 = vld [vmem:[%s11998_s1 + $0x1a4] sm:$0xf]  ;;  %v7423_v53 = vld [vmem:[%s11998_s1 + $0x8c] sm:$0xf0] }
  0x41   : > { %v5434_v48 = vor.u32 %v7427_v40, %v5433_v39  ;;  %v5417_v52 = vld [vmem:[%s11998_s1 + $0x80] sm:$0xf]  ;;  %v7455_v57 = vld [vmem:[%s11998_s1 + $0x18c] sm:$0xf0]  ;;  %v7421_v58 = vld [vmem:[%s11998_s1 + $0x84] sm:$0xf] }
  0x42   : > { %733 = vmatpush.bf16.msrb.mxu0 %v5138_v47  ;;  %v5563_v47 = vld [vmem:[%s11998_s1 + $0x1b0] sm:$0xf0]  ;;  %v5545_v54 = vld [vmem:[%s11998_s1 + $0x180] sm:$0xf]  ;;  %v7453_v60 = vld [vmem:[%s11998_s1 + $0x184] sm:$0xf] }
  0x43   : > { %747 = vmatpush.bf16.msrb.mxu1 %v5266_v49  ;;  %761 = vmatpush.bf16.msrb.mxu2 %v5142_v50  ;;  %v5562_v49 = vor.u32 %v7459_v43, %v5561_v41  ;;  %v5438_v50 = vor.u32 %v7425_v44, %v5435_v45  ;;  %v5419_v59 = vld [vmem:[%s11998_s1 + $0x90] sm:$0xf0]  ;;  %v5546_v63 = vor.u32 %v7455_v57, %v5545_v54  ;;  %v7417_v4 = vld [vmem:[%s11998_s1 + $0x64] sm:$0xf]  ;;  %v5385_v11 = vld [vmem:[%s11998_s1 + $0x40] sm:$0xf] }
  0x44   : > { %775 = vmatpush.bf16.msrb.mxu3 %v5270_v55  ;;  %v5566_v55 = vor.u32 %v7457_v46, %v5563_v47  ;;  %v5547_v61 = vld [vmem:[%s11998_s1 + $0x190] sm:$0xf0]  ;;  %v5422_v0 = vor.u32 %v7421_v58, %v5419_v59  ;;  %v7415_v12 = vld [vmem:[%s11998_s1 + $0x4c] sm:$0xf0]  ;;  %v7413_v16 = vld [vmem:[%s11998_s1 + $0x44] sm:$0xf] }
  0x45   : > { %v5550_v3 = vor.u32 %v7453_v60, %v5547_v61  ;;  %v5403_v5 = vld [vmem:[%s11998_s1 + $0x70] sm:$0xf0]  ;;  %v7447_v15 = vld [vmem:[%s11998_s1 + $0x14c] sm:$0xf0]  ;;  %v5386_v20 = vor.u32 %v7415_v12, %v5385_v11  ;;  %v5497_v25 = vld [vmem:[%s11998_s1 + $0x120] sm:$0xf] }
  0x46   : > { %734 = vmatpush.bf16.msrb.mxu0 %v5122_v62  ;;  %v5418_v62 = vor.u32 %v7423_v53, %v5417_v52  ;;  %v5531_v7 = vld [vmem:[%s11998_s1 + $0x170] sm:$0xf0]  ;;  %v5406_v10 = vor.u32 %v7417_v4, %v5403_v5  ;;  %v7443_v28 = vld [vmem:[%s11998_s1 + $0x12c] sm:$0xf0]  ;;  %v7441_v31 = vld [vmem:[%s11998_s1 + $0x124] sm:$0xf] }
  0x47   : > { %748 = vmatpush.bf16.msrb.mxu1 %v5250_v1  ;;  %762 = vmatpush.bf16.msrb.mxu2 %v5126_v2  ;;  %v5401_v1 = vld [vmem:[%s11998_s1 + $0x60] sm:$0xf]  ;;  %v7419_v2 = vld [vmem:[%s11998_s1 + $0x6c] sm:$0xf0]  ;;  %v5515_v19 = vld [vmem:[%s11998_s1 + $0x150] sm:$0xf0] }
  0x48   : > { %776 = vmatpush.bf16.msrb.mxu3 %v5254_v6  ;;  %v7449_v6 = vld [vmem:[%s11998_s1 + $0x164] sm:$0xf]  ;;  %v5402_v8 = vor.u32 %v7419_v2, %v5401_v1  ;;  %v5371_v30 = vld [vmem:[%s11998_s1 + $0x30] sm:$0xf0]  ;;  %v5353_v35 = vld [vmem:[%s11998_s1] sm:$0xf] }
  0x49   : > { %v5534_v14 = vor.u32 %v7449_v6, %v5531_v7  ;;  %v5499_v33 = vld [vmem:[%s11998_s1 + $0x130] sm:$0xf0]  ;;  %v5481_v39 = vld [vmem:[%s11998_s1 + $0x100] sm:$0xf]  ;;  %v7439_v40 = vld [vmem:[%s11998_s1 + $0x10c] sm:$0xf0] }
  0x4a   : > { %735 = vmatpush.bf16.msrb.mxu0 %v5106_v13  ;;  %v5513_v13 = vld [vmem:[%s11998_s1 + $0x140] sm:$0xf]  ;;  %v7405_v41 = vld [vmem:[%s11998_s1 + $0x4] sm:$0xf]  ;;  %v5355_v43 = vld [vmem:[%s11998_s1 + $0x10] sm:$0xf0]  ;;  %v5482_v54 = vor.u32 %v7439_v40, %v5481_v39 }
  0x4b   : > { %749 = vmatpush.bf16.msrb.mxu1 %v5234_v17  ;;  %763 = vmatpush.bf16.msrb.mxu2 %v5110_v18  ;;  %v5387_v17 = vld [vmem:[%s11998_s1 + $0x50] sm:$0xf0]  ;;  %v7445_v18 = vld [vmem:[%s11998_s1 + $0x144] sm:$0xf]  ;;  %v5473_v46 = vld [vmem:[%s11998_s1 + $0xe8] sm:$0xf] }
  0x4c   : > { %777 = vmatpush.bf16.msrb.mxu3 %v5238_v21  ;;  %v5514_v21 = vor.u32 %v7447_v15, %v5513_v13  ;;  %v5518_v26 = vor.u32 %v7445_v18, %v5515_v19  ;;  %v7437_v44 = vld [vmem:[%s11998_s1 + $0x104] sm:$0xf]  ;;  %v5483_v45 = vld [vmem:[%s11998_s1 + $0x110] sm:$0xf0]  ;;  %v7436_v47 = vld [vmem:[%s11998_s1 + $0xf4] sm:$0xf0] }
  0x4d   : > { %736 = vmatmul.bf16.vlgmr.msrb.gmra.mxu0 %v8392_v51  ;;  %v7434_v52 = vld [vmem:[%s11998_s1 + $0xec] sm:$0xf]  ;;  %v5475_v53 = vld [vmem:[%s11998_s1 + $0xf8] sm:$0xf0]  ;;  %v5486_v59 = vor.u32 %v7437_v44, %v5483_v45  ;;  %v5474_v60 = vor.u32 %v7436_v47, %v5473_v46  ;;  %v5585_v1 = vld [vmem:[%s11998_s1 + $0x1c8] sm:$0xf] }
  0x4e   : > { %1106 = vmatpush.bf16.msra.mxu0 %v5466_v22  ;;  %764 = vmatmul.bf16.vlgmr.msrb.gmra.mxu2 %v8392_v51  ;;  %v5529_v51 = vld [vmem:[%s11998_s1 + $0x160] sm:$0xf]  ;;  %v5390_v22 = vor.u32 %v7413_v16, %v5387_v17  ;;  %v7466_v57 = vld [vmem:[%s11998_s1 + $0x1ec] sm:$0xf]  ;;  %v5603_v58 = vld [vmem:[%s11998_s1 + $0x1f8] sm:$0xf0] }
  0x4f   : > { %1120 = vmatpush.bf16.msra.mxu1 %v5594_v23  ;;  %1134 = vmatpush.bf16.msra.mxu2 %v5470_v24  ;;  %v5369_v23 = vld [vmem:[%s11998_s1 + $0x20] sm:$0xf]  ;;  %v7411_v24 = vld [vmem:[%s11998_s1 + $0x2c] sm:$0xf0]  ;;  %v5606_v2 = vor.u32 %v7466_v57, %v5603_v58  ;;  %v7462_v4 = vld [vmem:[%s11998_s1 + $0x1cc] sm:$0xf] }
  0x50   : > { %1148 = vmatpush.bf16.msra.mxu3 %v5598_v29  ;;  %750 = vmatmul.bf16.vlgmr.msrb.gmra.mxu1 %v8403_v56  ;;  %v7409_v29 = vld [vmem:[%s11998_s1 + $0x24] sm:$0xf]  ;;  %v5370_v34 = vor.u32 %v7411_v24, %v5369_v23  ;;  %v5587_v5 = vld [vmem:[%s11998_s1 + $0x1d8] sm:$0xf0]  ;;  %v5569_v11 = vld [vmem:[%s11998_s1 + $0x1a8] sm:$0xf] }
  0x51   : > { %778 = vmatmul.bf16.vlgmr.msrb.gmra.mxu3 %v8403_v56  ;;  %v7451_v56 = vld [vmem:[%s11998_s1 + $0x16c] sm:$0xf0]  ;;  %v5590_v12 = vor.u32 %v7462_v4, %v5587_v5  ;;  %v7460_v13 = vld [vmem:[%s11998_s1 + $0x1b4] sm:$0xf0]  ;;  %v5443_v15 = vld [vmem:[%s11998_s1 + $0xb8] sm:$0xf0] }
  0x52   : > { %1107 = vmatpush.bf16.msra.mxu0 %v5450_v36  ;;  %v5530_v9 = vor.u32 %v7451_v56, %v5529_v51  ;;  %v7407_v36 = vld [vmem:[%s11998_s1 + $0xc] sm:$0xf0]  ;;  %v7464_v51 = vld [vmem:[%s11998_s1 + $0x1d4] sm:$0xf0]  ;;  %v5459_v56 = vld [vmem:[%s11998_s1 + $0xd8] sm:$0xf0]  ;;  %v5570_v19 = vor.u32 %v7460_v13, %v5569_v11 }
  0x53   : > { %1121 = vmatpush.bf16.msra.mxu1 %v5578_v37  ;;  %1135 = vmatpush.bf16.msra.mxu2 %v5454_v38  ;;  %v5498_v37 = vor.u32 %v7443_v28, %v5497_v25  ;;  %v5374_v38 = vor.u32 %v7409_v29, %v5371_v30  ;;  %v5586_v7 = vor.u32 %v7464_v51, %v5585_v1  ;;  %v7458_v16 = vld [vmem:[%s11998_s1 + $0x1ac] sm:$0xf]  ;;  %v5571_v17 = vld [vmem:[%s11998_s1 + $0x1b8] sm:$0xf0]  ;;  %v5553_v23 = vld [vmem:[%s11998_s1 + $0x188] sm:$0xf] }
  0x54   : > { %1149 = vmatpush.bf16.msra.mxu3 %v5582_v42  ;;  %v5502_v42 = vor.u32 %v7441_v31, %v5499_v33  ;;  %v5574_v24 = vor.u32 %v7458_v16, %v5571_v17  ;;  %v7456_v25 = vld [vmem:[%s11998_s1 + $0x194] sm:$0xf0]  ;;  %v5427_v28 = vld [vmem:[%s11998_s1 + $0x98] sm:$0xf0]  ;;  %v7454_v29 = vld [vmem:[%s11998_s1 + $0x18c] sm:$0xf] }
  0x55   : > { %v5555_v30 = vld [vmem:[%s11998_s1 + $0x198] sm:$0xf0]  ;;  %v5554_v33 = vor.u32 %v7456_v25, %v5553_v23  ;;  %v7452_v39 = vld [vmem:[%s11998_s1 + $0x174] sm:$0xf0]  ;;  %v7418_v40 = vld [vmem:[%s11998_s1 + $0x6c] sm:$0xf] }
  0x56   : > { %1108 = vmatpush.bf16.msra.mxu0 %v5434_v48  ;;  %v5601_v48 = vld [vmem:[%s11998_s1 + $0x1e8] sm:$0xf]  ;;  %v5523_v57 = vld [vmem:[%s11998_s1 + $0x158] sm:$0xf0]  ;;  %v7444_v1 = vld [vmem:[%s11998_s1 + $0x134] sm:$0xf0] }
  0x57   : > { %1122 = vmatpush.bf16.msra.mxu1 %v5562_v49  ;;  %1136 = vmatpush.bf16.msra.mxu2 %v5438_v50  ;;  %v5354_v49 = vor.u32 %v7407_v36, %v5353_v35  ;;  %v7468_v50 = vld [vmem:[%s11998_s1 + $0x1f4] sm:$0xf0]  ;;  %v5409_v35 = vld [vmem:[%s11998_s1 + $0x68] sm:$0xf]  ;;  %v5379_v51 = vld [vmem:[%s11998_s1 + $0x38] sm:$0xf0] }
  0x58   : > { %1150 = vmatpush.bf16.msra.mxu3 %v5566_v55  ;;  %v5358_v55 = vor.u32 %v7405_v41, %v5355_v43  ;;  %v5602_v61 = vor.u32 %v7468_v50, %v5601_v48  ;;  %v7420_v36 = vld [vmem:[%s11998_s1 + $0x74] sm:$0xf0]  ;;  %v5411_v41 = vld [vmem:[%s11998_s1 + $0x78] sm:$0xf0]  ;;  %v5393_v47 = vld [vmem:[%s11998_s1 + $0x48] sm:$0xf] }
  0x59   : > { %v5539_v43 = vld [vmem:[%s11998_s1 + $0x178] sm:$0xf0]  ;;  %v5410_v44 = vor.u32 %v7420_v36, %v5409_v35  ;;  %v5414_v46 = vor.u32 %v7418_v40, %v5411_v41  ;;  %v7416_v48 = vld [vmem:[%s11998_s1 + $0x54] sm:$0xf0]  ;;  %v5361_v5 = vld [vmem:[%s11998_s1 + $0x8] sm:$0xf] }
  0x5a   : > { %1109 = vmatpush.bf16.msra.mxu0 %v5418_v62  ;;  %v5478_v62 = vor.u32 %v7434_v52, %v5475_v53  ;;  %v7448_v52 = vld [vmem:[%s11998_s1 + $0x154] sm:$0xf0]  ;;  %v7414_v53 = vld [vmem:[%s11998_s1 + $0x4c] sm:$0xf]  ;;  %v5394_v58 = vor.u32 %v7416_v48, %v5393_v47  ;;  %v5363_v13 = vld [vmem:[%s11998_s1 + $0x18] sm:$0xf0] }
  0x5b   : > { %1123 = vmatpush.bf16.msra.mxu1 %v5546_v63  ;;  %1137 = vmatpush.bf16.msra.mxu2 %v5422_v0  ;;  %v5457_v63 = vld [vmem:[%s11998_s1 + $0xc8] sm:$0xf]  ;;  %v7432_v0 = vld [vmem:[%s11998_s1 + $0xd4] sm:$0xf0]  ;;  %v7406_v11 = vld [vmem:[%s11998_s1 + $0xc] sm:$0xf] }
  0x5c   : > { %1151 = vmatpush.bf16.msra.mxu3 %v5550_v3  ;;  %v7430_v3 = vld [vmem:[%s11998_s1 + $0xcc] sm:$0xf]  ;;  %v5458_v6 = vor.u32 %v7432_v0, %v5457_v63  ;;  %v5505_v63 = vld [vmem:[%s11998_s1 + $0x128] sm:$0xf]  ;;  %v5721_v16 = vld [vmem:[%s11998_s1 + $0x4e0] sm:$0xf] }
  0x5d   : > { %v7563_v17 = vld [vmem:[%s11998_s1 + $0x4ec] sm:$0xf0]  ;;  %v7593_v25 = vld [vmem:[%s11998_s1 + $0x5e4] sm:$0xf]  ;;  %v5833_v35 = vld [vmem:[%s11998_s1 + $0x5c0] sm:$0xf] }
  0x5e   : > { %1110 = vmatpush.bf16.msra.mxu0 %v5402_v8  ;;  %v5462_v8 = vor.u32 %v7430_v3, %v5459_v56  ;;  %v7442_v3 = vld [vmem:[%s11998_s1 + $0x12c] sm:$0xf]  ;;  %v5507_v56 = vld [vmem:[%s11998_s1 + $0x138] sm:$0xf0]  ;;  %v7589_v40 = vld [vmem:[%s11998_s1 + $0x5c4] sm:$0xf] }
  0x5f   : > { %1124 = vmatpush.bf16.msra.mxu1 %v5530_v9  ;;  %1138 = vmatpush.bf16.msra.mxu2 %v5406_v10  ;;  %v5441_v9 = vld [vmem:[%s11998_s1 + $0xa8] sm:$0xf]  ;;  %v7428_v10 = vld [vmem:[%s11998_s1 + $0xb4] sm:$0xf0]  ;;  %v5835_v41 = vld [vmem:[%s11998_s1 + $0x5d0] sm:$0xf0] }
  0x60   : > { %1152 = vmatpush.bf16.msra.mxu3 %v5534_v14  ;;  %v7426_v14 = vld [vmem:[%s11998_s1 + $0xac] sm:$0xf]  ;;  %v5442_v18 = vor.u32 %v7428_v10, %v5441_v9  ;;  %v5489_v9 = vld [vmem:[%s11998_s1 + $0x108] sm:$0xf]  ;;  %v7440_v10 = vld [vmem:[%s11998_s1 + $0x114] sm:$0xf0]  ;;  %v5838_v48 = vor.u32 %v7589_v40, %v5835_v41 }
  0x61   : > { %v5490_v23 = vor.u32 %v7440_v10, %v5489_v9  ;;  %v5817_v47 = vld [vmem:[%s11998_s1 + $0x5a0] sm:$0xf]  ;;  %v5659_v9 = vld [vmem:[%s11998_s1 + $0x470] sm:$0xf0]  ;;  %v7577_v10 = vld [vmem:[%s11998_s1 + $0x564] sm:$0xf] }
  0x62   : > { %1111 = vmatpush.bf16.msra.mxu0 %v5386_v20  ;;  %v5446_v20 = vor.u32 %v7426_v14, %v5443_v15  ;;  %v7438_v14 = vld [vmem:[%s11998_s1 + $0x10c] sm:$0xf]  ;;  %v5491_v15 = vld [vmem:[%s11998_s1 + $0x118] sm:$0xf0]  ;;  %v7537_v40 = vld [vmem:[%s11998_s1 + $0x424] sm:$0xf] }
  0x63   : > { %1125 = vmatpush.bf16.msra.mxu1 %v5514_v21  ;;  %1139 = vmatpush.bf16.msra.mxu2 %v5390_v22  ;;  %v5425_v21 = vld [vmem:[%s11998_s1 + $0x88] sm:$0xf]  ;;  %v7424_v22 = vld [vmem:[%s11998_s1 + $0x94] sm:$0xf0]  ;;  %v5627_v41 = vld [vmem:[%s11998_s1 + $0x430] sm:$0xf0] }
  0x64   : > { %1153 = vmatpush.bf16.msra.mxu3 %v5518_v26  ;;  %v7422_v26 = vld [vmem:[%s11998_s1 + $0x8c] sm:$0xf]  ;;  %v5426_v31 = vor.u32 %v7424_v22, %v5425_v21  ;;  %v7561_v21 = vld [vmem:[%s11998_s1 + $0x4e4] sm:$0xf]  ;;  %v5723_v22 = vld [vmem:[%s11998_s1 + $0x4f0] sm:$0xf0] }
  0x65   : > { %vm1823_vm1 = vsmask.f32 5376  ;;  %vm2889_vm3 = vsmask.f32 4352  ;;  %vm3958_vm4 = vsmask.f32 6400 }
  0x66   : > { %1112 = vmatpush.bf16.msra.mxu0 %v5370_v34  ;;  %v5430_v34 = vor.u32 %v7422_v26, %v5427_v28  ;;  %v5851_v26 = vld [vmem:[%s11998_s1 + $0x5f0] sm:$0xf0]  ;;  %v5494_v28 = vor.u32 %v7438_v14, %v5491_v15  ;;  %v7543_v14 = vld [vmem:[%s11998_s1 + $0x44c] sm:$0xf0]  ;;  %v5769_v15 = vld [vmem:[%s11998_s1 + $0x540] sm:$0xf] }
  0x67   : > { %1126 = vmatpush.bf16.msra.mxu1 %v5498_v37  ;;  %1140 = vmatpush.bf16.msra.mxu2 %v5374_v38  ;;  %v5537_v37 = vld [vmem:[%s11998_s1 + $0x168] sm:$0xf]  ;;  %v5558_v38 = vor.u32 %v7454_v29, %v5555_v30  ;;  %v5722_v29 = vor.u32 %v7563_v17, %v5721_v16  ;;  %v5854_v36 = vor.u32 %v7593_v25, %v5851_v26  ;;  %v7573_v25 = vld [vmem:[%s11998_s1 + $0x544] sm:$0xf]  ;;  %v5771_v26 = vld [vmem:[%s11998_s1 + $0x550] sm:$0xf0] }
  0x68   : > { %1154 = vmatpush.bf16.msra.mxu3 %v5502_v42  ;;  %v7450_v42 = vld [vmem:[%s11998_s1 + $0x16c] sm:$0xf]  ;;  %v5538_v45 = vor.u32 %v7452_v39, %v5537_v37  ;;  %v7591_v37 = vld [vmem:[%s11998_s1 + $0x5cc] sm:$0xf0]  ;;  %v5707_v39 = vld [vmem:[%s11998_s1 + $0x4d0] sm:$0xf0] }
  0x69   : > { %v5542_v50 = vor.u32 %v7450_v42, %v5539_v43  ;;  %v5834_v43 = vor.u32 %v7591_v37, %v5833_v35  ;;  %v7571_v35 = vld [vmem:[%s11998_s1 + $0x52c] sm:$0xf0]  ;;  %vm5010_vm6 = vcmask 1043456   ;;  %vm5011_vm7 = vsmask.f32 3328 }
  0x6a   : > { %1113 = vmatpush.bf16.msra.mxu0 %v5354_v49  ;;  %v5521_v49 = vld [vmem:[%s11998_s1 + $0x148] sm:$0xf]  ;;  %vm5013_vm8 = vcmask 1047556   ;;  %vm5014_vm9 = vsmask.f32 7424  ;;  %vm11951_vm10 = vmand %vm5010_vm6, %vm5011_vm7 }
  0x6b   : > { %1127 = vmatpush.bf16.msra.mxu1 %v5482_v54  ;;  %1141 = vmatpush.bf16.msra.mxu2 %v5358_v55  ;;  %v5395_v54 = vld [vmem:[%s11998_s1 + $0x58] sm:$0xf0]  ;;  %v7446_v55 = vld [vmem:[%s11998_s1 + $0x14c] sm:$0xf]  ;;  %vm11955_vm11 = vmand %vm5013_vm8, %vm5014_vm9 }
  0x6c   : > { %1155 = vmatpush.bf16.msra.mxu3 %v5486_v59  ;;  %v5522_v59 = vor.u32 %v7448_v52, %v5521_v49  ;;  %v5526_v0 = vor.u32 %v7446_v55, %v5523_v57  ;;  %v7587_v49 = vld [vmem:[%s11998_s1 + $0x5ac] sm:$0xf0]  ;;  %v5691_v52 = vld [vmem:[%s11998_s1 + $0x4b0] sm:$0xf0]  ;;  %vm5016_vm12 = vmor %vm11955_vm11, %vm11951_vm10 }
  0x6d   : > { %1114 = vmatmul.bf16.vlgmr.msra.gmra.mxu0 %v8359_v27  ;;  %v5818_v57 = vor.u32 %v7587_v49, %v5817_v47  ;;  %v5609_v49 = vld [vmem:[%s11998_s1 + $0x400] sm:$0xf] }
  0x6e   : > { %1162 = vmatpush.bf16.msrb.mxu0 %v5474_v60  ;;  %1142 = vmatmul.bf16.vlgmr.msra.gmra.mxu2 %v8359_v27  ;;  %v5398_v60 = vor.u32 %v7414_v53, %v5395_v54  ;;  %v7585_v53 = vld [vmem:[%s11998_s1 + $0x5a4] sm:$0xf]  ;;  %v5819_v54 = vld [vmem:[%s11998_s1 + $0x5b0] sm:$0xf0] }
  0x6f   : > { %1176 = vmatpush.bf16.msrb.mxu1 %v5602_v61  ;;  %1190 = vmatpush.bf16.msrb.mxu2 %v5478_v62  ;;  %v5377_v61 = vld [vmem:[%s11998_s1 + $0x28] sm:$0xf]  ;;  %v7412_v62 = vld [vmem:[%s11998_s1 + $0x34] sm:$0xf0] }
  0x70   : > { %1204 = vmatpush.bf16.msrb.mxu3 %v5606_v2  ;;  %1128 = vmatmul.bf16.vlgmr.msra.gmra.mxu1 %v8368_v32  ;;  %v7410_v2 = vld [vmem:[%s11998_s1 + $0x2c] sm:$0xf]  ;;  %v5378_v4 = vor.u32 %v7412_v62, %v5377_v61  ;;  %v7583_v61 = vld [vmem:[%s11998_s1 + $0x58c] sm:$0xf0]  ;;  %v7549_v62 = vld [vmem:[%s11998_s1 + $0x484] sm:$0xf] }
  0x71   : > { %1156 = vmatmul.bf16.vlgmr.msra.gmra.mxu3 %v8368_v32 }
  0x72   : > { %1163 = vmatpush.bf16.msrb.mxu0 %v5458_v6  ;;  %v7408_v6 = vld [vmem:[%s11998_s1 + $0x14] sm:$0xf0] }
  0x73   : > { %1177 = vmatpush.bf16.msrb.mxu1 %v5586_v7  ;;  %1191 = vmatpush.bf16.msrb.mxu2 %v5462_v8  ;;  %v5506_v7 = vor.u32 %v7444_v1, %v5505_v63  ;;  %v5382_v8 = vor.u32 %v7410_v2, %v5379_v51  ;;  %v5675_v63 = vld [vmem:[%s11998_s1 + $0x490] sm:$0xf0] }
  0x74   : > { %1205 = vmatpush.bf16.msrb.mxu3 %v5590_v12  ;;  %v5510_v12 = vor.u32 %v7442_v3, %v5507_v56  ;;  %v5803_v1 = vld [vmem:[%s11998_s1 + $0x590] sm:$0xf0]  ;;  %v5678_v3 = vor.u32 %v7549_v62, %v5675_v63  ;;  %v5657_v56 = vld [vmem:[%s11998_s1 + $0x460] sm:$0xf]  ;;  %v5729_v63 = vld [vmem:[%s11998_s1 + $0x4e8] sm:$0xf] }
  0x76   : > { %1164 = vmatpush.bf16.msrb.mxu0 %v5442_v18  ;;  %v5849_v18 = vld [vmem:[%s11998_s1 + $0x5e0] sm:$0xf] }
  0x77   : > { %1178 = vmatpush.bf16.msrb.mxu1 %v5570_v19  ;;  %1192 = vmatpush.bf16.msrb.mxu2 %v5446_v20  ;;  %v5362_v19 = vor.u32 %v7408_v6, %v5361_v5  ;;  %v7595_v20 = vld [vmem:[%s11998_s1 + $0x5ec] sm:$0xf0]  ;;  %v5785_v5 = vld [vmem:[%s11998_s1 + $0x560] sm:$0xf] }
  0x78   : > { %1206 = vmatpush.bf16.msrb.mxu3 %v5574_v24  ;;  %v5366_v24 = vor.u32 %v7406_v11, %v5363_v13  ;;  %v5850_v30 = vor.u32 %v7595_v20, %v5849_v18  ;;  %v5787_v11 = vld [vmem:[%s11998_s1 + $0x570] sm:$0xf0]  ;;  %v5641_v13 = vld [vmem:[%s11998_s1 + $0x440] sm:$0xf]  ;;  %v7575_v18 = vld [vmem:[%s11998_s1 + $0x54c] sm:$0xf0] }
  0x79   : > { %v5643_v20 = vld [vmem:[%s11998_s1 + $0x450] sm:$0xf0] }
  0x7a   : > { %1165 = vmatpush.bf16.msrb.mxu0 %v5426_v31  ;;  %v5726_v31 = vor.u32 %v7561_v21, %v5723_v22  ;;  %v5790_v21 = vor.u32 %v7577_v10, %v5787_v11  ;;  %v1218_v22 = vld [vmem:[%s8348_s6] sm:$0xee] }
  0x7b   : > { %1179 = vmatpush.bf16.msrb.mxu1 %v5554_v33  ;;  %1193 = vmatpush.bf16.msrb.mxu2 %v5430_v34  ;;  %v5705_v33 = vld [vmem:[%s11998_s1 + $0x4c0] sm:$0xf]  ;;  %v7559_v34 = vld [vmem:[%s11998_s1 + $0x4cc] sm:$0xf0] }
  0x7c   : > { %1207 = vmatpush.bf16.msrb.mxu3 %v5558_v38  ;;  %v7557_v38 = vld [vmem:[%s11998_s1 + $0x4c4] sm:$0xf]  ;;  %v5706_v42 = vor.u32 %v7559_v34, %v5705_v33  ;;  %v7539_v33 = vld [vmem:[%s11998_s1 + $0x42c] sm:$0xf0]  ;;  %v5753_v34 = vld [vmem:[%s11998_s1 + $0x520] sm:$0xf] }
  0x7e   : > { %1166 = vmatpush.bf16.msrb.mxu0 %v5410_v44  ;;  %v5710_v44 = vor.u32 %v7557_v38, %v5707_v39  ;;  %v5774_v39 = vor.u32 %v7573_v25, %v5771_v26  ;;  %v5843_v25 = vld [vmem:[%s11998_s1 + $0x5d8] sm:$0xf0] }
  0x7f   : > { %1180 = vmatpush.bf16.msrb.mxu1 %v5538_v45  ;;  %1194 = vmatpush.bf16.msrb.mxu2 %v5414_v46  ;;  %v5689_v45 = vld [vmem:[%s11998_s1 + $0x4a0] sm:$0xf]  ;;  %v7555_v46 = vld [vmem:[%s11998_s1 + $0x4ac] sm:$0xf0] }
  0x80   : > { %1208 = vmatpush.bf16.msrb.mxu3 %v5542_v50  ;;  %v7553_v50 = vld [vmem:[%s11998_s1 + $0x4a4] sm:$0xf]  ;;  %v5690_v55 = vor.u32 %v7555_v46, %v5689_v45  ;;  %v5755_v46 = vld [vmem:[%s11998_s1 + $0x530] sm:$0xf0] }
  0x81   : > { %v7569_v45 = vld [vmem:[%s11998_s1 + $0x524] sm:$0xf] }
  0x82   : > { %1167 = vmatpush.bf16.msrb.mxu0 %v5394_v58  ;;  %v5694_v58 = vor.u32 %v7553_v50, %v5691_v52  ;;  %v7535_v50 = vld [vmem:[%s11998_s1 + $0x40c] sm:$0xf0]  ;;  %v5630_v52 = vor.u32 %v7537_v40, %v5627_v41  ;;  %v7586_v40 = vld [vmem:[%s11998_s1 + $0x5ac] sm:$0xf]  ;;  %v5827_v41 = vld [vmem:[%s11998_s1 + $0x5b8] sm:$0xf0] }
  0x83   : > { %1181 = vmatpush.bf16.msrb.mxu1 %v5522_v59  ;;  %1195 = vmatpush.bf16.msrb.mxu2 %v5398_v60  ;;  %v7551_v59 = vld [vmem:[%s11998_s1 + $0x48c] sm:$0xf0]  ;;  %v5801_v60 = vld [vmem:[%s11998_s1 + $0x580] sm:$0xf] }
  0x84   : > { %1209 = vmatpush.bf16.msrb.mxu3 %v5526_v0  ;;  %v7581_v0 = vld [vmem:[%s11998_s1 + $0x584] sm:$0xf]  ;;  %v5802_v51 = vor.u32 %v7583_v61, %v5801_v60 }
  0x85   : > { %v5806_v6 = vor.u32 %v7581_v0, %v5803_v1  ;;  %v7565_v60 = vld [vmem:[%s11998_s1 + $0x504] sm:$0xf]  ;;  %v7564_v0 = vld [vmem:[%s11998_s1 + $0x4f4] sm:$0xf0]  ;;  %v5857_v1 = vld [vmem:[%s11998_s1 + $0x5e8] sm:$0xf] }
  0x86   : > { %1168 = vmatpush.bf16.msrb.mxu0 %v5378_v4  ;;  %v7547_v4 = vld [vmem:[%s11998_s1 + $0x46c] sm:$0xf0]  ;;  %v5730_v11 = vor.u32 %v7564_v0, %v5729_v63  ;;  %v7546_v63 = vld [vmem:[%s11998_s1 + $0x46c] sm:$0xf]  ;;  %v5667_v0 = vld [vmem:[%s11998_s1 + $0x478] sm:$0xf0] }
  0x87   : > { %1182 = vmatpush.bf16.msrb.mxu1 %v5506_v7  ;;  %1196 = vmatpush.bf16.msrb.mxu2 %v5382_v8  ;;  %v7579_v7 = vld [vmem:[%s11998_s1 + $0x56c] sm:$0xf0]  ;;  %v7545_v8 = vld [vmem:[%s11998_s1 + $0x464] sm:$0xf] }
  0x88   : > { %1210 = vmatpush.bf16.msrb.mxu3 %v5510_v12  ;;  %v5658_v12 = vor.u32 %v7547_v4, %v5657_v56  ;;  %v5786_v16 = vor.u32 %v7579_v7, %v5785_v5  ;;  %v5662_v17 = vor.u32 %v7545_v8, %v5659_v9  ;;  %v7562_v56 = vld [vmem:[%s11998_s1 + $0x4ec] sm:$0xf]  ;;  %v5731_v4 = vld [vmem:[%s11998_s1 + $0x4f8] sm:$0xf0] }
  0x89   : > { %v7594_v7 = vld [vmem:[%s11998_s1 + $0x5ec] sm:$0xf]  ;;  %v5859_v8 = vld [vmem:[%s11998_s1 + $0x5f8] sm:$0xf0] }
  0x8a   : > { %1169 = vmatpush.bf16.msrb.mxu0 %v5362_v19  ;;  %v7541_v19 = vld [vmem:[%s11998_s1 + $0x444] sm:$0xf] }
  0x8b   : > { %1183 = vmatpush.bf16.msrb.mxu1 %v5490_v23  ;;  %1197 = vmatpush.bf16.msrb.mxu2 %v5366_v24  ;;  %v1219_v23 = vld [vmem:[%s8348_s6 + $0x8] sm:$0xff]  ;;  %v1220_v24 = vld [vmem:[%s8348_s6 + $0x10] sm:$0x11] }
  0x8c   : > { %1211 = vmatpush.bf16.msrb.mxu3 %v5494_v28  ;;  %v5642_v28 = vor.u32 %v7543_v14, %v5641_v13  ;;  %v9003_v37 = vunpack.c.l.b16 %v1219_v23  ;;  %v1292_v38 = vunpack.c.l.b16 %v1220_v24 }
  0x8d   : > { %1170 = vmatmul.bf16.vlgmr.msrb.gmra.mxu0 %v8359_v27 }
  0x8e   : > { %1627 = vmatpush.bf16.msra.mxu0 %v5722_v29  ;;  %1198 = vmatmul.bf16.vlgmr.msrb.gmra.mxu2 %v8359_v27  ;;  %v5673_v27 = vld [vmem:[%s11998_s1 + $0x480] sm:$0xf]  ;;  %v5770_v29 = vor.u32 %v7575_v18, %v5769_v15  ;;  %v5734_v15 = vor.u32 %v7562_v56, %v5731_v4  ;;  %v5841_v18 = vld [vmem:[%s11998_s1 + $0x5c8] sm:$0xf]  ;;  %v5670_v56 = vor.u32 %v7546_v63, %v5667_v0  ;;  %v7655_v0 = vld [vmem:[%s11998_s1 + $0x7cc] sm:$0xf0] }
  0x8f   : > { %1641 = vmatpush.bf16.msra.mxu1 %v5850_v30  ;;  %1655 = vmatpush.bf16.msra.mxu2 %v5726_v31  ;;  %v5674_v2 = vor.u32 %v7551_v59, %v5673_v27  ;;  %v5625_v30 = vld [vmem:[%s11998_s1 + $0x420] sm:$0xf]  ;;  %v5646_v31 = vor.u32 %v7541_v19, %v5643_v20  ;;  %v5758_v27 = vor.u32 %v7569_v45, %v5755_v46  ;;  %v5611_v59 = vld [vmem:[%s11998_s1 + $0x410] sm:$0xf0]  ;;  %v7592_v20 = vld [vmem:[%s11998_s1 + $0x5d4] sm:$0xf0] }
  0x90   : > { %1669 = vmatpush.bf16.msra.mxu3 %v5854_v36  ;;  %1184 = vmatmul.bf16.vlgmr.msrb.gmra.mxu1 %v8368_v32  ;;  %v1288_v36 = vunpack.c.l.b16 %v1218_v22  ;;  %v5626_v47 = vor.u32 %v7539_v33, %v5625_v30  ;;  %v5862_v19 = vor.u32 %v7594_v7, %v5859_v8  ;;  %v7556_v33 = vld [vmem:[%s11998_s1 + $0x4b4] sm:$0xf0]  ;;  %v5681_v46 = vld [vmem:[%s11998_s1 + $0x488] sm:$0xf] }
  0x91   : > { %1212 = vmatmul.bf16.vlgmr.msrb.gmra.mxu3 %v8368_v32  ;;  %v5822_v32 = vor.u32 %v7585_v53, %v5819_v54  ;;  %v5737_v53 = vld [vmem:[%s11998_s1 + $0x500] sm:$0xf]  ;;  %v7567_v54 = vld [vmem:[%s11998_s1 + $0x50c] sm:$0xf0]  ;;  %v5649_v4 = vld [vmem:[%s11998_s1 + $0x448] sm:$0xf] }
  0x92   : > { %1628 = vmatpush.bf16.msra.mxu0 %v5706_v42  ;;  %v1289_v42 = vunpack.c.h.b16 %v1218_v22  ;;  %v5715_v22 = vld [vmem:[%s11998_s1 + $0x4d8] sm:$0xf0]  ;;  %v7576_v8 = vld [vmem:[%s11998_s1 + $0x554] sm:$0xf0] }
  0x93   : > { %1642 = vmatpush.bf16.msra.mxu1 %v5834_v43  ;;  %1656 = vmatpush.bf16.msra.mxu2 %v5710_v44  ;;  %v9011_v43 = vunpack.c.h.b16 %v1219_v23  ;;  %v1293_v44 = vunpack.c.h.b16 %v1220_v24  ;;  %v7590_v24 = vld [vmem:[%s11998_s1 + $0x5cc] sm:$0xf] }
  0x94   : > { %1670 = vmatpush.bf16.msra.mxu3 %v5838_v48  ;;  %v5754_v48 = vor.u32 %v7571_v35, %v5753_v34  ;;  %v5825_v34 = vld [vmem:[%s11998_s1 + $0x5a8] sm:$0xf]  ;;  %v5846_v35 = vor.u32 %v7590_v24, %v5843_v25  ;;  %v7570_v24 = vld [vmem:[%s11998_s1 + $0x52c] sm:$0xf]  ;;  %v5763_v25 = vld [vmem:[%s11998_s1 + $0x538] sm:$0xf0] }
  0x95   : > { %v1295_v61 = vpack.c.b16 %v9011_v43, %v1289_v42  ;;  %v1297_v62 = vpack.c.b16 %v1293_v44, %v1293_v44 }
  0x96   : > { %1629 = vmatpush.bf16.msra.mxu0 %v5690_v55  ;;  %v7533_v55 = vld [vmem:[%s11998_s1 + $0x404] sm:$0xf] }
  0x97   : > { %1643 = vmatpush.bf16.msra.mxu1 %v5818_v57  ;;  %1657 = vmatpush.bf16.msra.mxu2 %v5694_v58  ;;  %v1294_v57 = vpack.c.b16 %v9003_v37, %v1288_v36  ;;  %v1296_v58 = vpack.c.b16 %v1292_v38, %v1292_v38  ;;  %v5614_v5 = vor.u32 %v7533_v55, %v5611_v59  ;;  %v1303_v13 = vrot.slane %v1297_v62, 1  ;;  %v7588_v36 = vld [vmem:[%s11998_s1 + $0x5b4] sm:$0xf0]  ;;  %v7554_v38 = vld [vmem:[%s11998_s1 + $0x4ac] sm:$0xf] }
  0x98   : > { %1671 = vmatpush.bf16.msra.mxu3 %v5822_v32  ;;  %v5739_v32 = vld [vmem:[%s11998_s1 + $0x510] sm:$0xf0]  ;;  %v5826_v44 = vor.u32 %v7588_v36, %v5825_v34  ;;  %v5811_v55 = vld [vmem:[%s11998_s1 + $0x598] sm:$0xf0]  ;;  %v5665_v59 = vld [vmem:[%s11998_s1 + $0x468] sm:$0xf] }
  0x99   : > { %v1299_v9 = vrot.slane %v1294_v57, 1  ;;  %v1300_v10 = vrot.slane %v1296_v58, 1  ;;  %v7580_v62 = vld [vmem:[%s11998_s1 + $0x574] sm:$0xf0]  ;;  %v5745_v34 = vld [vmem:[%s11998_s1 + $0x508] sm:$0xf] }
  0x9a   : > { %1630 = vmatpush.bf16.msra.mxu0 %v5674_v2  ;;  %v5610_v2 = vor.u32 %v7535_v50, %v5609_v49  ;;  %v5830_v49 = vor.u32 %v7586_v40, %v5827_v41  ;;  %v7584_v50 = vld [vmem:[%s11998_s1 + $0x594] sm:$0xf0]  ;;  %v7534_v36 = vld [vmem:[%s11998_s1 + $0x40c] sm:$0xf]  ;;  %v5747_v41 = vld [vmem:[%s11998_s1 + $0x518] sm:$0xf0] }
  0x9b   : > { %1644 = vmatpush.bf16.msra.mxu1 %v5802_v51  ;;  %1658 = vmatpush.bf16.msra.mxu2 %v5678_v3  ;;  %v5738_v51 = vor.u32 %v7567_v54, %v5737_v53  ;;  %v7596_v3 = vld [vmem:[%s11998_s1 + $0x5f4] sm:$0xf0]  ;;  %v9088_v23 = vsel %vm1298_vm0, %v1299_v9, %v1300_v10  ;;  %v5683_v53 = vld [vmem:[%s11998_s1 + $0x498] sm:$0xf0]  ;;  %v7582_v54 = vld [vmem:[%s11998_s1 + $0x58c] sm:$0xf] }
  0x9c   : > { %1672 = vmatpush.bf16.msra.mxu3 %v5806_v6  ;;  %v5742_v6 = vor.u32 %v7565_v60, %v5739_v32  ;;  %v5858_v14 = vor.u32 %v7596_v3, %v5857_v1  ;;  %v7548_v60 = vld [vmem:[%s11998_s1 + $0x474] sm:$0xf0]  ;;  %v5793_v32 = vld [vmem:[%s11998_s1 + $0x568] sm:$0xf]  ;;  %v7578_v1 = vld [vmem:[%s11998_s1 + $0x56c] sm:$0xf] }
  0x9d   : > { %v5794_v3 = vor.u32 %v7580_v62, %v5793_v32  ;;  %v7542_v9 = vld [vmem:[%s11998_s1 + $0x44c] sm:$0xf]  ;;  %v5651_v10 = vld [vmem:[%s11998_s1 + $0x458] sm:$0xf0]  ;;  %v7623_v32 = vld [vmem:[%s11998_s1 + $0x6cc] sm:$0xf0] }
  0x9e   : > { %1631 = vmatpush.bf16.msra.mxu0 %v5658_v12  ;;  %v1302_v12 = vrot.slane %v1295_v61, 1  ;;  %v5814_v61 = vor.u32 %v7582_v54, %v5811_v55  ;;  %v7566_v40 = vld [vmem:[%s11998_s1 + $0x50c] sm:$0xf]  ;;  %v7657_v54 = vld [vmem:[%s11998_s1 + $0x7e4] sm:$0xf] }
  0x9f   : > { %1645 = vmatpush.bf16.msra.mxu1 %v5786_v16  ;;  %1659 = vmatpush.bf16.msra.mxu2 %v5662_v17  ;;  %v5713_v16 = vld [vmem:[%s11998_s1 + $0x4c8] sm:$0xf]  ;;  %v7560_v17 = vld [vmem:[%s11998_s1 + $0x4d4] sm:$0xf0]  ;;  %v6107_v55 = vld [vmem:[%s11998_s1 + $0x7f0] sm:$0xf0] }
  0xa0   : > { %1673 = vmatpush.bf16.msra.mxu3 %v5790_v21  ;;  %v7558_v21 = vld [vmem:[%s11998_s1 + $0x4cc] sm:$0xf]  ;;  %v9097_v26 = vsel %vm1298_vm0, %v1302_v12, %v1303_v13  ;;  %v5779_v12 = vld [vmem:[%s11998_s1 + $0x558] sm:$0xf0]  ;;  %v6110_v63 = vor.u32 %v7657_v54, %v6107_v55  ;;  %v7641_v54 = vld [vmem:[%s11998_s1 + $0x764] sm:$0xf] }
  0xa1   : > { %v5718_v30 = vor.u32 %v7558_v21, %v5715_v22  ;;  %v7538_v21 = vld [vmem:[%s11998_s1 + $0x42c] sm:$0xf]  ;;  %v5635_v22 = vld [vmem:[%s11998_s1 + $0x438] sm:$0xf0] }
  0xa2   : > { %1632 = vmatpush.bf16.msra.mxu0 %v5642_v28  ;;  %v5714_v28 = vor.u32 %v7560_v17, %v5713_v16  ;;  %v5633_v16 = vld [vmem:[%s11998_s1 + $0x428] sm:$0xf]  ;;  %v7540_v17 = vld [vmem:[%s11998_s1 + $0x434] sm:$0xf0] }
  0xa3   : > { %1646 = vmatpush.bf16.msra.mxu1 %v5770_v29  ;;  %1660 = vmatpush.bf16.msra.mxu2 %v5646_v31  ;;  %v5842_v29 = vor.u32 %v7592_v20, %v5841_v18  ;;  %v5697_v31 = vld [vmem:[%s11998_s1 + $0x4a8] sm:$0xf]  ;;  %v7572_v20 = vld [vmem:[%s11998_s1 + $0x534] sm:$0xf0] }
  0xa4   : > { %1674 = vmatpush.bf16.msra.mxu3 %v5774_v39  ;;  %v5699_v39 = vld [vmem:[%s11998_s1 + $0x4b8] sm:$0xf0]  ;;  %v5698_v42 = vor.u32 %v7556_v33, %v5697_v31  ;;  %v5761_v18 = vld [vmem:[%s11998_s1 + $0x528] sm:$0xf]  ;;  %v5638_v33 = vor.u32 %v7538_v21, %v5635_v22  ;;  %v7615_v21 = vld [vmem:[%s11998_s1 + $0x68c] sm:$0xf0] }
  0xa5   : > { %v5702_v45 = vor.u32 %v7554_v38, %v5699_v39  ;;  %v5762_v31 = vor.u32 %v7572_v20, %v5761_v18  ;;  %v5766_v38 = vor.u32 %v7570_v24, %v5763_v25  ;;  %v5619_v39 = vld [vmem:[%s11998_s1 + $0x418] sm:$0xf0]  ;;  %v6075_v18 = vld [vmem:[%s11998_s1 + $0x7b0] sm:$0xf0]  ;;  %v7647_v25 = vld [vmem:[%s11998_s1 + $0x78c] sm:$0xf0] }
  0xa6   : > { %1633 = vmatpush.bf16.msra.mxu0 %v5626_v47  ;;  %v7552_v47 = vld [vmem:[%s11998_s1 + $0x494] sm:$0xf0] }
  0xa7   : > { %1647 = vmatpush.bf16.msra.mxu1 %v5754_v48  ;;  %1661 = vmatpush.bf16.msra.mxu2 %v5630_v52  ;;  %v5809_v48 = vld [vmem:[%s11998_s1 + $0x588] sm:$0xf]  ;;  %v7550_v52 = vld [vmem:[%s11998_s1 + $0x48c] sm:$0xf]  ;;  %v5682_v57 = vor.u32 %v7552_v47, %v5681_v46  ;;  %v7659_v47 = vld [vmem:[%s11998_s1 + $0x7ec] sm:$0xf0] }
  0xa8   : > { %1675 = vmatpush.bf16.msra.mxu3 %v5758_v27  ;;  %v5810_v58 = vor.u32 %v7584_v50, %v5809_v48  ;;  %v5686_v27 = vor.u32 %v7550_v52, %v5683_v53  ;;  %v7625_v48 = vld [vmem:[%s11998_s1 + $0x6e4] sm:$0xf]  ;;  %v5622_v53 = vor.u32 %v7534_v36, %v5619_v39  ;;  %v6059_v36 = vld [vmem:[%s11998_s1 + $0x790] sm:$0xf0]  ;;  %v5913_v39 = vld [vmem:[%s11998_s1 + $0x660] sm:$0xf] }
  0xaa   : > { %1634 = vmatpush.bf16.msra.mxu0 %v5610_v2  ;;  %v5795_v2 = vld [vmem:[%s11998_s1 + $0x578] sm:$0xf0] }
  0xab   : > { %1648 = vmatpush.bf16.msra.mxu1 %v5738_v51  ;;  %1662 = vmatpush.bf16.msra.mxu2 %v5614_v5  ;;  %v5666_v51 = vor.u32 %v7548_v60, %v5665_v59  ;;  %v7544_v5 = vld [vmem:[%s11998_s1 + $0x454] sm:$0xf0]  ;;  %v5798_v7 = vor.u32 %v7578_v1, %v5795_v2  ;;  %v5961_v60 = vld [vmem:[%s11998_s1 + $0x6c0] sm:$0xf]  ;;  %v7621_v1 = vld [vmem:[%s11998_s1 + $0x6c4] sm:$0xf] }
  0xac   : > { %1676 = vmatpush.bf16.msra.mxu3 %v5742_v6  ;;  %v5777_v6 = vld [vmem:[%s11998_s1 + $0x548] sm:$0xf]  ;;  %v5650_v13 = vor.u32 %v7544_v5, %v5649_v4  ;;  %v5963_v2 = vld [vmem:[%s11998_s1 + $0x6d0] sm:$0xf0]  ;;  %v5962_v4 = vor.u32 %v7623_v32, %v5961_v60 }
  0xad   : > { %1635 = vmatmul.bf16.vlgmr.msra.gmra.mxu0 %v9088_v23 }
  0xae   : > { %1683 = vmatpush.bf16.msrb.mxu0 %v5730_v11  ;;  %1649 = vmatmul.bf16.vlgmr.msra.gmra.mxu1 %v9097_v26  ;;  %v7574_v11 = vld [vmem:[%s11998_s1 + $0x54c] sm:$0xf] }
  0xaf   : > { %1697 = vmatpush.bf16.msrb.mxu1 %v5858_v14  ;;  %1711 = vmatpush.bf16.msrb.mxu2 %v5734_v15  ;;  %v5778_v14 = vor.u32 %v7576_v8, %v5777_v6  ;;  %v5654_v15 = vor.u32 %v7542_v9, %v5651_v10  ;;  %v5945_v9 = vld [vmem:[%s11998_s1 + $0x6a0] sm:$0xf]  ;;  %v7619_v10 = vld [vmem:[%s11998_s1 + $0x6ac] sm:$0xf0] }
  0xb0   : > { %1725 = vmatpush.bf16.msrb.mxu3 %v5862_v19  ;;  %1663 = vmatmul.bf16.vlgmr.msra.gmra.mxu2 %v9088_v23  ;;  %v5782_v19 = vor.u32 %v7574_v11, %v5779_v12  ;;  %v6073_v11 = vld [vmem:[%s11998_s1 + $0x7a0] sm:$0xf]  ;;  %v5946_v20 = vor.u32 %v7619_v10, %v5945_v9 }
  0xb1   : > { %1677 = vmatmul.bf16.vlgmr.msra.gmra.mxu3 %v9097_v26 }
  0xb2   : > { %1684 = vmatpush.bf16.msrb.mxu0 %v5714_v28  ;;  %v5634_v28 = vor.u32 %v7540_v17, %v5633_v16  ;;  %v5947_v16 = vld [vmem:[%s11998_s1 + $0x6b0] sm:$0xf0]  ;;  %v7649_v17 = vld [vmem:[%s11998_s1 + $0x7a4] sm:$0xf] }
  0xb3   : > { %1698 = vmatpush.bf16.msrb.mxu1 %v5842_v29  ;;  %1712 = vmatpush.bf16.msrb.mxu2 %v5718_v30  ;;  %v5617_v29 = vld [vmem:[%s11998_s1 + $0x408] sm:$0xf]  ;;  %v7536_v30 = vld [vmem:[%s11998_s1 + $0x414] sm:$0xf0] }
  0xb4   : > { %1726 = vmatpush.bf16.msrb.mxu3 %v5846_v35  ;;  %v7568_v35 = vld [vmem:[%s11998_s1 + $0x514] sm:$0xf0]  ;;  %v5618_v46 = vor.u32 %v7536_v30, %v5617_v29  ;;  %v6078_v30 = vor.u32 %v7649_v17, %v6075_v18 }
  0xb5   : > { %v5746_v52 = vor.u32 %v7568_v35, %v5745_v34  ;;  %v1748_v34 = vld [vmem:[%s8348_s6 + $0x10] sm:$0x33]  ;;  %v7645_v35 = vld [vmem:[%s11998_s1 + $0x784] sm:$0xf] }
  0xb6   : > { %1685 = vmatpush.bf16.msrb.mxu0 %v5698_v42  ;;  %v5977_v42 = vld [vmem:[%s11998_s1 + $0x6e0] sm:$0xf]  ;;  %v681_v50 = vpop.f32.mrf.mxu0 }
  0xb7   : > { %1699 = vmatpush.bf16.msrb.mxu1 %v5826_v44  ;;  %1713 = vmatpush.bf16.msrb.mxu2 %v5702_v45  ;;  %v7627_v44 = vld [vmem:[%s11998_s1 + $0x6ec] sm:$0xf0]  ;;  %v6105_v45 = vld [vmem:[%s11998_s1 + $0x7e0] sm:$0xf]  ;;  %v695_v62 = vpop.f32.mrf.mxu1 }
  0xb8   : > { %1727 = vmatpush.bf16.msrb.mxu3 %v5830_v49  ;;  %v5979_v49 = vld [vmem:[%s11998_s1 + $0x6f0] sm:$0xf0] }
  0xb9   : > { %v5982_v59 = vor.u32 %v7625_v48, %v5979_v49  ;;  %v6062_v48 = vor.u32 %v7645_v35, %v6059_v36 }
  0xba   : > { %1686 = vmatpush.bf16.msrb.mxu0 %v5682_v57  ;;  %v5750_v57 = vor.u32 %v7566_v40, %v5747_v41 }
  0xbb   : > { %1700 = vmatpush.bf16.msrb.mxu1 %v5810_v58  ;;  %1714 = vmatpush.bf16.msrb.mxu2 %v5686_v27  ;;  %v5978_v58 = vor.u32 %v7627_v44, %v5977_v42  ;;  %v6106_v27 = vor.u32 %v7659_v47, %v6105_v45  ;;  %v709_v5 = vpop.f32.mrf.mxu2  ;;  %v7611_v42 = vld [vmem:[%s11998_s1 + $0x66c] sm:$0xf0]  ;;  %v6041_v44 = vld [vmem:[%s11998_s1 + $0x760] sm:$0xf]  ;;  %v1817_v47 = vunpack.c.l.b16 %v1748_v34 }
  0xbc   : > { %1728 = vmatpush.bf16.msrb.mxu3 %v5814_v61  ;;  %v6089_v61 = vld [vmem:[%s11998_s1 + $0x7c0] sm:$0xf]  ;;  %v723_v8 = vpop.f32.mrf.mxu3  ;;  %v7643_v45 = vld [vmem:[%s11998_s1 + $0x76c] sm:$0xf0]  ;;  %v5914_v60 = vor.u32 %v7611_v42, %v5913_v39 }
  0xbd   : > { %v6090_v6 = vor.u32 %v7655_v0, %v6089_v61  ;;  %v6042_v32 = vor.u32 %v7643_v45, %v6041_v44  ;;  %v6025_v61 = vld [vmem:[%s11998_s1 + $0x740] sm:$0xf] }
  0xbe   : > { %1687 = vmatpush.bf16.msrb.mxu0 %v5666_v51  ;;  %v9289_v51 = vadd.f32 %v695_v62, %v681_v50  ;;  %v7639_v62 = vld [vmem:[%s11998_s1 + $0x74c] sm:$0xf0]  ;;  %v5865_v39 = vld [vmem:[%s11998_s1 + $0x600] sm:$0xf] }
  0xbf   : > { %1701 = vmatpush.bf16.msrb.mxu1 %v5794_v3  ;;  %1715 = vmatpush.bf16.msrb.mxu2 %v5670_v56  ;;  %v7653_v3 = vld [vmem:[%s11998_s1 + $0x7c4] sm:$0xf]  ;;  %v6091_v56 = vld [vmem:[%s11998_s1 + $0x7d0] sm:$0xf0]  ;;  %v9344_v29 = vpop.f32.mrf.mxu1  ;;  %v6026_v17 = vor.u32 %v7639_v62, %v6025_v61 }
  0xc0   : > { %1729 = vmatpush.bf16.msrb.mxu3 %v5798_v7  ;;  %v5966_v7 = vor.u32 %v7621_v1, %v5963_v2  ;;  %v6094_v12 = vor.u32 %v7653_v3, %v6091_v56  ;;  %v5899_v1 = vld [vmem:[%s11998_s1 + $0x650] sm:$0xf0]  ;;  %v7637_v2 = vld [vmem:[%s11998_s1 + $0x744] sm:$0xf] }
  0xc1   : > { %v6027_v3 = vld [vmem:[%s11998_s1 + $0x750] sm:$0xf0] }
  0xc2   : > { %1688 = vmatpush.bf16.msrb.mxu0 %v5650_v13  ;;  %v9307_v13 = vadd.f32 %v723_v8, %v709_v5 }
  0xc3   : > { %1702 = vmatpush.bf16.msrb.mxu1 %v5778_v14  ;;  %1716 = vmatpush.bf16.msrb.mxu2 %v5654_v15  ;;  %v7651_v14 = vld [vmem:[%s11998_s1 + $0x7ac] sm:$0xf0]  ;;  %v7617_v15 = vld [vmem:[%s11998_s1 + $0x6a4] sm:$0xf]  ;;  %v9369_v49 = vpop.f32.mrf.mxu2 }
  0xc4   : > { %1730 = vmatpush.bf16.msrb.mxu3 %v5782_v19  ;;  %v9326_v19 = vpop.f32.mrf.mxu0  ;;  %v6074_v22 = vor.u32 %v7651_v14, %v6073_v11  ;;  %v5950_v24 = vor.u32 %v7617_v15, %v5947_v16  ;;  %v9371_v50 = vpop.f32.mrf.mxu3  ;;  %v5881_v11 = vld [vmem:[%s11998_s1 + $0x620] sm:$0xf]  ;;  %v7635_v15 = vld [vmem:[%s11998_s1 + $0x72c] sm:$0xf0] }
  0xc5   : > { %v6009_v14 = vld [vmem:[%s11998_s1 + $0x720] sm:$0xf] }
  0xc6   : > { %1689 = vmatpush.bf16.msrb.mxu0 %v5634_v28  ;;  %v7613_v28 = vld [vmem:[%s11998_s1 + $0x684] sm:$0xf]  ;;  %v6010_v45 = vor.u32 %v7635_v15, %v6009_v14 }
  0xc7   : > { %1703 = vmatpush.bf16.msrb.mxu1 %v5762_v31  ;;  %1717 = vmatpush.bf16.msrb.mxu2 %v5638_v33  ;;  %v5931_v31 = vld [vmem:[%s11998_s1 + $0x690] sm:$0xf0]  ;;  %v1747_v33 = vld [vmem:[%s8348_s6] sm:$0xcc] }
  0xc8   : > { %1731 = vmatpush.bf16.msrb.mxu3 %v5766_v38  ;;  %v5934_v41 = vor.u32 %v7613_v28, %v5931_v31  ;;  %v1816_v55 = vunpack.c.h.b16 %v1747_v33 }
  0xca   : > { %1690 = vmatpush.bf16.msrb.mxu0 %v5618_v46  ;;  %v1815_v46 = vunpack.c.l.b16 %v1747_v33  ;;  %v1820_v9 = vpack.c.b16 %v9011_v43, %v1816_v55 }
  0xcb   : > { %1704 = vmatpush.bf16.msrb.mxu1 %v5746_v52  ;;  %1718 = vmatpush.bf16.msrb.mxu2 %v5622_v53  ;;  %v7609_v52 = vld [vmem:[%s11998_s1 + $0x664] sm:$0xf]  ;;  %v5915_v53 = vld [vmem:[%s11998_s1 + $0x670] sm:$0xf0] }
  0xcc   : > { %1732 = vmatpush.bf16.msrb.mxu3 %v5750_v57  ;;  %v1818_v57 = vunpack.c.h.b16 %v1748_v34  ;;  %v5918_v0 = vor.u32 %v7609_v52, %v5915_v53  ;;  %v737_v56 = vpop.f32.mrf.mxu0  ;;  %v1819_v5 = vpack.c.b16 %v9003_v37, %v1815_v46  ;;  %v1842_v33 = vshrl.u32 %v1820_v9, 16  ;;  %v7597_v52 = vld [vmem:[%s11998_s1 + $0x604] sm:$0xf]  ;;  %v5867_v53 = vld [vmem:[%s11998_s1 + $0x610] sm:$0xf0] }
  0xcd   : > { %1691 = vmatmul.bf16.vlgmr.msrb.gmra.mxu0 %v9088_v23  ;;  %v1845_v34 = vshll.u32 %v1820_v9, 16  ;;  %v7658_v9 = vld [vmem:[%s11998_s1 + $0x7ec] sm:$0xf] }
  0xce   : > { %2180 = vmatpush.bf16.msra.mxu0 %v5978_v58  ;;  %1705 = vmatmul.bf16.vlgmr.msrb.gmra.mxu1 %v9097_v26  ;;  %v6043_v58 = vld [vmem:[%s11998_s1 + $0x770] sm:$0xf0]  ;;  %v1822_v10 = vpack.c.b16 %v1818_v57, %v1818_v57 }
  0xcf   : > { %2194 = vmatpush.bf16.msra.mxu1 %v6106_v27  ;;  %2208 = vmatpush.bf16.msra.mxu2 %v5982_v59  ;;  %v5897_v27 = vld [vmem:[%s11998_s1 + $0x640] sm:$0xf]  ;;  %v7607_v59 = vld [vmem:[%s11998_s1 + $0x64c] sm:$0xf0] }
  0xd0   : > { %2222 = vmatpush.bf16.msra.mxu3 %v6110_v63  ;;  %1719 = vmatmul.bf16.vlgmr.msrb.gmra.mxu2 %v9088_v23  ;;  %v5929_v23 = vld [vmem:[%s11998_s1 + $0x680] sm:$0xf]  ;;  %v7605_v63 = vld [vmem:[%s11998_s1 + $0x644] sm:$0xf]  ;;  %v5898_v16 = vor.u32 %v7607_v59, %v5897_v27  ;;  %v1850_v35 = vshrl.u32 %v1822_v10, 16  ;;  %v1853_v36 = vshll.u32 %v1822_v10, 16 }
  0xd1   : > { %1733 = vmatmul.bf16.vlgmr.msrb.gmra.mxu3 %v9097_v26  ;;  %v6057_v26 = vld [vmem:[%s11998_s1 + $0x780] sm:$0xf]  ;;  %v5930_v38 = vor.u32 %v7615_v21, %v5929_v23  ;;  %v5902_v18 = vor.u32 %v7605_v63, %v5899_v1  ;;  %v7601_v23 = vld [vmem:[%s11998_s1 + $0x624] sm:$0xf]  ;;  %v5883_v21 = vld [vmem:[%s11998_s1 + $0x630] sm:$0xf0]  ;;  %v765_v31 = vpop.f32.mrf.mxu2 }
  0xd2   : > { %2181 = vmatpush.bf16.msra.mxu0 %v5962_v4  ;;  %v6058_v40 = vor.u32 %v7647_v25, %v6057_v26  ;;  %v751_v4 = vpop.f32.mrf.mxu1  ;;  %v1825_v26 = vshrl.u32 %v1819_v5, 16  ;;  %v1828_v25 = vshll.u32 %v1819_v5, 16  ;;  %v5886_v46 = vor.u32 %v7601_v23, %v5883_v21  ;;  %v5995_v59 = vld [vmem:[%s11998_s1 + $0x710] sm:$0xf0]  ;;  %v5985_v63 = vld [vmem:[%s11998_s1 + $0x6e8] sm:$0xf] }
  0xd3   : > { %2195 = vmatpush.bf16.msra.mxu1 %v6090_v6  ;;  %2209 = vmatpush.bf16.msra.mxu2 %v5966_v7  ;;  %v1821_v6 = vpack.c.b16 %v1817_v47, %v1817_v47  ;;  %v6046_v7 = vor.u32 %v7641_v54, %v6043_v58  ;;  %v9410_v8 = vadd.f32 %v751_v4, %v737_v56  ;;  %v7629_v54 = vld [vmem:[%s11998_s1 + $0x704] sm:$0xf]  ;;  %v1852_v61 = vrot.slane %v1850_v35, 2  ;;  %v6113_v1 = vld [vmem:[%s11998_s1 + $0x7e8] sm:$0xf] }
  0xd4   : > { %2223 = vmatpush.bf16.msra.mxu3 %v6094_v12  ;;  %v7603_v12 = vld [vmem:[%s11998_s1 + $0x62c] sm:$0xf0]  ;;  %v1827_v55 = vrot.slane %v1825_v26, 2  ;;  %v1830_v57 = vrot.slane %v1828_v25, 3  ;;  %v1855_v62 = vrot.slane %v1853_v36, 3  ;;  %v5870_v56 = vor.u32 %v7597_v52, %v5867_v53 }
  0xd5   : > { %v1833_v28 = vshrl.u32 %v1821_v6, 16  ;;  %v5882_v44 = vor.u32 %v7603_v12, %v5881_v11  ;;  %v7660_v4 = vld [vmem:[%s11998_s1 + $0x7f4] sm:$0xf0]  ;;  %v7626_v5 = vld [vmem:[%s11998_s1 + $0x6ec] sm:$0xf] }
  0xd6   : > { %2182 = vmatpush.bf16.msra.mxu0 %v5946_v20  ;;  %v6030_v20 = vor.u32 %v7637_v2, %v6027_v3  ;;  %v6115_v10 = vld [vmem:[%s11998_s1 + $0x7f8] sm:$0xf0]  ;;  %v1831_v11 = vor.u32 %v1830_v57, %v1827_v55  ;;  %v5969_v23 = vld [vmem:[%s11998_s1 + $0x6c8] sm:$0xf]  ;;  %v7624_v21 = vld [vmem:[%s11998_s1 + $0x6d4] sm:$0xf0] }
  0xd7   : > { %2196 = vmatpush.bf16.msra.mxu1 %v6074_v22  ;;  %2210 = vmatpush.bf16.msra.mxu2 %v5950_v24  ;;  %v7633_v22 = vld [vmem:[%s11998_s1 + $0x724] sm:$0xf]  ;;  %v6011_v24 = vld [vmem:[%s11998_s1 + $0x730] sm:$0xf0]  ;;  %v1835_v58 = vrot.slane %v1833_v28, 2  ;;  %v5970_v36 = vor.u32 %v7624_v21, %v5969_v23 }
  0xd8   : > { %2224 = vmatpush.bf16.msra.mxu3 %v6078_v30  ;;  %v1836_v30 = vshll.u32 %v1821_v6, 16  ;;  %v6014_v47 = vor.u32 %v7633_v22, %v6011_v24  ;;  %v5987_v6 = vld [vmem:[%s11998_s1 + $0x6f8] sm:$0xf0]  ;;  %v6097_v22 = vld [vmem:[%s11998_s1 + $0x7c8] sm:$0xf]  ;;  %v6118_v24 = vor.u32 %v7658_v9, %v6115_v10 }
  0xd9   : > { %v7656_v26 = vld [vmem:[%s11998_s1 + $0x7d4] sm:$0xf0]  ;;  %v7622_v25 = vld [vmem:[%s11998_s1 + $0x6cc] sm:$0xf]  ;;  %v5971_v28 = vld [vmem:[%s11998_s1 + $0x6d8] sm:$0xf0]  ;;  %v9549_v55 = vpop.f32.mrf.mxu2 }
  0xda   : > { %2183 = vmatpush.bf16.msra.mxu0 %v5930_v38  ;;  %v779_v38 = vpop.f32.mrf.mxu3  ;;  %v1838_v27 = vrot.slane %v1836_v30, 3  ;;  %v9507_v30 = vpop.f32.mrf.mxu1  ;;  %v7650_v52 = vld [vmem:[%s11998_s1 + $0x7ac] sm:$0xf]  ;;  %v6083_v53 = vld [vmem:[%s11998_s1 + $0x7b8] sm:$0xf0] }
  0xdb   : > { %2197 = vmatpush.bf16.msra.mxu1 %v6058_v40  ;;  %2211 = vmatpush.bf16.msra.mxu2 %v5934_v41  ;;  %v7599_v40 = vld [vmem:[%s11998_s1 + $0x60c] sm:$0xf0]  ;;  %v5993_v41 = vld [vmem:[%s11998_s1 + $0x700] sm:$0xf]  ;;  %v9446_v42 = vadd.f32 %v779_v38, %v765_v31  ;;  %v6098_v38 = vor.u32 %v7656_v26, %v6097_v22  ;;  %v5921_v9 = vld [vmem:[%s11998_s1 + $0x668] sm:$0xf] }
  0xdc   : > { %2225 = vmatpush.bf16.msra.mxu3 %v6062_v48  ;;  %v7631_v48 = vld [vmem:[%s11998_s1 + $0x70c] sm:$0xf0]  ;;  %v5866_v2 = vor.u32 %v7599_v40, %v5865_v39  ;;  %v1839_v12 = vor.u32 %v1838_v27, %v1835_v58  ;;  %v5974_v39 = vor.u32 %v7622_v25, %v5971_v28  ;;  %v5953_v40 = vld [vmem:[%s11998_s1 + $0x6a8] sm:$0xf]  ;;  %v7612_v10 = vld [vmem:[%s11998_s1 + $0x674] sm:$0xf0] }
  0xdd   : > { %v5994_v3 = vor.u32 %v7631_v48, %v5993_v41  ;;  %v7620_v41 = vld [vmem:[%s11998_s1 + $0x6b4] sm:$0xf0]  ;;  %v5955_v48 = vld [vmem:[%s11998_s1 + $0x6b8] sm:$0xf0]  ;;  %v5922_v23 = vor.u32 %v7612_v10, %v5921_v9  ;;  %v6033_v25 = vld [vmem:[%s11998_s1 + $0x748] sm:$0xf] }
  0xde   : > { %2184 = vmatpush.bf16.msra.mxu0 %v5914_v60  ;;  %v1844_v60 = vrot.slane %v1842_v33, 2  ;;  %v9510_v31 = vsel %vm1823_vm1, %v1831_v11, %v1839_v12  ;;  %v7654_v33 = vld [vmem:[%s11998_s1 + $0x7cc] sm:$0xf]  ;;  %v6049_v11 = vld [vmem:[%s11998_s1 + $0x768] sm:$0xf] }
  0xdf   : > { %2198 = vmatpush.bf16.msra.mxu1 %v6042_v32  ;;  %2212 = vmatpush.bf16.msra.mxu2 %v5918_v0  ;;  %v1847_v32 = vrot.slane %v1845_v34, 3  ;;  %v7628_v0 = vld [vmem:[%s11998_s1 + $0x6f4] sm:$0xf0]  ;;  %v6099_v34 = vld [vmem:[%s11998_s1 + $0x7d8] sm:$0xf0] }
  0xe0   : > { %2226 = vmatpush.bf16.msra.mxu3 %v6046_v7  ;;  %v5998_v7 = vor.u32 %v7629_v54, %v5995_v59  ;;  %v5986_v14 = vor.u32 %v7628_v0, %v5985_v63  ;;  %v5954_v54 = vor.u32 %v7620_v41, %v5953_v40  ;;  %v5937_v59 = vld [vmem:[%s11998_s1 + $0x688] sm:$0xf]  ;;  %v7614_v63 = vld [vmem:[%s11998_s1 + $0x68c] sm:$0xf]  ;;  %v5939_v0 = vld [vmem:[%s11998_s1 + $0x698] sm:$0xf0] }
  0xe1   : > { %v1848_v15 = vor.u32 %v1847_v32, %v1844_v60  ;;  %v7616_v60 = vld [vmem:[%s11998_s1 + $0x694] sm:$0xf0]  ;;  %v6065_v32 = vld [vmem:[%s11998_s1 + $0x788] sm:$0xf]  ;;  %v7638_v41 = vld [vmem:[%s11998_s1 + $0x74c] sm:$0xf] }
  0xe2   : > { %2185 = vmatpush.bf16.msra.mxu0 %v5898_v16  ;;  %v1856_v16 = vor.u32 %v1855_v62, %v1852_v61  ;;  %v9551_v27 = vpop.f32.mrf.mxu3  ;;  %v6086_v61 = vor.u32 %v7650_v52, %v6083_v53  ;;  %v7648_v62 = vld [vmem:[%s11998_s1 + $0x794] sm:$0xf0]  ;;  %v6017_v53 = vld [vmem:[%s11998_s1 + $0x728] sm:$0xf]  ;;  %v6233_v9 = vld [vmem:[%s11998_s1 + $0x8e0] sm:$0xf] }
  0xe3   : > { %2199 = vmatpush.bf16.msra.mxu1 %v6026_v17  ;;  %2213 = vmatpush.bf16.msra.mxu2 %v5902_v18  ;;  %v6114_v17 = vor.u32 %v7660_v4, %v6113_v1  ;;  %v5990_v18 = vor.u32 %v7626_v5, %v5987_v6  ;;  %v5938_v4 = vor.u32 %v7616_v60, %v5937_v59  ;;  %v7608_v26 = vld [vmem:[%s11998_s1 + $0x654] sm:$0xf0]  ;;  %v5891_v59 = vld [vmem:[%s11998_s1 + $0x638] sm:$0xf0]  ;;  %v7634_v60 = vld [vmem:[%s11998_s1 + $0x72c] sm:$0xf] }
  0xe4   : > { %2227 = vmatpush.bf16.msra.mxu3 %v6030_v20  ;;  %v9487_v20 = vpop.f32.mrf.mxu0  ;;  %v9519_v35 = vsel %vm1823_vm1, %v1848_v15, %v1856_v16  ;;  %v6066_v6 = vor.u32 %v7648_v62, %v6065_v32  ;;  %v7610_v15 = vld [vmem:[%s11998_s1 + $0x66c] sm:$0xf]  ;;  %v5923_v16 = vld [vmem:[%s11998_s1 + $0x678] sm:$0xf0]  ;;  %v7604_v52 = vld [vmem:[%s11998_s1 + $0x634] sm:$0xf0] }
  0xe5   : > { %v5926_v22 = vor.u32 %v7610_v15, %v5923_v16  ;;  %v6019_v32 = vld [vmem:[%s11998_s1 + $0x738] sm:$0xf0]  ;;  %v5873_v62 = vld [vmem:[%s11998_s1 + $0x608] sm:$0xf]  ;;  %v7691_v10 = vld [vmem:[%s11998_s1 + $0x8ec] sm:$0xf0] }
  0xe6   : > { %2186 = vmatpush.bf16.msra.mxu0 %v5882_v44  ;;  %v6081_v44 = vld [vmem:[%s11998_s1 + $0x7a8] sm:$0xf]  ;;  %v7689_v15 = vld [vmem:[%s11998_s1 + $0x8e4] sm:$0xf]  ;;  %v6235_v16 = vld [vmem:[%s11998_s1 + $0x8f0] sm:$0xf0] }
  0xe7   : > { %2200 = vmatpush.bf16.msra.mxu1 %v6010_v45  ;;  %2214 = vmatpush.bf16.msra.mxu2 %v5886_v46  ;;  %v6102_v45 = vor.u32 %v7654_v33, %v6099_v34  ;;  %v7652_v46 = vld [vmem:[%s11998_s1 + $0x7b4] sm:$0xf0] }
  0xe8   : > { %2228 = vmatpush.bf16.msra.mxu3 %v6014_v47  ;;  %v7618_v47 = vld [vmem:[%s11998_s1 + $0x6ac] sm:$0xf]  ;;  %v6082_v57 = vor.u32 %v7652_v46, %v6081_v44  ;;  %v7640_v34 = vld [vmem:[%s11998_s1 + $0x754] sm:$0xf0]  ;;  %v6035_v44 = vld [vmem:[%s11998_s1 + $0x758] sm:$0xf0] }
  0xe9   : > { %v5958_v58 = vor.u32 %v7618_v47, %v5955_v48  ;;  %v6034_v47 = vor.u32 %v7640_v34, %v6033_v25  ;;  %v6238_v25 = vor.u32 %v7689_v15, %v6235_v16  ;;  %v6345_v34 = vld [vmem:[%s11998_s1 + $0x9c0] sm:$0xf] }
  0xea   : > { %2187 = vmatpush.bf16.msra.mxu0 %v5866_v2  ;;  %v7646_v2 = vld [vmem:[%s11998_s1 + $0x78c] sm:$0xf] }
  0xeb   : > { %2201 = vmatpush.bf16.msra.mxu1 %v5994_v3  ;;  %2215 = vmatpush.bf16.msra.mxu2 %v5870_v56  ;;  %v6067_v3 = vld [vmem:[%s11998_s1 + $0x798] sm:$0xf0] }
  0xec   : > { %2229 = vmatpush.bf16.msra.mxu3 %v5998_v7  ;;  %v1115_v1 = vpop.f32.mrf.mxu0  ;;  %v5942_v7 = vor.u32 %v7614_v63, %v5939_v0  ;;  %v7600_v63 = vld [vmem:[%s11998_s1 + $0x614] sm:$0xf0] }
  0xed   : > { %2188 = vmatmul.bf16.vlgmr.msra.gmra.mxu0 %v9510_v31  ;;  %v1116_v56 = vadd.f32 %v1115_v1, %v9289_v51  ;;  %v1129_v5 = vpop.f32.mrf.mxu1  ;;  %v6070_v51 = vor.u32 %v7646_v2, %v6067_v3  ;;  %v6001_v2 = vld [vmem:[%s11998_s1 + $0x708] sm:$0xf]  ;;  %v7632_v3 = vld [vmem:[%s11998_s1 + $0x714] sm:$0xf0] }
  0xee   : > { %2236 = vmatpush.bf16.msrb.mxu0 %v5986_v14  ;;  %2202 = vmatmul.bf16.vlgmr.msra.gmra.mxu1 %v9519_v35  ;;  %v7644_v14 = vld [vmem:[%s11998_s1 + $0x774] sm:$0xf0] }
  0xef   : > { %2250 = vmatpush.bf16.msrb.mxu1 %v6114_v17  ;;  %2264 = vmatpush.bf16.msrb.mxu2 %v5990_v18  ;;  %v9587_v12 = vadd.f32 %v1129_v5, %v1116_v56  ;;  %v7642_v17 = vld [vmem:[%s11998_s1 + $0x76c] sm:$0xf]  ;;  %v6051_v18 = vld [vmem:[%s11998_s1 + $0x778] sm:$0xf0]  ;;  %v6050_v21 = vor.u32 %v7644_v14, %v6049_v11  ;;  %v6361_v11 = vld [vmem:[%s11998_s1 + $0x9e0] sm:$0xf] }
  0xf0   : > { %2278 = vmatpush.bf16.msrb.mxu3 %v6118_v24  ;;  %2216 = vmatmul.bf16.vlgmr.msra.gmra.mxu2 %v9510_v31  ;;  %v5905_v24 = vld [vmem:[%s11998_s1 + $0x648] sm:$0xf]  ;;  %v6054_v28 = vor.u32 %v7642_v17, %v6051_v18  ;;  %v7598_v56 = vld [vmem:[%s11998_s1 + $0x60c] sm:$0xf]  ;;  %v5875_v5 = vld [vmem:[%s11998_s1 + $0x618] sm:$0xf0]  ;;  %v6002_v17 = vor.u32 %v7632_v3, %v6001_v2 }
  0xf1   : > { %2230 = vmatmul.bf16.vlgmr.msra.gmra.mxu3 %v9519_v35  ;;  %v1143_v33 = vpop.f32.mrf.mxu2  ;;  %v7723_v14 = vld [vmem:[%s11998_s1 + $0x9ec] sm:$0xf0]  ;;  %v5878_v18 = vor.u32 %v7598_v56, %v5875_v5  ;;  %v6313_v3 = vld [vmem:[%s11998_s1 + $0x980] sm:$0xf]  ;;  %v7677_v5 = vld [vmem:[%s11998_s1 + $0x884] sm:$0xf] }
  0xf2   : > { %2237 = vmatpush.bf16.msrb.mxu0 %v5970_v36  ;;  %v7606_v36 = vld [vmem:[%s11998_s1 + $0x64c] sm:$0xf]  ;;  %v7679_v2 = vld [vmem:[%s11998_s1 + $0x88c] sm:$0xf0] }
  0xf3   : > { %2251 = vmatpush.bf16.msrb.mxu1 %v6098_v38  ;;  %2265 = vmatpush.bf16.msrb.mxu2 %v5974_v39  ;;  %v5907_v38 = vld [vmem:[%s11998_s1 + $0x658] sm:$0xf0]  ;;  %v1144_v39 = vadd.f32 %v1143_v33, %v9307_v13  ;;  %v5889_v13 = vld [vmem:[%s11998_s1 + $0x628] sm:$0xf]  ;;  %v7687_v33 = vld [vmem:[%s11998_s1 + $0x8cc] sm:$0xf0] }
  0xf4   : > { %2279 = vmatpush.bf16.msrb.mxu3 %v6102_v45  ;;  %v1157_v40 = vpop.f32.mrf.mxu3  ;;  %v5906_v45 = vor.u32 %v7608_v26, %v5905_v24  ;;  %v5910_v48 = vor.u32 %v7606_v36, %v5907_v38  ;;  %v6234_v24 = vor.u32 %v7691_v10, %v6233_v9  ;;  %v6362_v26 = vor.u32 %v7723_v14, %v6361_v11  ;;  %v7719_v38 = vld [vmem:[%s11998_s1 + $0x9cc] sm:$0xf0]  ;;  %v7709_v10 = vld [vmem:[%s11998_s1 + $0x984] sm:$0xf]  ;;  %v6315_v11 = vld [vmem:[%s11998_s1 + $0x990] sm:$0xf0] }
  0xf5   : > { %v9629_v46 = vadd.f32 %v1157_v40, %v1144_v39  ;;  %v7685_v39 = vld [vmem:[%s11998_s1 + $0x8c4] sm:$0xf]  ;;  %v6219_v40 = vld [vmem:[%s11998_s1 + $0x8d0] sm:$0xf0] }
  0xf6   : > { %2238 = vmatpush.bf16.msrb.mxu0 %v5954_v54  ;;  %v6038_v54 = vor.u32 %v7638_v41, %v6035_v44  ;;  %v9721_v41 = vpop.f32.mrf.mxu0  ;;  %v7717_v44 = vld [vmem:[%s11998_s1 + $0x9c4] sm:$0xf] }
  0xf7   : > { %2252 = vmatpush.bf16.msrb.mxu1 %v6082_v57  ;;  %2266 = vmatpush.bf16.msrb.mxu2 %v5958_v58  ;;  %v7636_v57 = vld [vmem:[%s11998_s1 + $0x734] sm:$0xf0]  ;;  %v7602_v58 = vld [vmem:[%s11998_s1 + $0x62c] sm:$0xf] }
  0xf8   : > { %2280 = vmatpush.bf16.msrb.mxu3 %v6086_v61  ;;  %v5890_v61 = vor.u32 %v7604_v52, %v5889_v13  ;;  %v6018_v0 = vor.u32 %v7636_v57, %v6017_v53  ;;  %v5894_v1 = vor.u32 %v7602_v58, %v5891_v59  ;;  %v6346_v13 = vor.u32 %v7719_v38, %v6345_v34  ;;  %v6201_v53 = vld [vmem:[%s11998_s1 + $0x8a0] sm:$0xf]  ;;  %v7715_v59 = vld [vmem:[%s11998_s1 + $0x9ac] sm:$0xf0] }
  0xf9   : > { %v6222_v52 = vor.u32 %v7685_v39, %v6219_v40  ;;  %v6329_v57 = vld [vmem:[%s11998_s1 + $0x9a0] sm:$0xf]  ;;  %v9768_v56 = vpop.f32.mrf.mxu2  ;;  %v7671_v38 = vld [vmem:[%s11998_s1 + $0x84c] sm:$0xf0] }
  0xfa   : > { %2239 = vmatpush.bf16.msrb.mxu0 %v5938_v4  ;;  %v6022_v4 = vor.u32 %v7634_v60, %v6019_v32  ;;  %v7681_v60 = vld [vmem:[%s11998_s1 + $0x8a4] sm:$0xf]  ;;  %v6203_v32 = vld [vmem:[%s11998_s1 + $0x8b0] sm:$0xf0] }
  0xfb   : > { %2253 = vmatpush.bf16.msrb.mxu1 %v6066_v6  ;;  %2267 = vmatpush.bf16.msrb.mxu2 %v5942_v7  ;;  %v7630_v6 = vld [vmem:[%s11998_s1 + $0x70c] sm:$0xf]  ;;  %v6003_v7 = vld [vmem:[%s11998_s1 + $0x718] sm:$0xf0] }
  0xfc   : > { %2281 = vmatpush.bf16.msrb.mxu3 %v6070_v51  ;;  %v5874_v51 = vor.u32 %v7600_v63, %v5873_v62  ;;  %v6331_v62 = vld [vmem:[%s11998_s1 + $0x9b0] sm:$0xf0] }
  0xfe   : > { %2240 = vmatpush.bf16.msrb.mxu0 %v5922_v23  ;;  %v7721_v23 = vld [vmem:[%s11998_s1 + $0x9e4] sm:$0xf] }
  0xff   : > { %2254 = vmatpush.bf16.msrb.mxu1 %v6050_v21  ;;  %2268 = vmatpush.bf16.msrb.mxu2 %v5926_v22  ;;  %v6363_v21 = vld [vmem:[%s11998_s1 + $0x9f0] sm:$0xf0]  ;;  %v6006_v22 = vor.u32 %v7630_v6, %v6003_v7  ;;  %v9779_v7 = vpop.f32.mrf.mxu3 }
 0x100   : > { %2282 = vmatpush.bf16.msrb.mxu3 %v6054_v28  ;;  %v6217_v28 = vld [vmem:[%s11998_s1 + $0x8c0] sm:$0xf]  ;;  %v6366_v36 = vor.u32 %v7721_v23, %v6363_v21  ;;  %v6187_v6 = vld [vmem:[%s11998_s1 + $0x890] sm:$0xf0]  ;;  %v7675_v23 = vld [vmem:[%s11998_s1 + $0x86c] sm:$0xf0] }
 0x101   : > { %v6297_v21 = vld [vmem:[%s11998_s1 + $0x960] sm:$0xf] }
 0x102   : > { %2241 = vmatpush.bf16.msrb.mxu0 %v5906_v45  ;;  %v6347_v45 = vld [vmem:[%s11998_s1 + $0x9d0] sm:$0xf0] }
 0x103   : > { %2255 = vmatpush.bf16.msrb.mxu1 %v6034_v47  ;;  %2269 = vmatpush.bf16.msrb.mxu2 %v5910_v48  ;;  %v9729_v47 = vpop.f32.mrf.mxu1  ;;  %v6218_v48 = vor.u32 %v7687_v33, %v6217_v28  ;;  %v6350_v58 = vor.u32 %v7717_v44, %v6347_v45  ;;  %v7705_v28 = vld [vmem:[%s11998_s1 + $0x964] sm:$0xf]  ;;  %v6299_v33 = vld [vmem:[%s11998_s1 + $0x970] sm:$0xf0]  ;;  %v6281_v44 = vld [vmem:[%s11998_s1 + $0x940] sm:$0xf] }
 0x104   : > { %2283 = vmatpush.bf16.msrb.mxu3 %v6038_v54  ;;  %v7683_v54 = vld [vmem:[%s11998_s1 + $0x8ac] sm:$0xf0] }
 0x105   : > { %v6202_v63 = vor.u32 %v7683_v54, %v6201_v53  ;;  %v7703_v45 = vld [vmem:[%s11998_s1 + $0x94c] sm:$0xf0]  ;;  %v6155_v53 = vld [vmem:[%s11998_s1 + $0x850] sm:$0xf0]  ;;  %v2300_v54 = vld [vmem:[%s8348_s6] sm:$0x88] }
 0x106   : > { %2242 = vmatpush.bf16.msrb.mxu0 %v5890_v61  ;;  %v7713_v61 = vld [vmem:[%s11998_s1 + $0x9a4] sm:$0xf] }
 0x107   : > { %2256 = vmatpush.bf16.msrb.mxu1 %v6018_v0  ;;  %2270 = vmatpush.bf16.msrb.mxu2 %v5894_v1  ;;  %v6330_v0 = vor.u32 %v7715_v59, %v6329_v57  ;;  %v6206_v1 = vor.u32 %v7681_v60, %v6203_v32  ;;  %v2301_v57 = vld [vmem:[%s8348_s6 + $0x10] sm:$0x77]  ;;  %v7701_v60 = vld [vmem:[%s11998_s1 + $0x944] sm:$0xf] }
 0x108   : > { %2284 = vmatpush.bf16.msrb.mxu3 %v6022_v4  ;;  %v7711_v4 = vld [vmem:[%s11998_s1 + $0x98c] sm:$0xf0]  ;;  %v6283_v32 = vld [vmem:[%s11998_s1 + $0x950] sm:$0xf0] }
 0x109   : > { %v6314_v16 = vor.u32 %v7711_v4, %v6313_v3  ;;  %v2368_v3 = vunpack.c.l.b16 %v2300_v54  ;;  %v6286_v4 = vor.u32 %v7701_v60, %v6283_v32 }
 0x10a   : > { %2243 = vmatpush.bf16.msrb.mxu0 %v5874_v51  ;;  %v1171_v9 = vpop.f32.mrf.mxu0 }
 0x10b   : > { %2257 = vmatpush.bf16.msrb.mxu1 %v6002_v17  ;;  %2271 = vmatpush.bf16.msrb.mxu2 %v5878_v18  ;;  %v1172_v51 = vadd.f32 %v1171_v9, %v9410_v8  ;;  %v6190_v17 = vor.u32 %v7677_v5, %v6187_v6  ;;  %v6169_v18 = vld [vmem:[%s11998_s1 + $0x860] sm:$0xf]  ;;  %v6318_v8 = vor.u32 %v7709_v10, %v6315_v11  ;;  %v7665_v5 = vld [vmem:[%s11998_s1 + $0x824] sm:$0xf]  ;;  %v6139_v6 = vld [vmem:[%s11998_s1 + $0x830] sm:$0xf0]  ;;  %v2369_v9 = vunpack.c.h.b16 %v2300_v54 }
 0x10c   : > { %2285 = vmatpush.bf16.msrb.mxu3 %v6006_v22  ;;  %v6170_v34 = vor.u32 %v7675_v23, %v6169_v18  ;;  %v2371_v10 = vunpack.c.h.b16 %v2301_v57  ;;  %v7697_v11 = vld [vmem:[%s11998_s1 + $0x924] sm:$0xf]  ;;  %v6142_v18 = vor.u32 %v7665_v5, %v6139_v6  ;;  %v6249_v23 = vld [vmem:[%s11998_s1 + $0x900] sm:$0xf]  ;;  %v7722_v54 = vld [vmem:[%s11998_s1 + $0x9ec] sm:$0xf] }
 0x10d   : > { %2244 = vmatmul.bf16.vlgmr.msrb.gmra.mxu0 %v9510_v31  ;;  %v1185_v15 = vpop.f32.mrf.mxu1 }
 0x10e   : > { %2705 = vmatpush.bf16.msra.mxu0 %v6234_v24  ;;  %2258 = vmatmul.bf16.vlgmr.msrb.gmra.mxu1 %v9519_v35  ;;  %v9797_v22 = vadd.f32 %v1185_v15, %v1172_v51  ;;  %v7707_v24 = vld [vmem:[%s11998_s1 + $0x96c] sm:$0xf0]  ;;  %v6267_v51 = vld [vmem:[%s11998_s1 + $0x930] sm:$0xf0] }
 0x10f   : > { %2719 = vmatpush.bf16.msra.mxu1 %v6362_v26  ;;  %2733 = vmatpush.bf16.msra.mxu2 %v6238_v25  ;;  %v7673_v26 = vld [vmem:[%s11998_s1 + $0x864] sm:$0xf]  ;;  %v6171_v25 = vld [vmem:[%s11998_s1 + $0x870] sm:$0xf0]  ;;  %v6298_v39 = vor.u32 %v7707_v24, %v6297_v21  ;;  %v7695_v21 = vld [vmem:[%s11998_s1 + $0x90c] sm:$0xf0]  ;;  %v9883_v24 = vpack.c.b16 %v9003_v37, %v2368_v3  ;;  %v9899_v37 = vpack.c.b16 %v2371_v10, %v2371_v10 }
 0x110   : > { %2747 = vmatpush.bf16.msra.mxu3 %v6366_v36  ;;  %2272 = vmatmul.bf16.vlgmr.msrb.gmra.mxu2 %v9510_v31  ;;  %v6185_v31 = vld [vmem:[%s11998_s1 + $0x880] sm:$0xf]  ;;  %v6174_v40 = vor.u32 %v7673_v26, %v6171_v25  ;;  %v6270_v25 = vor.u32 %v7697_v11, %v6267_v51  ;;  %v7720_v3 = vld [vmem:[%s11998_s1 + $0x9d4] sm:$0xf0]  ;;  %v6355_v10 = vld [vmem:[%s11998_s1 + $0x9d8] sm:$0xf0] }
 0x111   : > { %2286 = vmatmul.bf16.vlgmr.msrb.gmra.mxu3 %v9519_v35  ;;  %v6334_v35 = vor.u32 %v7713_v61, %v6331_v62  ;;  %v6186_v14 = vor.u32 %v7679_v2, %v6185_v31  ;;  %v6153_v36 = vld [vmem:[%s11998_s1 + $0x840] sm:$0xf]  ;;  %v6282_v62 = vor.u32 %v7703_v45, %v6281_v44  ;;  %v7699_v2 = vld [vmem:[%s11998_s1 + $0x92c] sm:$0xf0]  ;;  %v6250_v45 = vor.u32 %v7695_v21, %v6249_v23  ;;  %v6337_v23 = vld [vmem:[%s11998_s1 + $0x9a8] sm:$0xf] }
 0x112   : > { %2706 = vmatpush.bf16.msra.mxu0 %v6218_v48  ;;  %v7669_v48 = vld [vmem:[%s11998_s1 + $0x844] sm:$0xf]  ;;  %v6154_v61 = vor.u32 %v7671_v38, %v6153_v36  ;;  %v6265_v31 = vld [vmem:[%s11998_s1 + $0x920] sm:$0xf]  ;;  %v9897_v36 = vpack.c.b16 %v9011_v43, %v2369_v9  ;;  %v6241_v38 = vld [vmem:[%s11998_s1 + $0x8e8] sm:$0xf]  ;;  %v9947_v5 = vpop.f32.mrf.mxu0 }
 0x113   : > { %2720 = vmatpush.bf16.msra.mxu1 %v6346_v13  ;;  %2734 = vmatpush.bf16.msra.mxu2 %v6222_v52  ;;  %v6302_v13 = vor.u32 %v7705_v28, %v6299_v33  ;;  %v1199_v52 = vpop.f32.mrf.mxu2  ;;  %v6266_v15 = vor.u32 %v7699_v2, %v6265_v31  ;;  %v6123_v28 = vld [vmem:[%s11998_s1 + $0x810] sm:$0xf0]  ;;  %v7693_v33 = vld [vmem:[%s11998_s1 + $0x904] sm:$0xf]  ;;  %v7724_v43 = vld [vmem:[%s11998_s1 + $0x9f4] sm:$0xf0] }
 0x114   : > { %2748 = vmatpush.bf16.msra.mxu3 %v6350_v58  ;;  %v1200_v58 = vadd.f32 %v1199_v52, %v9446_v42  ;;  %v1213_v59 = vpop.f32.mrf.mxu3  ;;  %v6158_v42 = vor.u32 %v7669_v48, %v6155_v53  ;;  %v7690_v48 = vld [vmem:[%s11998_s1 + $0x8ec] sm:$0xf]  ;;  %v2380_v32 = vrot.slane %v9897_v36, 3  ;;  %v6353_v31 = vld [vmem:[%s11998_s1 + $0x9c8] sm:$0xf] }
 0x115   : > { %v7718_v9 = vld [vmem:[%s11998_s1 + $0x9cc] sm:$0xf]  ;;  %v9958_v11 = vpop.f32.mrf.mxu1 }
 0x116   : > { %2707 = vmatpush.bf16.msra.mxu0 %v6202_v63  ;;  %v6137_v63 = vld [vmem:[%s11998_s1 + $0x820] sm:$0xf]  ;;  %v6358_v21 = vor.u32 %v7718_v9, %v6355_v10  ;;  %v6179_v9 = vld [vmem:[%s11998_s1 + $0x878] sm:$0xf0] }
 0x117   : > { %2721 = vmatpush.bf16.msra.mxu1 %v6330_v0  ;;  %2735 = vmatpush.bf16.msra.mxu2 %v6206_v1  ;;  %v9844_v0 = vadd.f32 %v1213_v59, %v1200_v58  ;;  %v7667_v1 = vld [vmem:[%s11998_s1 + $0x82c] sm:$0xf0]  ;;  %v2377_v58 = vrot.slane %v9883_v24, 3 }
 0x118   : > { %2749 = vmatpush.bf16.msra.mxu3 %v6334_v35  ;;  %v2370_v35 = vunpack.c.l.b16 %v2301_v57  ;;  %v6371_v57 = vld [vmem:[%s11998_s1 + $0x9f8] sm:$0xf0] }
 0x119   : > { %v6374_v2 = vor.u32 %v7722_v54, %v6371_v57  ;;  %v6195_v54 = vld [vmem:[%s11998_s1 + $0x898] sm:$0xf0] }
 0x11a   : > { %2708 = vmatpush.bf16.msra.mxu0 %v6186_v14  ;;  %v6138_v14 = vor.u32 %v7667_v1, %v6137_v63  ;;  %v9885_v26 = vpack.c.b16 %v2370_v35, %v2370_v35  ;;  %v7688_v1 = vld [vmem:[%s11998_s1 + $0x8d4] sm:$0xf0]  ;;  %v7686_v35 = vld [vmem:[%s11998_s1 + $0x8cc] sm:$0xf] }
 0x11b   : > { %2722 = vmatpush.bf16.msra.mxu1 %v6314_v16  ;;  %2736 = vmatpush.bf16.msra.mxu2 %v6190_v17  ;;  %v6121_v16 = vld [vmem:[%s11998_s1 + $0x800] sm:$0xf]  ;;  %v7663_v17 = vld [vmem:[%s11998_s1 + $0x80c] sm:$0xf0] }
 0x11c   : > { %2750 = vmatpush.bf16.msra.mxu3 %v6318_v8  ;;  %v7661_v8 = vld [vmem:[%s11998_s1 + $0x804] sm:$0xf]  ;;  %v6122_v44 = vor.u32 %v7663_v17, %v6121_v16  ;;  %v2378_v59 = vrot.slane %v9885_v26, 3  ;;  %v6209_v17 = vld [vmem:[%s11998_s1 + $0x8a8] sm:$0xf]  ;;  %v10011_v57 = vpop.f32.mrf.mxu3 }
 0x11d   : > { %v6126_v52 = vor.u32 %v7661_v8, %v6123_v28  ;;  %v7716_v8 = vld [vmem:[%s11998_s1 + $0x9b4] sm:$0xf0]  ;;  %v6211_v28 = vld [vmem:[%s11998_s1 + $0x8b8] sm:$0xf0] }
 0x11e   : > { %2709 = vmatpush.bf16.msra.mxu0 %v6170_v34  ;;  %v6251_v34 = vld [vmem:[%s11998_s1 + $0x910] sm:$0xf0]  ;;  %v9950_v6 = vsel %vm2376_vm2, %v2377_v58, %v2378_v59  ;;  %v7710_v59 = vld [vmem:[%s11998_s1 + $0x98c] sm:$0xf] }
 0x11f   : > { %2723 = vmatpush.bf16.msra.mxu1 %v6298_v39  ;;  %2737 = vmatpush.bf16.msra.mxu2 %v6174_v40  ;;  %v7692_v39 = vld [vmem:[%s11998_s1 + $0x8f4] sm:$0xf0]  ;;  %v6369_v40 = vld [vmem:[%s11998_s1 + $0x9e8] sm:$0xf]  ;;  %v6254_v53 = vor.u32 %v7693_v33, %v6251_v34  ;;  %v7714_v33 = vld [vmem:[%s11998_s1 + $0x9ac] sm:$0xf] }
 0x120   : > { %2751 = vmatpush.bf16.msra.mxu3 %v6302_v13  ;;  %v6243_v13 = vld [vmem:[%s11998_s1 + $0x8f8] sm:$0xf0]  ;;  %v6242_v60 = vor.u32 %v7692_v39, %v6241_v38  ;;  %v6338_v39 = vor.u32 %v7716_v8, %v6337_v23  ;;  %v6161_v23 = vld [vmem:[%s11998_s1 + $0x848] sm:$0xf] }
 0x121   : > { %v6246_v63 = vor.u32 %v7690_v48, %v6243_v13  ;;  %v6339_v34 = vld [vmem:[%s11998_s1 + $0x9b8] sm:$0xf0]  ;;  %v10000_v48 = vpop.f32.mrf.mxu2 }
 0x122   : > { %2710 = vmatpush.bf16.msra.mxu0 %v6154_v61  ;;  %v2381_v61 = vrot.slane %v9899_v37, 3  ;;  %v6342_v13 = vor.u32 %v7714_v33, %v6339_v34  ;;  %v7670_v33 = vld [vmem:[%s11998_s1 + $0x84c] sm:$0xf]  ;;  %v6163_v34 = vld [vmem:[%s11998_s1 + $0x858] sm:$0xf0] }
 0x123   : > { %2724 = vmatpush.bf16.msra.mxu1 %v6282_v62  ;;  %2738 = vmatpush.bf16.msra.mxu2 %v6158_v42  ;;  %v6370_v62 = vor.u32 %v7724_v43, %v6369_v40  ;;  %v6225_v42 = vld [vmem:[%s11998_s1 + $0x8c8] sm:$0xf] }
 0x124   : > { %2752 = vmatpush.bf16.msra.mxu3 %v6286_v4  ;;  %v6227_v4 = vld [vmem:[%s11998_s1 + $0x8d8] sm:$0xf0]  ;;  %v9961_v51 = vsel %vm2376_vm2, %v2380_v32, %v2381_v61  ;;  %v6321_v43 = vld [vmem:[%s11998_s1 + $0x988] sm:$0xf] }
 0x125   : > { %v6230_v16 = vor.u32 %v7686_v35, %v6227_v4  ;;  %v7708_v35 = vld [vmem:[%s11998_s1 + $0x974] sm:$0xf0]  ;;  %v7674_v4 = vld [vmem:[%s11998_s1 + $0x86c] sm:$0xf] }
 0x126   : > { %2711 = vmatpush.bf16.msra.mxu0 %v6138_v14  ;;  %v6226_v14 = vor.u32 %v7688_v1, %v6225_v42  ;;  %v6177_v1 = vld [vmem:[%s11998_s1 + $0x868] sm:$0xf] }
 0x127   : > { %2725 = vmatpush.bf16.msra.mxu1 %v6266_v15  ;;  %2739 = vmatpush.bf16.msra.mxu2 %v6142_v18  ;;  %v6354_v15 = vor.u32 %v7720_v3, %v6353_v31  ;;  %v7684_v18 = vld [vmem:[%s11998_s1 + $0x8b4] sm:$0xf0] }
 0x128   : > { %2753 = vmatpush.bf16.msra.mxu3 %v6270_v25  ;;  %v7682_v25 = vld [vmem:[%s11998_s1 + $0x8ac] sm:$0xf]  ;;  %v6210_v38 = vor.u32 %v7684_v18, %v6209_v17  ;;  %v7676_v31 = vld [vmem:[%s11998_s1 + $0x874] sm:$0xf0]  ;;  %v6182_v18 = vor.u32 %v7674_v4, %v6179_v9 }
 0x129   : > { %v6214_v40 = vor.u32 %v7682_v25, %v6211_v28  ;;  %v7704_v28 = vld [vmem:[%s11998_s1 + $0x954] sm:$0xf0]  ;;  %v7662_v4 = vld [vmem:[%s11998_s1 + $0x80c] sm:$0xf] }
 0x12a   : > { %2712 = vmatpush.bf16.msra.mxu0 %v6122_v44  ;;  %v6193_v44 = vld [vmem:[%s11998_s1 + $0x888] sm:$0xf]  ;;  %v1636_v58 = vpop.f32.mrf.mxu0 }
 0x12b   : > { %2726 = vmatpush.bf16.msra.mxu1 %v6250_v45  ;;  %2740 = vmatpush.bf16.msra.mxu2 %v6126_v52  ;;  %v7680_v45 = vld [vmem:[%s11998_s1 + $0x894] sm:$0xf0]  ;;  %v1650_v32 = vpop.f32.mrf.mxu1 }
 0x12c   : > { %2754 = vmatpush.bf16.msra.mxu3 %v6254_v53  ;;  %v7712_v52 = vld [vmem:[%s11998_s1 + $0x994] sm:$0xf0]  ;;  %v7678_v53 = vld [vmem:[%s11998_s1 + $0x88c] sm:$0xf]  ;;  %v6194_v61 = vor.u32 %v7680_v45, %v6193_v44 }
 0x12d   : > { %2713 = vmatmul.bf16.vlgmr.msra.gmra.mxu0 %v9950_v6  ;;  %v6198_v42 = vor.u32 %v7678_v53, %v6195_v54  ;;  %v7668_v53 = vld [vmem:[%s11998_s1 + $0x834] sm:$0xf0]  ;;  %v6273_v54 = vld [vmem:[%s11998_s1 + $0x928] sm:$0xf] }
 0x12e   : > { %2761 = vmatpush.bf16.msrb.mxu0 %v6242_v60  ;;  %2727 = vmatmul.bf16.vlgmr.msra.gmra.mxu1 %v9961_v51  ;;  %v6323_v60 = vld [vmem:[%s11998_s1 + $0x998] sm:$0xf0] }
 0x12f   : > { %2775 = vmatpush.bf16.msrb.mxu1 %v6370_v62  ;;  %2789 = vmatpush.bf16.msrb.mxu2 %v6246_v63  ;;  %v1651_v62 = vadd.f32 %v1650_v32, %v1636_v58  ;;  %v6322_v63 = vor.u32 %v7712_v52, %v6321_v43  ;;  %v6326_v3 = vor.u32 %v7710_v59, %v6323_v60  ;;  %v6145_v52 = vld [vmem:[%s11998_s1 + $0x828] sm:$0xf]  ;;  %v7700_v60 = vld [vmem:[%s11998_s1 + $0x934] sm:$0xf0]  ;;  %v7666_v32 = vld [vmem:[%s11998_s1 + $0x82c] sm:$0xf] }
 0x130   : > { %2803 = vmatpush.bf16.msrb.mxu3 %v6374_v2  ;;  %2741 = vmatmul.bf16.vlgmr.msra.gmra.mxu2 %v9950_v6  ;;  %v6305_v2 = vld [vmem:[%s11998_s1 + $0x968] sm:$0xf] }
 0x131   : > { %2755 = vmatmul.bf16.vlgmr.msra.gmra.mxu3 %v9961_v51  ;;  %v10038_v10 = vadd.f32 %v1651_v62, %v9587_v12  ;;  %v6306_v17 = vor.u32 %v7708_v35, %v6305_v2  ;;  %v7672_v12 = vld [vmem:[%s11998_s1 + $0x854] sm:$0xf0]  ;;  %v7698_v62 = vld [vmem:[%s11998_s1 + $0x92c] sm:$0xf] }
 0x132   : > { %2762 = vmatpush.bf16.msrb.mxu0 %v6226_v14  ;;  %v7706_v14 = vld [vmem:[%s11998_s1 + $0x96c] sm:$0xf]  ;;  %v6162_v45 = vor.u32 %v7672_v12, %v6161_v23  ;;  %v7696_v35 = vld [vmem:[%s11998_s1 + $0x914] sm:$0xf0]  ;;  %v6617_v23 = vld [vmem:[%s11998_s1 + $0xbe0] sm:$0xf] }
 0x133   : > { %2776 = vmatpush.bf16.msrb.mxu1 %v6354_v15  ;;  %2790 = vmatpush.bf16.msrb.mxu2 %v6230_v16  ;;  %v6307_v15 = vld [vmem:[%s11998_s1 + $0x978] sm:$0xf0]  ;;  %v6178_v16 = vor.u32 %v7676_v31, %v6177_v1  ;;  %v1664_v25 = vpop.f32.mrf.mxu2  ;;  %v7664_v1 = vld [vmem:[%s11998_s1 + $0x814] sm:$0xf0]  ;;  %v6274_v31 = vor.u32 %v7700_v60, %v6273_v54  ;;  %v7783_v54 = vld [vmem:[%s11998_s1 + $0xbcc] sm:$0xf0] }
 0x134   : > { %2804 = vmatpush.bf16.msrb.mxu3 %v6358_v21  ;;  %v6289_v21 = vld [vmem:[%s11998_s1 + $0x948] sm:$0xf]  ;;  %v6310_v8 = vor.u32 %v7706_v14, %v6307_v15  ;;  %v6131_v14 = vld [vmem:[%s11998_s1 + $0x818] sm:$0xf0]  ;;  %v7694_v15 = vld [vmem:[%s11998_s1 + $0x90c] sm:$0xf] }
 0x135   : > { %v6290_v43 = vor.u32 %v7704_v28, %v6289_v21  ;;  %v7787_v21 = vld [vmem:[%s11998_s1 + $0xbec] sm:$0xf0]  ;;  %v6475_v60 = vld [vmem:[%s11998_s1 + $0xad0] sm:$0xf0] }
 0x136   : > { %2763 = vmatpush.bf16.msrb.mxu0 %v6210_v38  ;;  %v1678_v38 = vpop.f32.mrf.mxu3 }
 0x137   : > { %2777 = vmatpush.bf16.msrb.mxu1 %v6338_v39  ;;  %2791 = vmatpush.bf16.msrb.mxu2 %v6214_v40  ;;  %v7702_v39 = vld [vmem:[%s11998_s1 + $0x94c] sm:$0xf]  ;;  %v6291_v40 = vld [vmem:[%s11998_s1 + $0x958] sm:$0xf0]  ;;  %v1679_v44 = vadd.f32 %v1678_v38, %v1664_v25  ;;  %v6491_v25 = vld [vmem:[%s11998_s1 + $0xaf0] sm:$0xf0] }
 0x138   : > { %2805 = vmatpush.bf16.msrb.mxu3 %v6342_v13  ;;  %v6166_v13 = vor.u32 %v7670_v33, %v6163_v34  ;;  %v6294_v59 = vor.u32 %v7702_v39, %v6291_v40  ;;  %v6134_v33 = vor.u32 %v7662_v4, %v6131_v14  ;;  %v7785_v34 = vld [vmem:[%s11998_s1 + $0xbe4] sm:$0xf]  ;;  %v6619_v38 = vld [vmem:[%s11998_s1 + $0xbf0] sm:$0xf0]  ;;  %v7779_v4 = vld [vmem:[%s11998_s1 + $0xbac] sm:$0xf0] }
 0x139   : > { %v10080_v58 = vadd.f32 %v1679_v44, %v9629_v46  ;;  %v6275_v46 = vld [vmem:[%s11998_s1 + $0x938] sm:$0xf0]  ;;  %v6618_v44 = vor.u32 %v7787_v21, %v6617_v23  ;;  %v6459_v14 = vld [vmem:[%s11998_s1 + $0xab0] sm:$0xf0]  ;;  %v6569_v21 = vld [vmem:[%s11998_s1 + $0xb80] sm:$0xf] }
 0x13a   : > { %2764 = vmatpush.bf16.msrb.mxu0 %v6194_v61  ;;  %v6147_v61 = vld [vmem:[%s11998_s1 + $0x838] sm:$0xf0]  ;;  %v6278_v9 = vor.u32 %v7698_v62, %v6275_v46  ;;  %v6603_v62 = vld [vmem:[%s11998_s1 + $0xbd0] sm:$0xf0]  ;;  %v10171_v46 = vpop.f32.mrf.mxu1 }
 0x13b   : > { %2778 = vmatpush.bf16.msrb.mxu1 %v6322_v63  ;;  %2792 = vmatpush.bf16.msrb.mxu2 %v6198_v42  ;;  %v6146_v63 = vor.u32 %v7668_v53, %v6145_v52  ;;  %v6129_v42 = vld [vmem:[%s11998_s1 + $0x808] sm:$0xf]  ;;  %v6150_v2 = vor.u32 %v7666_v32, %v6147_v61  ;;  %v6601_v52 = vld [vmem:[%s11998_s1 + $0xbc0] sm:$0xf]  ;;  %v6622_v53 = vor.u32 %v7785_v34, %v6619_v38  ;;  %v10163_v32 = vpop.f32.mrf.mxu0  ;;  %v7781_v61 = vld [vmem:[%s11998_s1 + $0xbc4] sm:$0xf] }
 0x13c   : > { %2806 = vmatpush.bf16.msrb.mxu3 %v6326_v3  ;;  %v6257_v3 = vld [vmem:[%s11998_s1 + $0x908] sm:$0xf]  ;;  %v6130_v12 = vor.u32 %v7664_v1, %v6129_v42  ;;  %v6602_v42 = vor.u32 %v7783_v54, %v6601_v52  ;;  %v7739_v54 = vld [vmem:[%s11998_s1 + $0xa6c] sm:$0xf0] }
 0x13d   : > { %v6258_v28 = vor.u32 %v7696_v35, %v6257_v3  ;;  %v6585_v3 = vld [vmem:[%s11998_s1 + $0xba0] sm:$0xf]  ;;  %v6606_v35 = vor.u32 %v7781_v61, %v6603_v62  ;;  %v7737_v62 = vld [vmem:[%s11998_s1 + $0xa64] sm:$0xf] }
 0x13e   : > { %2765 = vmatpush.bf16.msrb.mxu0 %v6178_v16  ;;  %v6259_v16 = vld [vmem:[%s11998_s1 + $0x918] sm:$0xf0]  ;;  %v10221_v34 = vpop.f32.mrf.mxu3 }
 0x13f   : > { %2779 = vmatpush.bf16.msrb.mxu1 %v6306_v17  ;;  %2793 = vmatpush.bf16.msrb.mxu2 %v6182_v18  ;;  %v6489_v17 = vld [vmem:[%s11998_s1 + $0xae0] sm:$0xf]  ;;  %v7755_v18 = vld [vmem:[%s11998_s1 + $0xaec] sm:$0xf0]  ;;  %v6262_v39 = vor.u32 %v7694_v15, %v6259_v16  ;;  %v7777_v15 = vld [vmem:[%s11998_s1 + $0xba4] sm:$0xf] }
 0x140   : > { %2807 = vmatpush.bf16.msrb.mxu3 %v6310_v8  ;;  %v7753_v8 = vld [vmem:[%s11998_s1 + $0xae4] sm:$0xf]  ;;  %v6490_v40 = vor.u32 %v7755_v18, %v6489_v17  ;;  %v6587_v16 = vld [vmem:[%s11998_s1 + $0xbb0] sm:$0xf0]  ;;  %v6586_v18 = vor.u32 %v7779_v4, %v6585_v3  ;;  %v7735_v3 = vld [vmem:[%s11998_s1 + $0xa4c] sm:$0xf0] }
 0x141   : > { %v6537_v4 = vld [vmem:[%s11998_s1 + $0xb40] sm:$0xf] }
 0x142   : > { %2766 = vmatpush.bf16.msrb.mxu0 %v6162_v45  ;;  %v6494_v45 = vor.u32 %v7753_v8, %v6491_v25  ;;  %v10210_v8 = vpop.f32.mrf.mxu2  ;;  %v7775_v25 = vld [vmem:[%s11998_s1 + $0xb8c] sm:$0xf0] }
 0x143   : > { %2780 = vmatpush.bf16.msrb.mxu1 %v6290_v43  ;;  %2794 = vmatpush.bf16.msrb.mxu2 %v6166_v13  ;;  %v6473_v43 = vld [vmem:[%s11998_s1 + $0xac0] sm:$0xf]  ;;  %v7751_v13 = vld [vmem:[%s11998_s1 + $0xacc] sm:$0xf0]  ;;  %v6570_v52 = vor.u32 %v7775_v25, %v6569_v21 }
 0x144   : > { %2808 = vmatpush.bf16.msrb.mxu3 %v6294_v59  ;;  %v7749_v59 = vld [vmem:[%s11998_s1 + $0xac4] sm:$0xf]  ;;  %v6393_v25 = vld [vmem:[%s11998_s1 + $0xa20] sm:$0xf] }
 0x145   : > { %v6478_v1 = vor.u32 %v7749_v59, %v6475_v60  ;;  %v6553_v59 = vld [vmem:[%s11998_s1 + $0xb60] sm:$0xf]  ;;  %v7771_v60 = vld [vmem:[%s11998_s1 + $0xb6c] sm:$0xf0] }
 0x146   : > { %2767 = vmatpush.bf16.msrb.mxu0 %v6146_v63  ;;  %v6474_v63 = vor.u32 %v7751_v13, %v6473_v43  ;;  %v6425_v43 = vld [vmem:[%s11998_s1 + $0xa60] sm:$0xf] }
 0x147   : > { %2781 = vmatpush.bf16.msrb.mxu1 %v6274_v31  ;;  %2795 = vmatpush.bf16.msrb.mxu2 %v6150_v2  ;;  %v6457_v31 = vld [vmem:[%s11998_s1 + $0xaa0] sm:$0xf]  ;;  %v7747_v2 = vld [vmem:[%s11998_s1 + $0xaac] sm:$0xf0] }
 0x148   : > { %2809 = vmatpush.bf16.msrb.mxu3 %v6278_v9  ;;  %v7745_v9 = vld [vmem:[%s11998_s1 + $0xaa4] sm:$0xf]  ;;  %v6458_v17 = vor.u32 %v7747_v2, %v6457_v31  ;;  %v6555_v31 = vld [vmem:[%s11998_s1 + $0xb70] sm:$0xf0]  ;;  %v6409_v2 = vld [vmem:[%s11998_s1 + $0xa40] sm:$0xf] }
 0x149   : > { %v6462_v23 = vor.u32 %v7745_v9, %v6459_v14  ;;  %v7733_v9 = vld [vmem:[%s11998_s1 + $0xa44] sm:$0xf]  ;;  %v6554_v14 = vor.u32 %v7771_v60, %v6553_v59  ;;  %v6410_v21 = vor.u32 %v7735_v3, %v6409_v2  ;;  %v2899_v59 = vshrl.u32 %v9885_v26, 16  ;;  %v6505_v2 = vld [vmem:[%s11998_s1 + $0xb00] sm:$0xf] }
 0x14a   : > { %2768 = vmatpush.bf16.msrb.mxu0 %v6130_v12  ;;  %v7743_v12 = vld [vmem:[%s11998_s1 + $0xa8c] sm:$0xf0]  ;;  %v1692_v38 = vpop.f32.mrf.mxu0  ;;  %v2902_v60 = vshll.u32 %v9885_v26, 16 }
 0x14b   : > { %2782 = vmatpush.bf16.msrb.mxu1 %v6258_v28  ;;  %2796 = vmatpush.bf16.msrb.mxu2 %v6134_v33  ;;  %v7741_v28 = vld [vmem:[%s11998_s1 + $0xa84] sm:$0xf]  ;;  %v6443_v33 = vld [vmem:[%s11998_s1 + $0xa90] sm:$0xf0]  ;;  %v7727_v26 = vld [vmem:[%s11998_s1 + $0xa0c] sm:$0xf0] }
 0x14c   : > { %2810 = vmatpush.bf16.msrb.mxu3 %v6262_v39  ;;  %v7773_v39 = vld [vmem:[%s11998_s1 + $0xb84] sm:$0xf] }
 0x14d   : > { %2769 = vmatmul.bf16.vlgmr.msrb.gmra.mxu0 %v9950_v6 }
 0x14e   : > { %3246 = vmatpush.bf16.msra.mxu0 %v6490_v40  ;;  %2783 = vmatmul.bf16.vlgmr.msrb.gmra.mxu1 %v9961_v51  ;;  %v6571_v40 = vld [vmem:[%s11998_s1 + $0xb90] sm:$0xf0] }
 0x14f   : > { %3260 = vmatpush.bf16.msra.mxu1 %v6618_v44  ;;  %3274 = vmatpush.bf16.msra.mxu2 %v6494_v45  ;;  %v1706_v44 = vpop.f32.mrf.mxu1  ;;  %v6574_v61 = vor.u32 %v7773_v39, %v6571_v40  ;;  %v7729_v39 = vld [vmem:[%s11998_s1 + $0xa24] sm:$0xf] }
 0x150   : > { %3288 = vmatpush.bf16.msra.mxu3 %v6622_v53  ;;  %2797 = vmatmul.bf16.vlgmr.msrb.gmra.mxu2 %v9950_v6  ;;  %v6441_v6 = vld [vmem:[%s11998_s1 + $0xa80] sm:$0xf]  ;;  %v1707_v13 = vadd.f32 %v1706_v44, %v1692_v38  ;;  %v6446_v53 = vor.u32 %v7741_v28, %v6443_v33  ;;  %v7731_v28 = vld [vmem:[%s11998_s1 + $0xa2c] sm:$0xf0] }
 0x151   : > { %2811 = vmatmul.bf16.vlgmr.msrb.gmra.mxu3 %v9961_v51  ;;  %v6590_v51 = vor.u32 %v7777_v15, %v6587_v16  ;;  %v6442_v45 = vor.u32 %v7743_v12, %v6441_v6  ;;  %v6411_v16 = vld [vmem:[%s11998_s1 + $0xa50] sm:$0xf0]  ;;  %v6521_v33 = vld [vmem:[%s11998_s1 + $0xb20] sm:$0xf]  ;;  %v7763_v38 = vld [vmem:[%s11998_s1 + $0xb2c] sm:$0xf0] }
 0x152   : > { %3247 = vmatpush.bf16.msra.mxu0 %v6474_v63  ;;  %v6427_v63 = vld [vmem:[%s11998_s1 + $0xa70] sm:$0xf0]  ;;  %v6414_v44 = vor.u32 %v7733_v9, %v6411_v16  ;;  %v6522_v3 = vor.u32 %v7763_v38, %v6521_v33  ;;  %v7757_v9 = vld [vmem:[%s11998_s1 + $0xb04] sm:$0xf]  ;;  %v2901_v16 = vrot.slane %v2899_v59, 3 }
 0x153   : > { %3261 = vmatpush.bf16.msra.mxu1 %v6602_v42  ;;  %3275 = vmatpush.bf16.msra.mxu2 %v6478_v1  ;;  %v7769_v42 = vld [vmem:[%s11998_s1 + $0xb64] sm:$0xf]  ;;  %v10251_v1 = vadd.f32 %v1707_v13, %v9797_v22  ;;  %v7767_v22 = vld [vmem:[%s11998_s1 + $0xb4c] sm:$0xf0]  ;;  %v6430_v15 = vor.u32 %v7737_v62, %v6427_v63  ;;  %v1720_v6 = vpop.f32.mrf.mxu2  ;;  %v2911_v63 = vshll.u32 %v9897_v36, 16 }
 0x154   : > { %3289 = vmatpush.bf16.msra.mxu3 %v6606_v35  ;;  %v6426_v35 = vor.u32 %v7739_v54, %v6425_v43  ;;  %v1734_v12 = vpop.f32.mrf.mxu3  ;;  %v6395_v43 = vld [vmem:[%s11998_s1 + $0xa30] sm:$0xf0]  ;;  %v7761_v13 = vld [vmem:[%s11998_s1 + $0xb24] sm:$0xf]  ;;  %v2894_v54 = vshll.u32 %v9883_v24, 16 }
 0x155   : > { %v1735_v40 = vadd.f32 %v1734_v12, %v1720_v6  ;;  %v2913_v6 = vrot.slane %v2911_v63, 4 }
 0x156   : > { %3248 = vmatpush.bf16.msra.mxu0 %v6458_v17  ;;  %v7765_v17 = vld [vmem:[%s11998_s1 + $0xb44] sm:$0xf] }
 0x157   : > { %3262 = vmatpush.bf16.msra.mxu1 %v6586_v18  ;;  %3276 = vmatpush.bf16.msra.mxu2 %v6462_v23  ;;  %v6539_v18 = vld [vmem:[%s11998_s1 + $0xb50] sm:$0xf0]  ;;  %v6558_v23 = vor.u32 %v7769_v42, %v6555_v31  ;;  %v10310_v62 = vadd.f32 %v1735_v40, %v9844_v0  ;;  %v2916_v42 = vshrl.u32 %v9899_v37, 16  ;;  %v2919_v31 = vshll.u32 %v9899_v37, 16  ;;  %v7759_v37 = vld [vmem:[%s11998_s1 + $0xb0c] sm:$0xf0] }
 0x158   : > { %3290 = vmatpush.bf16.msra.mxu3 %v6590_v51  ;;  %v6538_v51 = vor.u32 %v7767_v22, %v6537_v4  ;;  %v6394_v0 = vor.u32 %v7731_v28, %v6393_v25  ;;  %v7725_v4 = vld [vmem:[%s11998_s1 + $0xa04] sm:$0xf]  ;;  %v6379_v22 = vld [vmem:[%s11998_s1 + $0xa10] sm:$0xf0]  ;;  %v7756_v25 = vld [vmem:[%s11998_s1 + $0xaf4] sm:$0xf0]  ;;  %v6506_v38 = vor.u32 %v7759_v37, %v6505_v2 }
 0x159   : > { %v2918_v12 = vrot.slane %v2916_v42, 3  ;;  %v6625_v28 = vld [vmem:[%s11998_s1 + $0xbe8] sm:$0xf]  ;;  %v7788_v40 = vld [vmem:[%s11998_s1 + $0xbf4] sm:$0xf0] }
 0x15a   : > { %3249 = vmatpush.bf16.msra.mxu0 %v6442_v45  ;;  %v6542_v45 = vor.u32 %v7765_v17, %v6539_v18  ;;  %v2904_v17 = vrot.slane %v2902_v60, 4  ;;  %v6507_v18 = vld [vmem:[%s11998_s1 + $0xb10] sm:$0xf0]  ;;  %v6626_v63 = vor.u32 %v7788_v40, %v6625_v28  ;;  %v7778_v28 = vld [vmem:[%s11998_s1 + $0xbac] sm:$0xf] }
 0x15b   : > { %3263 = vmatpush.bf16.msra.mxu1 %v6570_v52  ;;  %3277 = vmatpush.bf16.msra.mxu2 %v6446_v53  ;;  %v2891_v52 = vshrl.u32 %v9883_v24, 16  ;;  %v6523_v53 = vld [vmem:[%s11998_s1 + $0xb30] sm:$0xf0]  ;;  %v6377_v24 = vld [vmem:[%s11998_s1 + $0xa00] sm:$0xf] }
 0x15c   : > { %3291 = vmatpush.bf16.msra.mxu3 %v6574_v61  ;;  %v2908_v61 = vshrl.u32 %v9897_v36, 16  ;;  %v6398_v36 = vor.u32 %v7729_v39, %v6395_v43  ;;  %v6378_v33 = vor.u32 %v7727_v26, %v6377_v24  ;;  %v6382_v39 = vor.u32 %v7725_v4, %v6379_v22  ;;  %v7752_v24 = vld [vmem:[%s11998_s1 + $0xad4] sm:$0xf0]  ;;  %v6609_v26 = vld [vmem:[%s11998_s1 + $0xbc8] sm:$0xf] }
 0x15d   : > { %v6510_v43 = vor.u32 %v7757_v9, %v6507_v18  ;;  %v7782_v4 = vld [vmem:[%s11998_s1 + $0xbcc] sm:$0xf]  ;;  %v6611_v22 = vld [vmem:[%s11998_s1 + $0xbd8] sm:$0xf0]  ;;  %v10392_v9 = vpop.f32.mrf.mxu1  ;;  %v6465_v18 = vld [vmem:[%s11998_s1 + $0xaa8] sm:$0xf] }
 0x15e   : > { %3250 = vmatpush.bf16.msra.mxu0 %v6426_v35  ;;  %v6526_v35 = vor.u32 %v7761_v13, %v6523_v53  ;;  %v7786_v13 = vld [vmem:[%s11998_s1 + $0xbec] sm:$0xf] }
 0x15f   : > { %3264 = vmatpush.bf16.msra.mxu1 %v6554_v14  ;;  %3278 = vmatpush.bf16.msra.mxu2 %v6430_v15  ;;  %v2893_v14 = vrot.slane %v2891_v52, 3  ;;  %v2896_v15 = vrot.slane %v2894_v54, 4  ;;  %v6627_v52 = vld [vmem:[%s11998_s1 + $0xbf8] sm:$0xf0]  ;;  %v2905_v54 = vor.u32 %v2904_v17, %v2901_v16 }
 0x160   : > { %3292 = vmatpush.bf16.msra.mxu3 %v6558_v23  ;;  %v2910_v23 = vrot.slane %v2908_v61, 3  ;;  %v6630_v2 = vor.u32 %v7786_v13, %v6627_v52  ;;  %v10434_v13 = vpop.f32.mrf.mxu2 }
 0x161   : > { %v2897_v53 = vor.u32 %v2896_v15, %v2893_v14 }
 0x162   : > { %3251 = vmatpush.bf16.msra.mxu0 %v6410_v21  ;;  %v2921_v21 = vrot.slane %v2919_v31, 4  ;;  %v2914_v60 = vor.u32 %v2913_v6, %v2910_v23  ;;  %v6481_v31 = vld [vmem:[%s11998_s1 + $0xac8] sm:$0xf]  ;;  %v7748_v23 = vld [vmem:[%s11998_s1 + $0xab4] sm:$0xf0] }
 0x163   : > { %3265 = vmatpush.bf16.msra.mxu1 %v6538_v51  ;;  %3279 = vmatpush.bf16.msra.mxu2 %v6414_v44  ;;  %v6497_v51 = vld [vmem:[%s11998_s1 + $0xae8] sm:$0xf]  ;;  %v7754_v44 = vld [vmem:[%s11998_s1 + $0xaec] sm:$0xf]  ;;  %v10384_v37 = vsel %vm2889_vm3, %v2897_v53, %v2905_v54  ;;  %v6482_v15 = vor.u32 %v7752_v24, %v6481_v31  ;;  %v7776_v53 = vld [vmem:[%s11998_s1 + $0xb94] sm:$0xf0] }
 0x164   : > { %3293 = vmatpush.bf16.msra.mxu3 %v6542_v45  ;;  %v6499_v45 = vld [vmem:[%s11998_s1 + $0xaf8] sm:$0xf0]  ;;  %v6498_v59 = vor.u32 %v7756_v25, %v6497_v51  ;;  %v2922_v61 = vor.u32 %v2921_v21, %v2918_v12  ;;  %v6593_v6 = vld [vmem:[%s11998_s1 + $0xba8] sm:$0xf]  ;;  %v6614_v12 = vor.u32 %v7782_v4, %v6611_v22  ;;  %v7780_v21 = vld [vmem:[%s11998_s1 + $0xbb4] sm:$0xf0] }
 0x165   : > { %v6502_v42 = vor.u32 %v7754_v44, %v6499_v45  ;;  %v7746_v51 = vld [vmem:[%s11998_s1 + $0xaac] sm:$0xf]  ;;  %v6467_v25 = vld [vmem:[%s11998_s1 + $0xab8] sm:$0xf0]  ;;  %v6449_v44 = vld [vmem:[%s11998_s1 + $0xa88] sm:$0xf] }
 0x166   : > { %3252 = vmatpush.bf16.msra.mxu0 %v6394_v0  ;;  %v7784_v0 = vld [vmem:[%s11998_s1 + $0xbd4] sm:$0xf0]  ;;  %v10395_v14 = vsel %vm2889_vm3, %v2914_v60, %v2922_v61  ;;  %v6470_v40 = vor.u32 %v7746_v51, %v6467_v25  ;;  %v7742_v54 = vld [vmem:[%s11998_s1 + $0xa8c] sm:$0xf]  ;;  %v10445_v60 = vpop.f32.mrf.mxu3  ;;  %v6561_v4 = vld [vmem:[%s11998_s1 + $0xb68] sm:$0xf] }
 0x167   : > { %3266 = vmatpush.bf16.msra.mxu1 %v6522_v3  ;;  %3280 = vmatpush.bf16.msra.mxu2 %v6398_v36  ;;  %v7750_v3 = vld [vmem:[%s11998_s1 + $0xacc] sm:$0xf]  ;;  %v6483_v36 = vld [vmem:[%s11998_s1 + $0xad8] sm:$0xf0]  ;;  %v6610_v16 = vor.u32 %v7784_v0, %v6609_v26  ;;  %v7744_v45 = vld [vmem:[%s11998_s1 + $0xa94] sm:$0xf0] }
 0x168   : > { %3294 = vmatpush.bf16.msra.mxu3 %v6526_v35  ;;  %v10381_v35 = vpop.f32.mrf.mxu0  ;;  %v6486_v17 = vor.u32 %v7750_v3, %v6483_v36  ;;  %v6450_v24 = vor.u32 %v7744_v45, %v6449_v44  ;;  %v6433_v3 = vld [vmem:[%s11998_s1 + $0xa68] sm:$0xf]  ;;  %v7740_v36 = vld [vmem:[%s11998_s1 + $0xa74] sm:$0xf0]  ;;  %v6419_v44 = vld [vmem:[%s11998_s1 + $0xa58] sm:$0xf0] }
 0x169   : > { %v6417_v25 = vld [vmem:[%s11998_s1 + $0xa48] sm:$0xf] }
 0x16a   : > { %3253 = vmatpush.bf16.msra.mxu0 %v6378_v33  ;;  %v6595_v33 = vld [vmem:[%s11998_s1 + $0xbb8] sm:$0xf0] }
 0x16b   : > { %3267 = vmatpush.bf16.msra.mxu1 %v6506_v38  ;;  %3281 = vmatpush.bf16.msra.mxu2 %v6382_v39  ;;  %v6466_v38 = vor.u32 %v7748_v23, %v6465_v18  ;;  %v6594_v39 = vor.u32 %v7780_v21, %v6593_v6  ;;  %v6598_v52 = vor.u32 %v7778_v28, %v6595_v33  ;;  %v2203_v31 = vpop.f32.mrf.mxu1  ;;  %v7770_v23 = vld [vmem:[%s11998_s1 + $0xb6c] sm:$0xf]  ;;  %v6563_v6 = vld [vmem:[%s11998_s1 + $0xb78] sm:$0xf0]  ;;  %v6545_v28 = vld [vmem:[%s11998_s1 + $0xb48] sm:$0xf] }
 0x16c   : > { %3295 = vmatpush.bf16.msra.mxu3 %v6510_v43  ;;  %v6577_v43 = vld [vmem:[%s11998_s1 + $0xb88] sm:$0xf]  ;;  %v6566_v33 = vor.u32 %v7770_v23, %v6563_v6  ;;  %v7728_v23 = vld [vmem:[%s11998_s1 + $0xa14] sm:$0xf0] }
 0x16d   : > { %3254 = vmatmul.bf16.vlgmr.msra.gmra.mxu0 %v10384_v37 }
 0x16e   : > { %3302 = vmatpush.bf16.msrb.mxu0 %v6498_v59  ;;  %3268 = vmatmul.bf16.vlgmr.msra.gmra.mxu1 %v10395_v14  ;;  %v6451_v59 = vld [vmem:[%s11998_s1 + $0xa98] sm:$0xf0] }
 0x16f   : > { %3316 = vmatpush.bf16.msrb.mxu1 %v6626_v63  ;;  %3330 = vmatpush.bf16.msrb.mxu2 %v6502_v42  ;;  %v7774_v63 = vld [vmem:[%s11998_s1 + $0xb8c] sm:$0xf]  ;;  %v6579_v42 = vld [vmem:[%s11998_s1 + $0xb98] sm:$0xf0]  ;;  %v6454_v0 = vor.u32 %v7742_v54, %v6451_v59 }
 0x170   : > { %3344 = vmatpush.bf16.msrb.mxu3 %v6630_v2  ;;  %3282 = vmatmul.bf16.vlgmr.msra.gmra.mxu2 %v10384_v37  ;;  %v2189_v61 = vpop.f32.mrf.mxu0  ;;  %v6578_v2 = vor.u32 %v7776_v53, %v6577_v43  ;;  %v6582_v22 = vor.u32 %v7774_v63, %v6579_v42  ;;  %v6547_v53 = vld [vmem:[%s11998_s1 + $0xb58] sm:$0xf0] }
 0x171   : > { %3296 = vmatmul.bf16.vlgmr.msra.gmra.mxu3 %v10395_v14  ;;  %v2204_v26 = vadd.f32 %v2203_v31, %v2189_v61 }
 0x172   : > { %3303 = vmatpush.bf16.msrb.mxu0 %v6482_v15  ;;  %v7772_v15 = vld [vmem:[%s11998_s1 + $0xb74] sm:$0xf0] }
 0x173   : > { %3317 = vmatpush.bf16.msrb.mxu1 %v6610_v16  ;;  %3331 = vmatpush.bf16.msrb.mxu2 %v6486_v17  ;;  %v7738_v16 = vld [vmem:[%s11998_s1 + $0xa6c] sm:$0xf]  ;;  %v6435_v17 = vld [vmem:[%s11998_s1 + $0xa78] sm:$0xf0]  ;;  %v10472_v18 = vadd.f32 %v2204_v26, %v10038_v10  ;;  %v6562_v21 = vor.u32 %v7772_v15, %v6561_v4  ;;  %v7736_v10 = vld [vmem:[%s11998_s1 + $0xa54] sm:$0xf0]  ;;  %v2205_v59 = vpop.f32.mrf.mxu1 }
 0x174   : > { %3345 = vmatpush.bf16.msrb.mxu3 %v6614_v12  ;;  %v6434_v12 = vor.u32 %v7740_v36, %v6433_v3  ;;  %v6438_v51 = vor.u32 %v7738_v16, %v6435_v17  ;;  %v2231_v45 = vpop.f32.mrf.mxu3  ;;  %v6418_v61 = vor.u32 %v7736_v10, %v6417_v25  ;;  %v7732_v26 = vld [vmem:[%s11998_s1 + $0xa34] sm:$0xf0]  ;;  %v7730_v4 = vld [vmem:[%s11998_s1 + $0xa2c] sm:$0xf]  ;;  %v6385_v17 = vld [vmem:[%s11998_s1 + $0xa08] sm:$0xf] }
 0x175   : > { %v7764_v36 = vld [vmem:[%s11998_s1 + $0xb34] sm:$0xf0]  ;;  %v7762_v15 = vld [vmem:[%s11998_s1 + $0xb2c] sm:$0xf] }
 0x176   : > { %3304 = vmatpush.bf16.msrb.mxu0 %v6466_v38  ;;  %v2217_v38 = vpop.f32.mrf.mxu2  ;;  %v7726_v25 = vld [vmem:[%s11998_s1 + $0xa0c] sm:$0xf] }
 0x177   : > { %3318 = vmatpush.bf16.msrb.mxu1 %v6594_v39  ;;  %3332 = vmatpush.bf16.msrb.mxu2 %v6470_v40  ;;  %v7768_v39 = vld [vmem:[%s11998_s1 + $0xb54] sm:$0xf0]  ;;  %v7734_v40 = vld [vmem:[%s11998_s1 + $0xa4c] sm:$0xf]  ;;  %v2232_v54 = vadd.f32 %v2231_v45, %v2217_v38  ;;  %v7819_v45 = vld [vmem:[%s11998_s1 + $0xcec] sm:$0xf0] }
 0x178   : > { %3346 = vmatpush.bf16.msrb.mxu3 %v6598_v52  ;;  %v2191_v43 = vpop.f32.mrf.mxu0  ;;  %v7766_v52 = vld [vmem:[%s11998_s1 + $0xb4c] sm:$0xf]  ;;  %v6546_v42 = vor.u32 %v7768_v39, %v6545_v28  ;;  %v6422_v31 = vor.u32 %v7734_v40, %v6419_v44  ;;  %v6515_v39 = vld [vmem:[%s11998_s1 + $0xb18] sm:$0xf0]  ;;  %v6745_v44 = vld [vmem:[%s11998_s1 + $0xce0] sm:$0xf] }
 0x179   : > { %v10504_v63 = vadd.f32 %v2205_v59, %v2191_v43  ;;  %v6550_v3 = vor.u32 %v7766_v52, %v6547_v53  ;;  %v7758_v38 = vld [vmem:[%s11998_s1 + $0xb0c] sm:$0xf]  ;;  %v6873_v43 = vld [vmem:[%s11998_s1 + $0xde0] sm:$0xf]  ;;  %v6386_v53 = vor.u32 %v7728_v23, %v6385_v17  ;;  %v7817_v59 = vld [vmem:[%s11998_s1 + $0xce4] sm:$0xf] }
 0x17a   : > { %3305 = vmatpush.bf16.msrb.mxu0 %v6450_v24  ;;  %v6401_v24 = vld [vmem:[%s11998_s1 + $0xa28] sm:$0xf]  ;;  %v7847_v17 = vld [vmem:[%s11998_s1 + $0xdcc] sm:$0xf0]  ;;  %v7813_v23 = vld [vmem:[%s11998_s1 + $0xcc4] sm:$0xf] }
 0x17b   : > { %3319 = vmatpush.bf16.msrb.mxu1 %v6578_v2  ;;  %3333 = vmatpush.bf16.msrb.mxu2 %v6454_v0  ;;  %v6529_v2 = vld [vmem:[%s11998_s1 + $0xb28] sm:$0xf]  ;;  %v10516_v0 = vadd.f32 %v2232_v54, %v10080_v58  ;;  %v6531_v58 = vld [vmem:[%s11998_s1 + $0xb38] sm:$0xf0]  ;;  %v6402_v16 = vor.u32 %v7732_v26, %v6401_v24  ;;  %v7851_v54 = vld [vmem:[%s11998_s1 + $0xdec] sm:$0xf0] }
 0x17c   : > { %3347 = vmatpush.bf16.msrb.mxu3 %v6582_v22  ;;  %v6403_v22 = vld [vmem:[%s11998_s1 + $0xa38] sm:$0xf0]  ;;  %v6530_v6 = vor.u32 %v7764_v36, %v6529_v2  ;;  %v6534_v10 = vor.u32 %v7762_v15, %v6531_v58  ;;  %v2233_v40 = vpop.f32.mrf.mxu3  ;;  %v7849_v24 = vld [vmem:[%s11998_s1 + $0xde4] sm:$0xf]  ;;  %v6875_v26 = vld [vmem:[%s11998_s1 + $0xdf0] sm:$0xf0]  ;;  %v6518_v2 = vor.u32 %v7758_v38, %v6515_v39  ;;  %v6874_v36 = vor.u32 %v7851_v54, %v6873_v43 }
 0x17d   : > { %v7815_v15 = vld [vmem:[%s11998_s1 + $0xccc] sm:$0xf0]  ;;  %v6857_v58 = vld [vmem:[%s11998_s1 + $0xdc0] sm:$0xf]  ;;  %v7841_v43 = vld [vmem:[%s11998_s1 + $0xda4] sm:$0xf] }
 0x17e   : > { %3306 = vmatpush.bf16.msrb.mxu0 %v6434_v12  ;;  %v6406_v12 = vor.u32 %v7730_v4, %v6403_v22  ;;  %v2219_v28 = vpop.f32.mrf.mxu2  ;;  %v6729_v22 = vld [vmem:[%s11998_s1 + $0xcc0] sm:$0xf] }
 0x17f   : > { %3320 = vmatpush.bf16.msrb.mxu1 %v6562_v21  ;;  %3334 = vmatpush.bf16.msrb.mxu2 %v6438_v51  ;;  %v6513_v21 = vld [vmem:[%s11998_s1 + $0xb08] sm:$0xf]  ;;  %v7760_v51 = vld [vmem:[%s11998_s1 + $0xb14] sm:$0xf0]  ;;  %v10566_v52 = vadd.f32 %v2233_v40, %v2219_v28  ;;  %v6713_v28 = vld [vmem:[%s11998_s1 + $0xca0] sm:$0xf] }
 0x180   : > { %3348 = vmatpush.bf16.msrb.mxu3 %v6566_v33  ;;  %v6387_v33 = vld [vmem:[%s11998_s1 + $0xa18] sm:$0xf0]  ;;  %v6841_v38 = vld [vmem:[%s11998_s1 + $0xda0] sm:$0xf]  ;;  %v7843_v40 = vld [vmem:[%s11998_s1 + $0xdac] sm:$0xf0] }
 0x182   : > { %3307 = vmatpush.bf16.msrb.mxu0 %v6418_v61  ;;  %v6747_v61 = vld [vmem:[%s11998_s1 + $0xcf0] sm:$0xf0] }
 0x183   : > { %3321 = vmatpush.bf16.msrb.mxu1 %v6546_v42  ;;  %3335 = vmatpush.bf16.msrb.mxu2 %v6422_v31  ;;  %v6514_v42 = vor.u32 %v7760_v51, %v6513_v21  ;;  %v6390_v31 = vor.u32 %v7726_v25, %v6387_v33  ;;  %v6750_v4 = vor.u32 %v7817_v59, %v6747_v61  ;;  %v6859_v21 = vld [vmem:[%s11998_s1 + $0xdd0] sm:$0xf0]  ;;  %v7811_v33 = vld [vmem:[%s11998_s1 + $0xcac] sm:$0xf0] }
 0x184   : > { %3349 = vmatpush.bf16.msrb.mxu3 %v6550_v3  ;;  %v6746_v3 = vor.u32 %v7819_v45, %v6745_v44  ;;  %v6730_v51 = vor.u32 %v7815_v15, %v6729_v22  ;;  %v6858_v25 = vor.u32 %v7847_v17, %v6857_v58  ;;  %v7809_v44 = vld [vmem:[%s11998_s1 + $0xca4] sm:$0xf]  ;;  %v6715_v45 = vld [vmem:[%s11998_s1 + $0xcb0] sm:$0xf0]  ;;  %v6714_v54 = vor.u32 %v7811_v33, %v6713_v28  ;;  %v6681_v58 = vld [vmem:[%s11998_s1 + $0xc60] sm:$0xf] }
 0x185   : > { %v6842_v59 = vor.u32 %v7843_v40, %v6841_v38  ;;  %v6718_v61 = vor.u32 %v7809_v44, %v6715_v45  ;;  %v7833_v28 = vld [vmem:[%s11998_s1 + $0xd64] sm:$0xf]  ;;  %v6811_v38 = vld [vmem:[%s11998_s1 + $0xd70] sm:$0xf0]  ;;  %v7799_v40 = vld [vmem:[%s11998_s1 + $0xc4c] sm:$0xf0] }
 0x186   : > { %3308 = vmatpush.bf16.msrb.mxu0 %v6402_v16  ;;  %v6878_v16 = vor.u32 %v7849_v24, %v6875_v26  ;;  %v7839_v24 = vld [vmem:[%s11998_s1 + $0xd8c] sm:$0xf0]  ;;  %v7805_v26 = vld [vmem:[%s11998_s1 + $0xc84] sm:$0xf] }
 0x187   : > { %3322 = vmatpush.bf16.msrb.mxu1 %v6530_v6  ;;  %3336 = vmatpush.bf16.msrb.mxu2 %v6406_v12  ;;  %v6731_v6 = vld [vmem:[%s11998_s1 + $0xcd0] sm:$0xf0]  ;;  %v7845_v12 = vld [vmem:[%s11998_s1 + $0xdc4] sm:$0xf]  ;;  %v7831_v45 = vld [vmem:[%s11998_s1 + $0xd4c] sm:$0xf0] }
 0x188   : > { %3350 = vmatpush.bf16.msrb.mxu3 %v6534_v10  ;;  %v6734_v10 = vor.u32 %v7813_v23, %v6731_v6  ;;  %v6862_v39 = vor.u32 %v7845_v12, %v6859_v21  ;;  %v7803_v6 = vld [vmem:[%s11998_s1 + $0xc6c] sm:$0xf0]  ;;  %v6809_v12 = vld [vmem:[%s11998_s1 + $0xd60] sm:$0xf] }
 0x189   : > { %v7835_v21 = vld [vmem:[%s11998_s1 + $0xd6c] sm:$0xf0]  ;;  %v6682_v44 = vor.u32 %v7803_v6, %v6681_v58 }
 0x18a   : > { %3309 = vmatpush.bf16.msrb.mxu0 %v6386_v53  ;;  %v6843_v53 = vld [vmem:[%s11998_s1 + $0xdb0] sm:$0xf0]  ;;  %v7795_v6 = vld [vmem:[%s11998_s1 + $0xc2c] sm:$0xf0] }
 0x18b   : > { %3323 = vmatpush.bf16.msrb.mxu1 %v6514_v42  ;;  %3337 = vmatpush.bf16.msrb.mxu2 %v6390_v31  ;;  %v7807_v42 = vld [vmem:[%s11998_s1 + $0xc8c] sm:$0xf0]  ;;  %v6825_v31 = vld [vmem:[%s11998_s1 + $0xd80] sm:$0xf]  ;;  %v2259_v22 = vpop.f32.mrf.mxu1 }
 0x18c   : > { %3351 = vmatpush.bf16.msrb.mxu3 %v6518_v2  ;;  %v6699_v2 = vld [vmem:[%s11998_s1 + $0xc90] sm:$0xf0]  ;;  %v6826_v17 = vor.u32 %v7839_v24, %v6825_v31 }
 0x18d   : > { %3310 = vmatmul.bf16.vlgmr.msrb.gmra.mxu0 %v10384_v37  ;;  %v6702_v23 = vor.u32 %v7805_v26, %v6699_v2  ;;  %v10712_v24 = vld [vmem:[%s8348_s6 + $0x10] sm:$0xff]  ;;  %v3368_v26 = vld [vmem:[%s8348_s6 + $0x18] sm:$0x11] }
 0x18e   : > { %3774 = vmatpush.bf16.msra.mxu0 %v6746_v3  ;;  %3324 = vmatmul.bf16.vlgmr.msrb.gmra.mxu1 %v10395_v14  ;;  %v2245_v3 = vpop.f32.mrf.mxu0 }
 0x18f   : > { %3788 = vmatpush.bf16.msra.mxu1 %v6874_v36  ;;  %3802 = vmatpush.bf16.msra.mxu2 %v6750_v4  ;;  %v7837_v36 = vld [vmem:[%s11998_s1 + $0xd84] sm:$0xf]  ;;  %v6827_v4 = vld [vmem:[%s11998_s1 + $0xd90] sm:$0xf0] }
 0x190   : > { %3816 = vmatpush.bf16.msra.mxu3 %v6878_v16  ;;  %3338 = vmatmul.bf16.vlgmr.msrb.gmra.mxu2 %v10384_v37  ;;  %v6697_v37 = vld [vmem:[%s11998_s1 + $0xc80] sm:$0xf]  ;;  %v2260_v16 = vadd.f32 %v2259_v22, %v2245_v3 }
 0x191   : > { %3352 = vmatmul.bf16.vlgmr.msrb.gmra.mxu3 %v10395_v14  ;;  %v6846_v14 = vor.u32 %v7841_v43, %v6843_v53  ;;  %v6698_v15 = vor.u32 %v7807_v42, %v6697_v37  ;;  %v7797_v43 = vld [vmem:[%s11998_s1 + $0xc44] sm:$0xf]  ;;  %v6810_v53 = vor.u32 %v7835_v21, %v6809_v12  ;;  %v6795_v37 = vld [vmem:[%s11998_s1 + $0xd50] sm:$0xf0]  ;;  %v6814_v42 = vor.u32 %v7833_v28, %v6811_v38  ;;  %v6777_v12 = vld [vmem:[%s11998_s1 + $0xd20] sm:$0xf] }
 0x192   : > { %3775 = vmatpush.bf16.msra.mxu0 %v6730_v51  ;;  %v6830_v51 = vor.u32 %v7837_v36, %v6827_v4  ;;  %v10681_v33 = vadd.f32 %v2260_v16, %v10251_v1  ;;  %v6793_v1 = vld [vmem:[%s11998_s1 + $0xd40] sm:$0xf]  ;;  %v7827_v21 = vld [vmem:[%s11998_s1 + $0xd2c] sm:$0xf0]  ;;  %v7793_v38 = vld [vmem:[%s11998_s1 + $0xc24] sm:$0xf] }
 0x193   : > { %3789 = vmatpush.bf16.msra.mxu1 %v6858_v25  ;;  %3803 = vmatpush.bf16.msra.mxu2 %v6734_v10  ;;  %v7801_v25 = vld [vmem:[%s11998_s1 + $0xc64] sm:$0xf]  ;;  %v6683_v10 = vld [vmem:[%s11998_s1 + $0xc70] sm:$0xf0]  ;;  %v2273_v31 = vpop.f32.mrf.mxu2  ;;  %v2261_v22 = vpop.f32.mrf.mxu1 }
 0x194   : > { %3817 = vmatpush.bf16.msra.mxu3 %v6862_v39  ;;  %v6665_v39 = vld [vmem:[%s11998_s1 + $0xc40] sm:$0xf]  ;;  %v2287_v2 = vpop.f32.mrf.mxu3 }
 0x195   : > { %v6666_v36 = vor.u32 %v7799_v40, %v6665_v39  ;;  %v2288_v4 = vadd.f32 %v2287_v2, %v2273_v31  ;;  %v6651_v39 = vld [vmem:[%s11998_s1 + $0xc30] sm:$0xf0]  ;;  %v7789_v31 = vld [vmem:[%s11998_s1 + $0xc04] sm:$0xf] }
 0x196   : > { %3776 = vmatpush.bf16.msra.mxu0 %v6714_v54  ;;  %v6686_v54 = vor.u32 %v7801_v25, %v6683_v10  ;;  %v2247_v3 = vpop.f32.mrf.mxu0  ;;  %v3438_v25 = vunpack.c.l.b16 %v10712_v24  ;;  %v3440_v10 = vunpack.c.l.b16 %v3368_v26 }
 0x197   : > { %3790 = vmatpush.bf16.msra.mxu1 %v6842_v59  ;;  %3804 = vmatpush.bf16.msra.mxu2 %v6718_v61  ;;  %v6667_v59 = vld [vmem:[%s11998_s1 + $0xc50] sm:$0xf0]  ;;  %v7829_v61 = vld [vmem:[%s11998_s1 + $0xd44] sm:$0xf]  ;;  %v10731_v28 = vadd.f32 %v2288_v4, %v10310_v62 }
 0x198   : > { %3818 = vmatpush.bf16.msra.mxu3 %v6846_v14  ;;  %v3366_v14 = vld [vmem:[%s8348_s6 + $0x8] sm:$0xee]  ;;  %v6670_v58 = vor.u32 %v7797_v43, %v6667_v59  ;;  %v6798_v16 = vor.u32 %v7829_v61, %v6795_v37  ;;  %v6779_v62 = vld [vmem:[%s11998_s1 + $0xd30] sm:$0xf0]  ;;  %v7791_v59 = vld [vmem:[%s11998_s1 + $0xc0c] sm:$0xf0]  ;;  %v6654_v61 = vor.u32 %v7793_v38, %v6651_v39 }
 0x199   : > { %v3437_v40 = vunpack.c.h.b16 %v3366_v14  ;;  %v6761_v37 = vld [vmem:[%s11998_s1 + $0xd00] sm:$0xf]  ;;  %v7821_v4 = vld [vmem:[%s11998_s1 + $0xd04] sm:$0xf]  ;;  %v7818_v38 = vld [vmem:[%s11998_s1 + $0xcec] sm:$0xf] }
 0x19a   : > { %3777 = vmatpush.bf16.msra.mxu0 %v6698_v15  ;;  %v6794_v15 = vor.u32 %v7831_v45, %v6793_v1  ;;  %v3441_v1 = vunpack.c.h.b16 %v3368_v26  ;;  %v7825_v45 = vld [vmem:[%s11998_s1 + $0xd24] sm:$0xf]  ;;  %v10765_v26 = vpack.c.b16 %v3440_v10, %v3440_v10  ;;  %v7852_v10 = vld [vmem:[%s11998_s1 + $0xdf4] sm:$0xf0]  ;;  %v6755_v39 = vld [vmem:[%s11998_s1 + $0xcf8] sm:$0xf0] }
 0x19b   : > { %3791 = vmatpush.bf16.msra.mxu1 %v6826_v17  ;;  %3805 = vmatpush.bf16.msra.mxu2 %v6702_v23  ;;  %v6649_v17 = vld [vmem:[%s11998_s1 + $0xc20] sm:$0xf]  ;;  %v10718_v23 = vadd.f32 %v2261_v22, %v2247_v3  ;;  %v6782_v2 = vor.u32 %v7825_v45, %v6779_v62  ;;  %v2275_v3 = vpop.f32.mrf.mxu2  ;;  %v6763_v22 = vld [vmem:[%s11998_s1 + $0xd10] sm:$0xf0]  ;;  %v7850_v45 = vld [vmem:[%s11998_s1 + $0xdec] sm:$0xf] }
 0x19c   : > { %3819 = vmatpush.bf16.msra.mxu3 %v6830_v51  ;;  %v3436_v51 = vunpack.c.l.b16 %v3366_v14  ;;  %v6650_v43 = vor.u32 %v7795_v6, %v6649_v17  ;;  %v6753_v17 = vld [vmem:[%s11998_s1 + $0xce8] sm:$0xf]  ;;  %v7820_v6 = vld [vmem:[%s11998_s1 + $0xcf4] sm:$0xf0]  ;;  %v6883_v62 = vld [vmem:[%s11998_s1 + $0xdf8] sm:$0xf0] }
 0x19e   : > { %3778 = vmatpush.bf16.msra.mxu0 %v6682_v44  ;;  %v3439_v44 = vunpack.c.h.b16 %v10712_v24  ;;  %v10763_v14 = vpack.c.b16 %v3438_v25, %v3436_v51  ;;  %v7946_v24 = vld [vmem:[%s11998_s1 + $0x10ec] sm:$0xf] }
 0x19f   : > { %3792 = vmatpush.bf16.msra.mxu1 %v6810_v53  ;;  %3806 = vmatpush.bf16.msra.mxu2 %v6686_v54  ;;  %v6778_v53 = vor.u32 %v7827_v21, %v6777_v12  ;;  %v6633_v54 = vld [vmem:[%s11998_s1 + $0xc00] sm:$0xf]  ;;  %v6881_v12 = vld [vmem:[%s11998_s1 + $0xde8] sm:$0xf] }
 0x1a0   : > { %3820 = vmatpush.bf16.msra.mxu3 %v6814_v42  ;;  %v7823_v42 = vld [vmem:[%s11998_s1 + $0xd0c] sm:$0xf0]  ;;  %v6634_v51 = vor.u32 %v7791_v59, %v6633_v54  ;;  %v3447_v54 = vrot.slane %v10765_v26, 1  ;;  %v6766_v59 = vor.u32 %v7821_v4, %v6763_v22  ;;  %v6886_v4 = vor.u32 %v7850_v45, %v6883_v62  ;;  %v7848_v22 = vld [vmem:[%s11998_s1 + $0xdd4] sm:$0xf0] }
 0x1a1   : > { %v7812_v45 = vld [vmem:[%s11998_s1 + $0xcb4] sm:$0xf0]  ;;  %v6849_v62 = vld [vmem:[%s11998_s1 + $0xda8] sm:$0xf] }
 0x1a2   : > { %3779 = vmatpush.bf16.msra.mxu0 %v6666_v36  ;;  %v6635_v36 = vld [vmem:[%s11998_s1 + $0xc10] sm:$0xf0] }
 0x1a3   : > { %3793 = vmatpush.bf16.msra.mxu1 %v6794_v15  ;;  %3807 = vmatpush.bf16.msra.mxu2 %v6670_v58  ;;  %v10778_v15 = vpack.c.b16 %v3439_v44, %v3437_v40  ;;  %v10780_v58 = vpack.c.b16 %v3441_v1, %v3441_v1  ;;  %v6762_v40 = vor.u32 %v7823_v42, %v6761_v37 }
 0x1a4   : > { %3821 = vmatpush.bf16.msra.mxu3 %v6798_v16  ;;  %v2289_v16 = vpop.f32.mrf.mxu3  ;;  %v6638_v1 = vor.u32 %v7789_v31, %v6635_v36  ;;  %v6882_v37 = vor.u32 %v7852_v10, %v6881_v12  ;;  %v6758_v42 = vor.u32 %v7818_v38, %v6755_v39  ;;  %v6737_v31 = vld [vmem:[%s11998_s1 + $0xcc8] sm:$0xf]  ;;  %v7816_v36 = vld [vmem:[%s11998_s1 + $0xcd4] sm:$0xf0]  ;;  %v7846_v12 = vld [vmem:[%s11998_s1 + $0xdcc] sm:$0xf] }
 0x1a5   : > { %v10791_v21 = vadd.f32 %v2289_v16, %v2275_v3  ;;  %v6754_v3 = vor.u32 %v7820_v6, %v6753_v17  ;;  %v7814_v16 = vld [vmem:[%s11998_s1 + $0xccc] sm:$0xf]  ;;  %v6739_v17 = vld [vmem:[%s11998_s1 + $0xcd8] sm:$0xf0]  ;;  %v6738_v38 = vor.u32 %v7816_v36, %v6737_v31  ;;  %v6705_v36 = vld [vmem:[%s11998_s1 + $0xc88] sm:$0xf] }
 0x1a6   : > { %3780 = vmatpush.bf16.msra.mxu0 %v6650_v43  ;;  %v3446_v43 = vrot.slane %v10763_v14, 1 }
 0x1a7   : > { %3794 = vmatpush.bf16.msra.mxu1 %v6778_v53  ;;  %3808 = vmatpush.bf16.msra.mxu2 %v6654_v61  ;;  %v3449_v53 = vrot.slane %v10778_v15, 1  ;;  %v3450_v61 = vrot.slane %v10780_v58, 1 }
 0x1a8   : > { %3822 = vmatpush.bf16.msra.mxu3 %v6782_v2  ;;  %v6865_v2 = vld [vmem:[%s11998_s1 + $0xdc8] sm:$0xf]  ;;  %v10831_v6 = vsel %vm1298_vm0, %v3446_v43, %v3447_v54  ;;  %v7844_v54 = vld [vmem:[%s11998_s1 + $0xdb4] sm:$0xf0] }
 0x1a9   : > { %v10840_v10 = vsel %vm1298_vm0, %v3449_v53, %v3450_v61  ;;  %v6866_v39 = vor.u32 %v7848_v22, %v6865_v2  ;;  %v7842_v53 = vld [vmem:[%s11998_s1 + $0xdac] sm:$0xf]  ;;  %v6851_v61 = vld [vmem:[%s11998_s1 + $0xdb8] sm:$0xf0]  ;;  %v7808_v2 = vld [vmem:[%s11998_s1 + $0xc94] sm:$0xf0]  ;;  %v698_v22 = vadd.f32 %v9344_v29, %v9326_v19 }
 0x1aa   : > { %3781 = vmatpush.bf16.msra.mxu0 %v6634_v51  ;;  %v6867_v51 = vld [vmem:[%s11998_s1 + $0xdd8] sm:$0xf0] }
 0x1ab   : > { %3795 = vmatpush.bf16.msra.mxu1 %v6762_v40  ;;  %3809 = vmatpush.bf16.msra.mxu2 %v6638_v1  ;;  %v6742_v40 = vor.u32 %v7814_v16, %v6739_v17  ;;  %v6721_v1 = vld [vmem:[%s11998_s1 + $0xca8] sm:$0xf]  ;;  %v6870_v43 = vor.u32 %v7846_v12, %v6867_v51  ;;  %v6854_v16 = vor.u32 %v7842_v53, %v6851_v61  ;;  %v7840_v17 = vld [vmem:[%s11998_s1 + $0xd94] sm:$0xf0]  ;;  %v7806_v12 = vld [vmem:[%s11998_s1 + $0xc8c] sm:$0xf] }
 0x1ac   : > { %3823 = vmatpush.bf16.msra.mxu3 %v6766_v59  ;;  %v7810_v59 = vld [vmem:[%s11998_s1 + $0xcac] sm:$0xf]  ;;  %v6707_v51 = vld [vmem:[%s11998_s1 + $0xc98] sm:$0xf0]  ;;  %v1118_v29 = vadd.f32 %v9721_v41, %v698_v22  ;;  %v6817_v41 = vld [vmem:[%s11998_s1 + $0xd68] sm:$0xf] }
 0x1ad   : > { %3782 = vmatmul.bf16.vlgmr.msra.gmra.mxu0 %v10831_v6  ;;  %v6835_v19 = vld [vmem:[%s11998_s1 + $0xd98] sm:$0xf0]  ;;  %v7836_v61 = vld [vmem:[%s11998_s1 + $0xd74] sm:$0xf0] }
 0x1ae   : > { %3830 = vmatpush.bf16.msrb.mxu0 %v6754_v3  ;;  %v6723_v3 = vld [vmem:[%s11998_s1 + $0xcb8] sm:$0xf0]  ;;  %3796 = vmatmul.bf16.vlgmr.msra.gmra.mxu1 %v10840_v10 }
 0x1af   : > { %3844 = vmatpush.bf16.msrb.mxu1 %v6882_v37  ;;  %3858 = vmatpush.bf16.msrb.mxu2 %v6758_v42  ;;  %v6722_v37 = vor.u32 %v7812_v45, %v6721_v1  ;;  %v6850_v42 = vor.u32 %v7844_v54, %v6849_v62  ;;  %v6726_v31 = vor.u32 %v7810_v59, %v6723_v3  ;;  %v6689_v54 = vld [vmem:[%s11998_s1 + $0xc68] sm:$0xf]  ;;  %v7804_v59 = vld [vmem:[%s11998_s1 + $0xc74] sm:$0xf0] }
 0x1b0   : > { %3872 = vmatpush.bf16.msrb.mxu3 %v6886_v4  ;;  %3810 = vmatmul.bf16.vlgmr.msra.gmra.mxu2 %v10831_v6  ;;  %v6833_v4 = vld [vmem:[%s11998_s1 + $0xd88] sm:$0xf]  ;;  %v6706_v1 = vor.u32 %v7808_v2, %v6705_v36  ;;  %v1653_v3 = vadd.f32 %v10171_v46, %v10163_v32  ;;  %v7834_v32 = vld [vmem:[%s11998_s1 + $0xd6c] sm:$0xf]  ;;  %v6819_v46 = vld [vmem:[%s11998_s1 + $0xd78] sm:$0xf0]  ;;  %v1132_v36 = vadd.f32 %v9729_v47, %v1118_v29 }
 0x1b1   : > { %3824 = vmatmul.bf16.vlgmr.msra.gmra.mxu3 %v10840_v10  ;;  %v6834_v62 = vor.u32 %v7840_v17, %v6833_v4  ;;  %v6690_v2 = vor.u32 %v7804_v59, %v6689_v54  ;;  %v6818_v4 = vor.u32 %v7836_v61, %v6817_v41  ;;  %v6801_v17 = vld [vmem:[%s11998_s1 + $0xd48] sm:$0xf]  ;;  %v726_v47 = vadd.f32 %v9371_v50, %v9369_v49  ;;  %v6675_v29 = vld [vmem:[%s11998_s1 + $0xc58] sm:$0xf0]  ;;  %v7830_v49 = vld [vmem:[%s11998_s1 + $0xd4c] sm:$0xf] }
 0x1b2   : > { %3831 = vmatpush.bf16.msrb.mxu0 %v6738_v38  ;;  %v2714_v38 = vpop.f32.mrf.mxu0  ;;  %v6803_v50 = vld [vmem:[%s11998_s1 + $0xd58] sm:$0xf0]  ;;  %v6657_v61 = vld [vmem:[%s11998_s1 + $0xc28] sm:$0xf] }
 0x1b3   : > { %3845 = vmatpush.bf16.msrb.mxu1 %v6866_v39  ;;  %3859 = vmatpush.bf16.msrb.mxu2 %v6742_v40  ;;  %v7838_v39 = vld [vmem:[%s11998_s1 + $0xd8c] sm:$0xf]  ;;  %v2728_v40 = vpop.f32.mrf.mxu1 }
 0x1b4   : > { %3873 = vmatpush.bf16.msrb.mxu3 %v6870_v43  ;;  %v2729_v45 = vadd.f32 %v2728_v40, %v2714_v38  ;;  %v6710_v43 = vor.u32 %v7806_v12, %v6707_v51  ;;  %v6838_v53 = vor.u32 %v7838_v39, %v6835_v19  ;;  %v1743_v12 = vadd.f32 %v1653_v3, %v1132_v36  ;;  %v2742_v38 = vpop.f32.mrf.mxu2  ;;  %v7832_v39 = vld [vmem:[%s11998_s1 + $0xd54] sm:$0xf0]  ;;  %v7798_v19 = vld [vmem:[%s11998_s1 + $0xc4c] sm:$0xf]  ;;  %v2756_v40 = vpop.f32.mrf.mxu3 }
 0x1b5   : > { %v6822_v51 = vor.u32 %v7834_v32, %v6819_v46  ;;  %v6802_v3 = vor.u32 %v7832_v39, %v6801_v17  ;;  %v6806_v32 = vor.u32 %v7830_v49, %v6803_v50  ;;  %v7828_v46 = vld [vmem:[%s11998_s1 + $0xd34] sm:$0xf0]  ;;  %v7794_v36 = vld [vmem:[%s11998_s1 + $0xc2c] sm:$0xf]  ;;  %v7001_v50 = vld [vmem:[%s11998_s1 + $0xee0] sm:$0xf] }
 0x1b6   : > { %3832 = vmatpush.bf16.msrb.mxu0 %v6722_v37  ;;  %v7802_v37 = vld [vmem:[%s11998_s1 + $0xc6c] sm:$0xf] }
 0x1b7   : > { %3846 = vmatpush.bf16.msrb.mxu1 %v6850_v42  ;;  %3860 = vmatpush.bf16.msrb.mxu2 %v6726_v31  ;;  %v6691_v42 = vld [vmem:[%s11998_s1 + $0xc78] sm:$0xf0]  ;;  %v10918_v31 = vadd.f32 %v2729_v45, %v10472_v18  ;;  %v6673_v18 = vld [vmem:[%s11998_s1 + $0xc48] sm:$0xf]  ;;  %v1146_v45 = vadd.f32 %v9768_v56, %v726_v47 }
 0x1b8   : > { %3874 = vmatpush.bf16.msrb.mxu3 %v6854_v16  ;;  %v6694_v22 = vor.u32 %v7802_v37, %v6691_v42  ;;  %v7800_v16 = vld [vmem:[%s11998_s1 + $0xc54] sm:$0xf0]  ;;  %v6785_v56 = vld [vmem:[%s11998_s1 + $0xd28] sm:$0xf] }
 0x1b9   : > { %v6674_v59 = vor.u32 %v7800_v16, %v6673_v18  ;;  %v7796_v37 = vld [vmem:[%s11998_s1 + $0xc34] sm:$0xf0]  ;;  %v6641_v18 = vld [vmem:[%s11998_s1 + $0xc08] sm:$0xf]  ;;  %v6786_v17 = vor.u32 %v7828_v46, %v6785_v56  ;;  %v7131_v56 = vld [vmem:[%s11998_s1 + $0xff0] sm:$0xf0] }
 0x1ba   : > { %3833 = vmatpush.bf16.msrb.mxu0 %v6706_v1  ;;  %v2716_v1 = vpop.f32.mrf.mxu0  ;;  %v7792_v16 = vld [vmem:[%s11998_s1 + $0xc14] sm:$0xf0] }
 0x1bb   : > { %3847 = vmatpush.bf16.msrb.mxu1 %v6834_v62  ;;  %3861 = vmatpush.bf16.msrb.mxu2 %v6710_v43  ;;  %v2296_v62 = vadd.f32 %v10504_v63, %v1743_v12  ;;  %v2757_v43 = vadd.f32 %v2756_v40, %v2742_v38  ;;  %v2730_v54 = vpop.f32.mrf.mxu1  ;;  %v1681_v63 = vadd.f32 %v10221_v34, %v10210_v8  ;;  %v7826_v8 = vld [vmem:[%s11998_s1 + $0xd2c] sm:$0xf]  ;;  %v6787_v34 = vld [vmem:[%s11998_s1 + $0xd38] sm:$0xf0]  ;;  %v6769_v12 = vld [vmem:[%s11998_s1 + $0xd08] sm:$0xf] }
 0x1bc   : > { %3875 = vmatpush.bf16.msrb.mxu3 %v6838_v53  ;;  %v2731_v41 = vadd.f32 %v2730_v54, %v2716_v1  ;;  %v6678_v53 = vor.u32 %v7798_v19, %v6675_v29  ;;  %v6790_v39 = vor.u32 %v7826_v8, %v6787_v34  ;;  %v2744_v19 = vpop.f32.mrf.mxu2  ;;  %v6643_v29 = vld [vmem:[%s11998_s1 + $0xc18] sm:$0xf0]  ;;  %v7822_v40 = vld [vmem:[%s11998_s1 + $0xd0c] sm:$0xf]  ;;  %v2758_v49 = vpop.f32.mrf.mxu3  ;;  %v6985_v8 = vld [vmem:[%s11998_s1 + $0xec0] sm:$0xf] }
 0x1bd   : > { %v10967_v42 = vadd.f32 %v2757_v43, %v10516_v0  ;;  %v1160_v0 = vadd.f32 %v9779_v7, %v1146_v45  ;;  %v7824_v7 = vld [vmem:[%s11998_s1 + $0xd14] sm:$0xf0]  ;;  %v6771_v1 = vld [vmem:[%s11998_s1 + $0xd18] sm:$0xf0]  ;;  %v7883_v45 = vld [vmem:[%s11998_s1 + $0xeec] sm:$0xf0]  ;;  %v2759_v54 = vadd.f32 %v2758_v49, %v2744_v19 }
 0x1be   : > { %3834 = vmatpush.bf16.msrb.mxu0 %v6690_v2  ;;  %v6659_v2 = vld [vmem:[%s11998_s1 + $0xc38] sm:$0xf0]  ;;  %v7002_v46 = vor.u32 %v7883_v45, %v7001_v50  ;;  %v7879_v34 = vld [vmem:[%s11998_s1 + $0xecc] sm:$0xf0]  ;;  %v7873_v49 = vld [vmem:[%s11998_s1 + $0xea4] sm:$0xf] }
 0x1bf   : > { %3848 = vmatpush.bf16.msrb.mxu1 %v6818_v4  ;;  %3862 = vmatpush.bf16.msrb.mxu2 %v6694_v22  ;;  %v10978_v4 = vadd.f32 %v2731_v41, %v2296_v62  ;;  %v6658_v22 = vor.u32 %v7796_v37, %v6657_v61  ;;  %v6662_v47 = vor.u32 %v7794_v36, %v6659_v2  ;;  %v7129_v62 = vld [vmem:[%s11998_s1 + $0xfe0] sm:$0xf]  ;;  %v7915_v41 = vld [vmem:[%s11998_s1 + $0xfec] sm:$0xf0]  ;;  %v6971_v50 = vld [vmem:[%s11998_s1 + $0xeb0] sm:$0xf0] }
 0x1c0   : > { %3876 = vmatpush.bf16.msrb.mxu3 %v6822_v51  ;;  %v7790_v51 = vld [vmem:[%s11998_s1 + $0xc0c] sm:$0xf]  ;;  %v1744_v38 = vadd.f32 %v1681_v63, %v1160_v0  ;;  %v6770_v61 = vor.u32 %v7824_v7, %v6769_v12  ;;  %v7130_v36 = vor.u32 %v7915_v41, %v7129_v62  ;;  %v7113_v0 = vld [vmem:[%s11998_s1 + $0xfc0] sm:$0xf]  ;;  %v7115_v12 = vld [vmem:[%s11998_s1 + $0xfd0] sm:$0xf0]  ;;  %v6986_v7 = vor.u32 %v7879_v34, %v6985_v8 }
 0x1c1   : > { %v6646_v37 = vor.u32 %v7790_v51, %v6643_v29  ;;  %v7875_v19 = vld [vmem:[%s11998_s1 + $0xeac] sm:$0xf0]  ;;  %v7097_v29 = vld [vmem:[%s11998_s1 + $0xfa0] sm:$0xf]  ;;  %v7905_v45 = vld [vmem:[%s11998_s1 + $0xfa4] sm:$0xf]  ;;  %v6974_v41 = vor.u32 %v7873_v49, %v6971_v50 }
 0x1c2   : > { %3835 = vmatpush.bf16.msrb.mxu0 %v6674_v59  ;;  %v2297_v43 = vadd.f32 %v10566_v52, %v1744_v38  ;;  %v6642_v59 = vor.u32 %v7792_v16, %v6641_v18  ;;  %v7913_v52 = vld [vmem:[%s11998_s1 + $0xfe4] sm:$0xf]  ;;  %v7911_v18 = vld [vmem:[%s11998_s1 + $0xfcc] sm:$0xf0]  ;;  %v7099_v62 = vld [vmem:[%s11998_s1 + $0xfb0] sm:$0xf0] }
 0x1c3   : > { %3849 = vmatpush.bf16.msrb.mxu1 %v6802_v3  ;;  %3863 = vmatpush.bf16.msrb.mxu2 %v6678_v53  ;;  %v7881_v3 = vld [vmem:[%s11998_s1 + $0xee4] sm:$0xf]  ;;  %v7003_v53 = vld [vmem:[%s11998_s1 + $0xef0] sm:$0xf0]  ;;  %v7114_v51 = vor.u32 %v7911_v18, %v7113_v0  ;;  %v7867_v34 = vld [vmem:[%s11998_s1 + $0xe6c] sm:$0xf0] }
 0x1c4   : > { %3877 = vmatpush.bf16.msrb.mxu3 %v6806_v32  ;;  %v11036_v63 = vadd.f32 %v2759_v54, %v2297_v43  ;;  %v6774_v32 = vor.u32 %v7822_v40, %v6771_v1  ;;  %v7006_v2 = vor.u32 %v7881_v3, %v7003_v53  ;;  %v7877_v16 = vld [vmem:[%s11998_s1 + $0xec4] sm:$0xf]  ;;  %v7907_v1 = vld [vmem:[%s11998_s1 + $0xfac] sm:$0xf0]  ;;  %v754_v54 = vadd.f32 %v9507_v30, %v9487_v20 }
 0x1c5   : > { %v7871_v3 = vld [vmem:[%s11998_s1 + $0xe8c] sm:$0xf0]  ;;  %v7102_v53 = vor.u32 %v7905_v45, %v7099_v62  ;;  %v7869_v30 = vld [vmem:[%s11998_s1 + $0xe84] sm:$0xf]  ;;  %v7051_v45 = vld [vmem:[%s11998_s1 + $0xf50] sm:$0xf0] }
 0x1c6   : > { %3836 = vmatpush.bf16.msrb.mxu0 %v6658_v22  ;;  %v7134_v22 = vor.u32 %v7913_v52, %v7131_v56  ;;  %v7903_v20 = vld [vmem:[%s11998_s1 + $0xf8c] sm:$0xf0]  ;;  %v7901_v56 = vld [vmem:[%s11998_s1 + $0xf84] sm:$0xf] }
 0x1c7   : > { %3850 = vmatpush.bf16.msrb.mxu1 %v6786_v17  ;;  %3864 = vmatpush.bf16.msrb.mxu2 %v6662_v47  ;;  %v6987_v17 = vld [vmem:[%s11998_s1 + $0xed0] sm:$0xf0]  ;;  %v7909_v47 = vld [vmem:[%s11998_s1 + $0xfc4] sm:$0xf] }
 0x1c8   : > { %3878 = vmatpush.bf16.msrb.mxu3 %v6790_v39  ;;  %v6990_v38 = vor.u32 %v7877_v16, %v6987_v17  ;;  %v6969_v39 = vld [vmem:[%s11998_s1 + $0xea0] sm:$0xf]  ;;  %v7118_v40 = vor.u32 %v7909_v47, %v7115_v12  ;;  %v6939_v17 = vld [vmem:[%s11998_s1 + $0xe70] sm:$0xf0]  ;;  %v7897_v47 = vld [vmem:[%s11998_s1 + $0xf64] sm:$0xf] }
 0x1c9   : > { %v6970_v43 = vor.u32 %v7875_v19, %v6969_v39  ;;  %v7067_v12 = vld [vmem:[%s11998_s1 + $0xf70] sm:$0xf0]  ;;  %v11159_v39 = vld [vmem:[%s11998_s1 + $0xf40] sm:$0xf]  ;;  %v7893_v50 = vld [vmem:[%s11998_s1 + $0xf44] sm:$0xf] }
 0x1ca   : > { %3837 = vmatpush.bf16.msrb.mxu0 %v6642_v59  ;;  %v7098_v59 = vor.u32 %v7907_v1, %v7097_v29  ;;  %v2770_v52 = vpop.f32.mrf.mxu0  ;;  %v6923_v29 = vld [vmem:[%s11998_s1 + $0xe50] sm:$0xf0] }
 0x1cb   : > { %3851 = vmatpush.bf16.msrb.mxu1 %v6770_v61  ;;  %3865 = vmatpush.bf16.msrb.mxu2 %v6646_v37  ;;  %v6955_v61 = vld [vmem:[%s11998_s1 + $0xe90] sm:$0xf0]  ;;  %v1174_v37 = vadd.f32 %v9947_v5, %v754_v54  ;;  %v6937_v5 = vld [vmem:[%s11998_s1 + $0xe60] sm:$0xf]  ;;  %v7070_v54 = vor.u32 %v7897_v47, %v7067_v12 }
 0x1cc   : > { %3879 = vmatpush.bf16.msrb.mxu3 %v6774_v32  ;;  %v7083_v32 = vld [vmem:[%s11998_s1 + $0xf90] sm:$0xf0]  ;;  %v6958_v18 = vor.u32 %v7869_v30, %v6955_v61  ;;  %v6938_v19 = vor.u32 %v7867_v34, %v6937_v5  ;;  %v6905_v30 = vld [vmem:[%s11998_s1 + $0xe20] sm:$0xf]  ;;  %v3968_v5 = vshrl.u32 %v10765_v26, 16  ;;  %v3971_v34 = vshll.u32 %v10765_v26, 16 }
 0x1cd   : > { %3838 = vmatmul.bf16.vlgmr.msrb.gmra.mxu0 %v10831_v6  ;;  %v7086_v16 = vor.u32 %v7901_v56, %v7083_v32  ;;  %v6907_v56 = vld [vmem:[%s11998_s1 + $0xe30] sm:$0xf0]  ;;  %v11208_v32 = vld [vmem:[%s11998_s1 + $0xf24] sm:$0xf]  ;;  %v3988_v26 = vshll.u32 %v10780_v58, 16 }
 0x1ce   : > { %4315 = vmatpush.bf16.msra.mxu0 %v7002_v46  ;;  %3852 = vmatmul.bf16.vlgmr.msrb.gmra.mxu1 %v10840_v10  ;;  %v782_v46 = vadd.f32 %v9551_v27, %v9549_v55  ;;  %v7065_v55 = vld [vmem:[%s11998_s1 + $0xf60] sm:$0xf]  ;;  %v7899_v27 = vld [vmem:[%s11998_s1 + $0xf6c] sm:$0xf0] }
 0x1cf   : > { %4329 = vmatpush.bf16.msra.mxu1 %v7130_v36  ;;  %4343 = vmatpush.bf16.msra.mxu2 %v7006_v2  ;;  %v1709_v36 = vadd.f32 %v10392_v9, %v10381_v35  ;;  %v2784_v2 = vpop.f32.mrf.mxu1  ;;  %v7865_v35 = vld [vmem:[%s11998_s1 + $0xe64] sm:$0xf]  ;;  %v7066_v1 = vor.u32 %v7899_v27, %v7065_v55  ;;  %v3980_v55 = vshll.u32 %v10778_v15, 16  ;;  %v3985_v27 = vshrl.u32 %v10780_v58, 16 }
 0x1d0   : > { %4357 = vmatpush.bf16.msra.mxu3 %v7134_v22  ;;  %3866 = vmatmul.bf16.vlgmr.msrb.gmra.mxu2 %v10831_v6  ;;  %v6953_v6 = vld [vmem:[%s11998_s1 + $0xe80] sm:$0xf]  ;;  %v2785_v0 = vadd.f32 %v2784_v2, %v2770_v52  ;;  %v1202_v9 = vadd.f32 %v10000_v48, %v782_v46  ;;  %v6942_v49 = vor.u32 %v7865_v35, %v6939_v17  ;;  %v3960_v46 = vshrl.u32 %v10763_v14, 16  ;;  %v7853_v17 = vld [vmem:[%s11998_s1 + $0xe04] sm:$0xf] }
 0x1d1   : > { %3880 = vmatmul.bf16.vlgmr.msrb.gmra.mxu3 %v10840_v10  ;;  %v7081_v10 = vld [vmem:[%s11998_s1 + $0xf80] sm:$0xf]  ;;  %v6954_v8 = vor.u32 %v7871_v3, %v6953_v6  ;;  %v7054_v52 = vor.u32 %v7893_v50, %v7051_v45  ;;  %v3982_v50 = vrot.slane %v3980_v55, 2  ;;  %v3987_v45 = vrot.slane %v3985_v27, 1  ;;  %v7910_v55 = vld [vmem:[%s11998_s1 + $0xfcc] sm:$0xf] }
 0x1d2   : > { %4316 = vmatpush.bf16.msra.mxu0 %v6986_v7  ;;  %v7082_v22 = vor.u32 %v7903_v20, %v7081_v10  ;;  %v1188_v7 = vadd.f32 %v9958_v11, %v1174_v37  ;;  %v6921_v48 = vld [vmem:[%s11998_s1 + $0xe40] sm:$0xf]  ;;  %v7895_v11 = vld [vmem:[%s11998_s1 + $0xf4c] sm:$0xf0]  ;;  %v1216_v62 = vadd.f32 %v10011_v57, %v1202_v9  ;;  %v2772_v3 = vpop.f32.mrf.mxu0  ;;  %v7123_v27 = vld [vmem:[%s11998_s1 + $0xfd8] sm:$0xf0] }
 0x1d3   : > { %4330 = vmatpush.bf16.msra.mxu1 %v7114_v51  ;;  %4344 = vmatpush.bf16.msra.mxu2 %v6990_v38  ;;  %v11148_v51 = vadd.f32 %v2785_v0, %v10681_v33  ;;  %v7863_v38 = vld [vmem:[%s11998_s1 + $0xe4c] sm:$0xf0]  ;;  %v7861_v33 = vld [vmem:[%s11998_s1 + $0xe44] sm:$0xf]  ;;  %v3977_v0 = vshrl.u32 %v10778_v15, 16 }
 0x1d4   : > { %4358 = vmatpush.bf16.msra.mxu3 %v7118_v40  ;;  %v1745_v40 = vadd.f32 %v1709_v36, %v1188_v7  ;;  %v2812_v6 = vpop.f32.mrf.mxu3  ;;  %v6922_v10 = vor.u32 %v7863_v38, %v6921_v48  ;;  %v6926_v20 = vor.u32 %v7861_v33, %v6923_v29  ;;  %v7859_v57 = vld [vmem:[%s11998_s1 + $0xe2c] sm:$0xf0]  ;;  %v3963_v36 = vshll.u32 %v10763_v14, 16  ;;  %v6889_v14 = vld [vmem:[%s11998_s1 + $0xe00] sm:$0xf] }
 0x1d5   : > { %v6906_v15 = vor.u32 %v7859_v57, %v6905_v30  ;;  %v6891_v7 = vld [vmem:[%s11998_s1 + $0xe10] sm:$0xf0]  ;;  %v7885_v48 = vld [vmem:[%s11998_s1 + $0xf04] sm:$0xf]  ;;  %v3970_v33 = vrot.slane %v3968_v5, 1  ;;  %v3973_v29 = vrot.slane %v3971_v34, 2 }
 0x1d6   : > { %4317 = vmatpush.bf16.msra.mxu0 %v6970_v43  ;;  %v1737_v43 = vadd.f32 %v10445_v60, %v10434_v13  ;;  %v11190_v13 = vld [vmem:[%s11998_s1 + $0xf20] sm:$0xf]  ;;  %v11195_v60 = vld [vmem:[%s11998_s1 + $0xf2c] sm:$0xf0]  ;;  %v7019_v38 = vld [vmem:[%s11998_s1 + $0xf10] sm:$0xf0] }
 0x1d7   : > { %4331 = vmatpush.bf16.msra.mxu1 %v7098_v59  ;;  %4345 = vmatpush.bf16.msra.mxu2 %v6974_v41  ;;  %v2798_v59 = vpop.f32.mrf.mxu2  ;;  %v2298_v41 = vadd.f32 %v10718_v23, %v1745_v40  ;;  %v11200_v23 = vld [vmem:[%s11998_s1 + $0xe24] sm:$0xf]  ;;  %v2786_v37 = vpop.f32.mrf.mxu1  ;;  %v7034_v58 = vor.u32 %v11195_v60, %v11190_v13  ;;  %v7882_v30 = vld [vmem:[%s11998_s1 + $0xeec] sm:$0xf]  ;;  %v7139_v60 = vld [vmem:[%s11998_s1 + $0xff8] sm:$0xf0] }
 0x1d8   : > { %4359 = vmatpush.bf16.msra.mxu3 %v7102_v53  ;;  %v7050_v53 = vor.u32 %v7895_v11, %v11159_v39  ;;  %v2813_v61 = vadd.f32 %v2812_v6, %v2798_v59  ;;  %v2787_v2 = vadd.f32 %v2786_v37, %v2772_v3  ;;  %v1746_v35 = vadd.f32 %v1737_v43, %v1216_v62  ;;  %v7009_v39 = vld [vmem:[%s11998_s1 + $0xee8] sm:$0xf]  ;;  %v7914_v13 = vld [vmem:[%s11998_s1 + $0xfec] sm:$0xf]  ;;  %v7912_v34 = vld [vmem:[%s11998_s1 + $0xfd4] sm:$0xf0] }
 0x1d9   : > { %v6910_v47 = vor.u32 %v11200_v23, %v6907_v56  ;;  %v3965_v11 = vrot.slane %v3963_v36, 2  ;;  %v3990_v62 = vrot.slane %v3988_v26, 2  ;;  %v6993_v36 = vld [vmem:[%s11998_s1 + $0xec8] sm:$0xf]  ;;  %v7142_v5 = vor.u32 %v7914_v13, %v7139_v60  ;;  %v7900_v13 = vld [vmem:[%s11998_s1 + $0xf74] sm:$0xf0] }
 0x1da   : > { %4318 = vmatpush.bf16.msra.mxu0 %v6954_v8  ;;  %v7035_v8 = vld [vmem:[%s11998_s1 + $0xf30] sm:$0xf0]  ;;  %v11230_v9 = vadd.f32 %v2787_v2, %v2298_v41  ;;  %v2299_v43 = vadd.f32 %v10791_v21, %v1746_v35  ;;  %v7137_v41 = vld [vmem:[%s11998_s1 + $0xfe8] sm:$0xf]  ;;  %v7011_v21 = vld [vmem:[%s11998_s1 + $0xef8] sm:$0xf0] }
 0x1db   : > { %4332 = vmatpush.bf16.msra.mxu1 %v7082_v22  ;;  %4346 = vmatpush.bf16.msra.mxu2 %v6958_v18  ;;  %v11219_v22 = vadd.f32 %v2813_v61, %v10731_v28  ;;  %v7855_v18 = vld [vmem:[%s11998_s1 + $0xe0c] sm:$0xf0]  ;;  %v7017_v28 = vld [vmem:[%s11998_s1 + $0xf00] sm:$0xf]  ;;  %v7038_v12 = vor.u32 %v11208_v32, %v7035_v8  ;;  %v3974_v61 = vor.u32 %v3973_v29, %v3970_v33  ;;  %v7880_v2 = vld [vmem:[%s11998_s1 + $0xed4] sm:$0xf0] }
 0x1dc   : > { %4360 = vmatpush.bf16.msra.mxu3 %v7086_v16  ;;  %v7887_v16 = vld [vmem:[%s11998_s1 + $0xf0c] sm:$0xf0]  ;;  %v6890_v59 = vor.u32 %v7855_v18, %v6889_v14  ;;  %v3991_v56 = vor.u32 %v3990_v62, %v3987_v45  ;;  %v7121_v8 = vld [vmem:[%s11998_s1 + $0xfc8] sm:$0xf]  ;;  %v6995_v14 = vld [vmem:[%s11998_s1 + $0xed8] sm:$0xf0]  ;;  %v6994_v35 = vor.u32 %v7880_v2, %v6993_v36 }
 0x1dd   : > { %v7018_v3 = vor.u32 %v7887_v16, %v7017_v28  ;;  %v7122_v28 = vor.u32 %v7912_v34, %v7121_v8  ;;  %v6961_v29 = vld [vmem:[%s11998_s1 + $0xe88] sm:$0xf]  ;;  %v7870_v45 = vld [vmem:[%s11998_s1 + $0xe8c] sm:$0xf]  ;;  %v6963_v62 = vld [vmem:[%s11998_s1 + $0xe98] sm:$0xf0] }
 0x1de   : > { %4319 = vmatpush.bf16.msra.mxu0 %v6938_v19  ;;  %v3962_v19 = vrot.slane %v3960_v46, 1  ;;  %v7014_v46 = vor.u32 %v7882_v30, %v7011_v21  ;;  %v7868_v30 = vld [vmem:[%s11998_s1 + $0xe74] sm:$0xf0]  ;;  %v7073_v21 = vld [vmem:[%s11998_s1 + $0xf68] sm:$0xf] }
 0x1df   : > { %4333 = vmatpush.bf16.msra.mxu1 %v7066_v1  ;;  %4347 = vmatpush.bf16.msra.mxu2 %v6942_v49  ;;  %v2800_v40 = vpop.f32.mrf.mxu2  ;;  %v7884_v1 = vld [vmem:[%s11998_s1 + $0xef4] sm:$0xf0]  ;;  %v3979_v49 = vrot.slane %v3977_v0, 1  ;;  %v7878_v0 = vld [vmem:[%s11998_s1 + $0xecc] sm:$0xf] }
 0x1e0   : > { %4361 = vmatpush.bf16.msra.mxu3 %v7070_v54  ;;  %v2814_v54 = vpop.f32.mrf.mxu3  ;;  %v7010_v57 = vor.u32 %v7884_v1, %v7009_v39  ;;  %v3966_v23 = vor.u32 %v3965_v11, %v3962_v19  ;;  %v6998_v16 = vor.u32 %v7878_v0, %v6995_v14  ;;  %v7107_v39 = vld [vmem:[%s11998_s1 + $0xfb8] sm:$0xf0]  ;;  %v7089_v1 = vld [vmem:[%s11998_s1 + $0xf88] sm:$0xf]  ;;  %v7866_v60 = vld [vmem:[%s11998_s1 + $0xe6c] sm:$0xf] }
 0x1e1   : > { %v2815_v6 = vadd.f32 %v2814_v54, %v2800_v40  ;;  %v7872_v40 = vld [vmem:[%s11998_s1 + $0xe94] sm:$0xf0]  ;;  %v7902_v54 = vld [vmem:[%s11998_s1 + $0xf8c] sm:$0xf]  ;;  %v6929_v2 = vld [vmem:[%s11998_s1 + $0xe48] sm:$0xf] }
 0x1e2   : > { %4320 = vmatpush.bf16.msra.mxu0 %v6922_v10  ;;  %v6894_v10 = vor.u32 %v7853_v17, %v6891_v7  ;;  %v11300_v18 = vsel %vm3958_vm4, %v3966_v23, %v3974_v61  ;;  %v6977_v17 = vld [vmem:[%s11998_s1 + $0xea8] sm:$0xf]  ;;  %v7874_v7 = vld [vmem:[%s11998_s1 + $0xeac] sm:$0xf]  ;;  %v6947_v23 = vld [vmem:[%s11998_s1 + $0xe78] sm:$0xf0] }
 0x1e3   : > { %4334 = vmatpush.bf16.msra.mxu1 %v7050_v53  ;;  %4348 = vmatpush.bf16.msra.mxu2 %v6926_v20  ;;  %v7022_v53 = vor.u32 %v7885_v48, %v7019_v38  ;;  %v7916_v20 = vld [vmem:[%s11998_s1 + $0xff4] sm:$0xf0]  ;;  %v11279_v37 = vadd.f32 %v2815_v6, %v2299_v43  ;;  %v6979_v48 = vld [vmem:[%s11998_s1 + $0xeb8] sm:$0xf0]  ;;  %v7906_v38 = vld [vmem:[%s11998_s1 + $0xfac] sm:$0xf]  ;;  %v6962_v6 = vor.u32 %v7872_v40, %v6961_v29 }
 0x1e4   : > { %4362 = vmatpush.bf16.msra.mxu3 %v7054_v52  ;;  %v3983_v52 = vor.u32 %v3982_v50, %v3979_v49  ;;  %v7138_v32 = vor.u32 %v7916_v20, %v7137_v41  ;;  %v6982_v33 = vor.u32 %v7874_v7, %v6979_v48  ;;  %v7110_v49 = vor.u32 %v7906_v38, %v7107_v39  ;;  %v7904_v50 = vld [vmem:[%s11998_s1 + $0xf94] sm:$0xf0]  ;;  %v6945_v20 = vld [vmem:[%s11998_s1 + $0xe68] sm:$0xf]  ;;  %v7862_v14 = vld [vmem:[%s11998_s1 + $0xe4c] sm:$0xf] }
 0x1e5   : > { %v6950_v36 = vor.u32 %v7866_v60, %v6947_v23  ;;  %v7057_v8 = vld [vmem:[%s11998_s1 + $0xf48] sm:$0xf]  ;;  %v7896_v0 = vld [vmem:[%s11998_s1 + $0xf54] sm:$0xf0]  ;;  %v7858_v29 = vld [vmem:[%s11998_s1 + $0xe2c] sm:$0xf] }
 0x1e6   : > { %4321 = vmatpush.bf16.msra.mxu0 %v6906_v15  ;;  %v11309_v26 = vsel %vm3958_vm4, %v3983_v52, %v3991_v56  ;;  %v7876_v15 = vld [vmem:[%s11998_s1 + $0xeb4] sm:$0xf0]  ;;  %v7898_v52 = vld [vmem:[%s11998_s1 + $0xf6c] sm:$0xf]  ;;  %v7075_v56 = vld [vmem:[%s11998_s1 + $0xf78] sm:$0xf0] }
 0x1e7   : > { %4335 = vmatpush.bf16.msra.mxu1 %v7034_v58  ;;  %4349 = vmatpush.bf16.msra.mxu2 %v6910_v47  ;;  %v7105_v58 = vld [vmem:[%s11998_s1 + $0xfa8] sm:$0xf]  ;;  %v7126_v47 = vor.u32 %v7910_v55, %v7123_v27  ;;  %v6978_v19 = vor.u32 %v7876_v15, %v6977_v17  ;;  %v6931_v55 = vld [vmem:[%s11998_s1 + $0xe58] sm:$0xf0]  ;;  %v7860_v38 = vld [vmem:[%s11998_s1 + $0xe34] sm:$0xf0] }
 0x1e8   : > { %4363 = vmatpush.bf16.msra.mxu3 %v7038_v12  ;;  %v7908_v12 = vld [vmem:[%s11998_s1 + $0xfb4] sm:$0xf0]  ;;  %v6934_v7 = vor.u32 %v7862_v14, %v6931_v55  ;;  %v6913_v48 = vld [vmem:[%s11998_s1 + $0xe28] sm:$0xf]  ;;  %v6915_v40 = vld [vmem:[%s11998_s1 + $0xe38] sm:$0xf0] }
 0x1e9   : > { %v7106_v11 = vor.u32 %v7908_v12, %v7105_v58  ;;  %v7058_v12 = vor.u32 %v7896_v0, %v7057_v8  ;;  %v7041_v39 = vld [vmem:[%s11998_s1 + $0xf28] sm:$0xf]  ;;  %v7241_v55 = vld [vmem:[%s11998_s1 + $0x10c0] sm:$0xf] }
 0x1ea   : > { %4322 = vmatpush.bf16.msra.mxu0 %v6890_v59  ;;  %v3255_v43 = vpop.f32.mrf.mxu0  ;;  %v7091_v59 = vld [vmem:[%s11998_s1 + $0xf98] sm:$0xf0] }
 0x1eb   : > { %4336 = vmatpush.bf16.msra.mxu1 %v7018_v3  ;;  %4350 = vmatpush.bf16.msra.mxu2 %v6894_v10  ;;  %v3269_v41 = vpop.f32.mrf.mxu1  ;;  %v7090_v10 = vor.u32 %v7904_v50, %v7089_v1  ;;  %v6914_v50 = vor.u32 %v7860_v38, %v6913_v48  ;;  %v7225_v48 = vld [vmem:[%s11998_s1 + $0x10a0] sm:$0xf]  ;;  %v7939_v38 = vld [vmem:[%s11998_s1 + $0x10ac] sm:$0xf0] }
 0x1ec   : > { %4364 = vmatpush.bf16.msra.mxu3 %v7022_v53  ;;  %v3270_v3 = vadd.f32 %v3269_v41, %v3255_v43  ;;  %v6966_v53 = vor.u32 %v7870_v45, %v6963_v62  ;;  %v6897_v45 = vld [vmem:[%s11998_s1 + $0xe08] sm:$0xf]  ;;  %v7856_v62 = vld [vmem:[%s11998_s1 + $0xe14] sm:$0xf0]  ;;  %v6918_v43 = vor.u32 %v7858_v29, %v6915_v40  ;;  %v7854_v41 = vld [vmem:[%s11998_s1 + $0xe0c] sm:$0xf] }
 0x1ed   : > { %4323 = vmatmul.bf16.vlgmr.msra.gmra.mxu0 %v11300_v18  ;;  %v6898_v23 = vor.u32 %v7856_v62, %v6897_v45  ;;  %v7937_v29 = vld [vmem:[%s11998_s1 + $0x10a4] sm:$0xf]  ;;  %v7227_v40 = vld [vmem:[%s11998_s1 + $0x10b0] sm:$0xf0] }
 0x1ee   : > { %4371 = vmatpush.bf16.msrb.mxu0 %v7010_v57  ;;  %4337 = vmatmul.bf16.vlgmr.msra.gmra.mxu1 %v11309_v26  ;;  %v7094_v57 = vor.u32 %v7902_v54, %v7091_v59  ;;  %v11382_v61 = vadd.f32 %v3270_v3, %v10918_v31  ;;  %v7864_v31 = vld [vmem:[%s11998_s1 + $0xe54] sm:$0xf0]  ;;  %v7025_v54 = vld [vmem:[%s11998_s1 + $0xf08] sm:$0xf]  ;;  %v7230_v62 = vor.u32 %v7937_v29, %v7227_v40 }
 0x1ef   : > { %4385 = vmatpush.bf16.msrb.mxu1 %v7138_v32  ;;  %4399 = vmatpush.bf16.msrb.mxu2 %v7014_v46  ;;  %v6946_v32 = vor.u32 %v7868_v30, %v6945_v20  ;;  %v7074_v46 = vor.u32 %v7900_v13, %v7073_v21  ;;  %v6930_v58 = vor.u32 %v7864_v31, %v6929_v2  ;;  %v7888_v59 = vld [vmem:[%s11998_s1 + $0xf14] sm:$0xf0]  ;;  %v7027_v20 = vld [vmem:[%s11998_s1 + $0xf18] sm:$0xf0]  ;;  %v7257_v21 = vld [vmem:[%s11998_s1 + $0x10e0] sm:$0xf] }
 0x1f0   : > { %4413 = vmatpush.bf16.msrb.mxu3 %v7142_v5  ;;  %4351 = vmatmul.bf16.vlgmr.msra.gmra.mxu2 %v11300_v18  ;;  %v7078_v5 = vor.u32 %v7898_v52, %v7075_v56  ;;  %v7385_v13 = vld [vmem:[%s11998_s1 + $0x11e0] sm:$0xf]  ;;  %v7979_v52 = vld [vmem:[%s11998_s1 + $0x11ec] sm:$0xf0]  ;;  %v7945_v56 = vld [vmem:[%s11998_s1 + $0x10e4] sm:$0xf] }
 0x1f1   : > { %4365 = vmatmul.bf16.vlgmr.msra.gmra.mxu3 %v11309_v26  ;;  %v7977_v2 = vld [vmem:[%s11998_s1 + $0x11e4] sm:$0xf]  ;;  %v7387_v31 = vld [vmem:[%s11998_s1 + $0x11f0] sm:$0xf0]  ;;  %v7386_v0 = vor.u32 %v7979_v52, %v7385_v13  ;;  %v7193_v13 = vld [vmem:[%s11998_s1 + $0x1060] sm:$0xf] }
 0x1f2   : > { %4372 = vmatpush.bf16.msrb.mxu0 %v6994_v35  ;;  %v3257_v35 = vpop.f32.mrf.mxu0 }
 0x1f3   : > { %4386 = vmatpush.bf16.msrb.mxu1 %v7122_v28  ;;  %4400 = vmatpush.bf16.msrb.mxu2 %v6998_v16  ;;  %v3283_v34 = vpop.f32.mrf.mxu2  ;;  %v7894_v28 = vld [vmem:[%s11998_s1 + $0xf4c] sm:$0xf]  ;;  %v7059_v16 = vld [vmem:[%s11998_s1 + $0xf58] sm:$0xf0]  ;;  %v3271_v15 = vpop.f32.mrf.mxu1 }
 0x1f4   : > { %4414 = vmatpush.bf16.msrb.mxu3 %v7126_v47  ;;  %v3297_v27 = vpop.f32.mrf.mxu3  ;;  %v3272_v47 = vadd.f32 %v3271_v15, %v3257_v35  ;;  %v7369_v35 = vld [vmem:[%s11998_s1 + $0x11c0] sm:$0xf]  ;;  %v7973_v15 = vld [vmem:[%s11998_s1 + $0x11c4] sm:$0xf] }
 0x1f5   : > { %v3298_v17 = vadd.f32 %v3297_v27, %v3283_v34  ;;  %v7943_v27 = vld [vmem:[%s11998_s1 + $0x10cc] sm:$0xf0] }
 0x1f6   : > { %4373 = vmatpush.bf16.msrb.mxu0 %v6978_v19  ;;  %v11436_v1 = vadd.f32 %v3272_v47, %v10978_v4  ;;  %v7242_v47 = vor.u32 %v7943_v27, %v7241_v55  ;;  %v7305_v55 = vld [vmem:[%s11998_s1 + $0x1140] sm:$0xf]  ;;  %v7959_v27 = vld [vmem:[%s11998_s1 + $0x114c] sm:$0xf0] }
 0x1f7   : > { %4387 = vmatpush.bf16.msrb.mxu1 %v7106_v11  ;;  %4401 = vmatpush.bf16.msrb.mxu2 %v6982_v33  ;;  %v11424_v19 = vadd.f32 %v3298_v17, %v10967_v42  ;;  %v7062_v11 = vor.u32 %v7894_v28, %v7059_v16  ;;  %v7892_v33 = vld [vmem:[%s11998_s1 + $0xf34] sm:$0xf0]  ;;  %v7890_v42 = vld [vmem:[%s11998_s1 + $0xf2c] sm:$0xf]  ;;  %v7390_v28 = vor.u32 %v7977_v2, %v7387_v31  ;;  %v7941_v16 = vld [vmem:[%s11998_s1 + $0x10c4] sm:$0xf] }
 0x1f8   : > { %4415 = vmatpush.bf16.msrb.mxu3 %v7110_v49  ;;  %v7043_v49 = vld [vmem:[%s11998_s1 + $0xf38] sm:$0xf0]  ;;  %v7042_v4 = vor.u32 %v7892_v33, %v7041_v39  ;;  %v7243_v17 = vld [vmem:[%s11998_s1 + $0x10d0] sm:$0xf0]  ;;  %v7353_v39 = vld [vmem:[%s11998_s1 + $0x11a0] sm:$0xf] }
 0x1f9   : > { %v7971_v33 = vld [vmem:[%s11998_s1 + $0x11ac] sm:$0xf0]  ;;  %v7961_v2 = vld [vmem:[%s11998_s1 + $0x1164] sm:$0xf]  ;;  %v7323_v31 = vld [vmem:[%s11998_s1 + $0x1170] sm:$0xf0] }
 0x1fa   : > { %4374 = vmatpush.bf16.msrb.mxu0 %v6962_v6  ;;  %v7046_v6 = vor.u32 %v7890_v42, %v7043_v49  ;;  %v7969_v42 = vld [vmem:[%s11998_s1 + $0x11a4] sm:$0xf]  ;;  %v7355_v49 = vld [vmem:[%s11998_s1 + $0x11b0] sm:$0xf0]  ;;  %v7354_v45 = vor.u32 %v7971_v33, %v7353_v39  ;;  %v7161_v33 = vld [vmem:[%s11998_s1 + $0x1020] sm:$0xf] }
 0x1fb   : > { %4388 = vmatpush.bf16.msrb.mxu1 %v7090_v10  ;;  %4402 = vmatpush.bf16.msrb.mxu2 %v6966_v53  ;;  %v3285_v3 = vpop.f32.mrf.mxu2  ;;  %v6899_v10 = vld [vmem:[%s11998_s1 + $0xe18] sm:$0xf0]  ;;  %v7886_v53 = vld [vmem:[%s11998_s1 + $0xf0c] sm:$0xf] }
 0x1fc   : > { %4416 = vmatpush.bf16.msrb.mxu3 %v7094_v57  ;;  %v3299_v30 = vpop.f32.mrf.mxu3  ;;  %v7947_v57 = vld [vmem:[%s11998_s1 + $0x10ec] sm:$0xf0] }
 0x1fd   : > { %v3300_v60 = vadd.f32 %v3299_v30, %v3285_v3  ;;  %v7258_v34 = vor.u32 %v7947_v57, %v7257_v21  ;;  %v7965_v3 = vld [vmem:[%s11998_s1 + $0x1184] sm:$0xf] }
 0x1fe   : > { %4375 = vmatpush.bf16.msrb.mxu0 %v6946_v32  ;;  %v7259_v32 = vld [vmem:[%s11998_s1 + $0x10f0] sm:$0xf0] }
 0x1ff   : > { %4389 = vmatpush.bf16.msrb.mxu1 %v7074_v46  ;;  %4403 = vmatpush.bf16.msrb.mxu2 %v6950_v36  ;;  %v7026_v46 = vor.u32 %v7888_v59, %v7025_v54  ;;  %v6902_v36 = vor.u32 %v7854_v41, %v6899_v10  ;;  %v11493_v8 = vadd.f32 %v3300_v60, %v11036_v63  ;;  %v7975_v63 = vld [vmem:[%s11998_s1 + $0x11cc] sm:$0xf0]  ;;  %v7933_v59 = vld [vmem:[%s11998_s1 + $0x1084] sm:$0xf]  ;;  %v7211_v41 = vld [vmem:[%s11998_s1 + $0x1090] sm:$0xf0] }
 0x200   : > { %4417 = vmatpush.bf16.msrb.mxu3 %v7078_v5  ;;  %v7030_v5 = vor.u32 %v7886_v53, %v7027_v20  ;;  %v7262_v14 = vor.u32 %v7945_v56, %v7259_v32  ;;  %v7967_v54 = vld [vmem:[%s11998_s1 + $0x118c] sm:$0xf0]  ;;  %v7339_v10 = vld [vmem:[%s11998_s1 + $0x1190] sm:$0xf0]  ;;  %v7214_v57 = vor.u32 %v7933_v59, %v7211_v41  ;;  %v7929_v32 = vld [vmem:[%s11998_s1 + $0x1064] sm:$0xf] }
 0x201   : > { %v7931_v60 = vld [vmem:[%s11998_s1 + $0x106c] sm:$0xf0]  ;;  %v7342_v52 = vor.u32 %v7965_v3, %v7339_v10  ;;  %v7145_v3 = vld [vmem:[%s11998_s1 + $0x1000] sm:$0xf] }
 0x202   : > { %4376 = vmatpush.bf16.msrb.mxu0 %v6930_v58  ;;  %v7371_v58 = vld [vmem:[%s11998_s1 + $0x11d0] sm:$0xf0]  ;;  %v7963_v56 = vld [vmem:[%s11998_s1 + $0x116c] sm:$0xf0] }
 0x203   : > { %4390 = vmatpush.bf16.msrb.mxu1 %v7058_v12  ;;  %4404 = vmatpush.bf16.msrb.mxu2 %v6934_v7  ;;  %v7370_v12 = vor.u32 %v7975_v63, %v7369_v35  ;;  %v7246_v7 = vor.u32 %v7941_v16, %v7243_v17  ;;  %v7925_v35 = vld [vmem:[%s11998_s1 + $0x1044] sm:$0xf]  ;;  %v7179_v16 = vld [vmem:[%s11998_s1 + $0x1050] sm:$0xf0]  ;;  %v4435_v17 = vld [vmem:[%s8348_s6 + $0x8] sm:$0xcc] }
 0x204   : > { %4418 = vmatpush.bf16.msrb.mxu3 %v7062_v11  ;;  %v7374_v11 = vor.u32 %v7973_v15, %v7371_v58  ;;  %v4436_v15 = vld [vmem:[%s8348_s6 + $0x18] sm:$0x33]  ;;  %v7182_v40 = vor.u32 %v7925_v35, %v7179_v16  ;;  %v7978_v16 = vld [vmem:[%s11998_s1 + $0x11ec] sm:$0xf] }
 0x205   : > { %v4506_v59 = vunpack.c.h.b16 %v4436_v15  ;;  %v7980_v35 = vld [vmem:[%s11998_s1 + $0x11f4] sm:$0xf0] }
 0x206   : > { %4377 = vmatpush.bf16.msrb.mxu0 %v6914_v50  ;;  %v7226_v50 = vor.u32 %v7939_v38, %v7225_v48 }
 0x207   : > { %4391 = vmatpush.bf16.msrb.mxu1 %v7042_v4  ;;  %4405 = vmatpush.bf16.msrb.mxu2 %v6918_v43  ;;  %v7935_v4 = vld [vmem:[%s11998_s1 + $0x108c] sm:$0xf0]  ;;  %v7337_v43 = vld [vmem:[%s11998_s1 + $0x1180] sm:$0xf] }
 0x208   : > { %4419 = vmatpush.bf16.msrb.mxu3 %v7046_v6  ;;  %v7338_v21 = vor.u32 %v7967_v54, %v7337_v43  ;;  %v7921_v43 = vld [vmem:[%s11998_s1 + $0x1024] sm:$0xf]  ;;  %v4504_v54 = vunpack.c.h.b16 %v4435_v17 }
 0x20a   : > { %4378 = vmatpush.bf16.msrb.mxu0 %v6898_v23  ;;  %v3311_v6 = vpop.f32.mrf.mxu0  ;;  %v7321_v23 = vld [vmem:[%s11998_s1 + $0x1160] sm:$0xf] }
 0x20b   : > { %4392 = vmatpush.bf16.msrb.mxu1 %v7026_v46  ;;  %4406 = vmatpush.bf16.msrb.mxu2 %v6902_v36  ;;  %v3325_v53 = vpop.f32.mrf.mxu1  ;;  %v7195_v46 = vld [vmem:[%s11998_s1 + $0x1070] sm:$0xf0] }
 0x20c   : > { %4420 = vmatpush.bf16.msrb.mxu3 %v7030_v5  ;;  %v3326_v30 = vadd.f32 %v3325_v53, %v3311_v6  ;;  %v7194_v5 = vor.u32 %v7931_v60, %v7193_v13  ;;  %v7953_v6 = vld [vmem:[%s11998_s1 + $0x1124] sm:$0xf]  ;;  %v7147_v13 = vld [vmem:[%s11998_s1 + $0x1010] sm:$0xf0] }
 0x20d   : > { %4379 = vmatmul.bf16.vlgmr.msrb.gmra.mxu0 %v11300_v18  ;;  %v7949_v60 = vld [vmem:[%s11998_s1 + $0x1104] sm:$0xf] }
 0x20e   : > { %4840 = vmatpush.bf16.msra.mxu0 %v7258_v34  ;;  %4393 = vmatmul.bf16.vlgmr.msrb.gmra.mxu1 %v11309_v26  ;;  %v11590_v36 = vadd.f32 %v3326_v30, %v11148_v51  ;;  %v7177_v34 = vld [vmem:[%s11998_s1 + $0x1040] sm:$0xf]  ;;  %v7927_v51 = vld [vmem:[%s11998_s1 + $0x104c] sm:$0xf0] }
 0x20f   : > { %4854 = vmatpush.bf16.msra.mxu1 %v7386_v0  ;;  %4868 = vmatpush.bf16.msra.mxu2 %v7262_v14  ;;  %v7322_v0 = vor.u32 %v7963_v56, %v7321_v23  ;;  %v7198_v14 = vor.u32 %v7929_v32, %v7195_v46  ;;  %v7178_v39 = vor.u32 %v7927_v51, %v7177_v34  ;;  %v7951_v30 = vld [vmem:[%s11998_s1 + $0x110c] sm:$0xf0]  ;;  %v7275_v46 = vld [vmem:[%s11998_s1 + $0x1110] sm:$0xf0]  ;;  %v7393_v51 = vld [vmem:[%s11998_s1 + $0x11e8] sm:$0xf] }
 0x210   : > { %4882 = vmatpush.bf16.msra.mxu3 %v7390_v28  ;;  %4407 = vmatmul.bf16.vlgmr.msrb.gmra.mxu2 %v11300_v18  ;;  %v7209_v18 = vld [vmem:[%s11998_s1 + $0x1080] sm:$0xf]  ;;  %v7326_v28 = vor.u32 %v7961_v2, %v7323_v31  ;;  %v7265_v2 = vld [vmem:[%s11998_s1 + $0x10e8] sm:$0xf]  ;;  %v7948_v31 = vld [vmem:[%s11998_s1 + $0x10f4] sm:$0xf0] }
 0x211   : > { %4421 = vmatmul.bf16.vlgmr.msrb.gmra.mxu3 %v11309_v26  ;;  %v7358_v26 = vor.u32 %v7969_v42, %v7355_v49  ;;  %v7210_v20 = vor.u32 %v7935_v4, %v7209_v18  ;;  %v7923_v42 = vld [vmem:[%s11998_s1 + $0x102c] sm:$0xf0]  ;;  %v7289_v49 = vld [vmem:[%s11998_s1 + $0x1120] sm:$0xf] }
 0x212   : > { %4841 = vmatpush.bf16.msra.mxu0 %v7242_v47  ;;  %v3313_v47 = vpop.f32.mrf.mxu0  ;;  %v7162_v10 = vor.u32 %v7923_v42, %v7161_v33  ;;  %v7377_v33 = vld [vmem:[%s11998_s1 + $0x11c8] sm:$0xf]  ;;  %v7251_v42 = vld [vmem:[%s11998_s1 + $0x10d8] sm:$0xf0] }
 0x213   : > { %4855 = vmatpush.bf16.msra.mxu1 %v7370_v12  ;;  %4869 = vmatpush.bf16.msra.mxu2 %v7246_v7  ;;  %v3339_v63 = vpop.f32.mrf.mxu2  ;;  %v7957_v12 = vld [vmem:[%s11998_s1 + $0x1144] sm:$0xf]  ;;  %v7307_v7 = vld [vmem:[%s11998_s1 + $0x1150] sm:$0xf0]  ;;  %v3327_v38 = vpop.f32.mrf.mxu1 }
 0x214   : > { %4883 = vmatpush.bf16.msra.mxu3 %v7374_v11  ;;  %v3353_v58 = vpop.f32.mrf.mxu3  ;;  %v7306_v11 = vor.u32 %v7959_v27, %v7305_v55  ;;  %v3328_v29 = vadd.f32 %v3327_v38, %v3313_v47  ;;  %v7310_v4 = vor.u32 %v7957_v12, %v7307_v7 }
 0x215   : > { %v3354_v48 = vadd.f32 %v3353_v58, %v3339_v63  ;;  %v7266_v63 = vor.u32 %v7948_v31, %v7265_v2  ;;  %v7966_v2 = vld [vmem:[%s11998_s1 + $0x118c] sm:$0xf]  ;;  %v7347_v31 = vld [vmem:[%s11998_s1 + $0x1198] sm:$0xf0] }
 0x216   : > { %4842 = vmatpush.bf16.msra.mxu0 %v7226_v50  ;;  %v7955_v50 = vld [vmem:[%s11998_s1 + $0x112c] sm:$0xf0]  ;;  %v11646_v41 = vadd.f32 %v3328_v29, %v11230_v9  ;;  %v7976_v29 = vld [vmem:[%s11998_s1 + $0x11d4] sm:$0xf0] }
 0x217   : > { %4856 = vmatpush.bf16.msra.mxu1 %v7354_v45  ;;  %4870 = vmatpush.bf16.msra.mxu2 %v7230_v62  ;;  %v4503_v45 = vunpack.c.l.b16 %v4435_v17  ;;  %v4505_v62 = vunpack.c.l.b16 %v4436_v15  ;;  %v11637_v18 = vadd.f32 %v3354_v48, %v11219_v22  ;;  %v7291_v22 = vld [vmem:[%s11998_s1 + $0x1130] sm:$0xf0]  ;;  %v7290_v53 = vor.u32 %v7955_v50, %v7289_v49  ;;  %v7919_v9 = vld [vmem:[%s11998_s1 + $0x100c] sm:$0xf0]  ;;  %v7395_v17 = vld [vmem:[%s11998_s1 + $0x11f8] sm:$0xf0] }
 0x218   : > { %4884 = vmatpush.bf16.msra.mxu3 %v7358_v26  ;;  %v7163_v26 = vld [vmem:[%s11998_s1 + $0x1030] sm:$0xf0]  ;;  %v7294_v56 = vor.u32 %v7953_v6, %v7291_v22  ;;  %v7394_v48 = vor.u32 %v7980_v35, %v7393_v51  ;;  %v7974_v50 = vld [vmem:[%s11998_s1 + $0x11cc] sm:$0xf]  ;;  %v7361_v6 = vld [vmem:[%s11998_s1 + $0x11a8] sm:$0xf] }
 0x219   : > { %v4507_v23 = vpack.c.b16 %v3438_v25, %v4503_v45  ;;  %v4510_v25 = vpack.c.b16 %v4506_v59, %v4506_v59  ;;  %v7379_v45 = vld [vmem:[%s11998_s1 + $0x11d8] sm:$0xf0]  ;;  %v7940_v59 = vld [vmem:[%s11998_s1 + $0x10b4] sm:$0xf0]  ;;  %v7201_v51 = vld [vmem:[%s11998_s1 + $0x1068] sm:$0xf] }
 0x21a   : > { %4843 = vmatpush.bf16.msra.mxu0 %v7210_v20  ;;  %v7273_v20 = vld [vmem:[%s11998_s1 + $0x1100] sm:$0xf]  ;;  %v7382_v22 = vor.u32 %v7974_v50, %v7379_v45  ;;  %v7930_v35 = vld [vmem:[%s11998_s1 + $0x106c] sm:$0xf]  ;;  %v7924_v50 = vld [vmem:[%s11998_s1 + $0x1034] sm:$0xf0] }
 0x21b   : > { %4857 = vmatpush.bf16.msra.mxu1 %v7338_v21  ;;  %4871 = vmatpush.bf16.msra.mxu2 %v7214_v57  ;;  %v7166_v21 = vor.u32 %v7921_v43, %v7163_v26  ;;  %v7917_v57 = vld [vmem:[%s11998_s1 + $0x1004] sm:$0xf]  ;;  %v3341_v32 = vpop.f32.mrf.mxu2  ;;  %v7274_v55 = vor.u32 %v7951_v30, %v7273_v20  ;;  %v4512_v15 = vrot.slane %v4507_v23, 2  ;;  %v4516_v7 = vrot.slane %v4510_v25, 2  ;;  %v7363_v20 = vld [vmem:[%s11998_s1 + $0x11b8] sm:$0xf0] }
 0x21c   : > { %4885 = vmatpush.bf16.msra.mxu3 %v7342_v52  ;;  %v4509_v52 = vpack.c.b16 %v4505_v62, %v4505_v62  ;;  %v3355_v34 = vpop.f32.mrf.mxu3  ;;  %v7150_v27 = vor.u32 %v7917_v57, %v7147_v13  ;;  %v7378_v43 = vor.u32 %v7976_v29, %v7377_v33  ;;  %v7217_v13 = vld [vmem:[%s11998_s1 + $0x1088] sm:$0xf]  ;;  %v7315_v33 = vld [vmem:[%s11998_s1 + $0x1158] sm:$0xf0] }
 0x21d   : > { %v7345_v23 = vld [vmem:[%s11998_s1 + $0x1188] sm:$0xf] }
 0x21e   : > { %4844 = vmatpush.bf16.msra.mxu0 %v7194_v5  ;;  %v4508_v5 = vpack.c.b16 %v3439_v44, %v4504_v54  ;;  %v7267_v44 = vld [vmem:[%s11998_s1 + $0x10f8] sm:$0xf0]  ;;  %v4513_v58 = vrot.slane %v4509_v52, 2  ;;  %v7233_v54 = vld [vmem:[%s11998_s1 + $0x10a8] sm:$0xf] }
 0x21f   : > { %4858 = vmatpush.bf16.msra.mxu1 %v7322_v0  ;;  %4872 = vmatpush.bf16.msra.mxu2 %v7198_v14  ;;  %v3356_v0 = vadd.f32 %v3355_v34, %v3341_v32  ;;  %v7146_v14 = vor.u32 %v7919_v9, %v7145_v3  ;;  %v7270_v38 = vor.u32 %v7946_v24, %v7267_v44  ;;  %v7972_v3 = vld [vmem:[%s11998_s1 + $0x11b4] sm:$0xf0]  ;;  %v7970_v9 = vld [vmem:[%s11998_s1 + $0x11ac] sm:$0xf]  ;;  %v7203_v24 = vld [vmem:[%s11998_s1 + $0x1078] sm:$0xf0] }
 0x220   : > { %4886 = vmatpush.bf16.msra.mxu3 %v7326_v28  ;;  %v7278_v28 = vor.u32 %v7949_v60, %v7275_v46  ;;  %v4515_v12 = vrot.slane %v4508_v5, 2  ;;  %v11728_v49 = vsel %vm4511_vm5, %v4512_v15, %v4513_v58  ;;  %v7234_v30 = vor.u32 %v7940_v59, %v7233_v54  ;;  %v7936_v60 = vld [vmem:[%s11998_s1 + $0x1094] sm:$0xf0]  ;;  %v7934_v32 = vld [vmem:[%s11998_s1 + $0x108c] sm:$0xf] }
 0x221   : > { %v11707_v47 = vadd.f32 %v3356_v0, %v11279_v37  ;;  %v7398_v37 = vor.u32 %v7978_v16, %v7395_v17  ;;  %v7366_v52 = vor.u32 %v7970_v9, %v7363_v20  ;;  %v7219_v46 = vld [vmem:[%s11998_s1 + $0x1098] sm:$0xf0]  ;;  %v7218_v5 = vor.u32 %v7936_v60, %v7217_v13  ;;  %v7932_v0 = vld [vmem:[%s11998_s1 + $0x1074] sm:$0xf0]  ;;  %v7962_v44 = vld [vmem:[%s11998_s1 + $0x116c] sm:$0xf] }
 0x222   : > { %4845 = vmatpush.bf16.msra.mxu0 %v7178_v39  ;;  %v7249_v39 = vld [vmem:[%s11998_s1 + $0x10c8] sm:$0xf]  ;;  %v11737_v62 = vsel %vm4511_vm5, %v4515_v12, %v4516_v7  ;;  %v7222_v34 = vor.u32 %v7934_v32, %v7219_v46  ;;  %v7206_v17 = vor.u32 %v7930_v35, %v7203_v24  ;;  %v7928_v58 = vld [vmem:[%s11998_s1 + $0x1054] sm:$0xf0]  ;;  %v7171_v54 = vld [vmem:[%s11998_s1 + $0x1038] sm:$0xf0] }
 0x223   : > { %4859 = vmatpush.bf16.msra.mxu1 %v7306_v11  ;;  %4873 = vmatpush.bf16.msra.mxu2 %v7182_v40  ;;  %v7944_v11 = vld [vmem:[%s11998_s1 + $0x10d4] sm:$0xf0]  ;;  %v7942_v40 = vld [vmem:[%s11998_s1 + $0x10cc] sm:$0xf]  ;;  %v7185_v15 = vld [vmem:[%s11998_s1 + $0x1048] sm:$0xf] }
 0x224   : > { %4887 = vmatpush.bf16.msra.mxu3 %v7310_v4  ;;  %v7250_v4 = vor.u32 %v7944_v11, %v7249_v39  ;;  %v7254_v26 = vor.u32 %v7942_v40, %v7251_v42  ;;  %v7313_v12 = vld [vmem:[%s11998_s1 + $0x1148] sm:$0xf]  ;;  %v7187_v39 = vld [vmem:[%s11998_s1 + $0x1058] sm:$0xf0]  ;;  %v7958_v11 = vld [vmem:[%s11998_s1 + $0x114c] sm:$0xf] }
 0x225   : > { %v7169_v42 = vld [vmem:[%s11998_s1 + $0x1028] sm:$0xf]  ;;  %v7952_v13 = vld [vmem:[%s11998_s1 + $0x1114] sm:$0xf0]  ;;  %v7918_v60 = vld [vmem:[%s11998_s1 + $0x100c] sm:$0xf] }
 0x226   : > { %4846 = vmatpush.bf16.msra.mxu0 %v7162_v10  ;;  %v7938_v10 = vld [vmem:[%s11998_s1 + $0x10ac] sm:$0xf]  ;;  %v7297_v45 = vld [vmem:[%s11998_s1 + $0x1128] sm:$0xf] }
 0x227   : > { %4860 = vmatpush.bf16.msra.mxu1 %v7290_v53  ;;  %4874 = vmatpush.bf16.msra.mxu2 %v7166_v21  ;;  %v7235_v53 = vld [vmem:[%s11998_s1 + $0x10b8] sm:$0xf0]  ;;  %v7362_v21 = vor.u32 %v7972_v3, %v7361_v6  ;;  %v7954_v6 = vld [vmem:[%s11998_s1 + $0x112c] sm:$0xf]  ;;  %v7153_v20 = vld [vmem:[%s11998_s1 + $0x1008] sm:$0xf] }
 0x228   : > { %4888 = vmatpush.bf16.msra.mxu3 %v7294_v56  ;;  %v7238_v57 = vor.u32 %v7938_v10, %v7235_v53  ;;  %v7968_v56 = vld [vmem:[%s11998_s1 + $0x1194] sm:$0xf0]  ;;  %v7170_v10 = vor.u32 %v7924_v50, %v7169_v42 }
 0x229   : > { %v7346_v25 = vor.u32 %v7968_v56, %v7345_v23  ;;  %v7155_v23 = vld [vmem:[%s11998_s1 + $0x1018] sm:$0xf0] }
 0x22a   : > { %4847 = vmatpush.bf16.msra.mxu0 %v7146_v14  ;;  %v7329_v14 = vld [vmem:[%s11998_s1 + $0x1168] sm:$0xf]  ;;  %v11857_v59 = vpop.f32.mrf.mxu0  ;;  %v7283_v56 = vld [vmem:[%s11998_s1 + $0x1118] sm:$0xf0] }
 0x22b   : > { %4861 = vmatpush.bf16.msra.mxu1 %v7274_v55  ;;  %4875 = vmatpush.bf16.msra.mxu2 %v7150_v27  ;;  %v7350_v55 = vor.u32 %v7966_v2, %v7347_v31  ;;  %v7964_v27 = vld [vmem:[%s11998_s1 + $0x1174] sm:$0xf0]  ;;  %v11865_v3 = vpop.f32.mrf.mxu1  ;;  %v7158_v2 = vor.u32 %v7918_v60, %v7155_v23 }
 0x22c   : > { %4889 = vmatpush.bf16.msra.mxu3 %v7278_v28  ;;  %v7331_v28 = vld [vmem:[%s11998_s1 + $0x1178] sm:$0xf0]  ;;  %v7330_v16 = vor.u32 %v7964_v27, %v7329_v14 }
 0x22d   : > { %4848 = vmatmul.bf16.vlgmr.msra.gmra.mxu0 %v11728_v49  ;;  %v7334_v7 = vor.u32 %v7962_v44, %v7331_v28 }
 0x22e   : > { %4896 = vmatpush.bf16.msrb.mxu0 %v7266_v63  ;;  %4862 = vmatmul.bf16.vlgmr.msra.gmra.mxu1 %v11737_v62  ;;  %v7202_v63 = vor.u32 %v7932_v0, %v7201_v51 }
 0x22f   : > { %4910 = vmatpush.bf16.msrb.mxu1 %v7394_v48  ;;  %4924 = vmatpush.bf16.msrb.mxu2 %v7270_v38  ;;  %v7960_v48 = vld [vmem:[%s11998_s1 + $0x1154] sm:$0xf0]  ;;  %v7926_v38 = vld [vmem:[%s11998_s1 + $0x104c] sm:$0xf] }
 0x230   : > { %4938 = vmatpush.bf16.msrb.mxu3 %v7398_v37  ;;  %4876 = vmatmul.bf16.vlgmr.msra.gmra.mxu2 %v11728_v49  ;;  %v7186_v37 = vor.u32 %v7928_v58, %v7185_v15  ;;  %v7314_v29 = vor.u32 %v7960_v48, %v7313_v12  ;;  %v7190_v40 = vor.u32 %v7926_v38, %v7187_v39 }
 0x231   : > { %4890 = vmatmul.bf16.vlgmr.msra.gmra.mxu3 %v11737_v62 }
 0x232   : > { %4897 = vmatpush.bf16.msrb.mxu0 %v7250_v4  ;;  %v7318_v4 = vor.u32 %v7958_v11, %v7315_v33 }
 0x233   : > { %4911 = vmatpush.bf16.msrb.mxu1 %v7378_v43  ;;  %4925 = vmatpush.bf16.msrb.mxu2 %v7254_v26  ;;  %v7956_v43 = vld [vmem:[%s11998_s1 + $0x1134] sm:$0xf0]  ;;  %v7922_v26 = vld [vmem:[%s11998_s1 + $0x102c] sm:$0xf]  ;;  %v3811_v31 = vpop.f32.mrf.mxu2  ;;  %v3799_v51 = vpop.f32.mrf.mxu1 }
 0x234   : > { %4939 = vmatpush.bf16.msrb.mxu3 %v7382_v22  ;;  %v7299_v22 = vld [vmem:[%s11998_s1 + $0x1138] sm:$0xf0]  ;;  %v7298_v53 = vor.u32 %v7956_v43, %v7297_v45  ;;  %v7174_v9 = vor.u32 %v7922_v26, %v7171_v54 }
 0x236   : > { %4898 = vmatpush.bf16.msrb.mxu0 %v7234_v30  ;;  %v7920_v30 = vld [vmem:[%s11998_s1 + $0x1014] sm:$0xf0] }
 0x237   : > { %4912 = vmatpush.bf16.msrb.mxu1 %v7362_v21  ;;  %4926 = vmatpush.bf16.msrb.mxu2 %v7238_v57  ;;  %v7281_v21 = vld [vmem:[%s11998_s1 + $0x1108] sm:$0xf]  ;;  %v7302_v57 = vor.u32 %v7954_v6, %v7299_v22  ;;  %v7154_v32 = vor.u32 %v7920_v30, %v7153_v20  ;;  %v11929_v20 = vld [vmem:[%s11999_s2] sm:$0xf] }
 0x238   : > { %4940 = vmatpush.bf16.msrb.mxu3 %v7366_v52  ;;  %v7950_v52 = vld [vmem:[%s11998_s1 + $0x110c] sm:$0xf]  ;;  %v7282_v46 = vor.u32 %v7952_v13, %v7281_v21 }
 0x23a   : > { %4899 = vmatpush.bf16.msrb.mxu0 %v7218_v5  ;;  %v7286_v5 = vor.u32 %v7950_v52, %v7283_v56 }
 0x23b   : > { %4913 = vmatpush.bf16.msrb.mxu1 %v7346_v25  ;;  %4927 = vmatpush.bf16.msrb.mxu2 %v7222_v34  ;;  %v3825_v25 = vpop.f32.mrf.mxu3  ;;  %v3785_v34 = vpop.f32.mrf.mxu0 }
 0x23c   : > { %4941 = vmatpush.bf16.msrb.mxu3 %v7350_v55  ;;  %v3813_v0 = vpop.f32.mrf.mxu2  ;;  %v3800_v21 = vadd.f32 %v3799_v51, %v3785_v34 }
 0x23e   : > { %4900 = vmatpush.bf16.msrb.mxu0 %v7202_v63  ;;  %v3890_v52 = vadd.f32 %v3800_v21, %v11436_v1 }
 0x23f   : > { %4914 = vmatpush.bf16.msrb.mxu1 %v7330_v16  ;;  %4928 = vmatpush.bf16.msrb.mxu2 %v7206_v17 }
 0x240   : > { %4942 = vmatpush.bf16.msrb.mxu3 %v7334_v7 }
 0x242   : > { %4901 = vmatpush.bf16.msrb.mxu0 %v7186_v37 }
 0x243   : > { %4915 = vmatpush.bf16.msrb.mxu1 %v7314_v29  ;;  %4929 = vmatpush.bf16.msrb.mxu2 %v7190_v40  ;;  %v3827_v14 = vpop.f32.mrf.mxu3 }
 0x244   : > { %4943 = vmatpush.bf16.msrb.mxu3 %v7318_v4  ;;  %v3798_v4 = vadd.f32 %v11865_v3, %v11857_v59  ;;  %v4962_v3 = vperm.slane %v11929_v20, 0 }
 0x246   : > { %4902 = vmatpush.bf16.msrb.mxu0 %v7170_v10  ;;  %v3886_v22 = vadd.f32 %v3798_v4, %v11382_v61  ;;  %v11936_v61 = vld [vmem:[%s12000_s3] sm:$0xf] }
 0x247   : > { %4916 = vmatpush.bf16.msrb.mxu1 %v7298_v53  ;;  %4930 = vmatpush.bf16.msrb.mxu2 %v7174_v9  ;;  %v3826_v53 = vadd.f32 %v3825_v25, %v3811_v31  ;;  %v4980_v31 = vperm.slane %v11936_v61, 0  ;;  %v4963_v25 = vperm.slane %v11929_v20, 1 }
 0x248   : > { %4944 = vmatpush.bf16.msrb.mxu3 %v7302_v57 }
 0x249   : > { %v3887_v13 = vadd.f32 %v3826_v53, %v11424_v19  ;;  %v3828_v19 = vadd.f32 %v3827_v14, %v3813_v0 }
 0x24a   : > { %4903 = vmatpush.bf16.msrb.mxu0 %v7154_v32  ;;  %v3839_v55 = vpop.f32.mrf.mxu0 }
 0x24b   : > { %4917 = vmatpush.bf16.msrb.mxu1 %v7282_v46  ;;  %4931 = vmatpush.bf16.msrb.mxu2 %v7158_v2  ;;  %v3853_v27 = vpop.f32.mrf.mxu1 }
 0x24c   : > { %4945 = vmatpush.bf16.msrb.mxu3 %v7286_v5  ;;  %v3854_v35 = vadd.f32 %v3853_v27, %v3839_v55 }
 0x24d   : > { %4904 = vmatmul.bf16.vlgmr.msrb.gmra.mxu0 %v11728_v49 }
 0x24e   : > { %4918 = vmatmul.bf16.vlgmr.msrb.gmra.mxu1 %v11737_v62  ;;  %4932 = vmatmul.bf16.vlgmr.msrb.gmra.mxu2 %v11728_v49  ;;  %v11896_v24 = vadd.f32 %v3854_v35, %v11590_v36  ;;  %v4981_v35 = vperm.slane %v11936_v61, 1 }
 0x24f   : > { %4946 = vmatmul.bf16.vlgmr.msrb.gmra.mxu3 %v11737_v62 }
 0x252   : > { %v3841_v63 = vpop.f32.mrf.mxu0 }
 0x253   : > { %v3867_v44 = vpop.f32.mrf.mxu2  ;;  %v3855_v17 = vpop.f32.mrf.mxu1 }
 0x254   : > { %v3881_v28 = vpop.f32.mrf.mxu3  ;;  %v3856_v15 = vadd.f32 %v3855_v17, %v3841_v63 }
 0x255   : > { %v3882_v16 = vadd.f32 %v3881_v28, %v3867_v44 }
 0x256   : > { %v11902_v49 = vadd.f32 %v3856_v15, %v11646_v41 }
 0x257   : > { %v11899_v58 = vadd.f32 %v3882_v16, %v11637_v18  ;;  %v3891_v16 = vadd.f32 %v3828_v19, %v11493_v8 }
 0x25b   : > { %v3869_v62 = vpop.f32.mrf.mxu2 }
 0x25c   : > { %v3883_v12 = vpop.f32.mrf.mxu3 }
 0x25d   : > { %v3884_v7 = vadd.f32 %v3883_v12, %v3869_v62 }
 0x25f   : > { %v11905_v48 = vadd.f32 %v3884_v7, %v11707_v47 }
 0x26a   : > { %v4324_v36 = vpop.f32.mrf.mxu0 }
 0x26b   : > { %v4338_v38 = vpop.f32.mrf.mxu1 }
 0x26c   : > { %v4339_v43 = vadd.f32 %v4338_v38, %v4324_v36 }
 0x26e   : > { %v4427_v30 = vadd.f32 %v4339_v43, %v3886_v22  ;;  %v5017_v43 = vld [vmem:[%s11948_s17 + $0x10] sm:$0xff] }
 0x272   : > { %v4326_v33 = vpop.f32.mrf.mxu0 }
 0x273   : > { %v4352_v39 = vpop.f32.mrf.mxu2  ;;  %v4340_v37 = vpop.f32.mrf.mxu1 }
 0x274   : > { %v4366_v11 = vpop.f32.mrf.mxu3  ;;  %v4341_v60 = vadd.f32 %v4340_v37, %v4326_v33 }
 0x275   : > { %v4367_v57 = vadd.f32 %v4366_v11, %v4352_v39 }
 0x276   : > { %v4431_v55 = vadd.f32 %v4341_v60, %v3890_v52 }
 0x277   : > { %v4428_v56 = vadd.f32 %v4367_v57, %v3887_v13 }
 0x27b   : > { %v4354_v29 = vpop.f32.mrf.mxu2 }
 0x27c   : > { %v4368_v40 = vpop.f32.mrf.mxu3 }
 0x27d   : > { %v4369_v44 = vadd.f32 %v4368_v40, %v4354_v29 }
 0x27f   : > { %v4432_v62 = vadd.f32 %v4369_v44, %v3891_v16 }
 0x28a   : > { %v11907_v42 = vpop.f32.mrf.mxu0 }
 0x28b   : > { %v11909_v18 = vpop.f32.mrf.mxu1 }
 0x28c   : > { %v4395_v22 = vadd.f32 %v11909_v18, %v11907_v42 }
 0x28e   : > { %v4429_v21 = vadd.f32 %v4395_v22, %v11896_v24  ;;  %v4965_v24 = vperm.slane %v11929_v20, 3 }
 0x292   : > { %v11915_v45 = vpop.f32.mrf.mxu0 }
 0x293   : > { %v11911_v41 = vpop.f32.mrf.mxu2  ;;  %v11917_v47 = vpop.f32.mrf.mxu1 }
 0x294   : > { %v11913_v50 = vpop.f32.mrf.mxu3  ;;  %v4397_v42 = vadd.f32 %v11917_v47, %v11915_v45 }
 0x295   : > { %v4423_v57 = vadd.f32 %v11913_v50, %v11911_v41 }
 0x296   : > { %v4433_v41 = vadd.f32 %v4397_v42, %v11902_v49 }
 0x297   : > { %v4430_v13 = vadd.f32 %v4423_v57, %v11899_v58 }
 0x29b   : > { %v11921_v26 = vpop.f32.mrf.mxu2 }
 0x29c   : > { %v11923_v54 = vpop.f32.mrf.mxu3 }
 0x29d   : > { %v4425_v45 = vadd.f32 %v11923_v54, %v11921_v26 }
 0x29f   : > { %v4434_v19 = vadd.f32 %v4425_v45, %v11905_v48 }
 0x2aa   : > { %v4849_v6 = vpop.f32.mrf.mxu0 }
 0x2ab   : > { %v4863_v10 = vpop.f32.mrf.mxu1 }
 0x2ac   : > { %v4864_v9 = vadd.f32 %v4863_v10, %v4849_v6 }
 0x2ae   : > { %v4952_v59 = vadd.f32 %v4864_v9, %v4427_v30 }
 0x2b0   : > { %v4970_v2 = vmul.f32 %v4962_v3, %v4952_v59 }
 0x2b2   : > { %v4851_v46 = vpop.f32.mrf.mxu0  ;;  %v4988_v28 = vadd.f32 %v4980_v31, %v4970_v2 }
 0x2b3   : > { %v4877_v23 = vpop.f32.mrf.mxu2  ;;  %v4865_v34 = vpop.f32.mrf.mxu1 }
 0x2b4   : > { %v4891_v32 = vpop.f32.mrf.mxu3  ;;  %v4866_v51 = vadd.f32 %v4865_v34, %v4851_v46  ;;  %v4996_v7 = vmax.f32 %v4988_v28, 0.0 }
 0x2b5   : > { %v4892_v5 = vadd.f32 %v4891_v32, %v4877_v23 }
 0x2b6   : > { %v4956_v63 = vadd.f32 %v4866_v51, %v4431_v55 }
 0x2b7   : > { %v4953_v27 = vadd.f32 %v4892_v5, %v4428_v56  ;;  %v4982_v56 = vperm.slane %v11936_v61, 2 }
 0x2b8   : > { %v4974_v38 = vmul.f32 %v4962_v3, %v4956_v63  ;;  %v4964_v3 = vperm.slane %v11929_v20, 2  ;;  %v5020_v63 = vld [vmem:[%s11948_s17 + $0x18] sm:$0xff] }
 0x2b9   : > { %v4971_v1 = vmul.f32 %v4963_v25, %v4953_v27 }
 0x2ba   : > { %v4992_v8 = vadd.f32 %v4980_v31, %v4974_v38  ;;  %v4983_v31 = vperm.slane %v11936_v61, 3 }
 0x2bb   : > { %v4989_v17 = vadd.f32 %v4981_v35, %v4971_v1  ;;  %v4879_v15 = vpop.f32.mrf.mxu2 }
 0x2bc   : > { %v4893_v12 = vpop.f32.mrf.mxu3  ;;  %v5000_v40 = vmax.f32 %v4992_v8, 0.0 }
 0x2bd   : > { %v4997_v36 = vmax.f32 %v4989_v17, 0.0  ;;  %v4894_v0 = vadd.f32 %v4893_v12, %v4879_v15 }
 0x2bf   : > { %v5004_v14 = vpack.c.bf16 %v4997_v36, %v4996_v7  ;;  %v4957_v39 = vadd.f32 %v4894_v0, %v4432_v62 }
 0x2c1   : > { %5008 = vst [vmem:[%s11948_s17] sm:$0xff] %v5004_v14  ;;  %v4975_v11 = vmul.f32 %v4963_v25, %v4957_v39 }
 0x2c3   : > { %v4993_v37 = vadd.f32 %v4981_v35, %v4975_v11 }
 0x2c5   : > { %v5001_v4 = vmax.f32 %v4993_v37, 0.0 }
 0x2c7   : > { %v5006_v6 = vpack.c.bf16 %v5001_v4, %v5000_v40 }
 0x2c9   : > { %v5018_v10 = vsel %vm5016_vm12, %v5006_v6, %v5017_v43 }
 0x2ca   : > { %v4905_v53 = vpop.f32.mrf.mxu0  ;;  %5019 = vst [vmem:[%s11948_s17 + $0x10] sm:$0xff] %v5018_v10 }
 0x2cb   : > { %v4919_v9 = vpop.f32.mrf.mxu1 }
 0x2cc   : > { %v4920_v30 = vadd.f32 %v4919_v9, %v4905_v53 }
 0x2ce   : > { %v4954_v59 = vadd.f32 %v4920_v30, %v4429_v21 }
 0x2d0   : > { %v4972_v52 = vmul.f32 %v4964_v3, %v4954_v59 }
 0x2d1   : > { %v4933_v18 = vpop.f32.mrf.mxu2 }
 0x2d2   : > { %v4947_v60 = vpop.f32.mrf.mxu3  ;;  %v4907_v23 = vpop.f32.mrf.mxu0  ;;  %v4990_v58 = vadd.f32 %v4982_v56, %v4972_v52 }
 0x2d3   : > { %v4948_v32 = vadd.f32 %v4947_v60, %v4933_v18  ;;  %v4921_v46 = vpop.f32.mrf.mxu1 }
 0x2d4   : > { %v4922_v2 = vadd.f32 %v4921_v46, %v4907_v23  ;;  %v4998_v51 = vmax.f32 %v4990_v58, 0.0 }
 0x2d5   : > { %v4955_v50 = vadd.f32 %v4948_v32, %v4430_v13 }
 0x2d6   : > { %v4958_v5 = vadd.f32 %v4922_v2, %v4433_v41 }
 0x2d7   : > { %v4973_v47 = vmul.f32 %v4965_v24, %v4955_v50 }
 0x2d8   : > { %v4976_v49 = vmul.f32 %v4964_v3, %v4958_v5 }
 0x2d9   : > { %v4991_v25 = vadd.f32 %v4983_v31, %v4973_v47  ;;  %v4935_v34 = vpop.f32.mrf.mxu2 }
 0x2da   : > { %v4949_v20 = vpop.f32.mrf.mxu3  ;;  %v4994_v61 = vadd.f32 %v4982_v56, %v4976_v49 }
 0x2db   : > { %v4999_v55 = vmax.f32 %v4991_v25, 0.0  ;;  %v4950_v27 = vadd.f32 %v4949_v20, %v4935_v34 }
 0x2dc   : > { %v5002_v54 = vmax.f32 %v4994_v61, 0.0 }
 0x2dd   : > { %v5005_v35 = vpack.c.bf16 %v4999_v55, %v4998_v51  ;;  %v4959_v44 = vadd.f32 %v4950_v27, %v4434_v19 }
 0x2df   : > { %5009 = vst [vmem:[%s11948_s17 + $0x8] sm:$0xff] %v5005_v35  ;;  %v4977_v28 = vmul.f32 %v4965_v24, %v4959_v44 }
 0x2e1   : > { %v4995_v26 = vadd.f32 %v4983_v31, %v4977_v28 }
 0x2e3   : > { %v5003_v1 = vmax.f32 %v4995_v26, 0.0 }
 0x2e5   : > { %v5007_v16 = vpack.c.bf16 %v5003_v1, %v5002_v54 }
 0x2e7   : > { %v5021_v48 = vsel %vm5016_vm12, %v5007_v16, %v5020_v63 }
 0x2e8   : > { %5022 = vst [vmem:[%s11948_s17 + $0x18] sm:$0xff] %v5021_v48 }
 0x2e9 PF: > { %s14_s15 = sadd.s32 1, %s7995_s15  }
 0x2ea   : > { %p11_p4 = scmp.ge.s32.totalorder %s14_s15, 4  }
 0x2ec   :  { %13 = sbr.rel (!%p11_p4) target bundleno = 1 (0x1), region = 66 }

</bundles_post_ra>
